<compile_context>
chip_gen: v5e
topology: v5e:2x2
jax: 0.10.0
libtpu: 0.0.40
codegen_flags: <defaults>
</compile_context>

<pallas_src>
import jax
import jax.numpy as jnp
from jax.experimental import pallas as pl
from jax.experimental.pallas import tpu as pltpu

BN_EPS = 1e-5


# ---------------------------------------------------------------------------
# Fused QSTN kernel: point MLP + max-pool + FC head.
# Grid = (B, N // tile_n); the point-tile axis is the reduction ("arbitrary")
# axis, the batch axis is "parallel" (megacore).
# ---------------------------------------------------------------------------
def qstn_kernel(x_ref,
                w1_ref, b1_ref, w2_ref, b2_ref, w3_ref, b3_ref,
                wf1_ref, b4_ref, wf2_ref, b5_ref, wf3_ref, bf3_ref,
                q_ref, acc_ref):
    nblk = pl.program_id(1)

    @pl.when(nblk == 0)
    def _init():
        acc_ref[...] = jnp.full_like(acc_ref, -jnp.inf)

    # ---- per-point MLP on this tile (BN scale already folded into weights) ---
    x = x_ref[0]                                          # (3, TN), lane-dense
    # conv1: contract the size-3 channel axis (transposed-lhs matmul, K=3, f32).
    h = jax.lax.dot_general(
        x, w1_ref[...],
        dimension_numbers=(((0,), (0,)), ((), ())),
        preferred_element_type=jnp.float32)               # (TN, 64)
    h = jnp.maximum(h + b1_ref[...], 0.0)
    # conv2 / conv3: bf16 MXU matmuls, f32 accumulation, f32 epilogue.
    h = jnp.dot(h.astype(jnp.bfloat16), w2_ref[...],
                preferred_element_type=jnp.float32)       # (TN, 128)
    h = jnp.maximum(h + b2_ref[...], 0.0)
    h = jnp.dot(h.astype(jnp.bfloat16), w3_ref[...],
                preferred_element_type=jnp.float32)       # (TN, 1024)
    h = jnp.maximum(h + b3_ref[...], 0.0)

    # Running max over point tiles (global feature accumulator, lane-dense).
    acc_ref[...] = jnp.maximum(acc_ref[...],
                               jnp.max(h, axis=0, keepdims=True))

    # ---- FC head, fused into the last point-tile iteration -------------------
    @pl.when(nblk == pl.num_programs(1) - 1)
    def _finalize():
        g = acc_ref[...]                                  # (1, 1024)
        f = jnp.dot(g.astype(jnp.bfloat16), wf1_ref[...],
                    preferred_element_type=jnp.float32)   # (1, 512)
        f = jnp.maximum(f + b4_ref[...], 0.0)
        f = jnp.dot(f.astype(jnp.bfloat16), wf2_ref[...],
                    preferred_element_type=jnp.float32)   # (1, 256)
        f = jnp.maximum(f + b5_ref[...], 0.0)
        # fc3 bias already contains the identity quaternion [1, 0, 0, 0].
        q = jnp.dot(f, wf3_ref[...],
                    preferred_element_type=jnp.float32) + bf3_ref[...]   # (1, 4)
        q_ref[0] = q


# ---------------------------------------------------------------------------
# Wrapper / parameter preparation
# ---------------------------------------------------------------------------
def _fold_bn(w_t, conv_bias, bn):
    """Fold eval-mode BN into the (Cin, Cout) weight and a per-channel shift."""
    gamma, beta, mean, var = bn
    scale = gamma * jax.lax.rsqrt(var + BN_EPS)                     # (Cout,)
    w_folded = w_t * scale[None, :]
    shift = (conv_bias - mean) * scale + beta
    return w_folded, shift.reshape(1, -1)


def prepare_params(raw):
    w1, b1 = _fold_bn(raw["w1"], raw["cb1"], raw["bn1"])
    w2, b2 = _fold_bn(raw["w2"], raw["cb2"], raw["bn2"])
    w3, b3 = _fold_bn(raw["w3"], raw["cb3"], raw["bn3"])
    wf1, b4 = _fold_bn(raw["wf1"], raw["fb1"], raw["bn4"])
    wf2, b5 = _fold_bn(raw["wf2"], raw["fb2"], raw["bn5"])
    bf3 = (raw["fb3"] + jnp.array([1.0, 0.0, 0.0, 0.0], jnp.float32)).reshape(1, 4)
    bf16 = jnp.bfloat16
    return {
        "w1": w1,                    # (3, 64)    f32 (K=3: keep full precision)
        "b1": b1,
        "w2": w2.astype(bf16),       # (64, 128)
        "b2": b2,
        "w3": w3.astype(bf16),       # (128, 1024)
        "b3": b3,
        "wf1": wf1.astype(bf16),     # (1024, 512)
        "b4": b4,
        "wf2": wf2.astype(bf16),     # (512, 256)
        "b5": b5,
        "wf3": raw["wf3"],           # (256, 4)   f32
        "bf3": bf3,
    }


def _pick_tile_n(n):
    for t in (512, 1024, 256, 128):     # prefer ~512 points per grid step
        if n % t == 0:
            return t
    return n                            # fall back: one full-N tile (block == dim)


def qstn_quaternion(x_ncw, p):
    """Run the fused Pallas kernel; returns the un-normalized quaternion (B, 4)."""
    B, C, N = x_ncw.shape
    assert C == 3
    tile_n = _pick_tile_n(N)

    def const_spec(arr):
        nd = arr.ndim
        return pl.BlockSpec(arr.shape, lambda bi, ni, _nd=nd: (0,) * _nd)

    weights = (p["w1"], p["b1"], p["w2"], p["b2"], p["w3"], p["b3"],
               p["wf1"], p["b4"], p["wf2"], p["b5"], p["wf3"], p["bf3"])

    q = pl.pallas_call(
        qstn_kernel,
        out_shape=jax.ShapeDtypeStruct((B, 1, 4), jnp.float32),
        grid_spec=pltpu.PrefetchScalarGridSpec(
            num_scalar_prefetch=0,
            grid=(B, N // tile_n),
            in_specs=[pl.BlockSpec((1, 3, tile_n), lambda bi, ni: (bi, 0, ni))]
                     + [const_spec(w) for w in weights],
            out_specs=pl.BlockSpec((1, 1, 4), lambda bi, ni: (bi, 0, 0)),
            scratch_shapes=[pltpu.VMEM((1, 1024), jnp.float32)],
        ),
        compiler_params=pltpu.CompilerParams(
            # Batch axis -> parallel (megacore); point tiles -> reduction.
            # TODO(synk): for B == 1 on v7x, split the 1024 output channels into
            #             a second parallel axis to keep both TensorCores busy.
            dimension_semantics=("parallel", "arbitrary"),
            vmem_limit_bytes=32 * 1024 * 1024,
        ),
    )(x_ncw.astype(jnp.float32), *weights)
    return q.reshape(B, 4)


def quat_to_rotmat(q):
    """batch_quat_to_rotmat (PCPNet convention), q = (w, x, y, z). Tiny (B,4)
    elementwise work: done in JAX to keep the kernel output lane-trivial."""
    s = 2.0 / jnp.sum(q * q, axis=1, keepdims=True)                  # (B, 1)
    w, x, y, z = (q[:, i:i + 1] for i in range(4))
    rows = [1.0 - (y * y + z * z) * s, (x * y - z * w) * s, (x * z + y * w) * s,
            (x * y + z * w) * s, 1.0 - (x * x + z * z) * s, (y * z - x * w) * s,
            (x * z - y * w) * s, (y * z + x * w) * s, 1.0 - (x * x + y * y) * s]
    return jnp.concatenate(rows, axis=1).reshape(-1, 3, 3)


def qstn_forward(x_ncw, raw):
    """Full QSTN forward: (B, 3, N) -> (B, 3, 3) rotation matrices."""
    p = prepare_params(raw)
    q = qstn_quaternion(x_ncw, p)
    return quat_to_rotmat(q)


# ---------------------------------------------------------------------------
# Pure-JAX references (for correctness checks only)
# ---------------------------------------------------------------------------
def reference_prepared(x_ncw, raw):
    """Replica of the exact numeric path the kernel takes (folded BN, bf16
    matmul inputs, f32 accumulation). Tight correctness check."""
    p = prepare_params(raw)
    hp = jax.lax.Precision.HIGHEST
    bf16 = jnp.bfloat16
    x = jnp.transpose(x_ncw, (0, 2, 1)).astype(jnp.float32)          # (B, N, 3)
    h = jnp.maximum(jnp.dot(x, p["w1"], precision=hp,
                            preferred_element_type=jnp.float32) + p["b1"], 0.0)
    h = jnp.maximum(jnp.dot(h.astype(bf16), p["w2"],
                            preferred_element_type=jnp.float32) + p["b2"], 0.0)
    h = jnp.maximum(jnp.dot(h.astype(bf16), p["w3"],
                            preferred_element_type=jnp.float32) + p["b3"], 0.0)
    g = jnp.max(h, axis=1)                                           # (B, 1024)
    f = jnp.maximum(jnp.dot(g.astype(bf16), p["wf1"],
                            preferred_element_type=jnp.float32) + p["b4"], 0.0)
    f = jnp.maximum(jnp.dot(f.astype(bf16), p["wf2"],
                            preferred_element_type=jnp.float32) + p["b5"], 0.0)
    q = jnp.dot(f, p["wf3"], precision=hp,
                preferred_element_type=jnp.float32) + p["bf3"]
    return quat_to_rotmat(q)


def reference_module(x_ncw, raw):
    """Faithful eval-mode f32 reference of the PyTorch QSTN module."""
    hp = jax.lax.Precision.HIGHEST

    def cbr(h, wt, cb, bn):
        gamma, beta, mean, var = bn
        y = jnp.dot(h, wt, precision=hp) + cb
        y = gamma * (y - mean) / jnp.sqrt(var + BN_EPS) + beta
        return jnp.maximum(y, 0.0)

    x = jnp.transpose(x_ncw, (0, 2, 1)).astype(jnp.float32)
    h = cbr(x, raw["w1"], raw["cb1"], raw["bn1"])
    h = cbr(h, raw["w2"], raw["cb2"], raw["bn2"])
    h = cbr(h, raw["w3"], raw["cb3"], raw["bn3"])
    g = jnp.max(h, axis=1)
    h = cbr(g, raw["wf1"], raw["fb1"], raw["bn4"])
    h = cbr(h, raw["wf2"], raw["fb2"], raw["bn5"])
    q = jnp.dot(h, raw["wf3"], precision=hp) + raw["fb3"]
    q = q + jnp.array([1.0, 0.0, 0.0, 0.0], jnp.float32)
    return quat_to_rotmat(q)


if __name__ == "__main__":
    B, DIM, N = 2, 3, 1024      # small: batch=2, dim=3, 1024 points (2 tiles/batch)

    key = jax.random.PRNGKey(0)
    keys = iter(jax.random.split(key, 64))

    def nrm(shape, scale=0.1):
        return scale * jax.random.normal(next(keys), shape, dtype=jnp.float32)

    def bn_params(c):
        gamma = 1.0 + nrm((c,))
        beta = nrm((c,))
        mean = nrm((c,))
        var = 1.0 + jnp.abs(nrm((c,)))
        return (gamma, beta, mean, var)

    raw = {
        # 1x1 convs / linears, weights stored transposed: (Cin, Cout)
        "w1": nrm((3, 64)), "cb1": nrm((64,)), "bn1": bn_params(64),
        "w2": nrm((64, 128)), "cb2": nrm((128,)), "bn2": bn_params(128),
        "w3": nrm((128, 1024)), "cb3": nrm((1024,)), "bn3": bn_params(1024),
        "wf1": nrm((1024, 512)), "fb1": nrm((512,)), "bn4": bn_params(512),
        "wf2": nrm((512, 256)), "fb2": nrm((256,)), "bn5": bn_params(256),
        "wf3": nrm((256, 4)), "fb3": nrm((4,)),
    }

    x = jax.random.normal(next(keys), (B, DIM, N), dtype=jnp.float32)   # NCW layout

    rot = qstn_forward(x, raw)
    rot = jax.block_until_ready(rot)
    assert rot.shape == (B, 3, 3)

    # Tight check against a pure-JAX replica of the kernel's numeric path.
    ref_b = reference_prepared(x, raw)
    assert jnp.allclose(rot, ref_b, rtol=2e-3, atol=2e-3), \
        "Pallas result mismatch vs bf16-path reference"

    # Loose check against the faithful f32 module semantics (bf16 MXU tolerance).
    ref_f = reference_module(x, raw)
    assert jnp.allclose(rot, ref_f, rtol=5e-2, atol=5e-2), \
        "Pallas result mismatch vs f32 module reference"

    print("KERNEL_OK")
</pallas_src>

<mosaic_0001>
module attributes {stable_mosaic.version = 11 : i64} {
  func.func @qstn_kernel(%arg0: i32, %arg1: i32, %arg2: memref<1x3x512xf32, #tpu.memory_space<vmem>>, %arg3: memref<3x64xf32, #tpu.memory_space<vmem>>, %arg4: memref<1x64xf32, #tpu.memory_space<vmem>>, %arg5: memref<64x128xbf16, #tpu.memory_space<vmem>>, %arg6: memref<1x128xf32, #tpu.memory_space<vmem>>, %arg7: memref<128x1024xbf16, #tpu.memory_space<vmem>>, %arg8: memref<1x1024xf32, #tpu.memory_space<vmem>>, %arg9: memref<1024x512xbf16, #tpu.memory_space<vmem>>, %arg10: memref<1x512xf32, #tpu.memory_space<vmem>>, %arg11: memref<512x256xbf16, #tpu.memory_space<vmem>>, %arg12: memref<1x256xf32, #tpu.memory_space<vmem>>, %arg13: memref<256x4xf32, #tpu.memory_space<vmem>>, %arg14: memref<1x4xf32, #tpu.memory_space<vmem>>, %arg15: memref<1x1x4xf32, #tpu.memory_space<vmem>>, %arg16: memref<1x1024xf32, #tpu.memory_space<vmem>>) attributes {dimension_semantics = [#tpu.dimension_semantics<parallel>, #tpu.dimension_semantics<arbitrary>], iteration_bounds = array<i64: 2, 2>, scalar_prefetch = 0 : i64, scratch_operands = 1 : i64, tpu.core_type = #tpu.core_type<tc>, window_params = [{transform_indices = @transform_0, window_bounds = array<i64: 1, 3, 512>}, {pipeline_mode = #tpu.pipeline_mode<synchronous>, transform_indices = @transform_1, window_bounds = array<i64: 3, 64>}, {pipeline_mode = #tpu.pipeline_mode<synchronous>, transform_indices = @transform_2, window_bounds = array<i64: 1, 64>}, {pipeline_mode = #tpu.pipeline_mode<synchronous>, transform_indices = @transform_3, window_bounds = array<i64: 64, 128>}, {pipeline_mode = #tpu.pipeline_mode<synchronous>, transform_indices = @transform_4, window_bounds = array<i64: 1, 128>}, {pipeline_mode = #tpu.pipeline_mode<synchronous>, transform_indices = @transform_5, window_bounds = array<i64: 128, 1024>}, {pipeline_mode = #tpu.pipeline_mode<synchronous>, transform_indices = @transform_6, window_bounds = array<i64: 1, 1024>}, {pipeline_mode = #tpu.pipeline_mode<synchronous>, transform_indices = @transform_7, window_bounds = array<i64: 1024, 512>}, {pipeline_mode = #tpu.pipeline_mode<synchronous>, transform_indices = @transform_8, window_bounds = array<i64: 1, 512>}, {pipeline_mode = #tpu.pipeline_mode<synchronous>, transform_indices = @transform_9, window_bounds = array<i64: 512, 256>}, {pipeline_mode = #tpu.pipeline_mode<synchronous>, transform_indices = @transform_10, window_bounds = array<i64: 1, 256>}, {pipeline_mode = #tpu.pipeline_mode<synchronous>, transform_indices = @transform_11, window_bounds = array<i64: 256, 4>}, {pipeline_mode = #tpu.pipeline_mode<synchronous>, transform_indices = @transform_12, window_bounds = array<i64: 1, 4>}, {transform_indices = @transform_13, window_bounds = array<i64: 1, 1, 4>}]} {
    %c0_i32 = arith.constant 0 : i32
    %0 = arith.cmpi eq, %arg1, %c0_i32 : i32
    %1 = arith.extui %0 : i1 to i32
    %c0_i32_0 = arith.constant 0 : i32
    %2 = arith.cmpi ne, %1, %c0_i32_0 : i32
    scf.if %2 {
      %cst_26 = arith.constant 0xFF800000 : f32
      %36 = vector.broadcast %cst_26 : f32 to vector<1x1024xf32>
      %c0_27 = arith.constant 0 : index
      %c0_28 = arith.constant 0 : index
      %37 = vector.load %arg16[%c0_27, %c0_28] : memref<1x1024xf32, #tpu.memory_space<vmem>>, vector<1x1024xf32>
      tpu.vector_store %arg16[%c0_27, %c0_28], %36 {strides = array<i32>} : memref<1x1024xf32, #tpu.memory_space<vmem>>, vector<1x1024xf32>,
    } else {
    }
    %c0 = arith.constant 0 : index
    %c0_1 = arith.constant 0 : index
    %c0_2 = arith.constant 0 : index
    %3 = vector.load %arg2[%c0, %c0_1, %c0_2] : memref<1x3x512xf32, #tpu.memory_space<vmem>>, vector<1x3x512xf32>
    %4 = vector.shape_cast %3 : vector<1x3x512xf32> to vector<3x512xf32>
    %c0_3 = arith.constant 0 : index
    %c0_4 = arith.constant 0 : index
    %5 = vector.load %arg3[%c0_3, %c0_4] : memref<3x64xf32, #tpu.memory_space<vmem>>, vector<3x64xf32>
    %cst = arith.constant dense<0.000000e+00> : vector<512x64xf32>
    %6 = tpu.matmul %4, %5, %cst {dimension_numbers = #tpu.dot_dimension_numbers<[0], [0], [1], [1], [0, 1, 1, 1], [], []>} : vector<3x512xf32>, vector<3x64xf32>, vector<512x64xf32> -> vector<512x64xf32>
    %c0_5 = arith.constant 0 : index
    %c0_6 = arith.constant 0 : index
    %7 = vector.load %arg4[%c0_5, %c0_6] : memref<1x64xf32, #tpu.memory_space<vmem>>, vector<1x64xf32>
    %8 = vector.broadcast %7 : vector<1x64xf32> to vector<512x64xf32>
    %9 = arith.addf %6, %8 : vector<512x64xf32>
    %cst_7 = arith.constant 0.000000e+00 : f32
    %10 = vector.broadcast %cst_7 : f32 to vector<512x64xf32>
    %11 = arith.maximumf %9, %10 : vector<512x64xf32>
    %12 = arith.truncf %11 : vector<512x64xf32> to vector<512x64xbf16>
    %c0_8 = arith.constant 0 : index
    %c0_9 = arith.constant 0 : index
    %13 = vector.load %arg5[%c0_8, %c0_9] : memref<64x128xbf16, #tpu.memory_space<vmem>>, vector<64x128xbf16>
    %cst_10 = arith.constant dense<0.000000e+00> : vector<512x128xf32>
    %14 = tpu.matmul %12, %13, %cst_10 {dimension_numbers = #tpu.dot_dimension_numbers<[1], [0], [0], [1], [0, 0, 1, 1], [], []>} : vector<512x64xbf16>, vector<64x128xbf16>, vector<512x128xf32> -> vector<512x128xf32>
    %c0_11 = arith.constant 0 : index
    %c0_12 = arith.constant 0 : index
    %15 = vector.load %arg6[%c0_11, %c0_12] : memref<1x128xf32, #tpu.memory_space<vmem>>, vector<1x128xf32>
    %16 = vector.broadcast %15 : vector<1x128xf32> to vector<512x128xf32>
    %17 = arith.addf %14, %16 : vector<512x128xf32>
    %cst_13 = arith.constant 0.000000e+00 : f32
    %18 = vector.broadcast %cst_13 : f32 to vector<512x128xf32>
    %19 = arith.maximumf %17, %18 : vector<512x128xf32>
    %20 = arith.truncf %19 : vector<512x128xf32> to vector<512x128xbf16>
    %c0_14 = arith.constant 0 : index
    %c0_15 = arith.constant 0 : index
    %21 = vector.load %arg7[%c0_14, %c0_15] : memref<128x1024xbf16, #tpu.memory_space<vmem>>, vector<128x1024xbf16>
    %cst_16 = arith.constant dense<0.000000e+00> : vector<512x1024xf32>
    %22 = tpu.matmul %20, %21, %cst_16 {dimension_numbers = #tpu.dot_dimension_numbers<[1], [0], [0], [1], [0, 0, 1, 1], [], []>} : vector<512x128xbf16>, vector<128x1024xbf16>, vector<512x1024xf32> -> vector<512x1024xf32>
    %c0_17 = arith.constant 0 : index
    %c0_18 = arith.constant 0 : index
    %23 = vector.load %arg8[%c0_17, %c0_18] : memref<1x1024xf32, #tpu.memory_space<vmem>>, vector<1x1024xf32>
    %24 = vector.broadcast %23 : vector<1x1024xf32> to vector<512x1024xf32>
    %25 = arith.addf %22, %24 : vector<512x1024xf32>
    %cst_19 = arith.constant 0.000000e+00 : f32
    %26 = vector.broadcast %cst_19 : f32 to vector<512x1024xf32>
    %27 = arith.maximumf %25, %26 : vector<512x1024xf32>
    %c0_20 = arith.constant 0 : index
    %c0_21 = arith.constant 0 : index
    %28 = vector.load %arg16[%c0_20, %c0_21] : memref<1x1024xf32, #tpu.memory_space<vmem>>, vector<1x1024xf32>
    %cst_22 = arith.constant dense<0xFF800000> : vector<1024xf32>
    %29 = vector.multi_reduction <maximumf>, %27, %cst_22 [0] : vector<512x1024xf32> to vector<1024xf32>
    %30 = vector.shape_cast %29 : vector<1024xf32> to vector<1x1024xf32>
    %31 = arith.maximumf %28, %30 : vector<1x1024xf32>
    %c0_23 = arith.constant 0 : index
    %c0_24 = arith.constant 0 : index
    %32 = vector.load %arg16[%c0_23, %c0_24] : memref<1x1024xf32, #tpu.memory_space<vmem>>, vector<1x1024xf32>
    tpu.vector_store %arg16[%c0_23, %c0_24], %31 {strides = array<i32>} : memref<1x1024xf32, #tpu.memory_space<vmem>>, vector<1x1024xf32>,
    %c1_i32 = arith.constant 1 : i32
    %33 = arith.cmpi eq, %arg1, %c1_i32 : i32
    %34 = arith.extui %33 : i1 to i32
    %c0_i32_25 = arith.constant 0 : i32
    %35 = arith.cmpi ne, %34, %c0_i32_25 : i32
    scf.if %35 {
      %c0_26 = arith.constant 0 : index
      %c0_27 = arith.constant 0 : index
      %36 = vector.load %arg16[%c0_26, %c0_27] : memref<1x1024xf32, #tpu.memory_space<vmem>>, vector<1x1024xf32>
      %37 = arith.truncf %36 : vector<1x1024xf32> to vector<1x1024xbf16>
      %c0_28 = arith.constant 0 : index
      %c0_29 = arith.constant 0 : index
      %38 = vector.load %arg9[%c0_28, %c0_29] : memref<1024x512xbf16, #tpu.memory_space<vmem>>, vector<1024x512xbf16>
      %cst_30 = arith.constant dense<0.000000e+00> : vector<1x512xf32>
      %39 = tpu.matmul %37, %38, %cst_30 {dimension_numbers = #tpu.dot_dimension_numbers<[1], [0], [0], [1], [0, 0, 1, 1], [], []>} : vector<1x1024xbf16>, vector<1024x512xbf16>, vector<1x512xf32> -> vector<1x512xf32>
      %c0_31 = arith.constant 0 : index
      %c0_32 = arith.constant 0 : index
      %40 = vector.load %arg10[%c0_31, %c0_32] : memref<1x512xf32, #tpu.memory_space<vmem>>, vector<1x512xf32>
      %41 = arith.addf %39, %40 : vector<1x512xf32>
      %cst_33 = arith.constant 0.000000e+00 : f32
      %42 = vector.broadcast %cst_33 : f32 to vector<1x512xf32>
      %43 = arith.maximumf %41, %42 : vector<1x512xf32>
      %44 = arith.truncf %43 : vector<1x512xf32> to vector<1x512xbf16>
      %c0_34 = arith.constant 0 : index
      %c0_35 = arith.constant 0 : index
      %45 = vector.load %arg11[%c0_34, %c0_35] : memref<512x256xbf16, #tpu.memory_space<vmem>>, vector<512x256xbf16>
      %cst_36 = arith.constant dense<0.000000e+00> : vector<1x256xf32>
      %46 = tpu.matmul %44, %45, %cst_36 {dimension_numbers = #tpu.dot_dimension_numbers<[1], [0], [0], [1], [0, 0, 1, 1], [], []>} : vector<1x512xbf16>, vector<512x256xbf16>, vector<1x256xf32> -> vector<1x256xf32>
      %c0_37 = arith.constant 0 : index
      %c0_38 = arith.constant 0 : index
      %47 = vector.load %arg12[%c0_37, %c0_38] : memref<1x256xf32, #tpu.memory_space<vmem>>, vector<1x256xf32>
      %48 = arith.addf %46, %47 : vector<1x256xf32>
      %cst_39 = arith.constant 0.000000e+00 : f32
      %49 = vector.broadcast %cst_39 : f32 to vector<1x256xf32>
      %50 = arith.maximumf %48, %49 : vector<1x256xf32>
      %c0_40 = arith.constant 0 : index
      %c0_41 = arith.constant 0 : index
      %51 = vector.load %arg13[%c0_40, %c0_41] : memref<256x4xf32, #tpu.memory_space<vmem>>, vector<256x4xf32>
      %cst_42 = arith.constant dense<0.000000e+00> : vector<1x4xf32>
      %52 = tpu.matmul %50, %51, %cst_42 {dimension_numbers = #tpu.dot_dimension_numbers<[1], [0], [0], [1], [0, 0, 1, 1], [], []>} : vector<1x256xf32>, vector<256x4xf32>, vector<1x4xf32> -> vector<1x4xf32>
      %c0_43 = arith.constant 0 : index
      %c0_44 = arith.constant 0 : index
      %53 = vector.load %arg14[%c0_43, %c0_44] : memref<1x4xf32, #tpu.memory_space<vmem>>, vector<1x4xf32>
      %54 = arith.addf %52, %53 : vector<1x4xf32>
      %c0_45 = arith.constant 0 : index
      %c0_46 = arith.constant 0 : index
      %c0_47 = arith.constant 0 : index
      %55 = vector.load %arg15[%c0_45, %c0_46, %c0_47] : memref<1x1x4xf32, #tpu.memory_space<vmem>>, vector<1x1x4xf32>
      %56 = vector.shape_cast %55 : vector<1x1x4xf32> to vector<1x4xf32>
      %57 = vector.shape_cast %54 : vector<1x4xf32> to vector<1x1x4xf32>
      tpu.vector_store %arg15[%c0_45, %c0_46, %c0_47], %57 {strides = array<i32>} : memref<1x1x4xf32, #tpu.memory_space<vmem>>, vector<1x1x4xf32>,
    } else {
    }
    return
  }
  func.func @transform_0(%arg0: i32, %arg1: i32) -> (i32, i32, i32) {
    %c0_i32 = arith.constant 0 : i32
    %c0_i32_0 = arith.constant 0 : i32
    return %arg0, %c0_i32, %arg1 : i32, i32, i32
  }
  func.func @transform_1(%arg0: i32, %arg1: i32) -> (i32, i32) {
    %c0_i32 = arith.constant 0 : i32
    %c0_i32_0 = arith.constant 0 : i32
    %c0_i32_1 = arith.constant 0 : i32
    return %c0_i32, %c0_i32_0 : i32, i32
  }
  func.func @transform_2(%arg0: i32, %arg1: i32) -> (i32, i32) {
    %c0_i32 = arith.constant 0 : i32
    %c0_i32_0 = arith.constant 0 : i32
    %c0_i32_1 = arith.constant 0 : i32
    return %c0_i32, %c0_i32_0 : i32, i32
  }
  func.func @transform_3(%arg0: i32, %arg1: i32) -> (i32, i32) {
    %c0_i32 = arith.constant 0 : i32
    %c0_i32_0 = arith.constant 0 : i32
    %c0_i32_1 = arith.constant 0 : i32
    return %c0_i32, %c0_i32_0 : i32, i32
  }
  func.func @transform_4(%arg0: i32, %arg1: i32) -> (i32, i32) {
    %c0_i32 = arith.constant 0 : i32
    %c0_i32_0 = arith.constant 0 : i32
    %c0_i32_1 = arith.constant 0 : i32
    return %c0_i32, %c0_i32_0 : i32, i32
  }
  func.func @transform_5(%arg0: i32, %arg1: i32) -> (i32, i32) {
    %c0_i32 = arith.constant 0 : i32
    %c0_i32_0 = arith.constant 0 : i32
    %c0_i32_1 = arith.constant 0 : i32
    return %c0_i32, %c0_i32_0 : i32, i32
  }
  func.func @transform_6(%arg0: i32, %arg1: i32) -> (i32, i32) {
    %c0_i32 = arith.constant 0 : i32
    %c0_i32_0 = arith.constant 0 : i32
    %c0_i32_1 = arith.constant 0 : i32
    return %c0_i32, %c0_i32_0 : i32, i32
  }
  func.func @transform_7(%arg0: i32, %arg1: i32) -> (i32, i32) {
    %c0_i32 = arith.constant 0 : i32
    %c0_i32_0 = arith.constant 0 : i32
    %c0_i32_1 = arith.constant 0 : i32
    return %c0_i32, %c0_i32_0 : i32, i32
  }
  func.func @transform_8(%arg0: i32, %arg1: i32) -> (i32, i32) {
    %c0_i32 = arith.constant 0 : i32
    %c0_i32_0 = arith.constant 0 : i32
    %c0_i32_1 = arith.constant 0 : i32
    return %c0_i32, %c0_i32_0 : i32, i32
  }
  func.func @transform_9(%arg0: i32, %arg1: i32) -> (i32, i32) {
    %c0_i32 = arith.constant 0 : i32
    %c0_i32_0 = arith.constant 0 : i32
    %c0_i32_1 = arith.constant 0 : i32
    return %c0_i32, %c0_i32_0 : i32, i32
  }
  func.func @transform_10(%arg0: i32, %arg1: i32) -> (i32, i32) {
    %c0_i32 = arith.constant 0 : i32
    %c0_i32_0 = arith.constant 0 : i32
    %c0_i32_1 = arith.constant 0 : i32
    return %c0_i32, %c0_i32_0 : i32, i32
  }
  func.func @transform_11(%arg0: i32, %arg1: i32) -> (i32, i32) {
    %c0_i32 = arith.constant 0 : i32
    %c0_i32_0 = arith.constant 0 : i32
    %c0_i32_1 = arith.constant 0 : i32
    return %c0_i32, %c0_i32_0 : i32, i32
  }
  func.func @transform_12(%arg0: i32, %arg1: i32) -> (i32, i32) {
    %c0_i32 = arith.constant 0 : i32
    %c0_i32_0 = arith.constant 0 : i32
    %c0_i32_1 = arith.constant 0 : i32
    return %c0_i32, %c0_i32_0 : i32, i32
  }
  func.func @transform_13(%arg0: i32, %arg1: i32) -> (i32, i32, i32) {
    %c0_i32 = arith.constant 0 : i32
    %c0_i32_0 = arith.constant 0 : i32
    %c0_i32_1 = arith.constant 0 : i32
    return %arg0, %c0_i32, %c0_i32_0 : i32, i32, i32
  }
}

</mosaic_0001>

<bundles_post_ra>
// kernel: tpu_custom_call.1
= control target key start
LH: loop header
LB: loop body
LE: loop exit
PB: predicated region body
PF: predicated region fallthrough
CT: control target
= control target key end

     0   :  { %s11213_s0 = inlined_call_operand.vmem [shape: f32[2,3,1024], index: 0, kind: input, shape index: {}]   ;;  %s11214_s1 = inlined_call_operand.vmem [shape: f32[3,64], index: 1, kind: input, shape index: {}]   ;;  %s11215_s2 = inlined_call_operand.vmem [shape: f32[1,64], index: 2, kind: input, shape index: {}]   ;;  %s11216_s3 = inlined_call_operand.vmem [shape: bf16[64,128], index: 3, kind: input, shape index: {}]   ;;  %s11217_s4 = inlined_call_operand.vmem [shape: f32[1,128], index: 4, kind: input, shape index: {}]   ;;  %s11218_s5 = inlined_call_operand.hbm [shape: bf16[128,1024], index: 5, kind: input, shape index: {}]   ;;  %s11219_s6 = inlined_call_operand.vmem [shape: f32[1,1024], index: 6, kind: input, shape index: {}]   ;;  %s11220_s7 = inlined_call_operand.hbm [shape: bf16[1024,512], index: 7, kind: input, shape index: {}]   ;;  %s11221_s8 = inlined_call_operand.vmem [shape: f32[1,512], index: 8, kind: input, shape index: {}]   ;;  %s11222_s9 = inlined_call_operand.hbm [shape: bf16[512,256], index: 9, kind: input, shape index: {}]   ;;  %s11223_s10 = inlined_call_operand.vmem [shape: f32[1,256], index: 10, kind: input, shape index: {}]   ;;  %s11224_s11 = inlined_call_operand.vmem [shape: f32[256,4], index: 11, kind: input, shape index: {}]   ;;  %s11225_s12 = inlined_call_operand.vmem [shape: f32[1,4], index: 12, kind: input, shape index: {}]   ;;  %s11226_s13 = inlined_call_operand.hbm [shape: f32[2,1,4], index: 13, kind: output, shape index: {}]  }
   0x1   :  { %11239 = sst [smem:[#allocation23_spill]] %s11220_s7 }
   0x2   :  { %11240 = sst [smem:[#allocation24_spill]] %s11224_s11 }
   0x3   :  { %11241 = sst [smem:[#allocation25_spill]] %s11225_s12 }
   0x4   :  { %11242 = sst [smem:[#allocation26_spill]] %s11226_s13 }
   0x5   :  { %18 = vsyncpa [#allocation4], 0 }
   0x6   :  { %19 = vsyncpa [#allocation7], 0 }
   0x7   :  { %20 = vsyncpa [#allocation5], 0 }
   0x8   :  { %22 = vsyncpa [#allocation5 + $0x1], 0  ;;  %s9561_s25 = smov 0   ;;  %s9563_s26 = smov 0  }
   0x9   :  { %s9565_s27 = smov 0   ;;  %s9567_s28 = smov 0  }
   0xa   :  { %s9569_s29 = smov 0   ;;  %s9571_s30 = smov 0  }
   0xb   :  { %s9573_s14 = smov 0   ;;  %s9575_s15 = smov 0  }
   0xc LB: > { %11243 = sst [smem:[#allocation13_spill]] %s9451_s25  ;;  %s7108_s16 = sadd.s32 4294967295, %s9479_s15   ;;  %s9479_s15 = sphi %s9575_s15, %s28_s15   ;;  %s9475_s14 = sphi %s9573_s14, %s11274_s14   ;;  %s9471_s30 = sphi %s9571_s30, %s11270_s30   ;;  %s9467_s29 = sphi %s9569_s29, %s11269_s29   ;;  %s9463_s28 = sphi %s9567_s28, %s11268_s28   ;;  %s9459_s27 = sphi %s9565_s27, %s11267_s27   ;;  %s9455_s26 = sphi %s9563_s26, %s11273_s26   ;;  %s9451_s25 = sphi %s9561_s25, %s11272_s25  }
   0xd   : > { %11244 = sst [smem:[#allocation14_spill]] %s9459_s27  ;;  %s7109_s17 = sadd.s32 4294967294, %s9479_s15  }
   0xe   : > { %11245 = sst [smem:[#allocation15_spill]] %s9471_s30  ;;  %s37_s18 = sadd.s32 1, %s9471_s30 }
   0xf   : > { %11246 = sst [smem:[#allocation16_spill]] %s9475_s14  ;;  %s40_s19 = sadd.s32 1, %s9475_s14 }
  0x10   : > { %11247 = sst [smem:[#allocation17_spill]] %s9479_s15  ;;  %p38_p0 = scmp.ge.s32.totalorder %s37_s18, 2 }
  0x11   : > { %s327_s20 = sadd.s32 1, %s9459_s27  ;;  %p337_p1 = scmp.ne.s32.totalorder %s9459_s27, %s9455_s26 }
  0x12   : > { %p338_p2 = scmp.eq.s32.totalorder %s7108_s16, 3  ;;  %s11276_s18 = smov (%p38_p0, %s37_s18), 0 }
  0x13   : > { %11248 = sst [smem:[#allocation18_spill]] %s11276_s18  ;;  %s11278_s19 = smov (!%p38_p0, %s40_s19), %s9475_s14 }
  0x14   : > { %p9611_p3 = por %p338_p2, %p337_p1  ;;  %p343_p4 = scmp.ne.s32.totalorder %s9455_s26, %s9451_s25 }
  0x15   : > { %p42_p5 = scmp.ge.s32.totalorder %s11278_s19, 2  ;;  %p344_p6 = scmp.eq.s32.totalorder %s7109_s17, 3 }
  0x16   : > { %s11249_s21 = scalar_select %p9611_p3, 1, 0 }
  0x17   : > { %p7110_p7 = scmp.ge.s32.totalorder %s9479_s15, 1  ;;  %p351_p8 = scmp.lt.s32.totalorder %s9479_s15, 5 }
  0x18   : > { %11250 = sst [smem:[#allocation19_spill]] %s11249_s21  ;;  %s11280_s19 = smov (%p42_p5, %s11278_s19), 0 }
  0x19   : > { %11251 = sst [smem:[#allocation20_spill]] %s11280_s19  ;;  %p9621_p9 = por %p344_p6, %p343_p4 }
  0x1a   : > { %p9625_p10 = pnand %p7110_p7, %p351_p8  ;;  %s324_s24 = ssub.s32 %s9475_s14, %s11280_s19 }
  0x1b   : > { %s11252_s22 = scalar_select %p9621_p9, 1, 0 }
  0x1c   : > { %p325_p11 = scmp.eq.s32.totalorder %s324_s24, 0  ;;  %p9182_p12 = pneg %p9625_p10 }
  0x1d   : > { %11253 = sst [smem:[#allocation21_spill]] %s11252_s22  ;;  %p9633_p13 = scmp.eq.s32.totalorder %s7108_s16, 0 }
  0x1e   : > { %s11256_s7 = sld [smem:[#allocation23_spill]]  ;;  %s9481_s24 = smov [#allocation6]  }
  0x1f   : > { %s9641_s15 = scalar_select %p325_p11, %s9459_s27, %s327_s20  }
  0x20   : > { %p9645_p0 = pnand %p9633_p13, %p9182_p12  ;;  %s393_s16 = sshll.u32 %s9481_s24, 4  ;;  %s394_s16 = int_to_ptr.vmem [resolvable:$true] %s393_s16 }
  0x21   : > { %11257 = sst [smem:[#allocation22_spill]] %s9641_s15  ;;  %s9482_s19 = smov 256  }
  0x22   : > { %s9483_s14 = smov 16   ;;  %s374_s20 = sshll.u32 %s11218_s5, 4  ;;  %s375_s20 = int_to_ptr.hbm [resolvable:$true] %s374_s20 }
  0x23   : > { %s408_s13 = sshll.u32 %s11222_s9, 4  ;;  %s9485_s12 = smov 512   ;;  %s409_s13 = int_to_ptr.hbm [resolvable:$true] %s408_s13 }
  0x24   : > { %s391_s25 = sshll.u32 %s11256_s7, 4  ;;  %s9484_s7 = smov [#allocation3]   ;;  %s392_s25 = int_to_ptr.hbm [resolvable:$true] %s391_s25 }
  0x25   : > { %9188 = dma.hbm_to_vmem [thread:$0]  (!%p9645_p0), %s392_s25, 32768, %s394_s16, [#allocation7], %s9482_s19, %s9482_s19, %s9483_s14  }
  0x26   : > { %s376_s15 = sshll.u32 %s9484_s7, 4  ;;  %s9486_s24 = smov 32   ;;  %s377_s15 = int_to_ptr.vmem [resolvable:$true] %s376_s15 }
  0x27   : > { %9185 = dma.hbm_to_vmem [thread:$0]  (!%p9645_p0), %s375_s20, 8192, %s377_s15, [#allocation4], %s9485_s12, %s9485_s12, %s9486_s24  }
  0x28   : > { %s9487_s11 = smov [#allocation8]   ;;  %s9488_s14 = smov 128  }
  0x29   : > { %s410_s25 = sshll.u32 %s9487_s11, 4  ;;  %s9489_s19 = smov 8   ;;  %s411_s25 = int_to_ptr.vmem [resolvable:$true] %s410_s25 }
  0x2a   : > { %9191 = dma.hbm_to_vmem [thread:$0]  (!%p9645_p0), %s409_s13, 8192, %s411_s25, [#allocation7], %s9488_s14, %s9488_s14, %s9489_s19  }
  0x2b   : > { %448 = sbr.rel (%p9625_p10) target bundleno = 2755 (0xac3), region = 72 }
  0x30   : > { %9438 = dma.done.wait (%p9633_p13), [#allocation4], 8192  }
  0x31   : > { %9440 = vsyncadd (%p9633_p13), [#allocation4], 4294959104 }
  0x32   : > { %9442 = dma.done.wait (%p9633_p13), [#allocation7], 40960  }
  0x33   : > { %9444 = vsyncadd (%p9633_p13), [#allocation7], 4294926336  ;;  %s504_s7 = sand.u32 1, %s9455_s26   ;;  %s7119_s11 = sshll.u32 %s9463_s28, 2 }
  0x34   : > { %p507_p1 = scmp.lt.s32.totalorder %s9467_s29, 1  ;;  %p509_p2 = scmp.lt.s32.totalorder %s7119_s11, 7 }
  0x35   : > { %s9680_s17 = scalar_lea.vmem [#allocation9], %s504_s7  ;;  %p7122_p4 = scmp.ne.s32.totalorder %s9463_s28, 0 }
  0x36   : > { %s508_s12 = scalar_select %p507_p1, %s9467_s29, 1 }
  0x37   : > { %s11282_s11 = smov (!%p509_p2, %s7119_s11), 7  ;;  %520 = sbr.rel (%p7122_p4) target bundleno = 62 (0x3e), region = 88 }
  0x38   : > { %s7120_s13 = sshll.u32 %s508_s12, 3 }
  0x39   : > { %s512_s27 = sadd.s32 %s7120_s13, %s11282_s11 }
  0x3a   : > { %s7121_s15 = sshll.u32 %s512_s27, 2 }
  0x3b   : > { %s514_s23 = scalar_lea.vmem %s11213_s0, %s7121_s15 }
  0x3c   : > { %v9490_v0 = vmov -inf  }
  0x3d   : > { %521 = vst [vmem:[#allocation2] sm:$0xff] %v9490_v0 }
  0x3e PF: > { %v522_v1 = vld [vmem:[%s514_s23] sm:$0x77]  ;;  %v523_v2 = vld [vmem:[%s514_s23 + $0x8] sm:$0x77]  ;;  %vm863_vm0 = vcmask 1042432   ;;  %vm670_vm1 = vcmask 23552  }
  0x3f   : > { %531 = vst [vmem:[#allocation1] ss:$2 sm:$0xff] %v522_v1  ;;  %v524_v5 = vld [vmem:[%s11214_s1] sm:$0x7]  ;;  %v8778_v32 = vld [vmem:[%s11216_s3 + $0x18] sm:$0xff]  ;;  %v8777_v34 = vld [vmem:[%s11216_s3 + $0x10] sm:$0xff] }
  0x40   : > { %533 = vst [vmem:[#allocation1 + $0x10] ss:$2 sm:$0xff] %v523_v2  ;;  %7123 = vmatpush.msk.msra.mxu0 %vm863_vm0, %v524_v5  ;;  %9163 = vmatpush.msk.msra.mxu3 %vm863_vm0, %v524_v5  ;;  %v8776_v36 = vld [vmem:[%s11216_s3 + $0x8] sm:$0xff]  ;;  %v8775_v38 = vld [vmem:[%s11216_s3] sm:$0xff]  ;;  %vm1208_vm2 = vcmask 523264   ;;  %vm4406_vm3 = vcmask 1042434  }
  0x41   : > { %1309 = vmatpush.bf16.msra.mxu1 %v8778_v32  ;;  %9164 = vmatpush.bf16.msra.mxu2 %v8778_v32  ;;  %v9734_v46 = vld [vmem:[%s11215_s2] ss:$0 sm:$0xff]  ;;  %vm4404_vm4 = vcmask 1040384   ;;  %vm4408_vm5 = vcmask 1041408   ;;  %vm4412_vm6 = vcmask 1046534   ;;  %vm4410_vm7 = vcmask 1044484  }
  0x42   : > { %vm4414_vm8 = vcmask 1045508   ;;  %vm4416_vm9 = vcmask 1043456   ;;  %p7492_p5 = scmp.ne.s32.totalorder %s9463_s28, 1 }
  0x43   : > { %s11259_s20 = sld [smem:[#allocation24_spill]] (!%p7492_p5) }
  0x44   : > { %s11260_s24 = sld [smem:[#allocation25_spill]] (!%p7492_p5) }
  0x45   : > { %1310 = vmatpush.bf16.msra.mxu1 %v8777_v34  ;;  %9165 = vmatpush.bf16.msra.mxu2 %v8777_v34 }
  0x46   : > { %v534_v3 = vld.sshfl [vmem:[#allocation1] sm:$0xff pattern:$0x75316420]  ;;  %v535_v6 = vld.sshfl [vmem:[#allocation1 + $0x8] sm:$0xff pattern:$0x75316420] }
  0x47   : > { %542 = vxpose.xlu0.b32.start.end [1/1] (short) %v534_v3, 128  ;;  %v536_v4 = vld.sshfl [vmem:[#allocation1 + $0x10] sm:$0xff pattern:$0x75316420]  ;;  %v537_v7 = vld.sshfl [vmem:[#allocation1 + $0x18] sm:$0xff pattern:$0x75316420] }
  0x48   : > { %606 = vxpose.xlu1.b32.start.end [1/1] (short) %v536_v4, 128 }
  0x49   : > { %1311 = vmatpush.bf16.msra.mxu1 %v8776_v36  ;;  %9166 = vmatpush.bf16.msra.mxu2 %v8776_v36 }
  0x4d   : > { %1312 = vmatpush.bf16.msra.mxu1 %v8775_v38  ;;  %9167 = vmatpush.bf16.msra.mxu2 %v8775_v38 }
  0xc7   : > { %574 = vxpose.xlu0.b32.start.end [1/1] (short) %v535_v6, 128 }
  0xc8   : > { %638 = vxpose.xlu1.b32.start.end [1/1] (short) %v537_v7, 128 }
  0xeb   : > { %v558_v8 = vpop.trf.xlu0 }
  0xec   : > { %7124 = vmatmul.msk.f32.vlgmr.msra.gmra.mxu0 %vm670_vm1, %v558_v8  ;;  %v9687_v9 = vpop.trf.xlu1 }
  0xf3   : > { %v559_v10 = vpop.trf.xlu0 }
  0xf4   : > { %7125 = vmatmul.msk.f32.gmra.mxu0 %vm670_vm1, %v559_v10  ;;  %v623_v11 = vpop.trf.xlu1 }
  0xf5   : > { %7157 = vmatmul.msk.f32.vlgmr.msra.gmra.mxu3 %vm670_vm1, %v623_v11 }
  0xfb   : > { %v560_v12 = vpop.trf.xlu0 }
  0xfc   : > { %7126 = vmatmul.msk.f32.gmra.mxu0 %vm670_vm1, %v560_v12  ;;  %v624_v13 = vpop.trf.xlu1 }
  0xfd   : > { %7158 = vmatmul.msk.f32.gmra.mxu3 %vm670_vm1, %v624_v13 }
 0x103   : > { %v561_v14 = vpop.trf.xlu0 }
 0x104   : > { %7127 = vmatmul.msk.f32.gmra.mxu0 %vm670_vm1, %v561_v14  ;;  %v625_v15 = vpop.trf.xlu1 }
 0x105   : > { %7159 = vmatmul.msk.f32.gmra.mxu3 %vm670_vm1, %v625_v15 }
 0x10b   : > { %v562_v16 = vpop.trf.xlu0 }
 0x10c   : > { %7128 = vmatmul.msk.f32.gmra.mxu0 %vm670_vm1, %v562_v16  ;;  %v626_v17 = vpop.trf.xlu1 }
 0x10d   : > { %7160 = vmatmul.msk.f32.gmra.mxu3 %vm670_vm1, %v626_v17 }
 0x113   : > { %v563_v18 = vpop.trf.xlu0 }
 0x114   : > { %7129 = vmatmul.msk.f32.gmra.mxu0 %vm670_vm1, %v563_v18  ;;  %v627_v19 = vpop.trf.xlu1 }
 0x115   : > { %7161 = vmatmul.msk.f32.gmra.mxu3 %vm670_vm1, %v627_v19 }
 0x11b   : > { %v564_v20 = vpop.trf.xlu0 }
 0x11c   : > { %7130 = vmatmul.msk.f32.gmra.mxu0 %vm670_vm1, %v564_v20  ;;  %v628_v21 = vpop.trf.xlu1 }
 0x11d   : > { %7162 = vmatmul.msk.f32.gmra.mxu3 %vm670_vm1, %v628_v21 }
 0x123   : > { %v565_v22 = vpop.trf.xlu0 }
 0x124   : > { %7131 = vmatmul.msk.f32.gmra.mxu0 %vm670_vm1, %v565_v22  ;;  %v629_v23 = vpop.trf.xlu1 }
 0x125   : > { %7163 = vmatmul.msk.f32.gmra.mxu3 %vm670_vm1, %v629_v23 }
 0x12b   : > { %v566_v24 = vpop.trf.xlu0 }
 0x12c   : > { %7132 = vmatmul.msk.f32.gmra.mxu0 %vm670_vm1, %v566_v24  ;;  %v630_v25 = vpop.trf.xlu1 }
 0x12d   : > { %7164 = vmatmul.msk.f32.gmra.mxu3 %vm670_vm1, %v630_v25 }
 0x133   : > { %v567_v26 = vpop.trf.xlu0 }
 0x134   : > { %7133 = vmatmul.msk.f32.gmra.mxu0 %vm670_vm1, %v567_v26  ;;  %v631_v27 = vpop.trf.xlu1 }
 0x135   : > { %7165 = vmatmul.msk.f32.gmra.mxu3 %vm670_vm1, %v631_v27 }
 0x13b   : > { %v568_v28 = vpop.trf.xlu0 }
 0x13c   : > { %7134 = vmatmul.msk.f32.gmra.mxu0 %vm670_vm1, %v568_v28  ;;  %v632_v29 = vpop.trf.xlu1 }
 0x13d   : > { %7166 = vmatmul.msk.f32.gmra.mxu3 %vm670_vm1, %v632_v29 }
 0x143   : > { %v569_v30 = vpop.trf.xlu0 }
 0x144   : > { %7135 = vmatmul.msk.f32.gmra.mxu0 %vm670_vm1, %v569_v30  ;;  %v633_v31 = vpop.trf.xlu1 }
 0x145   : > { %7167 = vmatmul.msk.f32.gmra.mxu3 %vm670_vm1, %v633_v31 }
 0x14b   : > { %v570_v33 = vpop.trf.xlu0 }
 0x14c   : > { %7136 = vmatmul.msk.f32.gmra.mxu0 %vm670_vm1, %v570_v33  ;;  %v634_v35 = vpop.trf.xlu1 }
 0x14d   : > { %7168 = vmatmul.msk.f32.gmra.mxu3 %vm670_vm1, %v634_v35 }
 0x153   : > { %v571_v37 = vpop.trf.xlu0 }
 0x154   : > { %7137 = vmatmul.msk.f32.gmra.mxu0 %vm670_vm1, %v571_v37  ;;  %v635_v39 = vpop.trf.xlu1 }
 0x155   : > { %7169 = vmatmul.msk.f32.gmra.mxu3 %vm670_vm1, %v635_v39 }
 0x15b   : > { %v572_v40 = vpop.trf.xlu0 }
 0x15c   : > { %7138 = vmatmul.msk.f32.gmra.mxu0 %vm670_vm1, %v572_v40  ;;  %v636_v41 = vpop.trf.xlu1 }
 0x15d   : > { %7170 = vmatmul.msk.f32.gmra.mxu3 %vm670_vm1, %v636_v41 }
 0x163   : > { %v573_v42 = vpop.trf.xlu0 }
 0x164   : > { %7139 = vmatmul.msk.f32.gmra.mxu0 %vm670_vm1, %v573_v42  ;;  %v637_v43 = vpop.trf.xlu1 }
 0x165   : > { %7171 = vmatmul.msk.f32.gmra.mxu3 %vm670_vm1, %v637_v43 }
 0x169   : > { %v884_v44 = vpop.f32.mrf.mxu0 }
 0x16a   : > { %v885_v48 = vadd.f32 %v9734_v46, %v884_v44 }
 0x16b   : > { %v590_v45 = vpop.trf.xlu0 }
 0x16c   : > { %7140 = vmatmul.msk.f32.gmra.mxu0 %vm670_vm1, %v590_v45  ;;  %v654_v47 = vpop.trf.xlu1  ;;  %v1076_v52 = vmax.f32 %v885_v48, 0.0 }
 0x16d   : > { %7172 = vmatmul.msk.f32.gmra.mxu3 %vm670_vm1, %v654_v47 }
 0x171   : > { %v887_v49 = vpop.f32.mrf.mxu0 }
 0x172   : > { %v888_v50 = vadd.f32 %v9734_v46, %v887_v49 }
 0x173   : > { %v591_v51 = vpop.trf.xlu0 }
 0x174   : > { %v1077_v53 = vmax.f32 %v888_v50, 0.0  ;;  %7141 = vmatmul.msk.f32.gmra.mxu0 %vm670_vm1, %v591_v51  ;;  %v655_v54 = vpop.trf.xlu1 }
 0x175   : > { %7173 = vmatmul.msk.f32.gmra.mxu3 %vm670_vm1, %v655_v54  ;;  %v8835_v54 = vld [vmem:[#allocation3 + $0x1c4] sm:$0xf] }
 0x176   : > { %v1140_v55 = vpack.c.bf16 %v1077_v53, %v1076_v52 }
 0x178   : > { %7204 = vmatmul.msk.bf16.vlgmr.msra.gmra.mxu1 %vm1208_vm2, %v1140_v55  ;;  %v9743_v56 = vpop.f32.mrf.mxu3  ;;  %v7464_v55 = vld [vmem:[#allocation3 + $0x1e0] sm:$0xf0] }
 0x179   : > { %v890_v57 = vpop.f32.mrf.mxu0 }
 0x17a   : > { %v891_v60 = vadd.f32 %v9734_v46, %v890_v57  ;;  %v7470_v57 = vld [vmem:[#allocation3 + $0x1c8] sm:$0xf] }
 0x17b   : > { %v592_v58 = vpop.trf.xlu0 }
 0x17c   : > { %7142 = vmatmul.msk.f32.gmra.mxu0 %vm670_vm1, %v592_v58  ;;  %v656_v59 = vpop.trf.xlu1  ;;  %v1078_v1 = vmax.f32 %v891_v60, 0.0  ;;  %v8840_v60 = vld [vmem:[#allocation3 + $0x1e4] sm:$0xf0] }
 0x17d   : > { %7174 = vmatmul.msk.f32.gmra.mxu3 %vm670_vm1, %v656_v59  ;;  %v7467_v59 = vor.u32 %v8835_v54, %v7464_v55  ;;  %v8800_v54 = vld [vmem:[#allocation3 + $0xa4] sm:$0xf0] }
 0x17f   : > { %2141 = vmatpush.bf16.msrb.mxu3 %v7467_v59  ;;  %v8787_v59 = vld [vmem:[#allocation3 + $0x44] sm:$0xf] }
 0x180   : > { %v9748_v61 = vpop.f32.mrf.mxu3 }
 0x181   : > { %v893_v62 = vpop.f32.mrf.mxu0 }
 0x182   : > { %v894_v63 = vadd.f32 %v9734_v46, %v893_v62 }
 0x183   : > { %v593_v0 = vpop.trf.xlu0 }
 0x184   : > { %v1079_v2 = vmax.f32 %v894_v63, 0.0  ;;  %7143 = vmatmul.msk.f32.gmra.mxu0 %vm670_vm1, %v593_v0  ;;  %v657_v3 = vpop.trf.xlu1 }
 0x185   : > { %7175 = vmatmul.msk.f32.gmra.mxu3 %vm670_vm1, %v657_v3  ;;  %v8827_v3 = vld [vmem:[#allocation3 + $0x184] sm:$0xf] }
 0x186   : > { %v1141_v4 = vpack.c.bf16 %v1079_v2, %v1078_v1  ;;  %v7471_v1 = vor.u32 %v8840_v60, %v7470_v57  ;;  %v7272_v60 = vld [vmem:[#allocation3 + $0x60] sm:$0xf0] }
 0x188   : > { %7205 = vmatmul.msk.bf16.gmra.mxu1 %vm1208_vm2, %v1141_v4  ;;  %v9754_v5 = vpop.f32.mrf.mxu3  ;;  %2310 = vmatpush.bf16.msrb.mxu0 %v7471_v1  ;;  %v7432_v4 = vld [vmem:[#allocation3 + $0x1a0] sm:$0xf0]  ;;  %v8792_v1 = vld [vmem:[#allocation3 + $0x64] sm:$0xf0] }
 0x189   : > { %v896_v6 = vpop.f32.mrf.mxu0 }
 0x18a   : > { %v897_v10 = vadd.f32 %v9734_v46, %v896_v6  ;;  %v7438_v6 = vld [vmem:[#allocation3 + $0x188] sm:$0xf] }
 0x18b   : > { %v594_v7 = vpop.trf.xlu0 }
 0x18c   : > { %7144 = vmatmul.msk.f32.gmra.mxu0 %vm670_vm1, %v594_v7  ;;  %v658_v8 = vpop.trf.xlu1  ;;  %v1080_v15 = vmax.f32 %v897_v10, 0.0  ;;  %v7435_v7 = vor.u32 %v8827_v3, %v7432_v4  ;;  %v8779_v4 = vld [vmem:[#allocation3 + $0x4] sm:$0xf] }
 0x18d   : > { %7176 = vmatmul.msk.f32.gmra.mxu3 %vm670_vm1, %v658_v8  ;;  %v8832_v8 = vld [vmem:[#allocation3 + $0x1a4] sm:$0xf0] }
 0x18e   : > { %2142 = vmatpush.bf16.msrb.mxu3 %v7435_v7  ;;  %v7246_v7 = vld [vmem:[#allocation3 + $0x8] sm:$0xf] }
 0x190   : > { %v9759_v11 = vpop.f32.mrf.mxu3 }
 0x191   : > { %v899_v12 = vpop.f32.mrf.mxu0 }
 0x192   : > { %v900_v13 = vadd.f32 %v9734_v46, %v899_v12  ;;  %v7439_v12 = vor.u32 %v8832_v8, %v7438_v6  ;;  %v7240_v6 = vld [vmem:[#allocation3 + $0x20] sm:$0xf0] }
 0x193   : > { %v595_v14 = vpop.trf.xlu0  ;;  %v7243_v8 = vor.u32 %v8779_v4, %v7240_v6 }
 0x194   : > { %v1081_v16 = vmax.f32 %v900_v13, 0.0  ;;  %7145 = vmatmul.msk.f32.gmra.mxu0 %vm670_vm1, %v595_v14  ;;  %v659_v17 = vpop.trf.xlu1  ;;  %v8819_v14 = vld [vmem:[#allocation3 + $0x144] sm:$0xf] }
 0x195   : > { %7177 = vmatmul.msk.f32.gmra.mxu3 %vm670_vm1, %v659_v17  ;;  %2311 = vmatpush.bf16.msrb.mxu0 %v7439_v12  ;;  %v8784_v12 = vld [vmem:[#allocation3 + $0x24] sm:$0xf0] }
 0x196   : > { %v1142_v18 = vpack.c.bf16 %v1081_v16, %v1080_v15  ;;  %v7400_v15 = vld [vmem:[#allocation3 + $0x160] sm:$0xf0]  ;;  %v7406_v16 = vld [vmem:[#allocation3 + $0x148] sm:$0xf] }
 0x198   : > { %7206 = vmatmul.msk.bf16.gmra.mxu1 %vm1208_vm2, %v1142_v18  ;;  %v9765_v19 = vpop.f32.mrf.mxu3  ;;  %v7403_v18 = vor.u32 %v8819_v14, %v7400_v15  ;;  %v7247_v15 = vor.u32 %v8784_v12, %v7246_v7 }
 0x199   : > { %v902_v20 = vpop.f32.mrf.mxu0 }
 0x19a   : > { %v903_v23 = vadd.f32 %v9734_v46, %v902_v20  ;;  %v8824_v20 = vld [vmem:[#allocation3 + $0x164] sm:$0xf0]  ;;  %2143 = vmatpush.bf16.msrb.mxu3 %v7403_v18 }
 0x19b   : > { %v596_v21 = vpop.trf.xlu0 }
 0x19c   : > { %7146 = vmatmul.msk.f32.gmra.mxu0 %vm670_vm1, %v596_v21  ;;  %v660_v22 = vpop.trf.xlu1  ;;  %v1082_v28 = vmax.f32 %v903_v23, 0.0  ;;  %v8811_v23 = vld [vmem:[#allocation3 + $0x104] sm:$0xf] }
 0x19d   : > { %7178 = vmatmul.msk.f32.gmra.mxu3 %vm670_vm1, %v660_v22  ;;  %v7407_v22 = vor.u32 %v8824_v20, %v7406_v16 }
 0x19f   : > { %2312 = vmatpush.bf16.msrb.mxu0 %v7407_v22 }
 0x1a0   : > { %v9770_v24 = vpop.f32.mrf.mxu3 }
 0x1a1   : > { %v905_v25 = vpop.f32.mrf.mxu0 }
 0x1a2   : > { %v906_v26 = vadd.f32 %v9734_v46, %v905_v25  ;;  %v7368_v25 = vld [vmem:[#allocation3 + $0x120] sm:$0xf0] }
 0x1a3   : > { %v597_v27 = vpop.trf.xlu0 }
 0x1a4   : > { %v1083_v29 = vmax.f32 %v906_v26, 0.0  ;;  %7147 = vmatmul.msk.f32.gmra.mxu0 %vm670_vm1, %v597_v27  ;;  %v661_v30 = vpop.trf.xlu1  ;;  %v7374_v26 = vld [vmem:[#allocation3 + $0x108] sm:$0xf]  ;;  %v7371_v27 = vor.u32 %v8811_v23, %v7368_v25 }
 0x1a5   : > { %7179 = vmatmul.msk.f32.gmra.mxu3 %vm670_vm1, %v661_v30 }
 0x1a6   : > { %v1143_v31 = vpack.c.bf16 %v1083_v29, %v1082_v28  ;;  %v8816_v28 = vld [vmem:[#allocation3 + $0x124] sm:$0xf0]  ;;  %2144 = vmatpush.bf16.msrb.mxu3 %v7371_v27 }
 0x1a8   : > { %7207 = vmatmul.msk.bf16.gmra.mxu1 %vm1208_vm2, %v1143_v31  ;;  %v9776_v32 = vpop.f32.mrf.mxu3  ;;  %v7375_v31 = vor.u32 %v8816_v28, %v7374_v26 }
 0x1a9   : > { %v908_v33 = vpop.f32.mrf.mxu0 }
 0x1aa   : > { %v909_v36 = vadd.f32 %v9734_v46, %v908_v33  ;;  %2313 = vmatpush.bf16.msrb.mxu0 %v7375_v31 }
 0x1ab   : > { %v598_v34 = vpop.trf.xlu0 }
 0x1ac   : > { %7148 = vmatmul.msk.f32.gmra.mxu0 %vm670_vm1, %v598_v34  ;;  %v662_v35 = vpop.trf.xlu1  ;;  %v1084_v41 = vmax.f32 %v909_v36, 0.0  ;;  %v7336_v36 = vld [vmem:[#allocation3 + $0xe0] sm:$0xf0] }
 0x1ad   : > { %7180 = vmatmul.msk.f32.gmra.mxu3 %vm670_vm1, %v662_v35  ;;  %v8803_v35 = vld [vmem:[#allocation3 + $0xc4] sm:$0xf] }
 0x1b0   : > { %v9781_v37 = vpop.f32.mrf.mxu3 }
 0x1b1   : > { %v911_v38 = vpop.f32.mrf.mxu0 }
 0x1b2   : > { %v912_v39 = vadd.f32 %v9734_v46, %v911_v38  ;;  %v7342_v38 = vld [vmem:[#allocation3 + $0xc8] sm:$0xf] }
 0x1b3   : > { %v599_v40 = vpop.trf.xlu0 }
 0x1b4   : > { %v1085_v42 = vmax.f32 %v912_v39, 0.0  ;;  %7149 = vmatmul.msk.f32.gmra.mxu0 %vm670_vm1, %v599_v40  ;;  %v663_v43 = vpop.trf.xlu1  ;;  %v7339_v40 = vor.u32 %v8803_v35, %v7336_v36 }
 0x1b5   : > { %7181 = vmatmul.msk.f32.gmra.mxu3 %vm670_vm1, %v663_v43 }
 0x1b6   : > { %v1144_v44 = vpack.c.bf16 %v1085_v42, %v1084_v41  ;;  %v8808_v41 = vld [vmem:[#allocation3 + $0xe4] sm:$0xf0]  ;;  %2145 = vmatpush.bf16.msrb.mxu3 %v7339_v40 }
 0x1b8   : > { %7208 = vmatmul.msk.bf16.gmra.mxu1 %vm1208_vm2, %v1144_v44  ;;  %v9787_v45 = vpop.f32.mrf.mxu3 }
 0x1b9   : > { %v914_v47 = vpop.f32.mrf.mxu0 }
 0x1ba   : > { %v915_v50 = vadd.f32 %v9734_v46, %v914_v47  ;;  %v7343_v47 = vor.u32 %v8808_v41, %v7342_v38  ;;  %v9831_v38 = vld [vmem:[%s11217_s4] ss:$0 sm:$0xff] }
 0x1bb   : > { %v600_v48 = vpop.trf.xlu0 }
 0x1bc   : > { %7150 = vmatmul.msk.f32.gmra.mxu0 %vm670_vm1, %v600_v48  ;;  %v664_v49 = vpop.trf.xlu1  ;;  %v1086_v62 = vmax.f32 %v915_v50, 0.0  ;;  %v7304_v50 = vld [vmem:[#allocation3 + $0xa0] sm:$0xf0] }
 0x1bd   : > { %7182 = vmatmul.msk.f32.gmra.mxu3 %vm670_vm1, %v664_v49  ;;  %2314 = vmatpush.bf16.msrb.mxu0 %v7343_v47  ;;  %v8795_v49 = vld [vmem:[#allocation3 + $0x84] sm:$0xf] }
 0x1c0   : > { %v9792_v51 = vpop.f32.mrf.mxu3 }
 0x1c1   : > { %v917_v52 = vpop.f32.mrf.mxu0 }
 0x1c2   : > { %v918_v53 = vadd.f32 %v9734_v46, %v917_v52  ;;  %v7310_v52 = vld [vmem:[#allocation3 + $0x88] sm:$0xf] }
 0x1c3   : > { %v601_v58 = vpop.trf.xlu0  ;;  %v7311_v57 = vor.u32 %v8800_v54, %v7310_v52 }
 0x1c4   : > { %v1087_v63 = vmax.f32 %v918_v53, 0.0  ;;  %7151 = vmatmul.msk.f32.gmra.mxu0 %vm670_vm1, %v601_v58  ;;  %v665_v0 = vpop.trf.xlu1  ;;  %v7307_v53 = vor.u32 %v8795_v49, %v7304_v50 }
 0x1c5   : > { %7183 = vmatmul.msk.f32.gmra.mxu3 %vm670_vm1, %v665_v0  ;;  %2315 = vmatpush.bf16.msrb.mxu0 %v7311_v57  ;;  %v7275_v0 = vor.u32 %v8787_v59, %v7272_v60 }
 0x1c6   : > { %v1145_v2 = vpack.c.bf16 %v1087_v63, %v1086_v62  ;;  %2146 = vmatpush.bf16.msrb.mxu3 %v7307_v53  ;;  %v7278_v62 = vld [vmem:[#allocation3 + $0x48] sm:$0xf] }
 0x1c7   : > { %v7279_v3 = vor.u32 %v8792_v1, %v7278_v62 }
 0x1c8   : > { %7209 = vmatmul.msk.bf16.gmra.mxu1 %vm1208_vm2, %v1145_v2  ;;  %v9798_v10 = vpop.f32.mrf.mxu3 }
 0x1c9   : > { %v920_v13 = vpop.f32.mrf.mxu0  ;;  %2316 = vmatpush.bf16.msrb.mxu0 %v7279_v3 }
 0x1ca   : > { %v921_v29 = vadd.f32 %v9734_v46, %v920_v13  ;;  %2147 = vmatpush.bf16.msrb.mxu3 %v7275_v0 }
 0x1cb   : > { %v602_v17 = vpop.trf.xlu0 }
 0x1cc   : > { %7152 = vmatmul.msk.f32.gmra.mxu0 %vm670_vm1, %v602_v17  ;;  %v666_v21 = vpop.trf.xlu1  ;;  %v1088_v42 = vmax.f32 %v921_v29, 0.0 }
 0x1cd   : > { %7184 = vmatmul.msk.f32.gmra.mxu3 %vm670_vm1, %v666_v21  ;;  %2317 = vmatpush.bf16.msrb.mxu0 %v7247_v15 }
 0x1ce   : > { %2148 = vmatpush.bf16.msrb.mxu3 %v7243_v8 }
 0x1d0   : > { %v9803_v30 = vpop.f32.mrf.mxu3 }
 0x1d1   : > { %v923_v33 = vpop.f32.mrf.mxu0 }
 0x1d2   : > { %v924_v34 = vadd.f32 %v9734_v46, %v923_v33 }
 0x1d3   : > { %v603_v39 = vpop.trf.xlu0 }
 0x1d4   : > { %v1089_v43 = vmax.f32 %v924_v34, 0.0  ;;  %7153 = vmatmul.msk.f32.gmra.mxu0 %vm670_vm1, %v603_v39  ;;  %v667_v44 = vpop.trf.xlu1 }
 0x1d5   : > { %7185 = vmatmul.msk.f32.gmra.mxu3 %vm670_vm1, %v667_v44 }
 0x1d6   : > { %v1146_v48 = vpack.c.bf16 %v1089_v43, %v1088_v42 }
 0x1d8   : > { %7210 = vmatmul.msk.bf16.gmra.mxu1 %vm1208_vm2, %v1146_v48  ;;  %v9809_v55 = vpop.f32.mrf.mxu3 }
 0x1d9   : > { %v926_v58 = vpop.f32.mrf.mxu0 }
 0x1da   : > { %v927_v13 = vadd.f32 %v9734_v46, %v926_v58 }
 0x1db   : > { %v604_v63 = vpop.trf.xlu0 }
 0x1dc   : > { %7154 = vmatmul.msk.f32.gmra.mxu0 %vm670_vm1, %v604_v63  ;;  %v668_v2 = vpop.trf.xlu1  ;;  %v1090_v20 = vmax.f32 %v927_v13, 0.0 }
 0x1dd   : > { %7186 = vmatmul.msk.f32.gmra.mxu3 %vm670_vm1, %v668_v2 }
 0x1e0   : > { %v9814_v14 = vpop.f32.mrf.mxu3 }
 0x1e1   : > { %v929_v16 = vpop.f32.mrf.mxu0 }
 0x1e2   : > { %v930_v17 = vadd.f32 %v9734_v46, %v929_v16 }
 0x1e3   : > { %v605_v18 = vpop.trf.xlu0 }
 0x1e4   : > { %v1091_v21 = vmax.f32 %v930_v17, 0.0  ;;  %7155 = vmatmul.msk.f32.gmra.mxu0 %vm670_vm1, %v605_v18  ;;  %v669_v22 = vpop.trf.xlu1 }
 0x1e5   : > { %7187 = vmatmul.msk.f32.gmra.mxu3 %vm670_vm1, %v669_v22 }
 0x1e6   : > { %v1147_v23 = vpack.c.bf16 %v1091_v21, %v1090_v20 }
 0x1e8   : > { %7211 = vmatmul.msk.bf16.gmra.mxu1 %vm1208_vm2, %v1147_v23  ;;  %v9820_v25 = vpop.f32.mrf.mxu3 }
 0x1e9   : > { %v932_v26 = vpop.f32.mrf.mxu0 }
 0x1ea   : > { %v933_v27 = vadd.f32 %v9734_v46, %v932_v26 }
 0x1ec   : > { %7156 = vmatmul.msk.f32.gmra.mxu0 %vm670_vm1, %v9687_v9  ;;  %v1092_v33 = vmax.f32 %v933_v27, 0.0 }
 0x1f0   : > { %v9825_v28 = vpop.f32.mrf.mxu3 }
 0x1f1   : > { %v935_v29 = vpop.f32.mrf.mxu0 }
 0x1f2   : > { %v936_v31 = vadd.f32 %v9734_v46, %v935_v29 }
 0x1f4   : > { %v1093_v34 = vmax.f32 %v936_v31, 0.0 }
 0x1f5   : > { %v1314_v35 = vpop.f32.mrf.mxu1 }
 0x1f6   : > { %v1148_v36 = vpack.c.bf16 %v1093_v34, %v1092_v33  ;;  %v1315_v40 = vadd.f32 %v9831_v38, %v1314_v35 }
 0x1f8   : > { %7212 = vmatmul.msk.bf16.gmra.mxu1 %vm1208_vm2, %v1148_v36  ;;  %v9834_v39 = vpop.f32.mrf.mxu3  ;;  %v1474_v43 = vmax.f32 %v1315_v40, 0.0 }
 0x1f9   : > { %v938_v9 = vpop.f32.mrf.mxu0 }
 0x1fa   : > { %v939_v44 = vadd.f32 %v9734_v46, %v938_v9 }
 0x1fc   : > { %v1094_v53 = vmax.f32 %v939_v44, 0.0 }
 0x1fd   : > { %v1316_v41 = vpop.f32.mrf.mxu1 }
 0x1fe   : > { %v1317_v42 = vadd.f32 %v9831_v38, %v1316_v41 }
 0x200   : > { %v1475_v47 = vmax.f32 %v1317_v42, 0.0  ;;  %v9839_v48 = vpop.f32.mrf.mxu3 }
 0x201   : > { %v941_v49 = vpop.f32.mrf.mxu0 }
 0x202   : > { %v9841_v50 = vpack.c.bf16 %v1475_v47, %v1474_v43  ;;  %v942_v52 = vadd.f32 %v9734_v46, %v941_v49 }
 0x204   : > { %v1095_v54 = vmax.f32 %v942_v52, 0.0  ;;  %2149 = vmatmul.bf16.vlgmr.msrb.gmra.mxu3 %v9841_v50  ;;  %2318 = vmatmul.bf16.vlgmr.msrb.gmra.mxu0 %v9841_v50 }
 0x205   : > { %v1319_v57 = vpop.f32.mrf.mxu1 }
 0x206   : > { %v1149_v58 = vpack.c.bf16 %v1095_v54, %v1094_v53  ;;  %v1320_v62 = vadd.f32 %v9831_v38, %v1319_v57 }
 0x208   : > { %7213 = vmatmul.msk.bf16.gmra.mxu1 %vm1208_vm2, %v1149_v58  ;;  %v9847_v59 = vpop.f32.mrf.mxu3  ;;  %v1476_v1 = vmax.f32 %v1320_v62, 0.0 }
 0x209   : > { %v944_v60 = vpop.f32.mrf.mxu0 }
 0x20a   : > { %v945_v2 = vadd.f32 %v9734_v46, %v944_v60 }
 0x20c   : > { %v1096_v12 = vmax.f32 %v945_v2, 0.0  ;;  %v7472_v2 = vld [vmem:[#allocation3 + $0x1e8] sm:$0xf0] }
 0x20d   : > { %v1321_v63 = vpop.f32.mrf.mxu1 }
 0x20e   : > { %v1322_v0 = vadd.f32 %v9831_v38, %v1321_v63 }
 0x210   : > { %v1477_v3 = vmax.f32 %v1322_v0, 0.0  ;;  %v9852_v4 = vpop.f32.mrf.mxu3 }
 0x211   : > { %v947_v6 = vpop.f32.mrf.mxu0 }
 0x212   : > { %v9854_v7 = vpack.c.bf16 %v1477_v3, %v1476_v1  ;;  %v948_v8 = vadd.f32 %v9734_v46, %v947_v6  ;;  %v8836_v1 = vld [vmem:[#allocation3 + $0x1cc] sm:$0xf] }
 0x213   : > { %v7475_v6 = vor.u32 %v8836_v1, %v7472_v2 }
 0x214   : > { %v1097_v13 = vmax.f32 %v948_v8, 0.0  ;;  %2154 = vmatmul.bf16.gmra.mxu3 %v9854_v7  ;;  %2323 = vmatmul.bf16.gmra.mxu0 %v9854_v7 }
 0x215   : > { %v1324_v15 = vpop.f32.mrf.mxu1  ;;  %2479 = vmatpush.bf16.msrb.mxu1 %v7475_v6  ;;  %v987_v6 = vadd.f32 %v9734_v46, %v9748_v61 }
 0x216   : > { %v1150_v16 = vpack.c.bf16 %v1097_v13, %v1096_v12  ;;  %v1325_v20 = vadd.f32 %v9831_v38, %v1324_v15  ;;  %v8828_v12 = vld [vmem:[#allocation3 + $0x18c] sm:$0xf] }
 0x217   : > { %v7440_v13 = vld [vmem:[#allocation3 + $0x1a8] sm:$0xf0] }
 0x218   : > { %7214 = vmatmul.msk.bf16.gmra.mxu1 %vm1208_vm2, %v1150_v16  ;;  %v9860_v18 = vpop.f32.mrf.mxu3  ;;  %v1478_v23 = vmax.f32 %v1325_v20, 0.0  ;;  %v7443_v15 = vor.u32 %v8828_v12, %v7440_v13 }
 0x219   : > { %v950_v17 = vpop.f32.mrf.mxu0 }
 0x21a   : > { %v951_v26 = vadd.f32 %v9734_v46, %v950_v17  ;;  %2480 = vmatpush.bf16.msrb.mxu1 %v7443_v15  ;;  %v8788_v15 = vld [vmem:[#allocation3 + $0x4c] sm:$0xf] }
 0x21c   : > { %v1098_v35 = vmax.f32 %v951_v26, 0.0 }
 0x21d   : > { %v1326_v21 = vpop.f32.mrf.mxu1 }
 0x21e   : > { %v1327_v22 = vadd.f32 %v9831_v38, %v1326_v21  ;;  %v8820_v21 = vld [vmem:[#allocation3 + $0x14c] sm:$0xf] }
 0x220   : > { %v1479_v27 = vmax.f32 %v1327_v22, 0.0  ;;  %v9868_v34 = vpop.f32.mrf.mxu3  ;;  %v7408_v22 = vld [vmem:[#allocation3 + $0x168] sm:$0xf0] }
 0x221   : > { %v953_v29 = vpop.f32.mrf.mxu0 }
 0x222   : > { %v9865_v31 = vpack.c.bf16 %v1479_v27, %v1478_v23  ;;  %v954_v33 = vadd.f32 %v9734_v46, %v953_v29  ;;  %v7411_v23 = vor.u32 %v8820_v21, %v7408_v22 }
 0x224   : > { %v1099_v36 = vmax.f32 %v954_v33, 0.0  ;;  %2159 = vmatmul.bf16.gmra.mxu3 %v9865_v31  ;;  %2328 = vmatmul.bf16.gmra.mxu0 %v9865_v31 }
 0x225   : > { %v1329_v9 = vpop.f32.mrf.mxu1  ;;  %2481 = vmatpush.bf16.msrb.mxu1 %v7411_v23  ;;  %v1110_v23 = vmax.f32 %v987_v6, 0.0 }
 0x226   : > { %v1151_v40 = vpack.c.bf16 %v1099_v36, %v1098_v35  ;;  %v1330_v42 = vadd.f32 %v9831_v38, %v1329_v9 }
 0x228   : > { %7215 = vmatmul.msk.bf16.gmra.mxu1 %vm1208_vm2, %v1151_v40  ;;  %v9874_v44 = vpop.f32.mrf.mxu3  ;;  %v1480_v49 = vmax.f32 %v1330_v42, 0.0  ;;  %v8812_v40 = vld [vmem:[#allocation3 + $0x10c] sm:$0xf] }
 0x229   : > { %v956_v41 = vpop.f32.mrf.mxu0 }
 0x22a   : > { %v957_v52 = vadd.f32 %v9734_v46, %v956_v41  ;;  %v7376_v41 = vld [vmem:[#allocation3 + $0x128] sm:$0xf0] }
 0x22b   : > { %v7379_v42 = vor.u32 %v8812_v40, %v7376_v41  ;;  %v7248_v41 = vld [vmem:[#allocation3 + $0x28] sm:$0xf0] }
 0x22c   : > { %v1100_v60 = vmax.f32 %v957_v52, 0.0 }
 0x22d   : > { %v1331_v43 = vpop.f32.mrf.mxu1  ;;  %2482 = vmatpush.bf16.msrb.mxu1 %v7379_v42 }
 0x22e   : > { %v1332_v47 = vadd.f32 %v9831_v38, %v1331_v43 }
 0x230   : > { %v1481_v53 = vmax.f32 %v1332_v47, 0.0  ;;  %v9883_v3 = vpop.f32.mrf.mxu3 }
 0x231   : > { %v959_v54 = vpop.f32.mrf.mxu0 }
 0x232   : > { %v9878_v57 = vpack.c.bf16 %v1481_v53, %v1480_v49  ;;  %v960_v58 = vadd.f32 %v9734_v46, %v959_v54  ;;  %v8804_v53 = vld [vmem:[#allocation3 + $0xcc] sm:$0xf] }
 0x233   : > { %v7344_v54 = vld [vmem:[#allocation3 + $0xe8] sm:$0xf0] }
 0x234   : > { %v1101_v62 = vmax.f32 %v960_v58, 0.0  ;;  %2164 = vmatmul.bf16.gmra.mxu3 %v9878_v57  ;;  %2333 = vmatmul.bf16.gmra.mxu0 %v9878_v57  ;;  %v7347_v58 = vor.u32 %v8804_v53, %v7344_v54 }
 0x235   : > { %v1334_v63 = vpop.f32.mrf.mxu1 }
 0x236   : > { %v1152_v0 = vpack.c.bf16 %v1101_v62, %v1100_v60  ;;  %v1335_v16 = vadd.f32 %v9831_v38, %v1334_v63  ;;  %2483 = vmatpush.bf16.msrb.mxu1 %v7347_v58  ;;  %v8796_v62 = vld [vmem:[#allocation3 + $0x8c] sm:$0xf] }
 0x237   : > { %v7312_v63 = vld [vmem:[#allocation3 + $0xa8] sm:$0xf0] }
 0x238   : > { %7216 = vmatmul.msk.bf16.gmra.mxu1 %vm1208_vm2, %v1152_v0  ;;  %v1482_v26 = vmax.f32 %v1335_v16, 0.0  ;;  %v9889_v35 = vpop.f32.mrf.mxu3  ;;  %v7315_v1 = vor.u32 %v8796_v62, %v7312_v63  ;;  %v7280_v16 = vld [vmem:[#allocation3 + $0x68] sm:$0xf0]  ;;  %v993_v63 = vadd.f32 %v9734_v46, %v9759_v11 }
 0x239   : > { %v962_v8 = vpop.f32.mrf.mxu0 }
 0x23a   : > { %v963_v27 = vadd.f32 %v9734_v46, %v962_v8  ;;  %v990_v8 = vadd.f32 %v9734_v46, %v9754_v5  ;;  %2484 = vmatpush.bf16.msrb.mxu1 %v7315_v1  ;;  %v7462_v5 = vld [vmem:[#allocation3 + $0x1c0] sm:$0xf]  ;;  %v996_v1 = vadd.f32 %v9734_v46, %v9765_v19 }
 0x23c   : > { %v1102_v43 = vmax.f32 %v963_v27, 0.0 }
 0x23d   : > { %v1336_v17 = vpop.f32.mrf.mxu1 }
 0x23e   : > { %v1337_v20 = vadd.f32 %v9831_v38, %v1336_v17  ;;  %v7283_v17 = vor.u32 %v8788_v15, %v7280_v16  ;;  %v1112_v16 = vmax.f32 %v993_v63, 0.0 }
 0x240   : > { %v1483_v29 = vmax.f32 %v1337_v20, 0.0  ;;  %v9897_v0 = vpop.f32.mrf.mxu3  ;;  %2485 = vmatpush.bf16.msrb.mxu1 %v7283_v17  ;;  %v1113_v17 = vmax.f32 %v996_v1, 0.0 }
 0x241   : > { %v965_v33 = vpop.f32.mrf.mxu0 }
 0x242   : > { %v9891_v36 = vpack.c.bf16 %v1483_v29, %v1482_v26  ;;  %v966_v9 = vadd.f32 %v9734_v46, %v965_v33  ;;  %v1111_v26 = vmax.f32 %v990_v8, 0.0  ;;  %v8839_v33 = vld [vmem:[#allocation3 + $0x1dc] sm:$0xf0] }
 0x243   : > { %v7463_v40 = vor.u32 %v8839_v33, %v7462_v5 }
 0x244   : > { %v1103_v47 = vmax.f32 %v966_v9, 0.0  ;;  %2169 = vmatmul.bf16.gmra.mxu3 %v9891_v36  ;;  %2338 = vmatmul.bf16.gmra.mxu0 %v9891_v36  ;;  %v8780_v9 = vld [vmem:[#allocation3 + $0xc] sm:$0xf]  ;;  %v1157_v54 = vpack.c.bf16 %v1111_v26, %v1110_v23  ;;  %v984_v23 = vadd.f32 %v9734_v46, %v9743_v56  ;;  %v1002_v56 = vadd.f32 %v9734_v46, %v9776_v32 }
 0x245   : > { %v1339_v49 = vpop.f32.mrf.mxu1  ;;  %1972 = vmatpush.bf16.msrb.mxu2 %v7463_v40 }
 0x246   : > { %v1153_v52 = vpack.c.bf16 %v1103_v47, %v1102_v43  ;;  %v1340_v2 = vadd.f32 %v9831_v38, %v1339_v49  ;;  %v7251_v47 = vor.u32 %v8780_v9, %v7248_v41  ;;  %v1109_v33 = vmax.f32 %v984_v23, 0.0 }
 0x248   : > { %7217 = vmatmul.msk.bf16.gmra.mxu1 %vm1208_vm2, %v1153_v52  ;;  %v1484_v20 = vmax.f32 %v1340_v2, 0.0  ;;  %v9911_v52 = vpop.f32.mrf.mxu3 }
 0x249   : > { %v968_v60 = vpop.f32.mrf.mxu0  ;;  %2486 = vmatpush.bf16.msrb.mxu1 %v7251_v47 }
 0x24a   : > { %v969_v21 = vadd.f32 %v9734_v46, %v968_v60 }
 0x24c   : > { %v1104_v42 = vmax.f32 %v969_v21, 0.0 }
 0x24d   : > { %v1341_v12 = vpop.f32.mrf.mxu1 }
 0x24e   : > { %v1342_v13 = vadd.f32 %v9831_v38, %v1341_v12 }
 0x250   : > { %v1485_v22 = vmax.f32 %v1342_v13, 0.0  ;;  %v9920_v6 = vpop.f32.mrf.mxu3 }
 0x251   : > { %v971_v27 = vpop.f32.mrf.mxu0 }
 0x252   : > { %v9906_v29 = vpack.c.bf16 %v1485_v22, %v1484_v20  ;;  %v972_v61 = vadd.f32 %v9734_v46, %v971_v27  ;;  %v1158_v27 = vpack.c.bf16 %v1113_v17, %v1112_v16 }
 0x254   : > { %v1105_v43 = vmax.f32 %v972_v61, 0.0  ;;  %2174 = vmatmul.bf16.gmra.mxu3 %v9906_v29  ;;  %2343 = vmatmul.bf16.gmra.mxu0 %v9906_v29 }
 0x255   : > { %v1344_v49 = vpop.f32.mrf.mxu1 }
 0x256   : > { %v1154_v53 = vpack.c.bf16 %v1105_v43, %v1104_v42  ;;  %v1345_v60 = vadd.f32 %v9831_v38, %v1344_v49  ;;  %v999_v43 = vadd.f32 %v9734_v46, %v9770_v24  ;;  %v7430_v24 = vld [vmem:[#allocation3 + $0x180] sm:$0xf] }
 0x258   : > { %7218 = vmatmul.msk.bf16.gmra.mxu1 %vm1208_vm2, %v1154_v53  ;;  %v1486_v8 = vmax.f32 %v1345_v60, 0.0  ;;  %v9931_v5 = vpop.f32.mrf.mxu3  ;;  %v1114_v60 = vmax.f32 %v999_v43, 0.0 }
 0x259   : > { %v974_v58 = vpop.f32.mrf.mxu0 }
 0x25a   : > { %v975_v12 = vadd.f32 %v9734_v46, %v974_v58 }
 0x25c   : > { %v1106_v22 = vmax.f32 %v975_v12, 0.0 }
 0x25d   : > { %v1346_v62 = vpop.f32.mrf.mxu1 }
 0x25e   : > { %v1347_v2 = vadd.f32 %v9831_v38, %v1346_v62  ;;  %v1115_v62 = vmax.f32 %v1002_v56, 0.0 }
 0x260   : > { %v1487_v13 = vmax.f32 %v1347_v2, 0.0  ;;  %v9943_v1 = vpop.f32.mrf.mxu3  ;;  %v8831_v2 = vld [vmem:[#allocation3 + $0x19c] sm:$0xf0]  ;;  %v9947_v12 = vpack.c.bf16 %v1115_v62, %v1114_v60 }
 0x261   : > { %v977_v15 = vpop.f32.mrf.mxu0 }
 0x262   : > { %v9923_v20 = vpack.c.bf16 %v1487_v13, %v1486_v8  ;;  %v978_v21 = vadd.f32 %v9734_v46, %v977_v15  ;;  %v7431_v8 = vor.u32 %v8831_v2, %v7430_v24 }
 0x264   : > { %v1107_v11 = vmax.f32 %v978_v21, 0.0  ;;  %2179 = vmatmul.bf16.gmra.mxu3 %v9923_v20  ;;  %2348 = vmatmul.bf16.gmra.mxu0 %v9923_v20 }
 0x265   : > { %v1349_v19 = vpop.f32.mrf.mxu1  ;;  %1973 = vmatpush.bf16.msrb.mxu2 %v7431_v8 }
 0x266   : > { %v1155_v26 = vpack.c.bf16 %v1107_v11, %v1106_v22  ;;  %v1350_v40 = vadd.f32 %v9831_v38, %v1349_v19  ;;  %v9958_v11 = vld [vmem:[%s11219_s6] sm:$0xff] }
 0x268   : > { %7219 = vmatmul.msk.bf16.gmra.mxu1 %vm1208_vm2, %v1155_v26  ;;  %v1488_v53 = vmax.f32 %v1350_v40, 0.0  ;;  %v9951_v16 = vpop.f32.mrf.mxu3  ;;  %v9963_v26 = vperm.slane %v9958_v11, 2  ;;  %v9970_v40 = vperm.slane %v9958_v11, 1 }
 0x269   : > { %v980_v61 = vpop.f32.mrf.mxu0 }
 0x26a   : > { %v981_v9 = vadd.f32 %v9734_v46, %v980_v61 }
 0x26c   : > { %v1108_v41 = vmax.f32 %v981_v9, 0.0 }
 0x26d   : > { %v1351_v42 = vpop.f32.mrf.mxu1 }
 0x26e   : > { %v1352_v47 = vadd.f32 %v9831_v38, %v1351_v42  ;;  %v1156_v49 = vpack.c.bf16 %v1109_v33, %v1108_v41 }
 0x270   : > { %v1489_v58 = vmax.f32 %v1352_v47, 0.0  ;;  %7220 = vmatmul.msk.bf16.vlgmr.msra.gmra.mxu2 %vm1208_vm2, %v1156_v49 }
 0x272   : > { %v9941_v63 = vpack.c.bf16 %v1489_v58, %v1488_v53 }
 0x274   : > { %2184 = vmatmul.bf16.gmra.mxu3 %v9941_v63  ;;  %2353 = vmatmul.bf16.gmra.mxu0 %v9941_v63 }
 0x275   : > { %v1354_v32 = vpop.f32.mrf.mxu1 }
 0x276   : > { %v1355_v13 = vadd.f32 %v9831_v38, %v1354_v32 }
 0x278   : > { %2487 = vmatmul.bf16.vlgmr.msrb.gmra.mxu1 %v9841_v50  ;;  %v1490_v21 = vmax.f32 %v1355_v13, 0.0 }
 0x27d   : > { %v1356_v15 = vpop.f32.mrf.mxu1 }
 0x27e   : > { %v1357_v17 = vadd.f32 %v9831_v38, %v1356_v15 }
 0x280   : > { %v1491_v22 = vmax.f32 %v1357_v17, 0.0  ;;  %7221 = vmatmul.msk.bf16.gmra.mxu2 %vm1208_vm2, %v1157_v54 }
 0x281   : > { %v2319_v19 = vpop.f32.mrf.mxu0 }
 0x282   : > { %v9960_v23 = vpack.c.bf16 %v1491_v22, %v1490_v21  ;;  %v2320_v9 = vadd.f32 %v2319_v19, %v9963_v26  ;;  %v7398_v19 = vld [vmem:[#allocation3 + $0x140] sm:$0xf] }
 0x284   : > { %2189 = vmatmul.bf16.gmra.mxu3 %v9960_v23  ;;  %2358 = vmatmul.bf16.gmra.mxu0 %v9960_v23  ;;  %v3326_v42 = vmax.f32 %v2320_v9, 0.0 }
 0x285   : > { %v1359_v61 = vpop.f32.mrf.mxu1 }
 0x286   : > { %v1360_v43 = vadd.f32 %v9831_v38, %v1359_v61  ;;  %v8823_v61 = vld [vmem:[#allocation3 + $0x15c] sm:$0xf0] }
 0x287   : > { %v2150_v33 = vpop.f32.mrf.mxu3  ;;  %v7399_v9 = vor.u32 %v8823_v61, %v7398_v19 }
 0x288   : > { %2492 = vmatmul.bf16.gmra.mxu1 %v9854_v7  ;;  %v2151_v49 = vadd.f32 %v2150_v33, %v9970_v40  ;;  %v1492_v62 = vmax.f32 %v1360_v43, 0.0 }
 0x289   : > { %v2321_v54 = vpop.f32.mrf.mxu0  ;;  %1974 = vmatpush.bf16.msrb.mxu2 %v7399_v9  ;;  %v1005_v9 = vadd.f32 %v9734_v46, %v9781_v37 }
 0x28a   : > { %v2322_v41 = vadd.f32 %v2321_v54, %v9963_v26  ;;  %v3325_v8 = vmax.f32 %v2151_v49, 0.0 }
 0x28c   : > { %v3334_v56 = vmax.f32 %v2322_v41, 0.0 }
 0x28d   : > { %v1361_v47 = vpop.f32.mrf.mxu1 }
 0x28e   : > { %v3975_v53 = vmax.f32 %v3326_v42, %v3334_v56  ;;  %v1362_v58 = vadd.f32 %v9831_v38, %v1361_v47 }
 0x28f   : > { %v2152_v60 = vpop.f32.mrf.mxu3 }
 0x290   : > { %v1493_v24 = vmax.f32 %v1362_v58, 0.0  ;;  %v2153_v2 = vadd.f32 %v2152_v60, %v9970_v40  ;;  %7222 = vmatmul.msk.bf16.gmra.mxu2 %vm1208_vm2, %v1158_v27 }
 0x291   : > { %v2324_v32 = vpop.f32.mrf.mxu0 }
 0x292   : > { %v9978_v13 = vpack.c.bf16 %v1493_v24, %v1492_v62  ;;  %v3333_v15 = vmax.f32 %v2153_v2, 0.0  ;;  %v2325_v17 = vadd.f32 %v2324_v32, %v9963_v26 }
 0x294   : > { %v3906_v21 = vmax.f32 %v3325_v8, %v3333_v15  ;;  %v3342_v22 = vmax.f32 %v2325_v17, 0.0  ;;  %2194 = vmatmul.bf16.gmra.mxu3 %v9978_v13  ;;  %2363 = vmatmul.bf16.gmra.mxu0 %v9978_v13 }
 0x295   : > { %v1364_v33 = vpop.f32.mrf.mxu1 }
 0x296   : > { %v3976_v54 = vmax.f32 %v3975_v53, %v3342_v22  ;;  %v1365_v47 = vadd.f32 %v9831_v38, %v1364_v33 }
 0x297   : > { %v2155_v41 = vpop.f32.mrf.mxu3 }
 0x298   : > { %v2156_v27 = vadd.f32 %v2155_v41, %v9970_v40  ;;  %2497 = vmatmul.bf16.gmra.mxu1 %v9865_v31  ;;  %v1494_v53 = vmax.f32 %v1365_v47, 0.0 }
 0x299   : > { %v2326_v42 = vpop.f32.mrf.mxu0 }
 0x29a   : > { %v3341_v43 = vmax.f32 %v2156_v27, 0.0  ;;  %v2327_v56 = vadd.f32 %v2326_v42, %v9963_v26 }
 0x29c   : > { %v3907_v49 = vmax.f32 %v3906_v21, %v3341_v43  ;;  %v3350_v58 = vmax.f32 %v2327_v56, 0.0  ;;  %v1116_v43 = vmax.f32 %v1005_v9, 0.0  ;;  %v7366_v9 = vld [vmem:[#allocation3 + $0x100] sm:$0xf] }
 0x29d   : > { %v1366_v60 = vpop.f32.mrf.mxu1 }
 0x29e   : > { %v3977_v62 = vmax.f32 %v3976_v54, %v3350_v58  ;;  %v1367_v24 = vadd.f32 %v9831_v38, %v1366_v60  ;;  %v1008_v54 = vadd.f32 %v9734_v46, %v9787_v45 }
 0x29f   : > { %v2157_v2 = vpop.f32.mrf.mxu3 }
 0x2a0   : > { %v1495_v32 = vmax.f32 %v1367_v24, 0.0  ;;  %v2158_v8 = vadd.f32 %v2157_v2, %v9970_v40  ;;  %7223 = vmatmul.msk.bf16.gmra.mxu2 %vm1208_vm2, %v9947_v12  ;;  %v1117_v56 = vmax.f32 %v1008_v54, 0.0  ;;  %v8815_v54 = vld [vmem:[#allocation3 + $0x11c] sm:$0xf0] }
 0x2a1   : > { %v2329_v15 = vpop.f32.mrf.mxu0 }
 0x2a2   : > { %v9991_v17 = vpack.c.bf16 %v1495_v32, %v1494_v53  ;;  %v3349_v22 = vmax.f32 %v2158_v8, 0.0  ;;  %v2330_v19 = vadd.f32 %v2329_v15, %v9963_v26  ;;  %v1160_v45 = vpack.c.bf16 %v1117_v56, %v1116_v43 }
 0x2a4   : > { %v3908_v21 = vmax.f32 %v3907_v49, %v3349_v22  ;;  %v3358_v61 = vmax.f32 %v2330_v19, 0.0  ;;  %2199 = vmatmul.bf16.gmra.mxu3 %v9991_v17  ;;  %2368 = vmatmul.bf16.gmra.mxu0 %v9991_v17 }
 0x2a5   : > { %v1369_v33 = vpop.f32.mrf.mxu1 }
 0x2a6   : > { %v3978_v12 = vmax.f32 %v3977_v62, %v3358_v61  ;;  %v1370_v58 = vadd.f32 %v9831_v38, %v1369_v33 }
 0x2a7   : > { %v2160_v41 = vpop.f32.mrf.mxu3 }
 0x2a8   : > { %v2161_v27 = vadd.f32 %v2160_v41, %v9970_v40  ;;  %2502 = vmatmul.bf16.gmra.mxu1 %v9878_v57  ;;  %v1496_v53 = vmax.f32 %v1370_v58, 0.0  ;;  %v7367_v41 = vor.u32 %v8815_v54, %v7366_v9 }
 0x2a9   : > { %v2331_v42 = vpop.f32.mrf.mxu0 }
 0x2aa   : > { %v3357_v47 = vmax.f32 %v2161_v27, 0.0  ;;  %v2332_v49 = vadd.f32 %v2331_v42, %v9963_v26  ;;  %v10015_v27 = vld [vmem:[%s11215_s2] ss:$0 sm:$0xff]  ;;  %1975 = vmatpush.bf16.msrb.mxu2 %v7367_v41 }
 0x2ab   : > { %v1011_v42 = vadd.f32 %v10015_v27, %v9792_v51  ;;  %v1014_v43 = vadd.f32 %v10015_v27, %v9798_v10 }
 0x2ac   : > { %v3909_v60 = vmax.f32 %v3908_v21, %v3357_v47  ;;  %v3366_v24 = vmax.f32 %v2332_v49, 0.0 }
 0x2ad   : > { %v1371_v37 = vpop.f32.mrf.mxu1 }
 0x2ae   : > { %v3979_v2 = vmax.f32 %v3978_v12, %v3366_v24  ;;  %v1372_v46 = vadd.f32 %v9831_v38, %v1371_v37  ;;  %v1119_v24 = vmax.f32 %v1014_v43, 0.0  ;;  %v1017_v43 = vadd.f32 %v10015_v27, %v9803_v30 }
 0x2af   : > { %v2162_v62 = vpop.f32.mrf.mxu3 }
 0x2b0   : > { %v1497_v32 = vmax.f32 %v1372_v46, 0.0  ;;  %v2163_v8 = vadd.f32 %v2162_v62, %v9970_v40  ;;  %7224 = vmatmul.msk.bf16.gmra.mxu2 %vm1208_vm2, %v1160_v45 }
 0x2b1   : > { %v2334_v15 = vpop.f32.mrf.mxu0 }
 0x2b2   : > { %v10007_v22 = vpack.c.bf16 %v1497_v32, %v1496_v53  ;;  %v3365_v19 = vmax.f32 %v2163_v8, 0.0  ;;  %v2335_v61 = vadd.f32 %v2334_v15, %v9963_v26 }
 0x2b4   : > { %v3910_v21 = vmax.f32 %v3909_v60, %v3365_v19  ;;  %v3374_v33 = vmax.f32 %v2335_v61, 0.0  ;;  %2204 = vmatmul.bf16.gmra.mxu3 %v10007_v22  ;;  %2373 = vmatmul.bf16.gmra.mxu0 %v10007_v22  ;;  %v1118_v60 = vmax.f32 %v1011_v42, 0.0 }
 0x2b5   : > { %v1374_v12 = vpop.f32.mrf.mxu1 }
 0x2b6   : > { %v3980_v56 = vmax.f32 %v3979_v2, %v3374_v33  ;;  %v1375_v45 = vadd.f32 %v9831_v38, %v1374_v12  ;;  %v1161_v2 = vpack.c.bf16 %v1119_v24, %v1118_v60  ;;  %v1120_v24 = vmax.f32 %v1017_v43, 0.0  ;;  %v8807_v43 = vld [vmem:[#allocation3 + $0xdc] sm:$0xf0] }
 0x2b7   : > { %v2165_v47 = vpop.f32.mrf.mxu3 }
 0x2b8   : > { %v2166_v49 = vadd.f32 %v2165_v47, %v9970_v40  ;;  %2507 = vmatmul.bf16.gmra.mxu1 %v9891_v36  ;;  %v1498_v15 = vmax.f32 %v1375_v45, 0.0 }
 0x2b9   : > { %v2336_v58 = vpop.f32.mrf.mxu0 }
 0x2ba   : > { %v3373_v37 = vmax.f32 %v2166_v49, 0.0  ;;  %v2337_v46 = vadd.f32 %v2336_v58, %v9963_v26 }
 0x2bc   : > { %v3911_v62 = vmax.f32 %v3910_v21, %v3373_v37  ;;  %v3382_v51 = vmax.f32 %v2337_v46, 0.0 }
 0x2bd   : > { %v1376_v53 = vpop.f32.mrf.mxu1 }
 0x2be   : > { %v3981_v32 = vmax.f32 %v3980_v56, %v3382_v51  ;;  %v1377_v10 = vadd.f32 %v9831_v38, %v1376_v53  ;;  %v1020_v56 = vadd.f32 %v10015_v27, %v9809_v55 }
 0x2bf   : > { %v2167_v8 = vpop.f32.mrf.mxu3 }
 0x2c0   : > { %v1499_v19 = vmax.f32 %v1377_v10, 0.0  ;;  %v2168_v61 = vadd.f32 %v2167_v8, %v9970_v40  ;;  %7225 = vmatmul.msk.bf16.gmra.mxu2 %vm1208_vm2, %v1161_v2  ;;  %v1121_v37 = vmax.f32 %v1020_v56, 0.0 }
 0x2c1   : > { %v2339_v33 = vpop.f32.mrf.mxu0 }
 0x2c2   : > { %v10028_v9 = vpack.c.bf16 %v1499_v19, %v1498_v15  ;;  %v3381_v54 = vmax.f32 %v2168_v61, 0.0  ;;  %v2340_v12 = vadd.f32 %v2339_v33, %v9963_v26 }
 0x2c4   : > { %v3912_v21 = vmax.f32 %v3911_v62, %v3381_v54  ;;  %v3390_v41 = vmax.f32 %v2340_v12, 0.0  ;;  %2209 = vmatmul.bf16.gmra.mxu3 %v10028_v9  ;;  %2378 = vmatmul.bf16.gmra.mxu0 %v10028_v9 }
 0x2c5   : > { %v1379_v42 = vpop.f32.mrf.mxu1 }
 0x2c6   : > { %v3982_v47 = vmax.f32 %v3981_v32, %v3390_v41  ;;  %v1380_v62 = vadd.f32 %v9831_v38, %v1379_v42  ;;  %v1162_v32 = vpack.c.bf16 %v1121_v37, %v1120_v24  ;;  %v7334_v42 = vld [vmem:[#allocation3 + $0xc0] sm:$0xf] }
 0x2c7   : > { %v2170_v49 = vpop.f32.mrf.mxu3 }
 0x2c8   : > { %v2171_v58 = vadd.f32 %v2170_v49, %v9970_v40  ;;  %2512 = vmatmul.bf16.gmra.mxu1 %v9906_v29  ;;  %v1500_v8 = vmax.f32 %v1380_v62, 0.0  ;;  %v1023_v49 = vadd.f32 %v10015_v27, %v9814_v14 }
 0x2c9   : > { %v2341_v60 = vpop.f32.mrf.mxu0 }
 0x2ca   : > { %v3389_v46 = vmax.f32 %v2171_v58, 0.0  ;;  %v2342_v45 = vadd.f32 %v2341_v60, %v9963_v26  ;;  %v1026_v58 = vadd.f32 %v10015_v27, %v9820_v25 }
 0x2cc   : > { %v3913_v51 = vmax.f32 %v3912_v21, %v3389_v46  ;;  %v3398_v53 = vmax.f32 %v2342_v45, 0.0  ;;  %v1122_v45 = vmax.f32 %v1023_v49, 0.0  ;;  %v1123_v62 = vmax.f32 %v1026_v58, 0.0 }
 0x2cd   : > { %v1381_v30 = vpop.f32.mrf.mxu1  ;;  %v1032_v49 = vadd.f32 %v10015_v27, %v9834_v39 }
 0x2ce   : > { %v3983_v10 = vmax.f32 %v3982_v47, %v3398_v53  ;;  %v1382_v55 = vadd.f32 %v9831_v38, %v1381_v30  ;;  %v7335_v47 = vor.u32 %v8807_v43, %v7334_v42 }
 0x2cf   : > { %v2172_v2 = vpop.f32.mrf.mxu3 }
 0x2d0   : > { %v1501_v15 = vmax.f32 %v1382_v55, 0.0  ;;  %v2173_v19 = vadd.f32 %v2172_v2, %v9970_v40  ;;  %7226 = vmatmul.msk.bf16.gmra.mxu2 %vm1208_vm2, %v1162_v32 }
 0x2d1   : > { %v2344_v61 = vpop.f32.mrf.mxu0  ;;  %1976 = vmatpush.bf16.msrb.mxu2 %v7335_v47  ;;  %v1029_v47 = vadd.f32 %v10015_v27, %v9825_v28 }
 0x2d2   : > { %v10044_v33 = vpack.c.bf16 %v1501_v15, %v1500_v8  ;;  %v3397_v54 = vmax.f32 %v2173_v19, 0.0  ;;  %v2345_v12 = vadd.f32 %v2344_v61, %v9963_v26 }
 0x2d4   : > { %v3914_v21 = vmax.f32 %v3913_v51, %v3397_v54  ;;  %v3406_v41 = vmax.f32 %v2345_v12, 0.0  ;;  %2214 = vmatmul.bf16.gmra.mxu3 %v10044_v33  ;;  %2383 = vmatmul.bf16.gmra.mxu0 %v10044_v33 }
 0x2d5   : > { %v1384_v56 = vpop.f32.mrf.mxu1 }
 0x2d6   : > { %v3984_v60 = vmax.f32 %v3983_v10, %v3406_v41  ;;  %v1385_v30 = vadd.f32 %v9831_v38, %v1384_v56  ;;  %v1163_v10 = vpack.c.bf16 %v1123_v62, %v1122_v45  ;;  %v1125_v45 = vmax.f32 %v1032_v49, 0.0 }
 0x2d7   : > { %v2175_v24 = vpop.f32.mrf.mxu3 }
 0x2d8   : > { %v2176_v37 = vadd.f32 %v2175_v24, %v9970_v40  ;;  %2517 = vmatmul.bf16.gmra.mxu1 %v9923_v20  ;;  %v1502_v15 = vmax.f32 %v1385_v30, 0.0 }
 0x2d9   : > { %v2346_v46 = vpop.f32.mrf.mxu0 }
 0x2da   : > { %v3405_v51 = vmax.f32 %v2176_v37, 0.0  ;;  %v2347_v53 = vadd.f32 %v2346_v46, %v9963_v26  ;;  %v1124_v46 = vmax.f32 %v1029_v47, 0.0 }
 0x2dc   : > { %v3915_v55 = vmax.f32 %v3914_v21, %v3405_v51  ;;  %v3414_v14 = vmax.f32 %v2347_v53, 0.0 }
 0x2dd   : > { %v1386_v32 = vpop.f32.mrf.mxu1 }
 0x2de   : > { %v3985_v2 = vmax.f32 %v3984_v60, %v3414_v14  ;;  %v1387_v25 = vadd.f32 %v9831_v38, %v1386_v32  ;;  %v1164_v32 = vpack.c.bf16 %v1125_v45, %v1124_v46  ;;  %v10086_v46 = vperm.slane %v9958_v11, 3 }
 0x2df   : > { %v2177_v8 = vpop.f32.mrf.mxu3 }
 0x2e0   : > { %v1503_v19 = vmax.f32 %v1387_v25, 0.0  ;;  %v2178_v61 = vadd.f32 %v2177_v8, %v9970_v40  ;;  %7227 = vmatmul.msk.bf16.gmra.mxu2 %vm1208_vm2, %v1163_v10 }
 0x2e1   : > { %v2349_v54 = vpop.f32.mrf.mxu0 }
 0x2e2   : > { %v10060_v12 = vpack.c.bf16 %v1503_v19, %v1502_v15  ;;  %v3413_v41 = vmax.f32 %v2178_v61, 0.0  ;;  %v2350_v42 = vadd.f32 %v2349_v54, %v9963_v26 }
 0x2e4   : > { %v3916_v21 = vmax.f32 %v3915_v55, %v3413_v41  ;;  %v3422_v43 = vmax.f32 %v2350_v42, 0.0  ;;  %2219 = vmatmul.bf16.gmra.mxu3 %v10060_v12  ;;  %2388 = vmatmul.bf16.gmra.mxu0 %v10060_v12 }
 0x2e5   : > { %v1389_v56 = vpop.f32.mrf.mxu1 }
 0x2e6   : > { %v3986_v58 = vmax.f32 %v3985_v2, %v3422_v43  ;;  %v1390_v53 = vadd.f32 %v9831_v38, %v1389_v56  ;;  %v7302_v43 = vld [vmem:[#allocation3 + $0x80] sm:$0xf] }
 0x2e7   : > { %v2180_v60 = vpop.f32.mrf.mxu3  ;;  %v8799_v56 = vld [vmem:[#allocation3 + $0x9c] sm:$0xf0] }
 0x2e8   : > { %v2181_v24 = vadd.f32 %v2180_v60, %v9970_v40  ;;  %2522 = vmatmul.bf16.gmra.mxu1 %v9941_v63  ;;  %v1504_v25 = vmax.f32 %v1390_v53, 0.0  ;;  %v7303_v49 = vor.u32 %v8799_v56, %v7302_v43  ;;  %v1038_v60 = vadd.f32 %v10015_v27, %v9847_v59 }
 0x2e9   : > { %v2351_v37 = vpop.f32.mrf.mxu0 }
 0x2ea   : > { %v3421_v62 = vmax.f32 %v2181_v24, 0.0  ;;  %v2352_v51 = vadd.f32 %v2351_v37, %v9963_v26  ;;  %1977 = vmatpush.bf16.msrb.mxu2 %v7303_v49  ;;  %v1127_v53 = vmax.f32 %v1038_v60, 0.0 }
 0x2ec   : > { %v3917_v30 = vmax.f32 %v3916_v21, %v3421_v62  ;;  %v3430_v55 = vmax.f32 %v2352_v51, 0.0 }
 0x2ed   : > { %v1391_v28 = vpop.f32.mrf.mxu1 }
 0x2ee   : > { %v3987_v14 = vmax.f32 %v3986_v58, %v3430_v55  ;;  %v1392_v39 = vadd.f32 %v9831_v38, %v1391_v28  ;;  %v1035_v58 = vadd.f32 %v10015_v27, %v9839_v48 }
 0x2ef   : > { %v2182_v2 = vpop.f32.mrf.mxu3 }
 0x2f0   : > { %v1505_v10 = vmax.f32 %v1392_v39, 0.0  ;;  %v2183_v8 = vadd.f32 %v2182_v2, %v9970_v40  ;;  %7228 = vmatmul.msk.bf16.gmra.mxu2 %vm1208_vm2, %v1164_v32  ;;  %v1126_v51 = vmax.f32 %v1035_v58, 0.0 }
 0x2f1   : > { %v2354_v15 = vpop.f32.mrf.mxu0 }
 0x2f2   : > { %v10076_v19 = vpack.c.bf16 %v1505_v10, %v1504_v25  ;;  %v3429_v61 = vmax.f32 %v2183_v8, 0.0  ;;  %v2355_v54 = vadd.f32 %v2354_v15, %v9963_v26  ;;  %v1165_v8 = vpack.c.bf16 %v1127_v53, %v1126_v51 }
 0x2f3   : > { %v1394_v41 = vpop.f32.mrf.mxu2 }
 0x2f4   : > { %v3918_v42 = vmax.f32 %v3917_v30, %v3429_v61  ;;  %v3438_v21 = vmax.f32 %v2355_v54, 0.0  ;;  %2224 = vmatmul.bf16.gmra.mxu3 %v10076_v19  ;;  %2393 = vmatmul.bf16.gmra.mxu0 %v10076_v19  ;;  %v1395_v48 = vadd.f32 %v9831_v38, %v1394_v41 }
 0x2f5   : > { %v2488_v47 = vpop.f32.mrf.mxu1 }
 0x2f6   : > { %v3988_v24 = vmax.f32 %v3987_v14, %v3438_v21  ;;  %v2489_v59 = vadd.f32 %v2488_v47, %v10086_v46  ;;  %v1506_v61 = vmax.f32 %v1395_v48, 0.0 }
 0x2f7   : > { %v2185_v37 = vpop.f32.mrf.mxu3 }
 0x2f8   : > { %v2186_v45 = vadd.f32 %v2185_v37, %v9970_v40  ;;  %2527 = vmatmul.bf16.gmra.mxu1 %v9960_v23  ;;  %v3327_v54 = vmax.f32 %v2489_v59, 0.0  ;;  %v1041_v37 = vadd.f32 %v10015_v27, %v9852_v4 }
 0x2f9   : > { %v2356_v62 = vpop.f32.mrf.mxu0 }
 0x2fa   : > { %v3437_v30 = vmax.f32 %v2186_v45, 0.0  ;;  %v2357_v55 = vadd.f32 %v2356_v62, %v9963_v26  ;;  %v1044_v62 = vadd.f32 %v10015_v27, %v9860_v18 }
 0x2fb   : > { %v1396_v28 = vpop.f32.mrf.mxu2 }
 0x2fc   : > { %v3919_v14 = vmax.f32 %v3918_v42, %v3437_v30  ;;  %v3446_v39 = vmax.f32 %v2357_v55, 0.0  ;;  %v1397_v11 = vadd.f32 %v9831_v38, %v1396_v28  ;;  %v1128_v28 = vmax.f32 %v1041_v37, 0.0 }
 0x2fd   : > { %v2490_v32 = vpop.f32.mrf.mxu1 }
 0x2fe   : > { %v3989_v2 = vmax.f32 %v3988_v24, %v3446_v39  ;;  %v1507_v25 = vmax.f32 %v1397_v11, 0.0  ;;  %v2491_v10 = vadd.f32 %v2490_v32, %v10086_v46 }
 0x2ff   : > { %v2187_v15 = vpop.f32.mrf.mxu3 }
 0x300   : > { %v3335_v21 = vmax.f32 %v2491_v10, 0.0  ;;  %v2188_v43 = vadd.f32 %v2187_v15, %v9970_v40  ;;  %7229 = vmatmul.msk.bf16.gmra.mxu2 %vm1208_vm2, %v1165_v8  ;;  %v10097_v56 = vpack.c.bf16 %v1507_v25, %v1506_v61 }
 0x301   : > { %v2359_v41 = vpop.f32.mrf.mxu0 }
 0x302   : > { %v4044_v42 = vmax.f32 %v3327_v54, %v3335_v21  ;;  %v3445_v47 = vmax.f32 %v2188_v43, 0.0  ;;  %v2360_v49 = vadd.f32 %v2359_v41, %v9963_v26 }
 0x303   : > { %v1399_v58 = vpop.f32.mrf.mxu2 }
 0x304   : > { %v3920_v60 = vmax.f32 %v3919_v14, %v3445_v47  ;;  %v3454_v24 = vmax.f32 %v2360_v49, 0.0  ;;  %2229 = vmatmul.bf16.gmra.mxu3 %v10097_v56  ;;  %2398 = vmatmul.bf16.gmra.mxu0 %v10097_v56  ;;  %v1129_v14 = vmax.f32 %v1044_v62, 0.0  ;;  %v1400_v25 = vadd.f32 %v9831_v38, %v1399_v58 }
 0x305   : > { %v2493_v45 = vpop.f32.mrf.mxu1 }
 0x306   : > { %v3990_v51 = vmax.f32 %v3989_v2, %v3454_v24  ;;  %v2494_v53 = vadd.f32 %v2493_v45, %v10086_v46  ;;  %v1166_v21 = vpack.c.bf16 %v1129_v14, %v1128_v28  ;;  %v1508_v41 = vmax.f32 %v1400_v25, 0.0 }
 0x307   : > { %v2190_v30 = vpop.f32.mrf.mxu3  ;;  %v1050_v28 = vadd.f32 %v10015_v27, %v9874_v44  ;;  %v10131_v44 = vld [vmem:[%s11217_s4] ss:$0 sm:$0xff] }
 0x308   : > { %v3343_v55 = vmax.f32 %v2494_v53, 0.0  ;;  %v2191_v48 = vadd.f32 %v2190_v30, %v9970_v40  ;;  %2532 = vmatmul.bf16.gmra.mxu1 %v9978_v13  ;;  %v8791_v53 = vld [vmem:[#allocation3 + $0x5c] sm:$0xf0]  ;;  %v1047_v30 = vadd.f32 %v10015_v27, %v9868_v34 }
 0x309   : > { %v2361_v59 = vpop.f32.mrf.mxu0 }
 0x30a   : > { %v4045_v39 = vmax.f32 %v4044_v42, %v3343_v55  ;;  %v3453_v11 = vmax.f32 %v2191_v48, 0.0  ;;  %v2362_v4 = vadd.f32 %v2361_v59, %v9963_v26 }
 0x30b   : > { %v1401_v32 = vpop.f32.mrf.mxu2 }
 0x30c   : > { %v3921_v18 = vmax.f32 %v3920_v60, %v3453_v11  ;;  %v3462_v2 = vmax.f32 %v2362_v4, 0.0  ;;  %v1402_v10 = vadd.f32 %v9831_v38, %v1401_v32  ;;  %v1130_v32 = vmax.f32 %v1047_v30, 0.0 }
 0x30d   : > { %v2495_v8 = vpop.f32.mrf.mxu1 }
 0x30e   : > { %v3991_v15 = vmax.f32 %v3990_v51, %v3462_v2  ;;  %v1509_v61 = vmax.f32 %v1402_v10, 0.0  ;;  %v2496_v54 = vadd.f32 %v2495_v8, %v10086_v46  ;;  %v7270_v51 = vld [vmem:[#allocation3 + $0x40] sm:$0xf] }
 0x30f   : > { %v2192_v43 = vpop.f32.mrf.mxu3  ;;  %v7271_v48 = vor.u32 %v8791_v53, %v7270_v51 }
 0x310   : > { %v3351_v47 = vmax.f32 %v2496_v54, 0.0  ;;  %v2193_v42 = vadd.f32 %v2192_v43, %v9970_v40  ;;  %7230 = vmatmul.msk.bf16.gmra.mxu2 %vm1208_vm2, %v1166_v21  ;;  %v10115_v24 = vpack.c.bf16 %v1509_v61, %v1508_v41 }
 0x311   : > { %v2364_v49 = vpop.f32.mrf.mxu0  ;;  %1978 = vmatpush.bf16.msrb.mxu2 %v7271_v48 }
 0x312   : > { %v4046_v58 = vmax.f32 %v4045_v39, %v3351_v47  ;;  %v3461_v60 = vmax.f32 %v2193_v42, 0.0  ;;  %v2365_v38 = vadd.f32 %v2364_v49, %v9963_v26 }
 0x313   : > { %v1404_v37 = vpop.f32.mrf.mxu2 }
 0x314   : > { %v3922_v45 = vmax.f32 %v3921_v18, %v3461_v60  ;;  %v3470_v62 = vmax.f32 %v2365_v38, 0.0  ;;  %2234 = vmatmul.bf16.gmra.mxu3 %v10115_v24  ;;  %2403 = vmatmul.bf16.gmra.mxu0 %v10115_v24  ;;  %v1131_v18 = vmax.f32 %v1050_v28, 0.0 }
 0x315   : > { %v2498_v55 = vpop.f32.mrf.mxu1 }
 0x316   : > { %v3992_v59 = vmax.f32 %v3991_v15, %v3470_v62  ;;  %v2499_v14 = vadd.f32 %v2498_v55, %v10086_v46  ;;  %v1405_v15 = vadd.f32 %v10131_v44, %v1404_v37  ;;  %v1167_v49 = vpack.c.bf16 %v1131_v18, %v1130_v32 }
 0x317   : > { %v2195_v39 = vpop.f32.mrf.mxu3 }
 0x318   : > { %v3359_v11 = vmax.f32 %v2499_v14, 0.0  ;;  %v2196_v4 = vadd.f32 %v2195_v39, %v9970_v40  ;;  %2537 = vmatmul.bf16.gmra.mxu1 %v9991_v17  ;;  %v1510_v60 = vmax.f32 %v1405_v15, 0.0  ;;  %v1056_v39 = vadd.f32 %v10015_v27, %v9889_v35 }
 0x319   : > { %v2366_v25 = vpop.f32.mrf.mxu0 }
 0x31a   : > { %v4047_v2 = vmax.f32 %v4046_v58, %v3359_v11  ;;  %v3469_v34 = vmax.f32 %v2196_v4, 0.0  ;;  %v2367_v10 = vadd.f32 %v2366_v25, %v9963_v26 }
 0x31b   : > { %v1406_v8 = vpop.f32.mrf.mxu2 }
 0x31c   : > { %v3923_v61 = vmax.f32 %v3922_v45, %v3469_v34  ;;  %v3478_v54 = vmax.f32 %v2367_v10, 0.0  ;;  %v1407_v21 = vadd.f32 %v10131_v44, %v1406_v8  ;;  %v1133_v10 = vmax.f32 %v1056_v39, 0.0  ;;  %v7238_v39 = vld [vmem:[#allocation3] sm:$0xf] }
 0x31d   : > { %v2500_v43 = vpop.f32.mrf.mxu1 }
 0x31e   : > { %v3993_v41 = vmax.f32 %v3992_v59, %v3478_v54  ;;  %v1511_v47 = vmax.f32 %v1407_v21, 0.0  ;;  %v2501_v42 = vadd.f32 %v2500_v43, %v10086_v46  ;;  %v1053_v59 = vadd.f32 %v10015_v27, %v9883_v3 }
 0x31f   : > { %v2197_v58 = vpop.f32.mrf.mxu3 }
 0x320   : > { %v3367_v38 = vmax.f32 %v2501_v42, 0.0  ;;  %v2198_v62 = vadd.f32 %v2197_v58, %v9970_v40  ;;  %7231 = vmatmul.msk.bf16.gmra.mxu2 %vm1208_vm2, %v1167_v49  ;;  %v10138_v53 = vpack.c.bf16 %v1511_v47, %v1510_v60 }
 0x321   : > { %v2369_v51 = vpop.f32.mrf.mxu0 }
 0x322   : > { %v4048_v37 = vmax.f32 %v4047_v2, %v3367_v38  ;;  %v3477_v45 = vmax.f32 %v2198_v62, 0.0  ;;  %v2370_v30 = vadd.f32 %v2369_v51, %v9963_v26  ;;  %v1132_v2 = vmax.f32 %v1053_v59, 0.0 }
 0x323   : > { %v1409_v55 = vpop.f32.mrf.mxu2 }
 0x324   : > { %v3924_v48 = vmax.f32 %v3923_v61, %v3477_v45  ;;  %v3486_v28 = vmax.f32 %v2370_v30, 0.0  ;;  %2239 = vmatmul.bf16.gmra.mxu3 %v10138_v53  ;;  %2408 = vmatmul.bf16.gmra.mxu0 %v10138_v53  ;;  %v1410_v54 = vadd.f32 %v10131_v44, %v1409_v55  ;;  %v1168_v47 = vpack.c.bf16 %v1133_v10, %v1132_v2 }
 0x325   : > { %v2503_v14 = vpop.f32.mrf.mxu1 }
 0x326   : > { %v3994_v11 = vmax.f32 %v3993_v41, %v3486_v28  ;;  %v2504_v4 = vadd.f32 %v2503_v14, %v10086_v46  ;;  %v1512_v38 = vmax.f32 %v1410_v54, 0.0 }
 0x327   : > { %v2200_v32 = vpop.f32.mrf.mxu3 }
 0x328   : > { %v3375_v25 = vmax.f32 %v2504_v4, 0.0  ;;  %v2201_v18 = vadd.f32 %v2200_v32, %v9970_v40  ;;  %2542 = vmatmul.bf16.gmra.mxu1 %v10007_v22  ;;  %v1059_v4 = vadd.f32 %v10015_v27, %v9897_v0 }
 0x329   : > { %v2371_v34 = vpop.f32.mrf.mxu0 }
 0x32a   : > { %v4049_v8 = vmax.f32 %v4048_v37, %v3375_v25  ;;  %v3485_v15 = vmax.f32 %v2201_v18, 0.0  ;;  %v2372_v3 = vadd.f32 %v2371_v34, %v9963_v26  ;;  %v1062_v18 = vadd.f32 %v10015_v27, %v9911_v52 }
 0x32b   : > { %v1411_v61 = vpop.f32.mrf.mxu2 }
 0x32c   : > { %v3925_v35 = vmax.f32 %v3924_v48, %v3485_v15  ;;  %v3494_v21 = vmax.f32 %v2372_v3, 0.0  ;;  %v1412_v43 = vadd.f32 %v10131_v44, %v1411_v61  ;;  %v1134_v3 = vmax.f32 %v1059_v4, 0.0 }
 0x32d   : > { %v2505_v41 = vpop.f32.mrf.mxu1  ;;  %v1135_v54 = vmax.f32 %v1062_v18, 0.0 }
 0x32e   : > { %v3995_v42 = vmax.f32 %v3994_v11, %v3494_v21  ;;  %v1513_v49 = vmax.f32 %v1412_v43, 0.0  ;;  %v2506_v58 = vadd.f32 %v2505_v41, %v10086_v46  ;;  %v8783_v11 = vld [vmem:[#allocation3 + $0x1c] sm:$0xf0] }
 0x32f   : > { %v2202_v60 = vpop.f32.mrf.mxu3  ;;  %v7239_v25 = vor.u32 %v8783_v11, %v7238_v39 }
 0x330   : > { %v3383_v62 = vmax.f32 %v2506_v58, 0.0  ;;  %v2203_v51 = vadd.f32 %v2202_v60, %v9970_v40  ;;  %7232 = vmatmul.msk.bf16.gmra.mxu2 %vm1208_vm2, %v1168_v47  ;;  %v10156_v45 = vpack.c.bf16 %v1513_v49, %v1512_v38  ;;  %v1169_v58 = vpack.c.bf16 %v1135_v54, %v1134_v3 }
 0x331   : > { %v2374_v37 = vpop.f32.mrf.mxu0  ;;  %1979 = vmatpush.bf16.msrb.mxu2 %v7239_v25  ;;  %v1065_v25 = vadd.f32 %v10015_v27, %v9920_v6 }
 0x332   : > { %v4050_v30 = vmax.f32 %v4049_v8, %v3383_v62  ;;  %v3493_v55 = vmax.f32 %v2203_v51, 0.0  ;;  %v2375_v48 = vadd.f32 %v2374_v37, %v9963_v26 }
 0x333   : > { %v1414_v28 = vpop.f32.mrf.mxu2 }
 0x334   : > { %v3926_v59 = vmax.f32 %v3925_v35, %v3493_v55  ;;  %v3502_v14 = vmax.f32 %v2375_v48, 0.0  ;;  %2244 = vmatmul.bf16.gmra.mxu3 %v10156_v45  ;;  %2413 = vmatmul.bf16.gmra.mxu0 %v10156_v45  ;;  %v1415_v52 = vadd.f32 %v10131_v44, %v1414_v28 }
 0x335   : > { %v2508_v32 = vpop.f32.mrf.mxu1 }
 0x336   : > { %v3996_v2 = vmax.f32 %v3995_v42, %v3502_v14  ;;  %v2509_v34 = vadd.f32 %v2508_v32, %v10086_v46  ;;  %v1514_v37 = vmax.f32 %v1415_v52, 0.0 }
 0x337   : > { %v2205_v10 = vpop.f32.mrf.mxu3 }
 0x338   : > { %v3391_v8 = vmax.f32 %v2509_v34, 0.0  ;;  %v2206_v15 = vadd.f32 %v2205_v10, %v9970_v40  ;;  %2547 = vmatmul.bf16.gmra.mxu1 %v10028_v9 }
 0x339   : > { %v2376_v61 = vpop.f32.mrf.mxu0 }
 0x33a   : > { %v4051_v35 = vmax.f32 %v4050_v30, %v3391_v8  ;;  %v3501_v0 = vmax.f32 %v2206_v15, 0.0  ;;  %v2377_v21 = vadd.f32 %v2376_v61, %v9963_v26  ;;  %v1136_v61 = vmax.f32 %v1065_v25, 0.0  ;;  %v7478_v25 = vld [vmem:[#allocation3 + $0x1d0] sm:$0xf] }
 0x33b   : > { %v1416_v43 = vpop.f32.mrf.mxu2 }
 0x33c   : > { %v3927_v41 = vmax.f32 %v3926_v59, %v3501_v0  ;;  %v3510_v47 = vmax.f32 %v2377_v21, 0.0  ;;  %v1417_v42 = vadd.f32 %v10131_v44, %v1416_v43 }
 0x33d   : > { %v2510_v49 = vpop.f32.mrf.mxu1 }
 0x33e   : > { %v3997_v60 = vmax.f32 %v3996_v2, %v3510_v47  ;;  %v1515_v38 = vmax.f32 %v1417_v42, 0.0  ;;  %v2511_v62 = vadd.f32 %v2510_v49, %v10086_v46  ;;  %v1068_v2 = vadd.f32 %v10015_v27, %v9931_v5 }
 0x33f   : > { %v2207_v51 = vpop.f32.mrf.mxu3 }
 0x340   : > { %v3399_v55 = vmax.f32 %v2511_v62, 0.0  ;;  %v2208_v30 = vadd.f32 %v2207_v51, %v9970_v40  ;;  %7233 = vmatmul.msk.bf16.gmra.mxu2 %vm1208_vm2, %v1169_v58  ;;  %v10174_v14 = vpack.c.bf16 %v1515_v38, %v1514_v37 }
 0x341   : > { %v2379_v48 = vpop.f32.mrf.mxu0 }
 0x342   : > { %v4052_v28 = vmax.f32 %v4051_v35, %v3399_v55  ;;  %v3509_v59 = vmax.f32 %v2208_v30, 0.0  ;;  %v2380_v39 = vadd.f32 %v2379_v48, %v9963_v26  ;;  %v1137_v35 = vmax.f32 %v1068_v2, 0.0 }
 0x343   : > { %v1419_v11 = vpop.f32.mrf.mxu2  ;;  %v1071_v2 = vadd.f32 %v10015_v27, %v9943_v1 }
 0x344   : > { %v3928_v4 = vmax.f32 %v3927_v41, %v3509_v59  ;;  %v3518_v32 = vmax.f32 %v2380_v39, 0.0  ;;  %2249 = vmatmul.bf16.gmra.mxu3 %v10174_v14  ;;  %2418 = vmatmul.bf16.gmra.mxu0 %v10174_v14  ;;  %v1420_v52 = vadd.f32 %v10131_v44, %v1419_v11  ;;  %v1170_v49 = vpack.c.bf16 %v1137_v35, %v1136_v61 }
 0x345   : > { %v2513_v18 = vpop.f32.mrf.mxu1  ;;  %v1138_v1 = vmax.f32 %v1071_v2, 0.0 }
 0x346   : > { %v3998_v34 = vmax.f32 %v3997_v60, %v3518_v32  ;;  %v2514_v10 = vadd.f32 %v2513_v18, %v10086_v46  ;;  %v1516_v51 = vmax.f32 %v1420_v52, 0.0  ;;  %v8841_v18 = vld [vmem:[#allocation3 + $0x1ec] sm:$0xf0] }
 0x347   : > { %v2210_v8 = vpop.f32.mrf.mxu3 }
 0x348   : > { %v3407_v15 = vmax.f32 %v2514_v10, 0.0  ;;  %v2211_v3 = vadd.f32 %v2210_v8, %v9970_v40  ;;  %2552 = vmatmul.bf16.gmra.mxu1 %v10044_v33  ;;  %v7479_v10 = vor.u32 %v8841_v18, %v7478_v25  ;;  %v8837_v8 = vld [vmem:[#allocation3 + $0x1d4] sm:$0xf] }
 0x349   : > { %v2381_v54 = vpop.f32.mrf.mxu0 }
 0x34a   : > { %v4053_v0 = vmax.f32 %v4052_v28, %v3407_v15  ;;  %v3517_v21 = vmax.f32 %v2211_v3, 0.0  ;;  %v2382_v6 = vadd.f32 %v2381_v54, %v9963_v26  ;;  %v7480_v15 = vld [vmem:[#allocation3 + $0x1f0] sm:$0xf0]  ;;  %v1074_v3 = vadd.f32 %v10015_v27, %v9951_v16  ;;  %2648 = vmatpush.bf16.msra.mxu2 %v7479_v10  ;;  %v7486_v16 = vld [vmem:[#allocation3 + $0x1d8] sm:$0xf] }
 0x34b   : > { %v1421_v43 = vpop.f32.mrf.mxu2  ;;  %v7483_v35 = vor.u32 %v8837_v8, %v7480_v15  ;;  %v8842_v27 = vld [vmem:[#allocation3 + $0x1f4] sm:$0xf0] }
 0x34c   : > { %v3929_v5 = vmax.f32 %v3928_v4, %v3517_v21  ;;  %v3526_v41 = vmax.f32 %v2382_v6, 0.0  ;;  %v1422_v47 = vadd.f32 %v10131_v44, %v1421_v43  ;;  %v1139_v52 = vmax.f32 %v1074_v3, 0.0 }
 0x34d   : > { %v2515_v42 = vpop.f32.mrf.mxu1  ;;  %2817 = vmatpush.bf16.msra.mxu3 %v7483_v35 }
 0x34e   : > { %v3999_v58 = vmax.f32 %v3998_v34, %v3526_v41  ;;  %v1517_v60 = vmax.f32 %v1422_v47, 0.0  ;;  %v2516_v38 = vadd.f32 %v2515_v42, %v10086_v46 }
 0x34f   : > { %v2212_v62 = vpop.f32.mrf.mxu3 }
 0x350   : > { %v3415_v37 = vmax.f32 %v2516_v38, 0.0  ;;  %v2213_v55 = vadd.f32 %v2212_v62, %v9970_v40  ;;  %7234 = vmatmul.msk.bf16.gmra.mxu2 %vm1208_vm2, %v1170_v49  ;;  %v10192_v48 = vpack.c.bf16 %v1517_v60, %v1516_v51  ;;  %v8838_v60 = vld [vmem:[#allocation3 + $0x1dc] sm:$0xf] }
 0x351   : > { %v2384_v30 = vpop.f32.mrf.mxu0  ;;  %v7488_v38 = vld [vmem:[#allocation3 + $0x1f8] sm:$0xf0] }
 0x352   : > { %v4054_v28 = vmax.f32 %v4053_v0, %v3415_v37  ;;  %v3525_v59 = vmax.f32 %v2213_v55, 0.0  ;;  %v2385_v39 = vadd.f32 %v2384_v30, %v9963_v26  ;;  %v7491_v55 = vor.u32 %v8838_v60, %v7488_v38 }
 0x353   : > { %v1424_v11 = vpop.f32.mrf.mxu2 }
 0x354   : > { %v3930_v4 = vmax.f32 %v3929_v5, %v3525_v59  ;;  %v3534_v32 = vmax.f32 %v2385_v39, 0.0  ;;  %2254 = vmatmul.bf16.gmra.mxu3 %v10192_v48  ;;  %2423 = vmatmul.bf16.gmra.mxu0 %v10192_v48  ;;  %v1425_v42 = vadd.f32 %v10131_v44, %v1424_v11  ;;  %v1171_v59 = vpack.c.bf16 %v1139_v52, %v1138_v1 }
 0x355   : > { %v2518_v34 = vpop.f32.mrf.mxu1  ;;  %3155 = vmatpush.bf16.msra.mxu1 %v7491_v55 }
 0x356   : > { %v4000_v61 = vmax.f32 %v3999_v58, %v3534_v32  ;;  %v2519_v54 = vadd.f32 %v2518_v34, %v10086_v46  ;;  %v7487_v58 = vor.u32 %v8842_v27, %v7486_v16  ;;  %v1518_v18 = vmax.f32 %v1425_v42, 0.0 }
 0x357   : > { %v2215_v0 = vpop.f32.mrf.mxu3 }
 0x358   : > { %v3423_v21 = vmax.f32 %v2519_v54, 0.0  ;;  %v2216_v6 = vadd.f32 %v2215_v0, %v9970_v40  ;;  %2557 = vmatmul.bf16.gmra.mxu1 %v10060_v12  ;;  %2986 = vmatpush.bf16.msra.mxu0 %v7487_v58 }
 0x359   : > { %v2386_v43 = vpop.f32.mrf.mxu0 }
 0x35a   : > { %v4055_v5 = vmax.f32 %v4054_v28, %v3423_v21  ;;  %v3533_v41 = vmax.f32 %v2216_v6, 0.0  ;;  %v2387_v47 = vadd.f32 %v2386_v43, %v9963_v26 }
 0x35b   : > { %v1426_v49 = vpop.f32.mrf.mxu2 }
 0x35c   : > { %v3931_v62 = vmax.f32 %v3930_v4, %v3533_v41  ;;  %v3542_v51 = vmax.f32 %v2387_v47, 0.0  ;;  %v1427_v37 = vadd.f32 %v10131_v44, %v1426_v49 }
 0x35d   : > { %v2520_v30 = vpop.f32.mrf.mxu1 }
 0x35e   : > { %v4001_v28 = vmax.f32 %v4000_v61, %v3542_v51  ;;  %v1519_v39 = vmax.f32 %v1427_v37, 0.0  ;;  %v2521_v32 = vadd.f32 %v2520_v30, %v10086_v46 }
 0x35f   : > { %v2217_v25 = vpop.f32.mrf.mxu3 }
 0x360   : > { %v3431_v11 = vmax.f32 %v2521_v32, 0.0  ;;  %v2218_v2 = vadd.f32 %v2217_v25, %v9970_v40  ;;  %7235 = vmatmul.msk.bf16.gmra.mxu2 %vm1208_vm2, %v1171_v59  ;;  %v10210_v34 = vpack.c.bf16 %v1519_v39, %v1518_v18 }
 0x361   : > { %v2389_v4 = vpop.f32.mrf.mxu0 }
 0x362   : > { %v4056_v10 = vmax.f32 %v4055_v5, %v3431_v11  ;;  %v3541_v8 = vmax.f32 %v2218_v2, 0.0  ;;  %v2390_v15 = vadd.f32 %v2389_v4, %v9963_v26 }
 0x363   : > { %v1429_v3 = vpop.f32.mrf.mxu2 }
 0x364   : > { %v3932_v61 = vmax.f32 %v3931_v62, %v3541_v8  ;;  %v3550_v54 = vmax.f32 %v2390_v15, 0.0  ;;  %2259 = vmatmul.bf16.gmra.mxu3 %v10210_v34  ;;  %2428 = vmatmul.bf16.gmra.mxu0 %v10210_v34  ;;  %v1430_v27 = vadd.f32 %v10131_v44, %v1429_v3 }
 0x365   : > { %v2523_v35 = vpop.f32.mrf.mxu1 }
 0x366   : > { %v4002_v0 = vmax.f32 %v4001_v28, %v3550_v54  ;;  %v2524_v21 = vadd.f32 %v2523_v35, %v10086_v46  ;;  %v1520_v55 = vmax.f32 %v1430_v27, 0.0 }
 0x367   : > { %v2220_v6 = vpop.f32.mrf.mxu3 }
 0x368   : > { %v3439_v1 = vmax.f32 %v2524_v21, 0.0  ;;  %v2221_v43 = vadd.f32 %v2220_v6, %v9970_v40  ;;  %2562 = vmatmul.bf16.gmra.mxu1 %v10076_v19 }
 0x369   : > { %v2391_v52 = vpop.f32.mrf.mxu0 }
 0x36a   : > { %v4057_v5 = vmax.f32 %v4056_v10, %v3439_v1  ;;  %v3549_v41 = vmax.f32 %v2221_v43, 0.0  ;;  %v2392_v47 = vadd.f32 %v2391_v52, %v9963_v26 }
 0x36b   : > { %v1431_v16 = vpop.f32.mrf.mxu2 }
 0x36c   : > { %v3933_v42 = vmax.f32 %v3932_v61, %v3549_v41  ;;  %v3558_v49 = vmax.f32 %v2392_v47, 0.0  ;;  %v1432_v58 = vadd.f32 %v10131_v44, %v1431_v16 }
 0x36d   : > { %v2525_v60 = vpop.f32.mrf.mxu1 }
 0x36e   : > { %v4003_v38 = vmax.f32 %v4002_v0, %v3558_v49  ;;  %v1521_v62 = vmax.f32 %v1432_v58, 0.0  ;;  %v2526_v51 = vadd.f32 %v2525_v60, %v10086_v46 }
 0x36f   : > { %v2222_v37 = vpop.f32.mrf.mxu3 }
 0x370   : > { %v3447_v30 = vmax.f32 %v2526_v51, 0.0  ;;  %v2223_v59 = vadd.f32 %v2222_v37, %v9970_v40  ;;  %1980 = vmatmul.bf16.vlgmr.msrb.gmra.mxu2 %v9841_v50  ;;  %v10224_v39 = vpack.c.bf16 %v1521_v62, %v1520_v55 }
 0x371   : > { %v2394_v28 = vpop.f32.mrf.mxu0 }
 0x372   : > { %v4058_v32 = vmax.f32 %v4057_v5, %v3447_v30  ;;  %v3557_v25 = vmax.f32 %v2223_v59, 0.0  ;;  %v2395_v18 = vadd.f32 %v2394_v28, %v9963_v26 }
 0x373   : > { %v1434_v11 = vpop.f32.mrf.mxu2 }
 0x374   : > { %v3934_v2 = vmax.f32 %v3933_v42, %v3557_v25  ;;  %v3566_v4 = vmax.f32 %v2395_v18, 0.0  ;;  %2264 = vmatmul.bf16.gmra.mxu3 %v10224_v39  ;;  %2433 = vmatmul.bf16.gmra.mxu0 %v10224_v39  ;;  %v1435_v43 = vadd.f32 %v10131_v44, %v1434_v11 }
 0x375   : > { %v2528_v10 = vpop.f32.mrf.mxu1 }
 0x376   : > { %v4004_v8 = vmax.f32 %v4003_v38, %v3566_v4  ;;  %v2529_v15 = vadd.f32 %v2528_v10, %v10086_v46  ;;  %v1522_v58 = vmax.f32 %v1435_v43, 0.0 }
 0x377   : > { %v2225_v3 = vpop.f32.mrf.mxu3 }
 0x378   : > { %v3455_v61 = vmax.f32 %v2529_v15, 0.0  ;;  %v2226_v54 = vadd.f32 %v2225_v3, %v9970_v40  ;;  %2567 = vmatmul.bf16.gmra.mxu1 %v10097_v56 }
 0x379   : > { %v2396_v35 = vpop.f32.mrf.mxu0 }
 0x37a   : > { %v4059_v0 = vmax.f32 %v4058_v32, %v3455_v61  ;;  %v3565_v21 = vmax.f32 %v2226_v54, 0.0  ;;  %v2397_v6 = vadd.f32 %v2396_v35, %v9963_v26 }
 0x37b   : > { %v1436_v1 = vpop.f32.mrf.mxu2 }
 0x37c   : > { %v3935_v52 = vmax.f32 %v3934_v2, %v3565_v21  ;;  %v3574_v5 = vmax.f32 %v2397_v6, 0.0  ;;  %v1437_v41 = vadd.f32 %v10131_v44, %v1436_v1 }
 0x37d   : > { %v2530_v47 = vpop.f32.mrf.mxu1 }
 0x37e   : > { %v4005_v16 = vmax.f32 %v4004_v8, %v3574_v5  ;;  %v1523_v27 = vmax.f32 %v1437_v41, 0.0  ;;  %v2531_v42 = vadd.f32 %v2530_v47, %v10086_v46 }
 0x37f   : > { %v2227_v49 = vpop.f32.mrf.mxu3 }
 0x380   : > { %v3463_v60 = vmax.f32 %v2531_v42, 0.0  ;;  %v2228_v38 = vadd.f32 %v2227_v49, %v9970_v40  ;;  %1985 = vmatmul.bf16.gmra.mxu2 %v9854_v7  ;;  %v10238_v51 = vpack.c.bf16 %v1523_v27, %v1522_v58 }
 0x381   : > { %v2399_v62 = vpop.f32.mrf.mxu0 }
 0x382   : > { %v4060_v37 = vmax.f32 %v4059_v0, %v3463_v60  ;;  %v3573_v55 = vmax.f32 %v2228_v38, 0.0  ;;  %v2400_v30 = vadd.f32 %v2399_v62, %v9963_v26 }
 0x383   : > { %v1439_v59 = vpop.f32.mrf.mxu2 }
 0x384   : > { %v3936_v28 = vmax.f32 %v3935_v52, %v3573_v55  ;;  %v3582_v32 = vmax.f32 %v2400_v30, 0.0  ;;  %2269 = vmatmul.bf16.gmra.mxu3 %v10238_v51  ;;  %2438 = vmatmul.bf16.gmra.mxu0 %v10238_v51  ;;  %v1440_v35 = vadd.f32 %v10131_v44, %v1439_v59  ;;  %v7446_v30 = vld [vmem:[#allocation3 + $0x190] sm:$0xf] }
 0x385   : > { %v2533_v25 = vpop.f32.mrf.mxu1  ;;  %v8833_v59 = vld [vmem:[#allocation3 + $0x1ac] sm:$0xf0] }
 0x386   : > { %v4006_v18 = vmax.f32 %v4005_v16, %v3582_v32  ;;  %v2534_v11 = vadd.f32 %v2533_v25, %v10086_v46  ;;  %v1524_v47 = vmax.f32 %v1440_v35, 0.0  ;;  %v7447_v32 = vor.u32 %v8833_v59, %v7446_v30  ;;  %v8829_v25 = vld [vmem:[#allocation3 + $0x194] sm:$0xf] }
 0x387   : > { %v2230_v2 = vpop.f32.mrf.mxu3 }
 0x388   : > { %v3471_v4 = vmax.f32 %v2534_v11, 0.0  ;;  %v2231_v10 = vadd.f32 %v2230_v2, %v9970_v40  ;;  %2572 = vmatmul.bf16.gmra.mxu1 %v10115_v24  ;;  %2649 = vmatpush.bf16.msra.mxu2 %v7447_v32 }
 0x389   : > { %v2401_v8 = vpop.f32.mrf.mxu0 }
 0x38a   : > { %v4061_v15 = vmax.f32 %v4060_v37, %v3471_v4  ;;  %v3581_v3 = vmax.f32 %v2231_v10, 0.0  ;;  %v2402_v61 = vadd.f32 %v2401_v8, %v9963_v26 }
 0x38b   : > { %v1441_v54 = vpop.f32.mrf.mxu2 }
 0x38c   : > { %v3937_v0 = vmax.f32 %v3936_v28, %v3581_v3  ;;  %v3590_v21 = vmax.f32 %v2402_v61, 0.0  ;;  %v1442_v6 = vadd.f32 %v10131_v44, %v1441_v54 }
 0x38d   : > { %v2535_v1 = vpop.f32.mrf.mxu1 }
 0x38e   : > { %v4007_v43 = vmax.f32 %v4006_v18, %v3590_v21  ;;  %v1525_v52 = vmax.f32 %v1442_v6, 0.0  ;;  %v2536_v5 = vadd.f32 %v2535_v1, %v10086_v46  ;;  %v7448_v18 = vld [vmem:[#allocation3 + $0x1b0] sm:$0xf0]  ;;  %v8834_v21 = vld [vmem:[#allocation3 + $0x1b4] sm:$0xf0] }
 0x38f   : > { %v2232_v41 = vpop.f32.mrf.mxu3  ;;  %v7451_v4 = vor.u32 %v8829_v25, %v7448_v18 }
 0x390   : > { %v3479_v16 = vmax.f32 %v2536_v5, 0.0  ;;  %v2233_v27 = vadd.f32 %v2232_v41, %v9970_v40  ;;  %1990 = vmatmul.bf16.gmra.mxu2 %v9865_v31  ;;  %v10252_v49 = vpack.c.bf16 %v1525_v52, %v1524_v47  ;;  %v8830_v52 = vld [vmem:[#allocation3 + $0x19c] sm:$0xf] }
 0x391   : > { %v2404_v42 = vpop.f32.mrf.mxu0  ;;  %2818 = vmatpush.bf16.msra.mxu3 %v7451_v4  ;;  %v7456_v5 = vld [vmem:[#allocation3 + $0x1b8] sm:$0xf0] }
 0x392   : > { %v4062_v58 = vmax.f32 %v4061_v15, %v3479_v16  ;;  %v3589_v60 = vmax.f32 %v2233_v27, 0.0  ;;  %v2405_v38 = vadd.f32 %v2404_v42, %v9963_v26  ;;  %v7459_v27 = vor.u32 %v8830_v52, %v7456_v5 }
 0x393   : > { %v1444_v62 = vpop.f32.mrf.mxu2 }
 0x394   : > { %v3938_v37 = vmax.f32 %v3937_v0, %v3589_v60  ;;  %v3598_v55 = vmax.f32 %v2405_v38, 0.0  ;;  %2274 = vmatmul.bf16.gmra.mxu3 %v10252_v49  ;;  %2443 = vmatmul.bf16.gmra.mxu0 %v10252_v49  ;;  %v7454_v0 = vld [vmem:[#allocation3 + $0x198] sm:$0xf]  ;;  %v1445_v6 = vadd.f32 %v10131_v44, %v1444_v62 }
 0x395   : > { %v2538_v28 = vpop.f32.mrf.mxu1  ;;  %3156 = vmatpush.bf16.msra.mxu1 %v7459_v27 }
 0x396   : > { %v4008_v11 = vmax.f32 %v4007_v43, %v3598_v55  ;;  %v2539_v2 = vadd.f32 %v2538_v28, %v10086_v46  ;;  %v7455_v43 = vor.u32 %v8834_v21, %v7454_v0  ;;  %v1526_v30 = vmax.f32 %v1445_v6, 0.0 }
 0x397   : > { %v2235_v10 = vpop.f32.mrf.mxu3 }
 0x398   : > { %v3487_v8 = vmax.f32 %v2539_v2, 0.0  ;;  %v2236_v15 = vadd.f32 %v2235_v10, %v9970_v40  ;;  %2577 = vmatmul.bf16.gmra.mxu1 %v10138_v53  ;;  %2987 = vmatpush.bf16.msra.mxu0 %v7455_v43 }
 0x399   : > { %v2406_v3 = vpop.f32.mrf.mxu0 }
 0x39a   : > { %v4063_v61 = vmax.f32 %v4062_v58, %v3487_v8  ;;  %v3597_v54 = vmax.f32 %v2236_v15, 0.0  ;;  %v2407_v35 = vadd.f32 %v2406_v3, %v9963_v26 }
 0x39b   : > { %v1446_v1 = vpop.f32.mrf.mxu2 }
 0x39c   : > { %v3939_v41 = vmax.f32 %v3938_v37, %v3597_v54  ;;  %v3606_v47 = vmax.f32 %v2407_v35, 0.0  ;;  %v1447_v16 = vadd.f32 %v10131_v44, %v1446_v1 }
 0x39d   : > { %v2540_v42 = vpop.f32.mrf.mxu1 }
 0x39e   : > { %v4009_v60 = vmax.f32 %v4008_v11, %v3606_v47  ;;  %v1527_v58 = vmax.f32 %v1447_v16, 0.0  ;;  %v2541_v38 = vadd.f32 %v2540_v42, %v10086_v46 }
 0x39f   : > { %v2237_v55 = vpop.f32.mrf.mxu3 }
 0x3a0   : > { %v3495_v59 = vmax.f32 %v2541_v38, 0.0  ;;  %v2238_v62 = vadd.f32 %v2237_v55, %v9970_v40  ;;  %1995 = vmatmul.bf16.gmra.mxu2 %v9878_v57  ;;  %v10266_v37 = vpack.c.bf16 %v1527_v58, %v1526_v30 }
 0x3a1   : > { %v2409_v28 = vpop.f32.mrf.mxu0 }
 0x3a2   : > { %v4064_v32 = vmax.f32 %v4063_v61, %v3495_v59  ;;  %v3605_v25 = vmax.f32 %v2238_v62, 0.0  ;;  %v2410_v18 = vadd.f32 %v2409_v28, %v9963_v26 }
 0x3a3   : > { %v1449_v2 = vpop.f32.mrf.mxu2 }
 0x3a4   : > { %v3940_v11 = vmax.f32 %v3939_v41, %v3605_v25  ;;  %v3614_v4 = vmax.f32 %v2410_v18, 0.0  ;;  %2279 = vmatmul.bf16.gmra.mxu3 %v10266_v37  ;;  %2448 = vmatmul.bf16.gmra.mxu0 %v10266_v37  ;;  %v1450_v43 = vadd.f32 %v10131_v44, %v1449_v2 }
 0x3a5   : > { %v2543_v10 = vpop.f32.mrf.mxu1 }
 0x3a6   : > { %v4010_v8 = vmax.f32 %v4009_v60, %v3614_v4  ;;  %v2544_v15 = vadd.f32 %v2543_v10, %v10086_v46  ;;  %v1528_v58 = vmax.f32 %v1450_v43, 0.0 }
 0x3a7   : > { %v2240_v3 = vpop.f32.mrf.mxu3 }
 0x3a8   : > { %v3503_v54 = vmax.f32 %v2544_v15, 0.0  ;;  %v2241_v35 = vadd.f32 %v2240_v3, %v9970_v40  ;;  %2582 = vmatmul.bf16.gmra.mxu1 %v10156_v45 }
 0x3a9   : > { %v2411_v61 = vpop.f32.mrf.mxu0 }
 0x3aa   : > { %v4065_v0 = vmax.f32 %v4064_v32, %v3503_v54  ;;  %v3613_v21 = vmax.f32 %v2241_v35, 0.0  ;;  %v2412_v6 = vadd.f32 %v2411_v61, %v9963_v26 }
 0x3ab   : > { %v1451_v1 = vpop.f32.mrf.mxu2 }
 0x3ac   : > { %v3941_v52 = vmax.f32 %v3940_v11, %v3613_v21  ;;  %v3622_v5 = vmax.f32 %v2412_v6, 0.0  ;;  %v1452_v41 = vadd.f32 %v10131_v44, %v1451_v1 }
 0x3ad   : > { %v2545_v47 = vpop.f32.mrf.mxu1 }
 0x3ae   : > { %v4011_v16 = vmax.f32 %v4010_v8, %v3622_v5  ;;  %v1529_v27 = vmax.f32 %v1452_v41, 0.0  ;;  %v2546_v42 = vadd.f32 %v2545_v47, %v10086_v46 }
 0x3af   : > { %v2242_v60 = vpop.f32.mrf.mxu3 }
 0x3b0   : > { %v3511_v38 = vmax.f32 %v2546_v42, 0.0  ;;  %v2243_v55 = vadd.f32 %v2242_v60, %v9970_v40  ;;  %2000 = vmatmul.bf16.gmra.mxu2 %v9891_v36  ;;  %v10280_v59 = vpack.c.bf16 %v1529_v27, %v1528_v58 }
 0x3b1   : > { %v2414_v30 = vpop.f32.mrf.mxu0 }
 0x3b2   : > { %v4066_v62 = vmax.f32 %v4065_v0, %v3511_v38  ;;  %v3621_v28 = vmax.f32 %v2243_v55, 0.0  ;;  %v2415_v32 = vadd.f32 %v2414_v30, %v9963_v26 }
 0x3b3   : > { %v1454_v25 = vpop.f32.mrf.mxu2 }
 0x3b4   : > { %v3942_v18 = vmax.f32 %v3941_v52, %v3621_v28  ;;  %v3630_v2 = vmax.f32 %v2415_v32, 0.0  ;;  %2284 = vmatmul.bf16.gmra.mxu3 %v10280_v59  ;;  %2453 = vmatmul.bf16.gmra.mxu0 %v10280_v59  ;;  %v1455_v6 = vadd.f32 %v10131_v44, %v1454_v25 }
 0x3b5   : > { %v2548_v11 = vpop.f32.mrf.mxu1 }
 0x3b6   : > { %v4012_v4 = vmax.f32 %v4011_v16, %v3630_v2  ;;  %v2549_v10 = vadd.f32 %v2548_v11, %v10086_v46  ;;  %v1530_v42 = vmax.f32 %v1455_v6, 0.0 }
 0x3b7   : > { %v2245_v8 = vpop.f32.mrf.mxu3 }
 0x3b8   : > { %v3519_v15 = vmax.f32 %v2549_v10, 0.0  ;;  %v2246_v3 = vadd.f32 %v2245_v8, %v9970_v40  ;;  %2587 = vmatmul.bf16.gmra.mxu1 %v10174_v14 }
 0x3b9   : > { %v2416_v54 = vpop.f32.mrf.mxu0 }
 0x3ba   : > { %v4067_v35 = vmax.f32 %v4066_v62, %v3519_v15  ;;  %v3629_v61 = vmax.f32 %v2246_v3, 0.0  ;;  %v2417_v0 = vadd.f32 %v2416_v54, %v9963_v26 }
 0x3bb   : > { %v1456_v21 = vpop.f32.mrf.mxu2 }
 0x3bc   : > { %v3943_v1 = vmax.f32 %v3942_v18, %v3629_v61  ;;  %v3638_v43 = vmax.f32 %v2417_v0, 0.0  ;;  %v1457_v52 = vadd.f32 %v10131_v44, %v1456_v21  ;;  %v8821_v0 = vld [vmem:[#allocation3 + $0x154] sm:$0xf] }
 0x3bd   : > { %v2550_v5 = vpop.f32.mrf.mxu1  ;;  %v7416_v21 = vld [vmem:[#allocation3 + $0x170] sm:$0xf0] }
 0x3be   : > { %v4013_v41 = vmax.f32 %v4012_v4, %v3638_v43  ;;  %v1531_v47 = vmax.f32 %v1457_v52, 0.0  ;;  %v2551_v16 = vadd.f32 %v2550_v5, %v10086_v46  ;;  %v7419_v43 = vor.u32 %v8821_v0, %v7416_v21  ;;  %v7422_v52 = vld [vmem:[#allocation3 + $0x158] sm:$0xf]  ;;  %v7352_v0 = vld [vmem:[#allocation3 + $0xf0] sm:$0xf0] }
 0x3bf   : > { %v2247_v27 = vpop.f32.mrf.mxu3  ;;  %v8826_v5 = vld [vmem:[#allocation3 + $0x174] sm:$0xf0] }
 0x3c0   : > { %v3527_v60 = vmax.f32 %v2551_v16, 0.0  ;;  %v2248_v58 = vadd.f32 %v2247_v27, %v9970_v40  ;;  %2005 = vmatmul.bf16.gmra.mxu2 %v9906_v29  ;;  %v10294_v55 = vpack.c.bf16 %v1531_v47, %v1530_v42  ;;  %v7423_v27 = vor.u32 %v8826_v5, %v7422_v52  ;;  %2819 = vmatpush.bf16.msra.mxu3 %v7419_v43  ;;  %v8810_v43 = vld [vmem:[#allocation3 + $0xf4] sm:$0xf0] }
 0x3c1   : > { %v2419_v38 = vpop.f32.mrf.mxu0 }
 0x3c2   : > { %v4068_v30 = vmax.f32 %v4067_v35, %v3527_v60  ;;  %v3637_v62 = vmax.f32 %v2248_v58, 0.0  ;;  %v2420_v28 = vadd.f32 %v2419_v38, %v9963_v26  ;;  %2988 = vmatpush.bf16.msra.mxu0 %v7423_v27 }
 0x3c3   : > { %v1459_v32 = vpop.f32.mrf.mxu2 }
 0x3c4   : > { %v3944_v25 = vmax.f32 %v3943_v1, %v3637_v62  ;;  %v3646_v18 = vmax.f32 %v2420_v28, 0.0  ;;  %2289 = vmatmul.bf16.gmra.mxu3 %v10294_v55  ;;  %2458 = vmatmul.bf16.gmra.mxu0 %v10294_v55  ;;  %v1460_v6 = vadd.f32 %v10131_v44, %v1459_v32  ;;  %v7384_v62 = vld [vmem:[#allocation3 + $0x130] sm:$0xf0] }
 0x3c5   : > { %v2553_v2 = vpop.f32.mrf.mxu1 }
 0x3c6   : > { %v4014_v11 = vmax.f32 %v4013_v41, %v3646_v18  ;;  %v2554_v4 = vadd.f32 %v2553_v2, %v10086_v46  ;;  %v7390_v18 = vld [vmem:[#allocation3 + $0x118] sm:$0xf] }
 0x3c7   : > { %v2250_v10 = vpop.f32.mrf.mxu3  ;;  %v8818_v2 = vld [vmem:[#allocation3 + $0x134] sm:$0xf0] }
 0x3c8   : > { %v3535_v8 = vmax.f32 %v2554_v4, 0.0  ;;  %v2251_v15 = vadd.f32 %v2250_v10, %v9970_v40  ;;  %2592 = vmatmul.bf16.gmra.mxu1 %v10192_v48  ;;  %v1532_v4 = vmax.f32 %v1460_v6, 0.0  ;;  %v7358_v6 = vld [vmem:[#allocation3 + $0xd8] sm:$0xf] }
 0x3c9   : > { %v2421_v3 = vpop.f32.mrf.mxu0  ;;  %v7359_v27 = vor.u32 %v8810_v43, %v7358_v6  ;;  %v8789_v43 = vld [vmem:[#allocation3 + $0x54] sm:$0xf] }
 0x3ca   : > { %v4069_v54 = vmax.f32 %v4068_v30, %v3535_v8  ;;  %v3645_v35 = vmax.f32 %v2251_v15, 0.0  ;;  %v2422_v61 = vadd.f32 %v2421_v3, %v9963_v26  ;;  %v8813_v30 = vld [vmem:[#allocation3 + $0x114] sm:$0xf] }
 0x3cb   : > { %v1461_v1 = vpop.f32.mrf.mxu2  ;;  %v7387_v32 = vor.u32 %v8813_v30, %v7384_v62  ;;  %v8797_v30 = vld [vmem:[#allocation3 + $0x94] sm:$0xf] }
 0x3cc   : > { %v3945_v41 = vmax.f32 %v3944_v25, %v3645_v35  ;;  %v3654_v47 = vmax.f32 %v2422_v61, 0.0  ;;  %v1462_v16 = vadd.f32 %v10131_v44, %v1461_v1  ;;  %v7391_v44 = vor.u32 %v8818_v2, %v7390_v18  ;;  %v8805_v61 = vld [vmem:[#allocation3 + $0xd4] sm:$0xf]  ;;  %v8802_v18 = vld [vmem:[#allocation3 + $0xb4] sm:$0xf0] }
 0x3cd   : > { %v2555_v42 = vpop.f32.mrf.mxu1  ;;  %2820 = vmatpush.bf16.msra.mxu3 %v7387_v32  ;;  %v7355_v1 = vor.u32 %v8805_v61, %v7352_v0  ;;  %v7320_v62 = vld [vmem:[#allocation3 + $0xb0] sm:$0xf0]  ;;  %v7326_v32 = vld [vmem:[#allocation3 + $0x98] sm:$0xf]  ;;  %v9282_v61 = vld [vmem:[%s11217_s4] ss:$0 sm:$0xff] }
 0x3ce   : > { %v4015_v60 = vmax.f32 %v4014_v11, %v3654_v47  ;;  %v1533_v58 = vmax.f32 %v1462_v16, 0.0  ;;  %v2556_v38 = vadd.f32 %v2555_v42, %v10086_v46  ;;  %2989 = vmatpush.bf16.msra.mxu0 %v7391_v44  ;;  %v7414_v47 = vld [vmem:[#allocation3 + $0x150] sm:$0xf] }
 0x3cf   : > { %v2252_v28 = vpop.f32.mrf.mxu3  ;;  %v8825_v16 = vld [vmem:[#allocation3 + $0x16c] sm:$0xf0] }
 0x3d0   : > { %v3543_v10 = vmax.f32 %v2556_v38, 0.0  ;;  %v2253_v25 = vadd.f32 %v2252_v28, %v9970_v40  ;;  %2010 = vmatmul.bf16.gmra.mxu2 %v9923_v20  ;;  %v10308_v11 = vpack.c.bf16 %v1533_v58, %v1532_v4  ;;  %v7415_v42 = vor.u32 %v8825_v16, %v7414_v47  ;;  %v7294_v47 = vld [vmem:[#allocation3 + $0x58] sm:$0xf] }
 0x3d1   : > { %v2424_v8 = vpop.f32.mrf.mxu0  ;;  %2821 = vmatpush.bf16.msra.mxu3 %v7355_v1 }
 0x3d2   : > { %v4070_v15 = vmax.f32 %v4069_v54, %v3543_v10  ;;  %v3653_v3 = vmax.f32 %v2253_v25, 0.0  ;;  %v2425_v35 = vadd.f32 %v2424_v8, %v9963_v26  ;;  %2990 = vmatpush.bf16.msra.mxu0 %v7359_v27  ;;  %2650 = vmatpush.bf16.msra.mxu2 %v7415_v42  ;;  %v7327_v10 = vor.u32 %v8802_v18, %v7326_v32  ;;  %v8794_v42 = vld [vmem:[#allocation3 + $0x74] sm:$0xf0]  ;;  %v8781_v32 = vld [vmem:[#allocation3 + $0x14] sm:$0xf] }
 0x3d3   : > { %v1464_v21 = vpop.f32.mrf.mxu2 }
 0x3d4   : > { %v3946_v52 = vmax.f32 %v3945_v41, %v3653_v3  ;;  %v3662_v5 = vmax.f32 %v2425_v35, 0.0  ;;  %2294 = vmatmul.bf16.gmra.mxu3 %v10308_v11  ;;  %2463 = vmatmul.bf16.gmra.mxu0 %v10308_v11  ;;  %v7323_v41 = vor.u32 %v8797_v30, %v7320_v62  ;;  %v8822_v3 = vld [vmem:[#allocation3 + $0x15c] sm:$0xf]  ;;  %v1465_v0 = vadd.f32 %v9282_v61, %v1464_v21  ;;  %v7256_v21 = vld [vmem:[#allocation3 + $0x30] sm:$0xf0] }
 0x3d5   : > { %v2558_v54 = vpop.f32.mrf.mxu1  ;;  %v7424_v35 = vld [vmem:[#allocation3 + $0x178] sm:$0xf0]  ;;  %v7295_v30 = vor.u32 %v8794_v42, %v7294_v47 }
 0x3d6   : > { %v4016_v58 = vmax.f32 %v4015_v60, %v3662_v5  ;;  %v2559_v38 = vadd.f32 %v2558_v54, %v10086_v46  ;;  %2822 = vmatpush.bf16.msra.mxu3 %v7323_v41  ;;  %2991 = vmatpush.bf16.msra.mxu0 %v7327_v10  ;;  %v7427_v6 = vor.u32 %v8822_v3, %v7424_v35  ;;  %v7288_v5 = vld [vmem:[#allocation3 + $0x70] sm:$0xf0]  ;;  %v8786_v10 = vld [vmem:[#allocation3 + $0x34] sm:$0xf0] }
 0x3d7   : > { %v2255_v28 = vpop.f32.mrf.mxu3 }
 0x3d8   : > { %v3551_v2 = vmax.f32 %v2559_v38, 0.0  ;;  %v2256_v4 = vadd.f32 %v2255_v28, %v9970_v40  ;;  %2597 = vmatmul.bf16.gmra.mxu1 %v10210_v34 }
 0x3d9   : > { %v2426_v25 = vpop.f32.mrf.mxu0  ;;  %3157 = vmatpush.bf16.msra.mxu1 %v7427_v6 }
 0x3da   : > { %v4071_v44 = vmax.f32 %v4070_v15, %v3551_v2  ;;  %v3661_v60 = vmax.f32 %v2256_v4, 0.0  ;;  %v2427_v8 = vadd.f32 %v2426_v25, %v9963_v26  ;;  %v7291_v15 = vor.u32 %v8789_v43, %v7288_v5  ;;  %2992 = vmatpush.bf16.msra.mxu0 %v7295_v30  ;;  %v7262_v4 = vld [vmem:[#allocation3 + $0x18] sm:$0xf] }
 0x3db   : > { %v1466_v1 = vpop.f32.mrf.mxu2  ;;  %v7259_v2 = vor.u32 %v8781_v32, %v7256_v21 }
 0x3dc   : > { %v3947_v16 = vmax.f32 %v3946_v52, %v3661_v60  ;;  %v3670_v27 = vmax.f32 %v2427_v8, 0.0  ;;  %v1467_v54 = vadd.f32 %v9282_v61, %v1466_v1  ;;  %2823 = vmatpush.bf16.msra.mxu3 %v7291_v15  ;;  %v1534_v52 = vmax.f32 %v1465_v0, 0.0 }
 0x3dd   : > { %v2560_v38 = vpop.f32.mrf.mxu1  ;;  %v7263_v8 = vor.u32 %v8786_v10, %v7262_v4 }
 0x3de   : > { %v4017_v62 = vmax.f32 %v4016_v58, %v3670_v27  ;;  %v1535_v28 = vmax.f32 %v1467_v54, 0.0  ;;  %v2561_v41 = vadd.f32 %v2560_v38, %v10086_v46 }
 0x3df   : > { %v2257_v18 = vpop.f32.mrf.mxu3  ;;  %2993 = vmatpush.bf16.msra.mxu0 %v7263_v8 }
 0x3e0   : > { %v3559_v25 = vmax.f32 %v2561_v41, 0.0  ;;  %v2258_v60 = vadd.f32 %v2257_v18, %v9970_v40  ;;  %2015 = vmatmul.bf16.gmra.mxu2 %v9941_v63  ;;  %v10323_v58 = vpack.c.bf16 %v1535_v28, %v1534_v52  ;;  %2824 = vmatpush.bf16.msra.mxu3 %v7259_v2 }
 0x3e1   : > { %v2429_v3 = vpop.f32.mrf.mxu0 }
 0x3e2   : > { %v4072_v35 = vmax.f32 %v4071_v44, %v3559_v25  ;;  %v3669_v1 = vmax.f32 %v2258_v60, 0.0  ;;  %v2430_v6 = vadd.f32 %v2429_v3, %v9963_v26 }
 0x3e3   : > { %v1469_v43 = vpop.f32.mrf.mxu2 }
 0x3e4   : > { %v3948_v5 = vmax.f32 %v3947_v16, %v3669_v1  ;;  %v3678_v47 = vmax.f32 %v2430_v6, 0.0  ;;  %2299 = vmatmul.bf16.gmra.mxu3 %v10323_v58  ;;  %2468 = vmatmul.bf16.gmra.mxu0 %v10323_v58  ;;  %v1470_v32 = vadd.f32 %v9282_v61, %v1469_v43 }
 0x3e5   : > { %v2563_v0 = vpop.f32.mrf.mxu1 }
 0x3e6   : > { %v4018_v27 = vmax.f32 %v4017_v62, %v3678_v47  ;;  %v2564_v54 = vadd.f32 %v2563_v0, %v10086_v46  ;;  %v1536_v60 = vmax.f32 %v1470_v32, 0.0 }
 0x3e7   : > { %v2260_v15 = vpop.f32.mrf.mxu3 }
 0x3e8   : > { %v3567_v42 = vmax.f32 %v2564_v54, 0.0  ;;  %v2261_v44 = vadd.f32 %v2260_v15, %v9970_v40  ;;  %2602 = vmatmul.bf16.gmra.mxu1 %v10224_v39  ;;  %v10343_v15 = vld [vmem:[%s11219_s6] sm:$0xff] }
 0x3e9   : > { %v2431_v38 = vpop.f32.mrf.mxu0 }
 0x3ea   : > { %v4073_v30 = vmax.f32 %v4072_v35, %v3567_v42  ;;  %v3677_v28 = vmax.f32 %v2261_v44, 0.0  ;;  %v2432_v16 = vadd.f32 %v2431_v38, %v9963_v26  ;;  %v10346_v42 = vperm.slane %v10343_v15, 0 }
 0x3eb   : > { %v1471_v41 = vpop.f32.mrf.mxu2 }
 0x3ec   : > { %v3949_v21 = vmax.f32 %v3948_v5, %v3677_v28  ;;  %v3686_v18 = vmax.f32 %v2432_v16, 0.0  ;;  %v1472_v2 = vadd.f32 %v9282_v61, %v1471_v41 }
 0x3ed   : > { %v2565_v4 = vpop.f32.mrf.mxu1 }
 0x3ee   : > { %v4019_v62 = vmax.f32 %v4018_v27, %v3686_v18  ;;  %v1537_v10 = vmax.f32 %v1472_v2, 0.0  ;;  %v2566_v52 = vadd.f32 %v2565_v4, %v10086_v46 }
 0x3ef   : > { %v2262_v25 = vpop.f32.mrf.mxu3 }
 0x3f0   : > { %v3575_v8 = vmax.f32 %v2566_v52, 0.0  ;;  %v2263_v3 = vadd.f32 %v2262_v25, %v9970_v40  ;;  %2020 = vmatmul.bf16.gmra.mxu2 %v9960_v23  ;;  %v10335_v1 = vpack.c.bf16 %v1537_v10, %v1536_v60 }
 0x3f1   : > { %v2434_v35 = vpop.f32.mrf.mxu0 }
 0x3f2   : > { %v4074_v6 = vmax.f32 %v4073_v30, %v3575_v8  ;;  %v3685_v43 = vmax.f32 %v2263_v3, 0.0  ;;  %v2435_v5 = vadd.f32 %v2434_v35, %v9963_v26 }
 0x3f3   : > { %v1981_v61 = vpop.f32.mrf.mxu2 }
 0x3f4   : > { %v3950_v47 = vmax.f32 %v3949_v21, %v3685_v43  ;;  %v3694_v0 = vmax.f32 %v2435_v5, 0.0  ;;  %2304 = vmatmul.bf16.gmra.mxu3 %v10335_v1  ;;  %2473 = vmatmul.bf16.gmra.mxu0 %v10335_v1  ;;  %v1982_v41 = vadd.f32 %v1981_v61, %v10346_v42 }
 0x3f5   : > { %v2568_v27 = vpop.f32.mrf.mxu1 }
 0x3f6   : > { %v4020_v54 = vmax.f32 %v4019_v62, %v3694_v0  ;;  %v2569_v44 = vadd.f32 %v2568_v27, %v10086_v46  ;;  %v3324_v25 = vmax.f32 %v1982_v41, 0.0 }
 0x3f7   : > { %v2265_v38 = vpop.f32.mrf.mxu3 }
 0x3f8   : > { %v3583_v30 = vmax.f32 %v2569_v44, 0.0  ;;  %v2266_v28 = vadd.f32 %v2265_v38, %v9970_v40  ;;  %2607 = vmatmul.bf16.gmra.mxu1 %v10238_v51 }
 0x3f9   : > { %v2436_v16 = vpop.f32.mrf.mxu0 }
 0x3fa   : > { %v4075_v32 = vmax.f32 %v4074_v6, %v3583_v30  ;;  %v3693_v21 = vmax.f32 %v2266_v28, 0.0  ;;  %v2437_v18 = vadd.f32 %v2436_v16, %v9963_v26 }
 0x3fb   : > { %v1983_v2 = vpop.f32.mrf.mxu2 }
 0x3fc   : > { %v3951_v4 = vmax.f32 %v3950_v47, %v3693_v21  ;;  %v3702_v62 = vmax.f32 %v2437_v18, 0.0  ;;  %v1984_v10 = vadd.f32 %v1983_v2, %v10346_v42 }
 0x3fd   : > { %v2570_v52 = vpop.f32.mrf.mxu1 }
 0x3fe   : > { %v4021_v60 = vmax.f32 %v4020_v54, %v3702_v62  ;;  %v3332_v8 = vmax.f32 %v1984_v10, 0.0  ;;  %v2571_v3 = vadd.f32 %v2570_v52, %v10086_v46 }
 0x3ff   : > { %v2267_v35 = vpop.f32.mrf.mxu3 }
 0x400   : > { %v3837_v43 = vmax.f32 %v3324_v25, %v3332_v8  ;;  %v3591_v5 = vmax.f32 %v2571_v3, 0.0  ;;  %v2268_v61 = vadd.f32 %v2267_v35, %v9970_v40  ;;  %2025 = vmatmul.bf16.gmra.mxu2 %v9978_v13 }
 0x401   : > { %v2439_v6 = vpop.f32.mrf.mxu0 }
 0x402   : > { %v4076_v0 = vmax.f32 %v4075_v32, %v3591_v5  ;;  %v3701_v27 = vmax.f32 %v2268_v61, 0.0  ;;  %v2440_v47 = vadd.f32 %v2439_v6, %v9963_v26 }
 0x403   : > { %v1986_v44 = vpop.f32.mrf.mxu2 }
 0x404   : > { %v3952_v38 = vmax.f32 %v3951_v4, %v3701_v27  ;;  %v3710_v30 = vmax.f32 %v2440_v47, 0.0  ;;  %v1987_v54 = vadd.f32 %v1986_v44, %v10346_v42  ;;  %2825 = vmatmul.bf16.vlgmr.msra.gmra.mxu3 %v9841_v50  ;;  %2994 = vmatmul.bf16.vlgmr.msra.gmra.mxu0 %v9841_v50 }
 0x405   : > { %v2573_v28 = vpop.f32.mrf.mxu1 }
 0x406   : > { %v4022_v16 = vmax.f32 %v4021_v60, %v3710_v30  ;;  %v3340_v41 = vmax.f32 %v1987_v54, 0.0  ;;  %v2574_v21 = vadd.f32 %v2573_v28, %v10086_v46 }
 0x407   : > { %v2270_v18 = vpop.f32.mrf.mxu3 }
 0x408   : > { %v3838_v2 = vmax.f32 %v3837_v43, %v3340_v41  ;;  %v3599_v32 = vmax.f32 %v2574_v21, 0.0  ;;  %v2271_v62 = vadd.f32 %v2270_v18, %v9970_v40  ;;  %2612 = vmatmul.bf16.gmra.mxu1 %v10252_v49 }
 0x409   : > { %v2441_v4 = vpop.f32.mrf.mxu0 }
 0x40a   : > { %v4077_v10 = vmax.f32 %v4076_v0, %v3599_v32  ;;  %v3709_v52 = vmax.f32 %v2271_v62, 0.0  ;;  %v2442_v25 = vadd.f32 %v2441_v4, %v9963_v26  ;;  %v8817_v32 = vld [vmem:[#allocation3 + $0x12c] sm:$0xf0] }
 0x40b   : > { %v1988_v8 = vpop.f32.mrf.mxu2 }
 0x40c   : > { %v3953_v3 = vmax.f32 %v3952_v38, %v3709_v52  ;;  %v3718_v35 = vmax.f32 %v2442_v25, 0.0  ;;  %v1989_v60 = vadd.f32 %v1988_v8, %v10346_v42 }
 0x40d   : > { %v2575_v5 = vpop.f32.mrf.mxu1 }
 0x40e   : > { %v4023_v61 = vmax.f32 %v4022_v16, %v3718_v35  ;;  %v3348_v6 = vmax.f32 %v1989_v60, 0.0  ;;  %v2576_v43 = vadd.f32 %v2575_v5, %v10086_v46 }
 0x40f   : > { %v2272_v27 = vpop.f32.mrf.mxu3 }
 0x410   : > { %v3839_v47 = vmax.f32 %v3838_v2, %v3348_v6  ;;  %v3607_v44 = vmax.f32 %v2576_v43, 0.0  ;;  %v2273_v30 = vadd.f32 %v2272_v27, %v9970_v40  ;;  %2030 = vmatmul.bf16.gmra.mxu2 %v9991_v17  ;;  %v7382_v2 = vld [vmem:[#allocation3 + $0x110] sm:$0xf] }
 0x411   : > { %v2444_v0 = vpop.f32.mrf.mxu0  ;;  %v7383_v4 = vor.u32 %v8817_v32, %v7382_v2 }
 0x412   : > { %v4078_v54 = vmax.f32 %v4077_v10, %v3607_v44  ;;  %v3717_v28 = vmax.f32 %v2273_v30, 0.0  ;;  %v2445_v38 = vadd.f32 %v2444_v0, %v9963_v26  ;;  %v8814_v44 = vld [vmem:[#allocation3 + $0x11c] sm:$0xf] }
 0x413   : > { %v1991_v41 = vpop.f32.mrf.mxu2  ;;  %2651 = vmatpush.bf16.msra.mxu2 %v7383_v4  ;;  %v7392_v30 = vld [vmem:[#allocation3 + $0x138] sm:$0xf0] }
 0x414   : > { %v3954_v21 = vmax.f32 %v3953_v3, %v3717_v28  ;;  %v3726_v18 = vmax.f32 %v2445_v38, 0.0  ;;  %v1992_v16 = vadd.f32 %v1991_v41, %v10346_v42  ;;  %2830 = vmatmul.bf16.gmra.mxu3 %v9854_v7  ;;  %2999 = vmatmul.bf16.gmra.mxu0 %v9854_v7 }
 0x415   : > { %v2578_v62 = vpop.f32.mrf.mxu1 }
 0x416   : > { %v4024_v52 = vmax.f32 %v4023_v61, %v3726_v18  ;;  %v3356_v25 = vmax.f32 %v1992_v16, 0.0  ;;  %v2579_v10 = vadd.f32 %v2578_v62, %v10086_v46  ;;  %v7395_v61 = vor.u32 %v8814_v44, %v7392_v30 }
 0x417   : > { %v2275_v8 = vpop.f32.mrf.mxu3 }
 0x418   : > { %v3840_v35 = vmax.f32 %v3839_v47, %v3356_v25  ;;  %v3615_v60 = vmax.f32 %v2579_v10, 0.0  ;;  %v2276_v3 = vadd.f32 %v2275_v8, %v9970_v40  ;;  %2617 = vmatmul.bf16.gmra.mxu1 %v10266_v37 }
 0x419   : > { %v2446_v5 = vpop.f32.mrf.mxu0  ;;  %3158 = vmatpush.bf16.msra.mxu1 %v7395_v61 }
 0x41a   : > { %v4079_v6 = vmax.f32 %v4078_v54, %v3615_v60  ;;  %v3725_v43 = vmax.f32 %v2276_v3, 0.0  ;;  %v2447_v27 = vadd.f32 %v2446_v5, %v9963_v26 }
 0x41b   : > { %v1993_v0 = vpop.f32.mrf.mxu2 }
 0x41c   : > { %v3955_v28 = vmax.f32 %v3954_v21, %v3725_v43  ;;  %v3734_v38 = vmax.f32 %v2447_v27, 0.0  ;;  %v1994_v41 = vadd.f32 %v1993_v0, %v10346_v42 }
 0x41d   : > { %v2580_v18 = vpop.f32.mrf.mxu1 }
 0x41e   : > { %v4025_v47 = vmax.f32 %v4024_v52, %v3734_v38  ;;  %v3364_v16 = vmax.f32 %v1994_v41, 0.0  ;;  %v2581_v2 = vadd.f32 %v2580_v18, %v10086_v46 }
 0x41f   : > { %v2277_v32 = vpop.f32.mrf.mxu3 }
 0x420   : > { %v3841_v62 = vmax.f32 %v3840_v35, %v3364_v16  ;;  %v3623_v54 = vmax.f32 %v2581_v2, 0.0  ;;  %v2278_v4 = vadd.f32 %v2277_v32, %v9970_v40  ;;  %2035 = vmatmul.bf16.gmra.mxu2 %v10007_v22 }
 0x421   : > { %v2449_v25 = vpop.f32.mrf.mxu0 }
 0x422   : > { %v4080_v10 = vmax.f32 %v4079_v6, %v3623_v54  ;;  %v3733_v8 = vmax.f32 %v2278_v4, 0.0  ;;  %v2450_v21 = vadd.f32 %v2449_v25, %v9963_v26 }
 0x423   : > { %v1996_v60 = vpop.f32.mrf.mxu2 }
 0x424   : > { %v3956_v3 = vmax.f32 %v3955_v28, %v3733_v8  ;;  %v3742_v5 = vmax.f32 %v2450_v21, 0.0  ;;  %v1997_v52 = vadd.f32 %v1996_v60, %v10346_v42  ;;  %2835 = vmatmul.bf16.gmra.mxu3 %v9865_v31  ;;  %3004 = vmatmul.bf16.gmra.mxu0 %v9865_v31 }
 0x425   : > { %v2583_v35 = vpop.f32.mrf.mxu1 }
 0x426   : > { %v4026_v43 = vmax.f32 %v4025_v47, %v3742_v5  ;;  %v3372_v27 = vmax.f32 %v1997_v52, 0.0  ;;  %v2584_v44 = vadd.f32 %v2583_v35, %v10086_v46 }
 0x427   : > { %v2280_v30 = vpop.f32.mrf.mxu3 }
 0x428   : > { %v3842_v0 = vmax.f32 %v3841_v62, %v3372_v27  ;;  %v3631_v6 = vmax.f32 %v2584_v44, 0.0  ;;  %v2281_v61 = vadd.f32 %v2280_v30, %v9970_v40  ;;  %2622 = vmatmul.bf16.gmra.mxu1 %v10280_v59 }
 0x429   : > { %v2451_v28 = vpop.f32.mrf.mxu0 }
 0x42a   : > { %v4081_v38 = vmax.f32 %v4080_v10, %v3631_v6  ;;  %v3741_v41 = vmax.f32 %v2281_v61, 0.0  ;;  %v2452_v18 = vadd.f32 %v2451_v28, %v9963_v26 }
 0x42b   : > { %v1998_v16 = vpop.f32.mrf.mxu2 }
 0x42c   : > { %v3957_v2 = vmax.f32 %v3956_v3, %v3741_v41  ;;  %v3750_v32 = vmax.f32 %v2452_v18, 0.0  ;;  %v1999_v47 = vadd.f32 %v1998_v16, %v10346_v42 }
 0x42d   : > { %v2585_v54 = vpop.f32.mrf.mxu1 }
 0x42e   : > { %v4027_v4 = vmax.f32 %v4026_v43, %v3750_v32  ;;  %v3380_v25 = vmax.f32 %v1999_v47, 0.0  ;;  %v2586_v62 = vadd.f32 %v2585_v54, %v10086_v46 }
 0x42f   : > { %v2282_v8 = vpop.f32.mrf.mxu3 }
 0x430   : > { %v3843_v21 = vmax.f32 %v3842_v0, %v3380_v25  ;;  %v3639_v60 = vmax.f32 %v2586_v62, 0.0  ;;  %v2283_v5 = vadd.f32 %v2282_v8, %v9970_v40  ;;  %2040 = vmatmul.bf16.gmra.mxu2 %v10028_v9 }
 0x431   : > { %v2454_v10 = vpop.f32.mrf.mxu0 }
 0x432   : > { %v4082_v52 = vmax.f32 %v4081_v38, %v3639_v60  ;;  %v3749_v35 = vmax.f32 %v2283_v5, 0.0  ;;  %v2455_v3 = vadd.f32 %v2454_v10, %v9963_v26 }
 0x433   : > { %v2001_v27 = vpop.f32.mrf.mxu2 }
 0x434   : > { %v3958_v44 = vmax.f32 %v3957_v2, %v3749_v35  ;;  %v3758_v30 = vmax.f32 %v2455_v3, 0.0  ;;  %v2002_v43 = vadd.f32 %v2001_v27, %v10346_v42  ;;  %2840 = vmatmul.bf16.gmra.mxu3 %v9878_v57  ;;  %3009 = vmatmul.bf16.gmra.mxu0 %v9878_v57 }
 0x435   : > { %v2588_v0 = vpop.f32.mrf.mxu1 }
 0x436   : > { %v4028_v6 = vmax.f32 %v4027_v4, %v3758_v30  ;;  %v3388_v61 = vmax.f32 %v2002_v43, 0.0  ;;  %v2589_v28 = vadd.f32 %v2588_v0, %v10086_v46 }
 0x437   : > { %v2285_v41 = vpop.f32.mrf.mxu3 }
 0x438   : > { %v3844_v18 = vmax.f32 %v3843_v21, %v3388_v61  ;;  %v3647_v38 = vmax.f32 %v2589_v28, 0.0  ;;  %v2286_v16 = vadd.f32 %v2285_v41, %v9970_v40  ;;  %2627 = vmatmul.bf16.gmra.mxu1 %v10294_v55 }
 0x439   : > { %v2456_v2 = vpop.f32.mrf.mxu0 }
 0x43a   : > { %v4083_v32 = vmax.f32 %v4082_v52, %v3647_v38  ;;  %v3757_v47 = vmax.f32 %v2286_v16, 0.0  ;;  %v2457_v54 = vadd.f32 %v2456_v2, %v9963_v26 }
 0x43b   : > { %v2003_v25 = vpop.f32.mrf.mxu2 }
 0x43c   : > { %v3959_v62 = vmax.f32 %v3958_v44, %v3757_v47  ;;  %v3766_v8 = vmax.f32 %v2457_v54, 0.0  ;;  %v2004_v4 = vadd.f32 %v2003_v25, %v10346_v42  ;;  %v8806_v47 = vld [vmem:[#allocation3 + $0xdc] sm:$0xf] }
 0x43d   : > { %v2590_v60 = vpop.f32.mrf.mxu1  ;;  %v7360_v54 = vld [vmem:[#allocation3 + $0xf8] sm:$0xf0] }
 0x43e   : > { %v4029_v5 = vmax.f32 %v4028_v6, %v3766_v8  ;;  %v3396_v10 = vmax.f32 %v2004_v4, 0.0  ;;  %v2591_v21 = vadd.f32 %v2590_v60, %v10086_v46  ;;  %v7363_v25 = vor.u32 %v8806_v47, %v7360_v54 }
 0x43f   : > { %v2287_v35 = vpop.f32.mrf.mxu3 }
 0x440   : > { %v3845_v3 = vmax.f32 %v3844_v18, %v3396_v10  ;;  %v3655_v27 = vmax.f32 %v2591_v21, 0.0  ;;  %v2288_v30 = vadd.f32 %v2287_v35, %v9970_v40  ;;  %2045 = vmatmul.bf16.gmra.mxu2 %v10044_v33  ;;  %3159 = vmatpush.bf16.msra.mxu1 %v7363_v25 }
 0x441   : > { %v2459_v52 = vpop.f32.mrf.mxu0 }
 0x442   : > { %v4084_v43 = vmax.f32 %v4083_v32, %v3655_v27  ;;  %v3765_v0 = vmax.f32 %v2288_v30, 0.0  ;;  %v2460_v44 = vadd.f32 %v2459_v52, %v9963_v26  ;;  %v7328_v27 = vld [vmem:[#allocation3 + $0xb8] sm:$0xf0] }
 0x443   : > { %v2006_v61 = vpop.f32.mrf.mxu2 }
 0x444   : > { %v3960_v28 = vmax.f32 %v3959_v62, %v3765_v0  ;;  %v3774_v41 = vmax.f32 %v2460_v44, 0.0  ;;  %v2007_v6 = vadd.f32 %v2006_v61, %v10346_v42  ;;  %2845 = vmatmul.bf16.gmra.mxu3 %v9891_v36  ;;  %3014 = vmatmul.bf16.gmra.mxu0 %v9891_v36 }
 0x445   : > { %v2593_v18 = vpop.f32.mrf.mxu1 }
 0x446   : > { %v4030_v38 = vmax.f32 %v4029_v5, %v3774_v41  ;;  %v3404_v16 = vmax.f32 %v2007_v6, 0.0  ;;  %v2594_v2 = vadd.f32 %v2593_v18, %v10086_v46  ;;  %v8798_v5 = vld [vmem:[#allocation3 + $0x9c] sm:$0xf] }
 0x447   : > { %v2290_v32 = vpop.f32.mrf.mxu3  ;;  %v7331_v52 = vor.u32 %v8798_v5, %v7328_v27 }
 0x448   : > { %v3846_v8 = vmax.f32 %v3845_v3, %v3404_v16  ;;  %v3663_v4 = vmax.f32 %v2594_v2, 0.0  ;;  %v2291_v62 = vadd.f32 %v2290_v32, %v9970_v40  ;;  %2632 = vmatmul.bf16.gmra.mxu1 %v10308_v11  ;;  %v8790_v16 = vld [vmem:[#allocation3 + $0x5c] sm:$0xf] }
 0x449   : > { %v2461_v60 = vpop.f32.mrf.mxu0  ;;  %3160 = vmatpush.bf16.msra.mxu1 %v7331_v52  ;;  %v7296_v2 = vld [vmem:[#allocation3 + $0x78] sm:$0xf0] }
 0x44a   : > { %v4085_v10 = vmax.f32 %v4084_v43, %v3663_v4  ;;  %v3773_v21 = vmax.f32 %v2291_v62, 0.0  ;;  %v2462_v35 = vadd.f32 %v2461_v60, %v9963_v26  ;;  %v7299_v47 = vor.u32 %v8790_v16, %v7296_v2 }
 0x44b   : > { %v2008_v30 = vpop.f32.mrf.mxu2 }
 0x44c   : > { %v3961_v0 = vmax.f32 %v3960_v28, %v3773_v21  ;;  %v3782_v44 = vmax.f32 %v2462_v35, 0.0  ;;  %v2009_v61 = vadd.f32 %v2008_v30, %v10346_v42  ;;  %v7264_v21 = vld [vmem:[#allocation3 + $0x38] sm:$0xf0] }
 0x44d   : > { %v2595_v3 = vpop.f32.mrf.mxu1  ;;  %3161 = vmatpush.bf16.msra.mxu1 %v7299_v47 }
 0x44e   : > { %v4031_v41 = vmax.f32 %v4030_v38, %v3782_v44  ;;  %v3412_v6 = vmax.f32 %v2009_v61, 0.0  ;;  %v2596_v18 = vadd.f32 %v2595_v3, %v10086_v46  ;;  %v8782_v38 = vld [vmem:[#allocation3 + $0x1c] sm:$0xf]  ;;  %v8809_v44 = vld [vmem:[#allocation3 + $0xec] sm:$0xf0] }
 0x44f   : > { %v2292_v43 = vpop.f32.mrf.mxu3  ;;  %v7267_v5 = vor.u32 %v8782_v38, %v7264_v21 }
 0x450   : > { %v3847_v54 = vmax.f32 %v3846_v8, %v3412_v6  ;;  %v3671_v32 = vmax.f32 %v2596_v18, 0.0  ;;  %v2293_v25 = vadd.f32 %v2292_v43, %v9970_v40  ;;  %2050 = vmatmul.bf16.gmra.mxu2 %v10060_v12  ;;  %v7350_v8 = vld [vmem:[#allocation3 + $0xd0] sm:$0xf] }
 0x451   : > { %v2464_v28 = vpop.f32.mrf.mxu0  ;;  %v7351_v3 = vor.u32 %v8809_v44, %v7350_v8  ;;  %3162 = vmatpush.bf16.msra.mxu1 %v7267_v5 }
 0x452   : > { %v4086_v4 = vmax.f32 %v4085_v10, %v3671_v32  ;;  %v3781_v62 = vmax.f32 %v2293_v25, 0.0  ;;  %v2465_v60 = vadd.f32 %v2464_v28, %v9963_v26 }
 0x453   : > { %v2011_v35 = vpop.f32.mrf.mxu2  ;;  %2652 = vmatpush.bf16.msra.mxu2 %v7351_v3 }
 0x454   : > { %v3962_v27 = vmax.f32 %v3961_v0, %v3781_v62  ;;  %v3790_v30 = vmax.f32 %v2465_v60, 0.0  ;;  %v2012_v52 = vadd.f32 %v2011_v35, %v10346_v42  ;;  %2850 = vmatmul.bf16.gmra.mxu3 %v9906_v29  ;;  %3019 = vmatmul.bf16.gmra.mxu0 %v9906_v29 }
 0x455   : > { %v2598_v61 = vpop.f32.mrf.mxu1 }
 0x456   : > { %v4032_v10 = vmax.f32 %v4031_v41, %v3790_v30  ;;  %v3420_v6 = vmax.f32 %v2012_v52, 0.0  ;;  %v2599_v18 = vadd.f32 %v2598_v61, %v10086_v46 }
 0x457   : > { %v2295_v16 = vpop.f32.mrf.mxu3 }
 0x458   : > { %v3848_v2 = vmax.f32 %v3847_v54, %v3420_v6  ;;  %v3679_v0 = vmax.f32 %v2599_v18, 0.0  ;;  %v2296_v43 = vadd.f32 %v2295_v16, %v9970_v40  ;;  %2637 = vmatmul.bf16.gmra.mxu1 %v10323_v58 }
 0x459   : > { %v2466_v47 = vpop.f32.mrf.mxu0 }
 0x45a   : > { %v4087_v32 = vmax.f32 %v4086_v4, %v3679_v0  ;;  %v3789_v25 = vmax.f32 %v2296_v43, 0.0  ;;  %v2467_v28 = vadd.f32 %v2466_v47, %v9963_v26 }
 0x45b   : > { %v2013_v62 = vpop.f32.mrf.mxu2 }
 0x45c   : > { %v3963_v60 = vmax.f32 %v3962_v27, %v3789_v25  ;;  %v3798_v38 = vmax.f32 %v2467_v28, 0.0  ;;  %v2014_v41 = vadd.f32 %v2013_v62, %v10346_v42 }
 0x45d   : > { %v2600_v21 = vpop.f32.mrf.mxu1 }
 0x45e   : > { %v4033_v35 = vmax.f32 %v4032_v10, %v3798_v38  ;;  %v3428_v5 = vmax.f32 %v2014_v41, 0.0  ;;  %v2601_v54 = vadd.f32 %v2600_v21, %v10086_v46 }
 0x45f   : > { %v2297_v30 = vpop.f32.mrf.mxu3 }
 0x460   : > { %v3849_v52 = vmax.f32 %v3848_v2, %v3428_v5  ;;  %v3687_v8 = vmax.f32 %v2601_v54, 0.0  ;;  %v2298_v44 = vadd.f32 %v2297_v30, %v9970_v40  ;;  %2055 = vmatmul.bf16.gmra.mxu2 %v10076_v19 }
 0x461   : > { %v2469_v4 = vpop.f32.mrf.mxu0 }
 0x462   : > { %v4088_v61 = vmax.f32 %v4087_v32, %v3687_v8  ;;  %v3797_v3 = vmax.f32 %v2298_v44, 0.0  ;;  %v2470_v27 = vadd.f32 %v2469_v4, %v9963_v26 }
 0x463   : > { %v2016_v6 = vpop.f32.mrf.mxu2 }
 0x464   : > { %v3964_v18 = vmax.f32 %v3963_v60, %v3797_v3  ;;  %v3806_v16 = vmax.f32 %v2470_v27, 0.0  ;;  %v2017_v10 = vadd.f32 %v2016_v6, %v10346_v42  ;;  %2855 = vmatmul.bf16.gmra.mxu3 %v9923_v20  ;;  %3024 = vmatmul.bf16.gmra.mxu0 %v9923_v20 }
 0x465   : > { %v2603_v2 = vpop.f32.mrf.mxu1 }
 0x466   : > { %v4034_v0 = vmax.f32 %v4033_v35, %v3806_v16  ;;  %v3436_v43 = vmax.f32 %v2017_v10, 0.0  ;;  %v2604_v47 = vadd.f32 %v2603_v2, %v10086_v46 }
 0x467   : > { %v2300_v25 = vpop.f32.mrf.mxu3 }
 0x468   : > { %v3850_v28 = vmax.f32 %v3849_v52, %v3436_v43  ;;  %v3695_v32 = vmax.f32 %v2604_v47, 0.0  ;;  %v2301_v62 = vadd.f32 %v2300_v25, %v9970_v40  ;;  %2642 = vmatmul.bf16.gmra.mxu1 %v10335_v1 }
 0x469   : > { %v2471_v60 = vpop.f32.mrf.mxu0 }
 0x46a   : > { %v4089_v38 = vmax.f32 %v4088_v61, %v3695_v32  ;;  %v3805_v41 = vmax.f32 %v2301_v62, 0.0  ;;  %v2472_v21 = vadd.f32 %v2471_v60, %v9963_v26 }
 0x46b   : > { %v2018_v5 = vpop.f32.mrf.mxu2 }
 0x46c   : > { %v3965_v54 = vmax.f32 %v3964_v18, %v3805_v41  ;;  %v3814_v30 = vmax.f32 %v2472_v21, 0.0  ;;  %v2019_v35 = vadd.f32 %v2018_v5, %v10346_v42 }
 0x46d   : > { %v2605_v8 = vpop.f32.mrf.mxu1 }
 0x46e   : > { %v4035_v44 = vmax.f32 %v4034_v0, %v3814_v30  ;;  %v3444_v4 = vmax.f32 %v2019_v35, 0.0  ;;  %v2606_v52 = vadd.f32 %v2605_v8, %v10086_v46 }
 0x46f   : > { %v2302_v3 = vpop.f32.mrf.mxu3 }
 0x470   : > { %v3851_v27 = vmax.f32 %v3850_v28, %v3444_v4  ;;  %v3703_v6 = vmax.f32 %v2606_v52, 0.0  ;;  %v2303_v16 = vadd.f32 %v2302_v3, %v9970_v40  ;;  %2060 = vmatmul.bf16.gmra.mxu2 %v10097_v56 }
 0x471   : > { %v2474_v61 = vpop.f32.mrf.mxu0 }
 0x472   : > { %v4090_v10 = vmax.f32 %v4089_v38, %v3703_v6  ;;  %v3813_v2 = vmax.f32 %v2303_v16, 0.0  ;;  %v2475_v18 = vadd.f32 %v2474_v61, %v9963_v26 }
 0x473   : > { %v2021_v43 = vpop.f32.mrf.mxu2 }
 0x474   : > { %v3966_v47 = vmax.f32 %v3965_v54, %v3813_v2  ;;  %v3822_v25 = vmax.f32 %v2475_v18, 0.0  ;;  %v2022_v0 = vadd.f32 %v2021_v43, %v10346_v42  ;;  %2860 = vmatmul.bf16.gmra.mxu3 %v9941_v63  ;;  %3029 = vmatmul.bf16.gmra.mxu0 %v9941_v63 }
 0x475   : > { %v2608_v28 = vpop.f32.mrf.mxu1 }
 0x476   : > { %v4036_v32 = vmax.f32 %v4035_v44, %v3822_v25  ;;  %v3452_v62 = vmax.f32 %v2022_v0, 0.0  ;;  %v2609_v60 = vadd.f32 %v2608_v28, %v10086_v46 }
 0x477   : > { %v2305_v41 = vpop.f32.mrf.mxu3 }
 0x478   : > { %v3852_v21 = vmax.f32 %v3851_v27, %v3452_v62  ;;  %v3711_v38 = vmax.f32 %v2609_v60, 0.0  ;;  %v2306_v5 = vadd.f32 %v2305_v41, %v9970_v40  ;;  %3163 = vmatmul.bf16.vlgmr.msra.gmra.mxu1 %v9841_v50  ;;  %v10458_v62 = vperm.slane %v10343_v15, 6 }
 0x479   : > { %v2476_v54 = vpop.f32.mrf.mxu0 }
 0x47a   : > { %v4091_v30 = vmax.f32 %v4090_v10, %v3711_v38  ;;  %v3821_v35 = vmax.f32 %v2306_v5, 0.0  ;;  %v2477_v8 = vadd.f32 %v2476_v54, %v9963_v26 }
 0x47b   : > { %v2023_v4 = vpop.f32.mrf.mxu2 }
 0x47c   : > { %v3967_v52 = vmax.f32 %v3966_v47, %v3821_v35  ;;  %v3830_v3 = vmax.f32 %v2477_v8, 0.0  ;;  %v2024_v44 = vadd.f32 %v2023_v4, %v10346_v42  ;;  %v10467_v8 = vperm.slane %v10343_v15, 5 }
 0x47d   : > { %v2610_v6 = vpop.f32.mrf.mxu1 }
 0x47e   : > { %v10450_v16 = vmax.f32 %v4036_v32, %v3830_v3  ;;  %v3460_v61 = vmax.f32 %v2024_v44, 0.0  ;;  %v2611_v27 = vadd.f32 %v2610_v6, %v10086_v46 }
 0x47f   : > { %v2307_v2 = vpop.f32.mrf.mxu3 }
 0x480   : > { %v3853_v18 = vmax.f32 %v3852_v21, %v3460_v61  ;;  %v3719_v43 = vmax.f32 %v2611_v27, 0.0  ;;  %v2308_v25 = vadd.f32 %v2307_v2, %v9970_v40  ;;  %2065 = vmatmul.bf16.gmra.mxu2 %v10115_v24 }
 0x481   : > { %v2995_v10 = vpop.f32.mrf.mxu0 }
 0x482   : > { %v4092_v26 = vmax.f32 %v4091_v30, %v3719_v43  ;;  %v3829_v0 = vmax.f32 %v2308_v25, 0.0  ;;  %v2996_v38 = vadd.f32 %v2995_v10, %v10458_v62 }
 0x483   : > { %v2026_v47 = vpop.f32.mrf.mxu2 }
 0x484   : > { %v10455_v28 = vmax.f32 %v3967_v52, %v3829_v0  ;;  %v2027_v32 = vadd.f32 %v2026_v47, %v10346_v42  ;;  %2865 = vmatmul.bf16.gmra.mxu3 %v9960_v23  ;;  %3034 = vmatmul.bf16.gmra.mxu0 %v9960_v23  ;;  %v3330_v3 = vmax.f32 %v2996_v38, 0.0 }
 0x485   : > { %v2613_v60 = vpop.f32.mrf.mxu1 }
 0x486   : > { %v3468_v41 = vmax.f32 %v2027_v32, 0.0  ;;  %v2614_v40 = vadd.f32 %v2613_v60, %v10086_v46 }
 0x487   : > { %v2826_v21 = vpop.f32.mrf.mxu3 }
 0x488   : > { %v3854_v5 = vmax.f32 %v3853_v18, %v3468_v41  ;;  %v3727_v54 = vmax.f32 %v2614_v40, 0.0  ;;  %3168 = vmatmul.bf16.gmra.mxu1 %v9854_v7  ;;  %v2827_v27 = vadd.f32 %v2826_v21, %v10467_v8 }
 0x489   : > { %v2997_v30 = vpop.f32.mrf.mxu0 }
 0x48a   : > { %v4093_v35 = vmax.f32 %v4092_v26, %v3727_v54  ;;  %v2998_v4 = vadd.f32 %v2997_v30, %v10458_v62  ;;  %v3329_v47 = vmax.f32 %v2827_v27, 0.0  ;;  %v8801_v30 = vld [vmem:[#allocation3 + $0xac] sm:$0xf0] }
 0x48b   : > { %v2028_v52 = vpop.f32.mrf.mxu2 }
 0x48c   : > { %v3338_v44 = vmax.f32 %v2998_v4, 0.0  ;;  %v2029_v6 = vadd.f32 %v2028_v52, %v10346_v42 }
 0x48d   : > { %v2615_v61 = vpop.f32.mrf.mxu1 }
 0x48e   : > { %v4251_v2 = vmax.f32 %v3330_v3, %v3338_v44  ;;  %v3476_v18 = vmax.f32 %v2029_v6, 0.0  ;;  %v2616_v43 = vadd.f32 %v2615_v61, %v10086_v46 }
 0x48f   : > { %v2828_v25 = vpop.f32.mrf.mxu3 }
 0x490   : > { %v3855_v10 = vmax.f32 %v3854_v5, %v3476_v18  ;;  %v3735_v26 = vmax.f32 %v2616_v43, 0.0  ;;  %v2829_v15 = vadd.f32 %v2828_v25, %v10467_v8  ;;  %2070 = vmatmul.bf16.gmra.mxu2 %v10138_v53  ;;  %v7318_v5 = vld [vmem:[#allocation3 + $0x90] sm:$0xf] }
 0x491   : > { %v3000_v0 = vpop.f32.mrf.mxu0  ;;  %v7319_v52 = vor.u32 %v8801_v30, %v7318_v5 }
 0x492   : > { %v4094_v32 = vmax.f32 %v4093_v35, %v3735_v26  ;;  %v3337_v60 = vmax.f32 %v2829_v15, 0.0  ;;  %v3001_v41 = vadd.f32 %v3000_v0, %v10458_v62 }
 0x493   : > { %v2031_v40 = vpop.f32.mrf.mxu2  ;;  %2653 = vmatpush.bf16.msra.mxu2 %v7319_v52 }
 0x494   : > { %v4182_v38 = vmax.f32 %v3329_v47, %v3337_v60  ;;  %v3346_v21 = vmax.f32 %v3001_v41, 0.0  ;;  %v2032_v54 = vadd.f32 %v2031_v40, %v10346_v42  ;;  %2870 = vmatmul.bf16.gmra.mxu3 %v9978_v13  ;;  %3039 = vmatmul.bf16.gmra.mxu0 %v9978_v13 }
 0x495   : > { %v2618_v4 = vpop.f32.mrf.mxu1 }
 0x496   : > { %v4252_v3 = vmax.f32 %v4251_v2, %v3346_v21  ;;  %v3484_v44 = vmax.f32 %v2032_v54, 0.0  ;;  %v2619_v35 = vadd.f32 %v2618_v4, %v10086_v46 }
 0x497   : > { %v2831_v6 = vpop.f32.mrf.mxu3 }
 0x498   : > { %v3856_v61 = vmax.f32 %v3855_v10, %v3484_v44  ;;  %v3743_v27 = vmax.f32 %v2619_v35, 0.0  ;;  %v2832_v18 = vadd.f32 %v2831_v6, %v10467_v8  ;;  %3173 = vmatmul.bf16.gmra.mxu1 %v9865_v31 }
 0x499   : > { %v3002_v43 = vpop.f32.mrf.mxu0 }
 0x49a   : > { %v4095_v25 = vmax.f32 %v4094_v32, %v3743_v27  ;;  %v3345_v26 = vmax.f32 %v2832_v18, 0.0  ;;  %v3003_v15 = vadd.f32 %v3002_v43, %v10458_v62 }
 0x49b   : > { %v2033_v0 = vpop.f32.mrf.mxu2 }
 0x49c   : > { %v4183_v47 = vmax.f32 %v4182_v38, %v3345_v26  ;;  %v3354_v60 = vmax.f32 %v3003_v15, 0.0  ;;  %v2034_v2 = vadd.f32 %v2033_v0, %v10346_v42 }
 0x49d   : > { %v2620_v41 = vpop.f32.mrf.mxu1 }
 0x49e   : > { %v4253_v40 = vmax.f32 %v4252_v3, %v3354_v60  ;;  %v3492_v21 = vmax.f32 %v2034_v2, 0.0  ;;  %v2621_v10 = vadd.f32 %v2620_v41, %v10086_v46 }
 0x49f   : > { %v2833_v54 = vpop.f32.mrf.mxu3 }
 0x4a0   : > { %v3857_v5 = vmax.f32 %v3856_v61, %v3492_v21  ;;  %v3751_v30 = vmax.f32 %v2621_v10, 0.0  ;;  %v2834_v4 = vadd.f32 %v2833_v54, %v10467_v8  ;;  %2075 = vmatmul.bf16.gmra.mxu2 %v10156_v45 }
 0x4a1   : > { %v3005_v32 = vpop.f32.mrf.mxu0 }
 0x4a2   : > { %v4096_v52 = vmax.f32 %v4095_v25, %v3751_v30  ;;  %v3353_v44 = vmax.f32 %v2834_v4, 0.0  ;;  %v3006_v38 = vadd.f32 %v3005_v32, %v10458_v62 }
 0x4a3   : > { %v2036_v35 = vpop.f32.mrf.mxu2 }
 0x4a4   : > { %v4184_v6 = vmax.f32 %v4183_v47, %v3353_v44  ;;  %v3362_v27 = vmax.f32 %v3006_v38, 0.0  ;;  %v2037_v3 = vadd.f32 %v2036_v35, %v10346_v42  ;;  %2875 = vmatmul.bf16.gmra.mxu3 %v9991_v17  ;;  %3044 = vmatmul.bf16.gmra.mxu0 %v9991_v17 }
 0x4a5   : > { %v2623_v61 = vpop.f32.mrf.mxu1 }
 0x4a6   : > { %v4254_v18 = vmax.f32 %v4253_v40, %v3362_v27  ;;  %v3500_v43 = vmax.f32 %v2037_v3, 0.0  ;;  %v2624_v26 = vadd.f32 %v2623_v61, %v10086_v46 }
 0x4a7   : > { %v2836_v15 = vpop.f32.mrf.mxu3 }
 0x4a8   : > { %v3858_v0 = vmax.f32 %v3857_v5, %v3500_v43  ;;  %v3759_v25 = vmax.f32 %v2624_v26, 0.0  ;;  %v2837_v60 = vadd.f32 %v2836_v15, %v10467_v8  ;;  %3178 = vmatmul.bf16.gmra.mxu1 %v9878_v57 }
 0x4a9   : > { %v3007_v47 = vpop.f32.mrf.mxu0 }
 0x4aa   : > { %v4097_v2 = vmax.f32 %v4096_v52, %v3759_v25  ;;  %v3361_v41 = vmax.f32 %v2837_v60, 0.0  ;;  %v3008_v21 = vadd.f32 %v3007_v47, %v10458_v62 }
 0x4ab   : > { %v2038_v10 = vpop.f32.mrf.mxu2 }
 0x4ac   : > { %v4185_v54 = vmax.f32 %v4184_v6, %v3361_v41  ;;  %v3370_v30 = vmax.f32 %v3008_v21, 0.0  ;;  %v2039_v40 = vadd.f32 %v2038_v10, %v10346_v42 }
 0x4ad   : > { %v2625_v4 = vpop.f32.mrf.mxu1 }
 0x4ae   : > { %v4255_v32 = vmax.f32 %v4254_v18, %v3370_v30  ;;  %v3508_v44 = vmax.f32 %v2039_v40, 0.0  ;;  %v2626_v5 = vadd.f32 %v2625_v4, %v10086_v46 }
 0x4af   : > { %v2838_v38 = vpop.f32.mrf.mxu3 }
 0x4b0   : > { %v3859_v35 = vmax.f32 %v3858_v0, %v3508_v44  ;;  %v3767_v27 = vmax.f32 %v2626_v5, 0.0  ;;  %v2839_v3 = vadd.f32 %v2838_v38, %v10467_v8  ;;  %2080 = vmatmul.bf16.gmra.mxu2 %v10174_v14 }
 0x4b1   : > { %v3010_v52 = vpop.f32.mrf.mxu0 }
 0x4b2   : > { %v4098_v61 = vmax.f32 %v4097_v2, %v3767_v27  ;;  %v3369_v43 = vmax.f32 %v2839_v3, 0.0  ;;  %v3011_v6 = vadd.f32 %v3010_v52, %v10458_v62 }
 0x4b3   : > { %v2041_v26 = vpop.f32.mrf.mxu2 }
 0x4b4   : > { %v4186_v15 = vmax.f32 %v4185_v54, %v3369_v43  ;;  %v3378_v25 = vmax.f32 %v3011_v6, 0.0  ;;  %v2042_v18 = vadd.f32 %v2041_v26, %v10346_v42  ;;  %2880 = vmatmul.bf16.gmra.mxu3 %v10007_v22  ;;  %3049 = vmatmul.bf16.gmra.mxu0 %v10007_v22 }
 0x4b5   : > { %v2628_v0 = vpop.f32.mrf.mxu1 }
 0x4b6   : > { %v4256_v60 = vmax.f32 %v4255_v32, %v3378_v25  ;;  %v3516_v47 = vmax.f32 %v2042_v18, 0.0  ;;  %v2629_v41 = vadd.f32 %v2628_v0, %v10086_v46 }
 0x4b7   : > { %v2841_v21 = vpop.f32.mrf.mxu3 }
 0x4b8   : > { %v3860_v10 = vmax.f32 %v3859_v35, %v3516_v47  ;;  %v3775_v2 = vmax.f32 %v2629_v41, 0.0  ;;  %v2842_v30 = vadd.f32 %v2841_v21, %v10467_v8  ;;  %3183 = vmatmul.bf16.gmra.mxu1 %v9891_v36 }
 0x4b9   : > { %v3012_v54 = vpop.f32.mrf.mxu0 }
 0x4ba   : > { %v4099_v40 = vmax.f32 %v4098_v61, %v3775_v2  ;;  %v3377_v4 = vmax.f32 %v2842_v30, 0.0  ;;  %v3013_v44 = vadd.f32 %v3012_v54, %v10458_v62 }
 0x4bb   : > { %v2043_v5 = vpop.f32.mrf.mxu2 }
 0x4bc   : > { %v4187_v38 = vmax.f32 %v4186_v15, %v3377_v4  ;;  %v3386_v27 = vmax.f32 %v3013_v44, 0.0  ;;  %v2044_v32 = vadd.f32 %v2043_v5, %v10346_v42 }
 0x4bd   : > { %v2630_v3 = vpop.f32.mrf.mxu1 }
 0x4be   : > { %v4257_v52 = vmax.f32 %v4256_v60, %v3386_v27  ;;  %v3524_v43 = vmax.f32 %v2044_v32, 0.0  ;;  %v2631_v35 = vadd.f32 %v2630_v3, %v10086_v46 }
 0x4bf   : > { %v2843_v6 = vpop.f32.mrf.mxu3 }
 0x4c0   : > { %v3861_v26 = vmax.f32 %v3860_v10, %v3524_v43  ;;  %v3783_v25 = vmax.f32 %v2631_v35, 0.0  ;;  %v2844_v18 = vadd.f32 %v2843_v6, %v10467_v8  ;;  %2085 = vmatmul.bf16.gmra.mxu2 %v10192_v48 }
 0x4c1   : > { %v3015_v61 = vpop.f32.mrf.mxu0 }
 0x4c2   : > { %v4100_v0 = vmax.f32 %v4099_v40, %v3783_v25  ;;  %v3385_v47 = vmax.f32 %v2844_v18, 0.0  ;;  %v3016_v15 = vadd.f32 %v3015_v61, %v10458_v62 }
 0x4c3   : > { %v2046_v41 = vpop.f32.mrf.mxu2 }
 0x4c4   : > { %v4188_v21 = vmax.f32 %v4187_v38, %v3385_v47  ;;  %v3394_v2 = vmax.f32 %v3016_v15, 0.0  ;;  %v2047_v60 = vadd.f32 %v2046_v41, %v10346_v42  ;;  %2885 = vmatmul.bf16.gmra.mxu3 %v10028_v9  ;;  %3054 = vmatmul.bf16.gmra.mxu0 %v10028_v9 }
 0x4c5   : > { %v2633_v10 = vpop.f32.mrf.mxu1 }
 0x4c6   : > { %v4258_v30 = vmax.f32 %v4257_v52, %v3394_v2  ;;  %v3532_v54 = vmax.f32 %v2047_v60, 0.0  ;;  %v2634_v4 = vadd.f32 %v2633_v10, %v10086_v46 }
 0x4c7   : > { %v2846_v44 = vpop.f32.mrf.mxu3 }
 0x4c8   : > { %v3862_v5 = vmax.f32 %v3861_v26, %v3532_v54  ;;  %v3791_v40 = vmax.f32 %v2634_v4, 0.0  ;;  %v2847_v27 = vadd.f32 %v2846_v44, %v10467_v8  ;;  %3188 = vmatmul.bf16.gmra.mxu1 %v9906_v29 }
 0x4c9   : > { %v3017_v38 = vpop.f32.mrf.mxu0 }
 0x4ca   : > { %v4101_v32 = vmax.f32 %v4100_v0, %v3791_v40  ;;  %v3393_v3 = vmax.f32 %v2847_v27, 0.0  ;;  %v3018_v43 = vadd.f32 %v3017_v38, %v10458_v62 }
 0x4cb   : > { %v2048_v35 = vpop.f32.mrf.mxu2 }
 0x4cc   : > { %v4189_v6 = vmax.f32 %v4188_v21, %v3393_v3  ;;  %v3402_v25 = vmax.f32 %v3018_v43, 0.0  ;;  %v2049_v52 = vadd.f32 %v2048_v35, %v10346_v42 }
 0x4cd   : > { %v2635_v18 = vpop.f32.mrf.mxu1 }
 0x4ce   : > { %v4259_v61 = vmax.f32 %v4258_v30, %v3402_v25  ;;  %v3540_v47 = vmax.f32 %v2049_v52, 0.0  ;;  %v2636_v26 = vadd.f32 %v2635_v18, %v10086_v46 }
 0x4cf   : > { %v2848_v15 = vpop.f32.mrf.mxu3 }
 0x4d0   : > { %v3863_v41 = vmax.f32 %v3862_v5, %v3540_v47  ;;  %v3799_v2 = vmax.f32 %v2636_v26, 0.0  ;;  %v2849_v60 = vadd.f32 %v2848_v15, %v10467_v8  ;;  %2090 = vmatmul.bf16.gmra.mxu2 %v10210_v34 }
 0x4d1   : > { %v3020_v0 = vpop.f32.mrf.mxu0 }
 0x4d2   : > { %v4102_v10 = vmax.f32 %v4101_v32, %v3799_v2  ;;  %v3401_v54 = vmax.f32 %v2849_v60, 0.0  ;;  %v3021_v21 = vadd.f32 %v3020_v0, %v10458_v62 }
 0x4d3   : > { %v2051_v4 = vpop.f32.mrf.mxu2 }
 0x4d4   : > { %v4190_v44 = vmax.f32 %v4189_v6, %v3401_v54  ;;  %v3410_v40 = vmax.f32 %v3021_v21, 0.0  ;;  %v2052_v30 = vadd.f32 %v2051_v4, %v10346_v42  ;;  %2890 = vmatmul.bf16.gmra.mxu3 %v10044_v33  ;;  %3059 = vmatmul.bf16.gmra.mxu0 %v10044_v33 }
 0x4d5   : > { %v2638_v5 = vpop.f32.mrf.mxu1 }
 0x4d6   : > { %v4260_v27 = vmax.f32 %v4259_v61, %v3410_v40  ;;  %v3548_v38 = vmax.f32 %v2052_v30, 0.0  ;;  %v2639_v3 = vadd.f32 %v2638_v5, %v10086_v46 }
 0x4d7   : > { %v2851_v43 = vpop.f32.mrf.mxu3 }
 0x4d8   : > { %v3864_v35 = vmax.f32 %v3863_v41, %v3548_v38  ;;  %v3807_v32 = vmax.f32 %v2639_v3, 0.0  ;;  %v2852_v25 = vadd.f32 %v2851_v43, %v10467_v8  ;;  %3193 = vmatmul.bf16.gmra.mxu1 %v9923_v20  ;;  %v7286_v3 = vld [vmem:[#allocation3 + $0x50] sm:$0xf] }
 0x4d9   : > { %v3022_v6 = vpop.f32.mrf.mxu0  ;;  %v8793_v43 = vld [vmem:[#allocation3 + $0x6c] sm:$0xf0] }
 0x4da   : > { %v4103_v52 = vmax.f32 %v4102_v10, %v3807_v32  ;;  %v3409_v18 = vmax.f32 %v2852_v25, 0.0  ;;  %v3023_v47 = vadd.f32 %v3022_v6, %v10458_v62  ;;  %v7287_v25 = vor.u32 %v8793_v43, %v7286_v3 }
 0x4db   : > { %v2053_v26 = vpop.f32.mrf.mxu2 }
 0x4dc   : > { %v4191_v15 = vmax.f32 %v4190_v44, %v3409_v18  ;;  %v3418_v2 = vmax.f32 %v3023_v47, 0.0  ;;  %v2054_v61 = vadd.f32 %v2053_v26, %v10346_v42  ;;  %2654 = vmatpush.bf16.msra.mxu2 %v7287_v25 }
 0x4dd   : > { %v2640_v60 = vpop.f32.mrf.mxu1 }
 0x4de   : > { %v4261_v0 = vmax.f32 %v4260_v27, %v3418_v2  ;;  %v3556_v54 = vmax.f32 %v2054_v61, 0.0  ;;  %v2641_v41 = vadd.f32 %v2640_v60, %v10086_v46  ;;  %v4038_v2 = vrot.slane %v10450_v16, 4 }
 0x4df   : > { %v2853_v21 = vpop.f32.mrf.mxu3 }
 0x4e0   : > { %v3865_v4 = vmax.f32 %v3864_v35, %v3556_v54  ;;  %v3815_v40 = vmax.f32 %v2641_v41, 0.0  ;;  %v2854_v30 = vadd.f32 %v2853_v21, %v10467_v8  ;;  %2095 = vmatmul.bf16.gmra.mxu2 %v10224_v39 }
 0x4e1   : > { %v3025_v10 = vpop.f32.mrf.mxu0 }
 0x4e2   : > { %v4104_v5 = vmax.f32 %v4103_v52, %v3815_v40  ;;  %v3417_v38 = vmax.f32 %v2854_v30, 0.0  ;;  %v3026_v44 = vadd.f32 %v3025_v10, %v10458_v62  ;;  %v4039_v10 = vmax.f32 %v10450_v16, %v4038_v2 }
 0x4e3   : > { %v2056_v32 = vpop.f32.mrf.mxu2 }
 0x4e4   : > { %v4192_v27 = vmax.f32 %v4191_v15, %v3417_v38  ;;  %v3426_v6 = vmax.f32 %v3026_v44, 0.0  ;;  %v2057_v18 = vadd.f32 %v2056_v32, %v10346_v42  ;;  %2895 = vmatmul.bf16.gmra.mxu3 %v10060_v12  ;;  %3064 = vmatmul.bf16.gmra.mxu0 %v10060_v12 }
 0x4e5   : > { %v2643_v35 = vpop.f32.mrf.mxu1 }
 0x4e6   : > { %v4262_v47 = vmax.f32 %v4261_v0, %v3426_v6  ;;  %v3564_v26 = vmax.f32 %v2057_v18, 0.0  ;;  %v2644_v52 = vadd.f32 %v2643_v35, %v10086_v46  ;;  %v4040_v6 = vrot.slane %v4039_v10, 2 }
 0x4e7   : > { %v2856_v61 = vpop.f32.mrf.mxu3 }
 0x4e8   : > { %v3866_v60 = vmax.f32 %v3865_v4, %v3564_v26  ;;  %v3823_v54 = vmax.f32 %v2644_v52, 0.0  ;;  %v2857_v15 = vadd.f32 %v2856_v61, %v10467_v8  ;;  %3198 = vmatmul.bf16.gmra.mxu1 %v9941_v63  ;;  %v4041_v61 = vmax.f32 %v4039_v10, %v4040_v6 }
 0x4e9   : > { %v3027_v41 = vpop.f32.mrf.mxu0 }
 0x4ea   : > { %v4105_v21 = vmax.f32 %v4104_v5, %v3823_v54  ;;  %v3425_v40 = vmax.f32 %v2857_v15, 0.0  ;;  %v3028_v30 = vadd.f32 %v3027_v41, %v10458_v62 }
 0x4eb   : > { %v2058_v0 = vpop.f32.mrf.mxu2 }
 0x4ec   : > { %v4193_v38 = vmax.f32 %v4192_v27, %v3425_v40  ;;  %v3434_v44 = vmax.f32 %v3028_v30, 0.0  ;;  %v2059_v3 = vadd.f32 %v2058_v0, %v10346_v42 }
 0x4ed   : > { %v2645_v43 = vpop.f32.mrf.mxu1 }
 0x4ee   : > { %v4263_v32 = vmax.f32 %v4262_v47, %v3434_v44  ;;  %v3572_v4 = vmax.f32 %v2059_v3, 0.0  ;;  %v2646_v25 = vadd.f32 %v2645_v43, %v10086_v46  ;;  %v4042_v44 = vrot.slane %v4041_v61, 1 }
 0x4ef   : > { %v2858_v18 = vpop.f32.mrf.mxu3 }
 0x4f0   : > { %v3867_v35 = vmax.f32 %v3866_v60, %v3572_v4  ;;  %v3831_v26 = vmax.f32 %v2646_v25, 0.0  ;;  %v2859_v5 = vadd.f32 %v2858_v18, %v10467_v8  ;;  %2100 = vmatmul.bf16.gmra.mxu2 %v10238_v51 }
 0x4f1   : > { %v3030_v52 = vpop.f32.mrf.mxu0 }
 0x4f2   : > { %v4106_v16 = vmax.f32 %v4105_v21, %v3831_v26  ;;  %v3433_v2 = vmax.f32 %v2859_v5, 0.0  ;;  %v3031_v27 = vadd.f32 %v3030_v52, %v10458_v62  ;;  %v9284_v21 = vld [vmem:[%s11219_s6] sm:$0xff]  ;;  %v4043_v26 = vmax.f32 %v4041_v61, %v4042_v44 }
 0x4f3   : > { %v2061_v54 = vpop.f32.mrf.mxu2  ;;  %v10556_v10 = vperm.slane %v9284_v21, 7 }
 0x4f4   : > { %v4107_v15 = vrot.slane %v4106_v16, 4  ;;  %v4194_v47 = vmax.f32 %v4193_v38, %v3433_v2  ;;  %v3442_v41 = vmax.f32 %v3031_v27, 0.0  ;;  %v2062_v46 = vadd.f32 %v2061_v54, %v10346_v42  ;;  %2900 = vmatmul.bf16.gmra.mxu3 %v10076_v19  ;;  %3069 = vmatmul.bf16.gmra.mxu0 %v10076_v19 }
 0x4f5   : > { %v3164_v60 = vpop.f32.mrf.mxu1  ;;  %v4398_v21 = vrot.slane %v4043_v26, 6 }
 0x4f6   : > { %v4108_v40 = vmax.f32 %v4106_v16, %v4107_v15  ;;  %v4264_v30 = vmax.f32 %v4263_v32, %v3442_v41  ;;  %v3580_v0 = vmax.f32 %v2062_v46, 0.0  ;;  %v3165_v5 = vadd.f32 %v3164_v60, %v10556_v10 }
 0x4f7   : > { %v2861_v3 = vpop.f32.mrf.mxu3 }
 0x4f8   : > { %v4109_v38 = vrot.slane %v4108_v40, 2  ;;  %v3868_v43 = vmax.f32 %v3867_v35, %v3580_v0  ;;  %v2862_v4 = vadd.f32 %v2861_v3, %v10467_v8  ;;  %3203 = vmatmul.bf16.gmra.mxu1 %v9960_v23 }
 0x4f9   : > { %v3032_v25 = vpop.f32.mrf.mxu0 }
 0x4fa   : > { %v4110_v6 = vmax.f32 %v4108_v40, %v4109_v38  ;;  %v3441_v18 = vmax.f32 %v2862_v4, 0.0  ;;  %v3033_v32 = vadd.f32 %v3032_v25, %v10458_v62  ;;  %v3331_v40 = vmax.f32 %v3165_v5, 0.0 }
 0x4fb   : > { %v2063_v52 = vpop.f32.mrf.mxu2 }
 0x4fc   : > { %v4111_v16 = vrot.slane %v4110_v6, 1  ;;  %v4195_v2 = vmax.f32 %v4194_v47, %v3441_v18  ;;  %v3450_v27 = vmax.f32 %v3033_v32, 0.0  ;;  %v2064_v54 = vadd.f32 %v2063_v52, %v10346_v42 }
 0x4fd   : > { %v3166_v15 = vpop.f32.mrf.mxu1 }
 0x4fe   : > { %v4112_v35 = vmax.f32 %v4110_v6, %v4111_v16  ;;  %v4265_v41 = vmax.f32 %v4264_v30, %v3450_v27  ;;  %v3588_v46 = vmax.f32 %v2064_v54, 0.0  ;;  %v3167_v0 = vadd.f32 %v3166_v15, %v10556_v10 }
 0x4ff   : > { %v2863_v3 = vpop.f32.mrf.mxu3 }
 0x500   : > { %v4399_v38 = vrot.slane %v4112_v35, 5  ;;  %v3869_v61 = vmax.f32 %v3868_v43, %v3588_v46  ;;  %v3339_v44 = vmax.f32 %v3167_v0, 0.0  ;;  %v2864_v60 = vadd.f32 %v2863_v3, %v10467_v8  ;;  %2105 = vmatmul.bf16.gmra.mxu2 %v10252_v49 }
 0x501   : > { %v3035_v47 = vpop.f32.mrf.mxu0 }
 0x502   : > { %v10566_v4 = vsel %vm4406_vm3, %v4398_v21, %v4399_v38  ;;  %v4320_v25 = vmax.f32 %v3331_v40, %v3339_v44  ;;  %v3449_v6 = vmax.f32 %v2864_v60, 0.0  ;;  %v3036_v30 = vadd.f32 %v3035_v47, %v10458_v62 }
 0x503   : > { %v2066_v18 = vpop.f32.mrf.mxu2 }
 0x504   : > { %v4196_v32 = vmax.f32 %v4195_v2, %v3449_v6  ;;  %v3458_v26 = vmax.f32 %v3036_v30, 0.0  ;;  %v2067_v5 = vadd.f32 %v2066_v18, %v10346_v42  ;;  %2905 = vmatmul.bf16.gmra.mxu3 %v10097_v56  ;;  %3074 = vmatmul.bf16.gmra.mxu0 %v10097_v56 }
 0x505   : > { %v3169_v43 = vpop.f32.mrf.mxu1 }
 0x506   : > { %v4266_v52 = vmax.f32 %v4265_v41, %v3458_v26  ;;  %v3596_v16 = vmax.f32 %v2067_v5, 0.0  ;;  %v3170_v27 = vadd.f32 %v3169_v43, %v10556_v10 }
 0x507   : > { %v2866_v54 = vpop.f32.mrf.mxu3 }
 0x508   : > { %v3870_v15 = vmax.f32 %v3869_v61, %v3596_v16  ;;  %v3347_v35 = vmax.f32 %v3170_v27, 0.0  ;;  %v2867_v46 = vadd.f32 %v2866_v54, %v10467_v8  ;;  %3208 = vmatmul.bf16.gmra.mxu1 %v9978_v13 }
 0x509   : > { %v3037_v2 = vpop.f32.mrf.mxu0 }
 0x50a   : > { %v4321_v0 = vmax.f32 %v4320_v25, %v3347_v35  ;;  %v3457_v21 = vmax.f32 %v2867_v46, 0.0  ;;  %v3038_v40 = vadd.f32 %v3037_v2, %v10458_v62  ;;  %v8785_v46 = vld [vmem:[#allocation3 + $0x2c] sm:$0xf0] }
 0x50b   : > { %v2068_v3 = vpop.f32.mrf.mxu2 }
 0x50c   : > { %v4197_v38 = vmax.f32 %v4196_v32, %v3457_v21  ;;  %v3466_v44 = vmax.f32 %v3038_v40, 0.0  ;;  %v2069_v41 = vadd.f32 %v2068_v3, %v10346_v42 }
 0x50d   : > { %v3171_v60 = vpop.f32.mrf.mxu1 }
 0x50e   : > { %v4267_v47 = vmax.f32 %v4266_v52, %v3466_v44  ;;  %v3604_v6 = vmax.f32 %v2069_v41, 0.0  ;;  %v3172_v61 = vadd.f32 %v3171_v60, %v10556_v10 }
 0x50f   : > { %v2868_v30 = vpop.f32.mrf.mxu3 }
 0x510   : > { %v3871_v18 = vmax.f32 %v3870_v15, %v3604_v6  ;;  %v3355_v26 = vmax.f32 %v3172_v61, 0.0  ;;  %v2869_v5 = vadd.f32 %v2868_v30, %v10467_v8  ;;  %2110 = vmatmul.bf16.gmra.mxu2 %v10266_v37  ;;  %v7254_v15 = vld [vmem:[#allocation3 + $0x10] sm:$0xf] }
 0x511   : > { %v3040_v25 = vpop.f32.mrf.mxu0  ;;  %v7255_v21 = vor.u32 %v8785_v46, %v7254_v15 }
 0x512   : > { %v4322_v43 = vmax.f32 %v4321_v0, %v3355_v26  ;;  %v3465_v16 = vmax.f32 %v2869_v5, 0.0  ;;  %v3041_v32 = vadd.f32 %v3040_v25, %v10458_v62 }
 0x513   : > { %v2071_v27 = vpop.f32.mrf.mxu2  ;;  %2655 = vmatpush.bf16.msra.mxu2 %v7255_v21 }
 0x514   : > { %v4198_v54 = vmax.f32 %v4197_v38, %v3465_v16  ;;  %v3474_v35 = vmax.f32 %v3041_v32, 0.0  ;;  %v2072_v52 = vadd.f32 %v2071_v27, %v10346_v42  ;;  %2910 = vmatmul.bf16.gmra.mxu3 %v10115_v24  ;;  %3079 = vmatmul.bf16.gmra.mxu0 %v10115_v24 }
 0x515   : > { %v3174_v2 = vpop.f32.mrf.mxu1 }
 0x516   : > { %v4268_v40 = vmax.f32 %v4267_v47, %v3474_v35  ;;  %v3612_v3 = vmax.f32 %v2072_v52, 0.0  ;;  %v3175_v0 = vadd.f32 %v3174_v2, %v10556_v10 }
 0x517   : > { %v2871_v44 = vpop.f32.mrf.mxu3 }
 0x518   : > { %v3872_v41 = vmax.f32 %v3871_v18, %v3612_v3  ;;  %v3363_v60 = vmax.f32 %v3175_v0, 0.0  ;;  %v2872_v38 = vadd.f32 %v2871_v44, %v10467_v8  ;;  %3213 = vmatmul.bf16.gmra.mxu1 %v9991_v17 }
 0x519   : > { %v3042_v6 = vpop.f32.mrf.mxu0 }
 0x51a   : > { %v4323_v61 = vmax.f32 %v4322_v43, %v3363_v60  ;;  %v3473_v30 = vmax.f32 %v2872_v38, 0.0  ;;  %v3043_v26 = vadd.f32 %v3042_v6, %v10458_v62 }
 0x51b   : > { %v2073_v5 = vpop.f32.mrf.mxu2 }
 0x51c   : > { %v4199_v25 = vmax.f32 %v4198_v54, %v3473_v30  ;;  %v3482_v16 = vmax.f32 %v3043_v26, 0.0  ;;  %v2074_v47 = vadd.f32 %v2073_v5, %v10346_v42 }
 0x51d   : > { %v3176_v32 = vpop.f32.mrf.mxu1 }
 0x51e   : > { %v4269_v27 = vmax.f32 %v4268_v40, %v3482_v16  ;;  %v3620_v35 = vmax.f32 %v2074_v47, 0.0  ;;  %v3177_v18 = vadd.f32 %v3176_v32, %v10556_v10 }
 0x51f   : > { %v2873_v52 = vpop.f32.mrf.mxu3 }
 0x520   : > { %v3873_v15 = vmax.f32 %v3872_v41, %v3620_v35  ;;  %v3371_v46 = vmax.f32 %v3177_v18, 0.0  ;;  %v2874_v2 = vadd.f32 %v2873_v52, %v10467_v8  ;;  %2115 = vmatmul.bf16.gmra.mxu2 %v10280_v59 }
 0x521   : > { %v3045_v43 = vpop.f32.mrf.mxu0 }
 0x522   : > { %v4324_v21 = vmax.f32 %v4323_v61, %v3371_v46  ;;  %v3481_v3 = vmax.f32 %v2874_v2, 0.0  ;;  %v3046_v54 = vadd.f32 %v3045_v43, %v10458_v62 }
 0x523   : > { %v2076_v0 = vpop.f32.mrf.mxu2 }
 0x524   : > { %v4200_v44 = vmax.f32 %v4199_v25, %v3481_v3  ;;  %v3490_v60 = vmax.f32 %v3046_v54, 0.0  ;;  %v2077_v40 = vadd.f32 %v2076_v0, %v10346_v42  ;;  %2915 = vmatmul.bf16.gmra.mxu3 %v10138_v53  ;;  %3084 = vmatmul.bf16.gmra.mxu0 %v10138_v53 }
 0x525   : > { %v3179_v41 = vpop.f32.mrf.mxu1 }
 0x526   : > { %v4270_v38 = vmax.f32 %v4269_v27, %v3490_v60  ;;  %v3628_v6 = vmax.f32 %v2077_v40, 0.0  ;;  %v3180_v30 = vadd.f32 %v3179_v41, %v10556_v10 }
 0x527   : > { %v2876_v26 = vpop.f32.mrf.mxu3 }
 0x528   : > { %v3874_v5 = vmax.f32 %v3873_v15, %v3628_v6  ;;  %v3379_v61 = vmax.f32 %v3180_v30, 0.0  ;;  %v2877_v16 = vadd.f32 %v2876_v26, %v10467_v8  ;;  %3218 = vmatmul.bf16.gmra.mxu1 %v10007_v22 }
 0x529   : > { %v3047_v25 = vpop.f32.mrf.mxu0 }
 0x52a   : > { %v4325_v47 = vmax.f32 %v4324_v21, %v3379_v61  ;;  %v3489_v32 = vmax.f32 %v2877_v16, 0.0  ;;  %v3048_v35 = vadd.f32 %v3047_v25, %v10458_v62 }
 0x52b   : > { %v2078_v18 = vpop.f32.mrf.mxu2 }
 0x52c   : > { %v4201_v52 = vmax.f32 %v4200_v44, %v3489_v32  ;;  %v3498_v46 = vmax.f32 %v3048_v35, 0.0  ;;  %v2079_v27 = vadd.f32 %v2078_v18, %v10346_v42 }
 0x52d   : > { %v3181_v2 = vpop.f32.mrf.mxu1 }
 0x52e   : > { %v4271_v43 = vmax.f32 %v4270_v38, %v3498_v46  ;;  %v3636_v3 = vmax.f32 %v2079_v27, 0.0  ;;  %v3182_v15 = vadd.f32 %v3181_v2, %v10556_v10 }
 0x52f   : > { %v2878_v54 = vpop.f32.mrf.mxu3 }
 0x530   : > { %v3875_v0 = vmax.f32 %v3874_v5, %v3636_v3  ;;  %v3387_v60 = vmax.f32 %v3182_v15, 0.0  ;;  %v2879_v40 = vadd.f32 %v2878_v54, %v10467_v8  ;;  %2120 = vmatmul.bf16.gmra.mxu2 %v10294_v55 }
 0x531   : > { %v3050_v21 = vpop.f32.mrf.mxu0 }
 0x532   : > { %v4326_v41 = vmax.f32 %v4325_v47, %v3387_v60  ;;  %v3497_v6 = vmax.f32 %v2879_v40, 0.0  ;;  %v3051_v44 = vadd.f32 %v3050_v21, %v10458_v62 }
 0x533   : > { %v2081_v30 = vpop.f32.mrf.mxu2 }
 0x534   : > { %v4202_v26 = vmax.f32 %v4201_v52, %v3497_v6  ;;  %v3506_v61 = vmax.f32 %v3051_v44, 0.0  ;;  %v2082_v38 = vadd.f32 %v2081_v30, %v10346_v42  ;;  %2920 = vmatmul.bf16.gmra.mxu3 %v10156_v45  ;;  %3089 = vmatmul.bf16.gmra.mxu0 %v10156_v45 }
 0x535   : > { %v3184_v5 = vpop.f32.mrf.mxu1 }
 0x536   : > { %v4272_v16 = vmax.f32 %v4271_v43, %v3506_v61  ;;  %v3644_v25 = vmax.f32 %v2082_v38, 0.0  ;;  %v3185_v32 = vadd.f32 %v3184_v5, %v10556_v10 }
 0x537   : > { %v2881_v35 = vpop.f32.mrf.mxu3 }
 0x538   : > { %v3876_v18 = vmax.f32 %v3875_v0, %v3644_v25  ;;  %v3395_v47 = vmax.f32 %v3185_v32, 0.0  ;;  %v2882_v46 = vadd.f32 %v2881_v35, %v10467_v8  ;;  %3223 = vmatmul.bf16.gmra.mxu1 %v10028_v9 }
 0x539   : > { %v3052_v52 = vpop.f32.mrf.mxu0 }
 0x53a   : > { %v4327_v27 = vmax.f32 %v4326_v41, %v3395_v47  ;;  %v3505_v2 = vmax.f32 %v2882_v46, 0.0  ;;  %v3053_v3 = vadd.f32 %v3052_v52, %v10458_v62 }
 0x53b   : > { %v2083_v15 = vpop.f32.mrf.mxu2 }
 0x53c   : > { %v4203_v54 = vmax.f32 %v4202_v26, %v3505_v2  ;;  %v3514_v60 = vmax.f32 %v3053_v3, 0.0  ;;  %v2084_v43 = vadd.f32 %v2083_v15, %v10346_v42 }
 0x53d   : > { %v3186_v40 = vpop.f32.mrf.mxu1 }
 0x53e   : > { %v4273_v21 = vmax.f32 %v4272_v16, %v3514_v60  ;;  %v3652_v6 = vmax.f32 %v2084_v43, 0.0  ;;  %v3187_v0 = vadd.f32 %v3186_v40, %v10556_v10 }
 0x53f   : > { %v2883_v44 = vpop.f32.mrf.mxu3 }
 0x540   : > { %v3877_v30 = vmax.f32 %v3876_v18, %v3652_v6  ;;  %v3403_v61 = vmax.f32 %v3187_v0, 0.0  ;;  %v2884_v38 = vadd.f32 %v2883_v44, %v10467_v8  ;;  %2125 = vmatmul.bf16.gmra.mxu2 %v10308_v11 }
 0x541   : > { %v3055_v41 = vpop.f32.mrf.mxu0 }
 0x542   : > { %v4328_v5 = vmax.f32 %v4327_v27, %v3403_v61  ;;  %v3513_v25 = vmax.f32 %v2884_v38, 0.0  ;;  %v3056_v26 = vadd.f32 %v3055_v41, %v10458_v62 }
 0x543   : > { %v2086_v32 = vpop.f32.mrf.mxu2 }
 0x544   : > { %v4204_v35 = vmax.f32 %v4203_v54, %v3513_v25  ;;  %v3522_v47 = vmax.f32 %v3056_v26, 0.0  ;;  %v2087_v16 = vadd.f32 %v2086_v32, %v10346_v42  ;;  %2925 = vmatmul.bf16.gmra.mxu3 %v10174_v14  ;;  %3094 = vmatmul.bf16.gmra.mxu0 %v10174_v14 }
 0x545   : > { %v3189_v18 = vpop.f32.mrf.mxu1 }
 0x546   : > { %v4274_v46 = vmax.f32 %v4273_v21, %v3522_v47  ;;  %v3660_v52 = vmax.f32 %v2087_v16, 0.0  ;;  %v3190_v2 = vadd.f32 %v3189_v18, %v10556_v10 }
 0x547   : > { %v2886_v3 = vpop.f32.mrf.mxu3 }
 0x548   : > { %v3878_v15 = vmax.f32 %v3877_v30, %v3660_v52  ;;  %v3411_v27 = vmax.f32 %v3190_v2, 0.0  ;;  %v2887_v60 = vadd.f32 %v2886_v3, %v10467_v8  ;;  %3228 = vmatmul.bf16.gmra.mxu1 %v10044_v33 }
 0x549   : > { %v3057_v54 = vpop.f32.mrf.mxu0 }
 0x54a   : > { %v4329_v43 = vmax.f32 %v4328_v5, %v3411_v27  ;;  %v3521_v40 = vmax.f32 %v2887_v60, 0.0  ;;  %v3058_v6 = vadd.f32 %v3057_v54, %v10458_v62 }
 0x54b   : > { %v2088_v0 = vpop.f32.mrf.mxu2 }
 0x54c   : > { %v4205_v44 = vmax.f32 %v4204_v35, %v3521_v40  ;;  %v3530_v61 = vmax.f32 %v3058_v6, 0.0  ;;  %v2089_v21 = vadd.f32 %v2088_v0, %v10346_v42 }
 0x54d   : > { %v3191_v38 = vpop.f32.mrf.mxu1 }
 0x54e   : > { %v4275_v41 = vmax.f32 %v4274_v46, %v3530_v61  ;;  %v3668_v25 = vmax.f32 %v2089_v21, 0.0  ;;  %v3192_v30 = vadd.f32 %v3191_v38, %v10556_v10 }
 0x54f   : > { %v2888_v26 = vpop.f32.mrf.mxu3 }
 0x550   : > { %v3879_v32 = vmax.f32 %v3878_v15, %v3668_v25  ;;  %v3419_v47 = vmax.f32 %v3192_v30, 0.0  ;;  %v2889_v16 = vadd.f32 %v2888_v26, %v10467_v8  ;;  %2130 = vmatmul.bf16.gmra.mxu2 %v10323_v58 }
 0x551   : > { %v3060_v5 = vpop.f32.mrf.mxu0 }
 0x552   : > { %v4330_v18 = vmax.f32 %v4329_v43, %v3419_v47  ;;  %v3529_v52 = vmax.f32 %v2889_v16, 0.0  ;;  %v3061_v35 = vadd.f32 %v3060_v5, %v10458_v62 }
 0x553   : > { %v2091_v2 = vpop.f32.mrf.mxu2 }
 0x554   : > { %v4206_v3 = vmax.f32 %v4205_v44, %v3529_v52  ;;  %v3538_v27 = vmax.f32 %v3061_v35, 0.0  ;;  %v2092_v46 = vadd.f32 %v2091_v2, %v10346_v42  ;;  %2930 = vmatmul.bf16.gmra.mxu3 %v10192_v48  ;;  %3099 = vmatmul.bf16.gmra.mxu0 %v10192_v48 }
 0x555   : > { %v3194_v15 = vpop.f32.mrf.mxu1 }
 0x556   : > { %v4276_v60 = vmax.f32 %v4275_v41, %v3538_v27  ;;  %v3676_v54 = vmax.f32 %v2092_v46, 0.0  ;;  %v3195_v40 = vadd.f32 %v3194_v15, %v10556_v10 }
 0x557   : > { %v2891_v6 = vpop.f32.mrf.mxu3 }
 0x558   : > { %v3880_v0 = vmax.f32 %v3879_v32, %v3676_v54  ;;  %v3427_v43 = vmax.f32 %v3195_v40, 0.0  ;;  %v2892_v61 = vadd.f32 %v2891_v6, %v10467_v8  ;;  %3233 = vmatmul.bf16.gmra.mxu1 %v10060_v12 }
 0x559   : > { %v3062_v44 = vpop.f32.mrf.mxu0 }
 0x55a   : > { %v4331_v21 = vmax.f32 %v4330_v18, %v3427_v43  ;;  %v3537_v38 = vmax.f32 %v2892_v61, 0.0  ;;  %v3063_v25 = vadd.f32 %v3062_v44, %v10458_v62 }
 0x55b   : > { %v2093_v30 = vpop.f32.mrf.mxu2 }
 0x55c   : > { %v4207_v26 = vmax.f32 %v4206_v3, %v3537_v38  ;;  %v3546_v47 = vmax.f32 %v3063_v25, 0.0  ;;  %v2094_v41 = vadd.f32 %v2093_v30, %v10346_v42 }
 0x55d   : > { %v3196_v16 = vpop.f32.mrf.mxu1 }
 0x55e   : > { %v4277_v5 = vmax.f32 %v4276_v60, %v3546_v47  ;;  %v3684_v52 = vmax.f32 %v2094_v41, 0.0  ;;  %v3197_v32 = vadd.f32 %v3196_v16, %v10556_v10 }
 0x55f   : > { %v2893_v35 = vpop.f32.mrf.mxu3 }
 0x560   : > { %v3881_v2 = vmax.f32 %v3880_v0, %v3684_v52  ;;  %v3435_v27 = vmax.f32 %v3197_v32, 0.0  ;;  %v2894_v46 = vadd.f32 %v2893_v35, %v10467_v8  ;;  %2135 = vmatmul.bf16.gmra.mxu2 %v10335_v1 }
 0x561   : > { %v3065_v18 = vpop.f32.mrf.mxu0 }
 0x562   : > { %v4332_v15 = vmax.f32 %v4331_v21, %v3435_v27  ;;  %v3545_v54 = vmax.f32 %v2894_v46, 0.0  ;;  %v3066_v3 = vadd.f32 %v3065_v18, %v10458_v62 }
 0x563   : > { %v2096_v40 = vpop.f32.mrf.mxu2 }
 0x564   : > { %v4208_v6 = vmax.f32 %v4207_v26, %v3545_v54  ;;  %v3554_v43 = vmax.f32 %v3066_v3, 0.0  ;;  %v2097_v60 = vadd.f32 %v2096_v40, %v10346_v42  ;;  %2935 = vmatmul.bf16.gmra.mxu3 %v10210_v34  ;;  %3104 = vmatmul.bf16.gmra.mxu0 %v10210_v34 }
 0x565   : > { %v3199_v0 = vpop.f32.mrf.mxu1 }
 0x566   : > { %v4278_v61 = vmax.f32 %v4277_v5, %v3554_v43  ;;  %v3692_v44 = vmax.f32 %v2097_v60, 0.0  ;;  %v3200_v38 = vadd.f32 %v3199_v0, %v10556_v10 }
 0x567   : > { %v2896_v25 = vpop.f32.mrf.mxu3 }
 0x568   : > { %v3882_v30 = vmax.f32 %v3881_v2, %v3692_v44  ;;  %v3443_v21 = vmax.f32 %v3200_v38, 0.0  ;;  %v2897_v47 = vadd.f32 %v2896_v25, %v10467_v8  ;;  %3238 = vmatmul.bf16.gmra.mxu1 %v10076_v19 }
 0x569   : > { %v3067_v26 = vpop.f32.mrf.mxu0 }
 0x56a   : > { %v4333_v41 = vmax.f32 %v4332_v15, %v3443_v21  ;;  %v3553_v16 = vmax.f32 %v2897_v47, 0.0  ;;  %v3068_v52 = vadd.f32 %v3067_v26, %v10458_v62 }
 0x56b   : > { %v2098_v32 = vpop.f32.mrf.mxu2 }
 0x56c   : > { %v4209_v35 = vmax.f32 %v4208_v6, %v3553_v16  ;;  %v3562_v27 = vmax.f32 %v3068_v52, 0.0  ;;  %v2099_v5 = vadd.f32 %v2098_v32, %v10346_v42 }
 0x56d   : > { %v3201_v46 = vpop.f32.mrf.mxu1 }
 0x56e   : > { %v4279_v18 = vmax.f32 %v4278_v61, %v3562_v27  ;;  %v3700_v54 = vmax.f32 %v2099_v5, 0.0  ;;  %v3202_v2 = vadd.f32 %v3201_v46, %v10556_v10 }
 0x56f   : > { %v2898_v3 = vpop.f32.mrf.mxu3 }
 0x570   : > { %v3883_v40 = vmax.f32 %v3882_v30, %v3700_v54  ;;  %v3451_v43 = vmax.f32 %v3202_v2, 0.0  ;;  %v2899_v60 = vadd.f32 %v2898_v3, %v10467_v8  ;;  %2656 = vmatmul.bf16.vlgmr.msra.gmra.mxu2 %v9841_v50 }
 0x571   : > { %v3070_v15 = vpop.f32.mrf.mxu0 }
 0x572   : > { %v4334_v0 = vmax.f32 %v4333_v41, %v3451_v43  ;;  %v3561_v44 = vmax.f32 %v2899_v60, 0.0  ;;  %v3071_v6 = vadd.f32 %v3070_v15, %v10458_v62 }
 0x573   : > { %v2101_v38 = vpop.f32.mrf.mxu2 }
 0x574   : > { %v4210_v25 = vmax.f32 %v4209_v35, %v3561_v44  ;;  %v3570_v21 = vmax.f32 %v3071_v6, 0.0  ;;  %v2102_v61 = vadd.f32 %v2101_v38, %v10346_v42  ;;  %2940 = vmatmul.bf16.gmra.mxu3 %v10224_v39  ;;  %3109 = vmatmul.bf16.gmra.mxu0 %v10224_v39 }
 0x575   : > { %v3204_v30 = vpop.f32.mrf.mxu1 }
 0x576   : > { %v4280_v47 = vmax.f32 %v4279_v18, %v3570_v21  ;;  %v3708_v26 = vmax.f32 %v2102_v61, 0.0  ;;  %v3205_v16 = vadd.f32 %v3204_v30, %v10556_v10 }
 0x577   : > { %v2901_v50 = vpop.f32.mrf.mxu3 }
 0x578   : > { %v3884_v52 = vmax.f32 %v3883_v40, %v3708_v26  ;;  %v3459_v41 = vmax.f32 %v3205_v16, 0.0  ;;  %v2902_v32 = vadd.f32 %v2901_v50, %v10467_v8  ;;  %3243 = vmatmul.bf16.gmra.mxu1 %v10097_v56 }
 0x579   : > { %v3072_v35 = vpop.f32.mrf.mxu0 }
 0x57a   : > { %v4335_v27 = vmax.f32 %v4334_v0, %v3459_v41  ;;  %v3569_v5 = vmax.f32 %v2902_v32, 0.0  ;;  %v3073_v46 = vadd.f32 %v3072_v35, %v10458_v62 }
 0x57b   : > { %v2103_v54 = vpop.f32.mrf.mxu2 }
 0x57c   : > { %v4211_v2 = vmax.f32 %v4210_v25, %v3569_v5  ;;  %v3578_v3 = vmax.f32 %v3073_v46, 0.0  ;;  %v2104_v18 = vadd.f32 %v2103_v54, %v10346_v42 }
 0x57d   : > { %v3206_v43 = vpop.f32.mrf.mxu1 }
 0x57e   : > { %v4281_v60 = vmax.f32 %v4280_v47, %v3578_v3  ;;  %v3716_v15 = vmax.f32 %v2104_v18, 0.0  ;;  %v3207_v40 = vadd.f32 %v3206_v43, %v10556_v10 }
 0x57f   : > { %v2903_v44 = vpop.f32.mrf.mxu3 }
 0x580   : > { %v3885_v6 = vmax.f32 %v3884_v52, %v3716_v15  ;;  %v3467_v38 = vmax.f32 %v3207_v40, 0.0  ;;  %v2904_v21 = vadd.f32 %v2903_v44, %v10467_v8  ;;  %2661 = vmatmul.bf16.gmra.mxu2 %v9854_v7 }
 0x581   : > { %v3075_v0 = vpop.f32.mrf.mxu0 }
 0x582   : > { %v4336_v61 = vmax.f32 %v4335_v27, %v3467_v38  ;;  %v3577_v30 = vmax.f32 %v2904_v21, 0.0  ;;  %v3076_v25 = vadd.f32 %v3075_v0, %v10458_v62 }
 0x583   : > { %v2106_v26 = vpop.f32.mrf.mxu2 }
 0x584   : > { %v4212_v16 = vmax.f32 %v4211_v2, %v3577_v30  ;;  %v3586_v50 = vmax.f32 %v3076_v25, 0.0  ;;  %v2107_v47 = vadd.f32 %v2106_v26, %v10346_v42  ;;  %2945 = vmatmul.bf16.gmra.mxu3 %v10238_v51  ;;  %3114 = vmatmul.bf16.gmra.mxu0 %v10238_v51 }
 0x585   : > { %v3209_v52 = vpop.f32.mrf.mxu1 }
 0x586   : > { %v4282_v41 = vmax.f32 %v4281_v60, %v3586_v50  ;;  %v3724_v32 = vmax.f32 %v2107_v47, 0.0  ;;  %v3210_v35 = vadd.f32 %v3209_v52, %v10556_v10 }
 0x587   : > { %v2906_v7 = vpop.f32.mrf.mxu3 }
 0x588   : > { %v3886_v5 = vmax.f32 %v3885_v6, %v3724_v32  ;;  %v3475_v27 = vmax.f32 %v3210_v35, 0.0  ;;  %v2907_v46 = vadd.f32 %v2906_v7, %v10467_v8  ;;  %3248 = vmatmul.bf16.gmra.mxu1 %v10115_v24 }
 0x589   : > { %v3077_v54 = vpop.f32.mrf.mxu0 }
 0x58a   : > { %v4337_v2 = vmax.f32 %v4336_v61, %v3475_v27  ;;  %v3585_v3 = vmax.f32 %v2907_v46, 0.0  ;;  %v3078_v18 = vadd.f32 %v3077_v54, %v10458_v62 }
 0x58b   : > { %v2108_v43 = vpop.f32.mrf.mxu2 }
 0x58c   : > { %v4213_v15 = vmax.f32 %v4212_v16, %v3585_v3  ;;  %v3594_v40 = vmax.f32 %v3078_v18, 0.0  ;;  %v2109_v60 = vadd.f32 %v2108_v43, %v10346_v42 }
 0x58d   : > { %v3211_v44 = vpop.f32.mrf.mxu1 }
 0x58e   : > { %v4283_v38 = vmax.f32 %v4282_v41, %v3594_v40  ;;  %v3732_v21 = vmax.f32 %v2109_v60, 0.0  ;;  %v3212_v6 = vadd.f32 %v3211_v44, %v10556_v10 }
 0x58f   : > { %v2908_v0 = vpop.f32.mrf.mxu3 }
 0x590   : > { %v3887_v30 = vmax.f32 %v3886_v5, %v3732_v21  ;;  %v3483_v25 = vmax.f32 %v3212_v6, 0.0  ;;  %v2909_v26 = vadd.f32 %v2908_v0, %v10467_v8  ;;  %2666 = vmatmul.bf16.gmra.mxu2 %v9865_v31 }
 0x591   : > { %v3080_v61 = vpop.f32.mrf.mxu0 }
 0x592   : > { %v4338_v50 = vmax.f32 %v4337_v2, %v3483_v25  ;;  %v3593_v47 = vmax.f32 %v2909_v26, 0.0  ;;  %v3081_v16 = vadd.f32 %v3080_v61, %v10458_v62 }
 0x593   : > { %v2111_v52 = vpop.f32.mrf.mxu2 }
 0x594   : > { %v4214_v32 = vmax.f32 %v4213_v15, %v3593_v47  ;;  %v3602_v35 = vmax.f32 %v3081_v16, 0.0  ;;  %v2112_v41 = vadd.f32 %v2111_v52, %v10346_v42  ;;  %2950 = vmatmul.bf16.gmra.mxu3 %v10252_v49  ;;  %3119 = vmatmul.bf16.gmra.mxu0 %v10252_v49 }
 0x595   : > { %v3214_v7 = vpop.f32.mrf.mxu1 }
 0x596   : > { %v4284_v5 = vmax.f32 %v4283_v38, %v3602_v35  ;;  %v3740_v27 = vmax.f32 %v2112_v41, 0.0  ;;  %v3215_v46 = vadd.f32 %v3214_v7, %v10556_v10 }
 0x597   : > { %v2911_v31 = vpop.f32.mrf.mxu3 }
 0x598   : > { %v3888_v54 = vmax.f32 %v3887_v30, %v3740_v27  ;;  %v3491_v2 = vmax.f32 %v3215_v46, 0.0  ;;  %v2912_v3 = vadd.f32 %v2911_v31, %v10467_v8  ;;  %3253 = vmatmul.bf16.gmra.mxu1 %v10138_v53 }
 0x599   : > { %v3082_v18 = vpop.f32.mrf.mxu0 }
 0x59a   : > { %v4339_v43 = vmax.f32 %v4338_v50, %v3491_v2  ;;  %v3601_v15 = vmax.f32 %v2912_v3, 0.0  ;;  %v3083_v40 = vadd.f32 %v3082_v18, %v10458_v62 }
 0x59b   : > { %v2113_v60 = vpop.f32.mrf.mxu2 }
 0x59c   : > { %v4215_v44 = vmax.f32 %v4214_v32, %v3601_v15  ;;  %v3610_v21 = vmax.f32 %v3083_v40, 0.0  ;;  %v2114_v38 = vadd.f32 %v2113_v60, %v10346_v42 }
 0x59d   : > { %v3216_v6 = vpop.f32.mrf.mxu1 }
 0x59e   : > { %v4285_v0 = vmax.f32 %v4284_v5, %v3610_v21  ;;  %v3748_v25 = vmax.f32 %v2114_v38, 0.0  ;;  %v3217_v30 = vadd.f32 %v3216_v6, %v10556_v10 }
 0x59f   : > { %v2913_v26 = vpop.f32.mrf.mxu3 }
 0x5a0   : > { %v3889_v61 = vmax.f32 %v3888_v54, %v3748_v25  ;;  %v3499_v47 = vmax.f32 %v3217_v30, 0.0  ;;  %v2914_v16 = vadd.f32 %v2913_v26, %v10467_v8  ;;  %2671 = vmatmul.bf16.gmra.mxu2 %v9878_v57 }
 0x5a1   : > { %v3085_v50 = vpop.f32.mrf.mxu0 }
 0x5a2   : > { %v4340_v52 = vmax.f32 %v4339_v43, %v3499_v47  ;;  %v3609_v35 = vmax.f32 %v2914_v16, 0.0  ;;  %v3086_v32 = vadd.f32 %v3085_v50, %v10458_v62 }
 0x5a3   : > { %v2116_v41 = vpop.f32.mrf.mxu2 }
 0x5a4   : > { %v4216_v7 = vmax.f32 %v4215_v44, %v3609_v35  ;;  %v3618_v27 = vmax.f32 %v3086_v32, 0.0  ;;  %v2117_v5 = vadd.f32 %v2116_v41, %v10346_v42  ;;  %2955 = vmatmul.bf16.gmra.mxu3 %v10266_v37  ;;  %3124 = vmatmul.bf16.gmra.mxu0 %v10266_v37 }
 0x5a5   : > { %v3219_v46 = vpop.f32.mrf.mxu1 }
 0x5a6   : > { %v4286_v31 = vmax.f32 %v4285_v0, %v3618_v27  ;;  %v3756_v54 = vmax.f32 %v2117_v5, 0.0  ;;  %v3220_v2 = vadd.f32 %v3219_v46, %v10556_v10 }
 0x5a7   : > { %v2916_v57 = vpop.f32.mrf.mxu3 }
 0x5a8   : > { %v3890_v3 = vmax.f32 %v3889_v61, %v3756_v54  ;;  %v3507_v18 = vmax.f32 %v3220_v2, 0.0  ;;  %v2917_v43 = vadd.f32 %v2916_v57, %v10467_v8  ;;  %3258 = vmatmul.bf16.gmra.mxu1 %v10156_v45 }
 0x5a9   : > { %v3087_v15 = vpop.f32.mrf.mxu0 }
 0x5aa   : > { %v4341_v40 = vmax.f32 %v4340_v52, %v3507_v18  ;;  %v3617_v60 = vmax.f32 %v2917_v43, 0.0  ;;  %v3088_v44 = vadd.f32 %v3087_v15, %v10458_v62 }
 0x5ab   : > { %v2118_v21 = vpop.f32.mrf.mxu2 }
 0x5ac   : > { %v4217_v38 = vmax.f32 %v4216_v7, %v3617_v60  ;;  %v3626_v6 = vmax.f32 %v3088_v44, 0.0  ;;  %v2119_v0 = vadd.f32 %v2118_v21, %v10346_v42 }
 0x5ad   : > { %v3221_v25 = vpop.f32.mrf.mxu1 }
 0x5ae   : > { %v4287_v30 = vmax.f32 %v4286_v31, %v3626_v6  ;;  %v3764_v26 = vmax.f32 %v2119_v0, 0.0  ;;  %v3222_v61 = vadd.f32 %v3221_v25, %v10556_v10 }
 0x5af   : > { %v2918_v47 = vpop.f32.mrf.mxu3 }
 0x5b0   : > { %v3891_v16 = vmax.f32 %v3890_v3, %v3764_v26  ;;  %v3515_v50 = vmax.f32 %v3222_v61, 0.0  ;;  %v2919_v35 = vadd.f32 %v2918_v47, %v10467_v8  ;;  %2676 = vmatmul.bf16.gmra.mxu2 %v9891_v36 }
 0x5b1   : > { %v3090_v52 = vpop.f32.mrf.mxu0 }
 0x5b2   : > { %v4342_v32 = vmax.f32 %v4341_v40, %v3515_v50  ;;  %v3625_v41 = vmax.f32 %v2919_v35, 0.0  ;;  %v3091_v7 = vadd.f32 %v3090_v52, %v10458_v62 }
 0x5b3   : > { %v2121_v27 = vpop.f32.mrf.mxu2 }
 0x5b4   : > { %v4218_v5 = vmax.f32 %v4217_v38, %v3625_v41  ;;  %v3634_v46 = vmax.f32 %v3091_v7, 0.0  ;;  %v2122_v31 = vadd.f32 %v2121_v27, %v10346_v42  ;;  %2960 = vmatmul.bf16.gmra.mxu3 %v10280_v59  ;;  %3129 = vmatmul.bf16.gmra.mxu0 %v10280_v59 }
 0x5b5   : > { %v3224_v54 = vpop.f32.mrf.mxu1 }
 0x5b6   : > { %v4288_v2 = vmax.f32 %v4287_v30, %v3634_v46  ;;  %v3772_v57 = vmax.f32 %v2122_v31, 0.0  ;;  %v3225_v3 = vadd.f32 %v3224_v54, %v10556_v10 }
 0x5b7   : > { %v2921_v36 = vpop.f32.mrf.mxu3 }
 0x5b8   : > { %v3892_v18 = vmax.f32 %v3891_v16, %v3772_v57  ;;  %v3523_v43 = vmax.f32 %v3225_v3, 0.0  ;;  %v2922_v15 = vadd.f32 %v2921_v36, %v10467_v8  ;;  %3263 = vmatmul.bf16.gmra.mxu1 %v10174_v14 }
 0x5b9   : > { %v3092_v40 = vpop.f32.mrf.mxu0 }
 0x5ba   : > { %v4343_v60 = vmax.f32 %v4342_v32, %v3523_v43  ;;  %v3633_v44 = vmax.f32 %v2922_v15, 0.0  ;;  %v3093_v21 = vadd.f32 %v3092_v40, %v10458_v62 }
 0x5bb   : > { %v2123_v38 = vpop.f32.mrf.mxu2 }
 0x5bc   : > { %v4219_v6 = vmax.f32 %v4218_v5, %v3633_v44  ;;  %v3642_v0 = vmax.f32 %v3093_v21, 0.0  ;;  %v2124_v25 = vadd.f32 %v2123_v38, %v10346_v42 }
 0x5bd   : > { %v3226_v30 = vpop.f32.mrf.mxu1 }
 0x5be   : > { %v4289_v26 = vmax.f32 %v4288_v2, %v3642_v0  ;;  %v3780_v61 = vmax.f32 %v2124_v25, 0.0  ;;  %v3227_v47 = vadd.f32 %v3226_v30, %v10556_v10 }
 0x5bf   : > { %v2923_v16 = vpop.f32.mrf.mxu3 }
 0x5c0   : > { %v3893_v50 = vmax.f32 %v3892_v18, %v3780_v61  ;;  %v3531_v35 = vmax.f32 %v3227_v47, 0.0  ;;  %v2924_v52 = vadd.f32 %v2923_v16, %v10467_v8  ;;  %2681 = vmatmul.bf16.gmra.mxu2 %v9906_v29 }
 0x5c1   : > { %v3095_v32 = vpop.f32.mrf.mxu0 }
 0x5c2   : > { %v4344_v41 = vmax.f32 %v4343_v60, %v3531_v35  ;;  %v3641_v7 = vmax.f32 %v2924_v52, 0.0  ;;  %v3096_v27 = vadd.f32 %v3095_v32, %v10458_v62 }
 0x5c3   : > { %v2126_v5 = vpop.f32.mrf.mxu2 }
 0x5c4   : > { %v4220_v46 = vmax.f32 %v4219_v6, %v3641_v7  ;;  %v3650_v31 = vmax.f32 %v3096_v27, 0.0  ;;  %v2127_v54 = vadd.f32 %v2126_v5, %v10346_v42  ;;  %2965 = vmatmul.bf16.gmra.mxu3 %v10294_v55  ;;  %3134 = vmatmul.bf16.gmra.mxu0 %v10294_v55 }
 0x5c5   : > { %v3229_v2 = vpop.f32.mrf.mxu1 }
 0x5c6   : > { %v4290_v57 = vmax.f32 %v4289_v26, %v3650_v31  ;;  %v3788_v3 = vmax.f32 %v2127_v54, 0.0  ;;  %v3230_v36 = vadd.f32 %v3229_v2, %v10556_v10 }
 0x5c7   : > { %v2926_v29 = vpop.f32.mrf.mxu3 }
 0x5c8   : > { %v3894_v18 = vmax.f32 %v3893_v50, %v3788_v3  ;;  %v3539_v43 = vmax.f32 %v3230_v36, 0.0  ;;  %v2927_v15 = vadd.f32 %v2926_v29, %v10467_v8  ;;  %3268 = vmatmul.bf16.gmra.mxu1 %v10192_v48 }
 0x5c9   : > { %v3097_v40 = vpop.f32.mrf.mxu0 }
 0x5ca   : > { %v4345_v60 = vmax.f32 %v4344_v41, %v3539_v43  ;;  %v3649_v44 = vmax.f32 %v2927_v15, 0.0  ;;  %v3098_v21 = vadd.f32 %v3097_v40, %v10458_v62 }
 0x5cb   : > { %v2128_v38 = vpop.f32.mrf.mxu2 }
 0x5cc   : > { %v4221_v6 = vmax.f32 %v4220_v46, %v3649_v44  ;;  %v3658_v0 = vmax.f32 %v3098_v21, 0.0  ;;  %v2129_v25 = vadd.f32 %v2128_v38, %v10346_v42 }
 0x5cd   : > { %v3231_v30 = vpop.f32.mrf.mxu1 }
 0x5ce   : > { %v4291_v26 = vmax.f32 %v4290_v57, %v3658_v0  ;;  %v3796_v61 = vmax.f32 %v2129_v25, 0.0  ;;  %v3232_v47 = vadd.f32 %v3231_v30, %v10556_v10 }
 0x5cf   : > { %v2928_v16 = vpop.f32.mrf.mxu3 }
 0x5d0   : > { %v3895_v50 = vmax.f32 %v3894_v18, %v3796_v61  ;;  %v3547_v35 = vmax.f32 %v3232_v47, 0.0  ;;  %v2929_v52 = vadd.f32 %v2928_v16, %v10467_v8  ;;  %2686 = vmatmul.bf16.gmra.mxu2 %v9923_v20 }
 0x5d1   : > { %v3100_v32 = vpop.f32.mrf.mxu0 }
 0x5d2   : > { %v4346_v41 = vmax.f32 %v4345_v60, %v3547_v35  ;;  %v3657_v7 = vmax.f32 %v2929_v52, 0.0  ;;  %v3101_v27 = vadd.f32 %v3100_v32, %v10458_v62 }
 0x5d3   : > { %v2131_v5 = vpop.f32.mrf.mxu2 }
 0x5d4   : > { %v4222_v46 = vmax.f32 %v4221_v6, %v3657_v7  ;;  %v3666_v31 = vmax.f32 %v3101_v27, 0.0  ;;  %v2132_v54 = vadd.f32 %v2131_v5, %v10346_v42  ;;  %2970 = vmatmul.bf16.gmra.mxu3 %v10308_v11  ;;  %3139 = vmatmul.bf16.gmra.mxu0 %v10308_v11  ;;  %v3969_v27 = vrot.slane %v10455_v28, 4 }
 0x5d5   : > { %v3234_v2 = vpop.f32.mrf.mxu1 }
 0x5d6   : > { %v4292_v57 = vmax.f32 %v4291_v26, %v3666_v31  ;;  %v3804_v3 = vmax.f32 %v2132_v54, 0.0  ;;  %v3235_v36 = vadd.f32 %v3234_v2, %v10556_v10 }
 0x5d7   : > { %v2931_v20 = vpop.f32.mrf.mxu3 }
 0x5d8   : > { %v3896_v29 = vmax.f32 %v3895_v50, %v3804_v3  ;;  %v3555_v18 = vmax.f32 %v3235_v36, 0.0  ;;  %v2932_v43 = vadd.f32 %v2931_v20, %v10467_v8  ;;  %3273 = vmatmul.bf16.gmra.mxu1 %v10210_v34  ;;  %v3970_v36 = vmax.f32 %v10455_v28, %v3969_v27 }
 0x5d9   : > { %v3102_v15 = vpop.f32.mrf.mxu0 }
 0x5da   : > { %v4347_v40 = vmax.f32 %v4346_v41, %v3555_v18  ;;  %v3665_v60 = vmax.f32 %v2932_v43, 0.0  ;;  %v3103_v44 = vadd.f32 %v3102_v15, %v10458_v62 }
 0x5db   : > { %v2133_v21 = vpop.f32.mrf.mxu2 }
 0x5dc   : > { %v4223_v38 = vmax.f32 %v4222_v46, %v3665_v60  ;;  %v3674_v6 = vmax.f32 %v3103_v44, 0.0  ;;  %v2134_v0 = vadd.f32 %v2133_v21, %v10346_v42  ;;  %v3971_v21 = vrot.slane %v3970_v36, 2 }
 0x5dd   : > { %v3236_v25 = vpop.f32.mrf.mxu1 }
 0x5de   : > { %v4293_v30 = vmax.f32 %v4292_v57, %v3674_v6  ;;  %v3812_v26 = vmax.f32 %v2134_v0, 0.0  ;;  %v3237_v61 = vadd.f32 %v3236_v25, %v10556_v10 }
 0x5df   : > { %v2933_v47 = vpop.f32.mrf.mxu3 }
 0x5e0   : > { %v3897_v16 = vmax.f32 %v3896_v29, %v3812_v26  ;;  %v3563_v50 = vmax.f32 %v3237_v61, 0.0  ;;  %v2934_v35 = vadd.f32 %v2933_v47, %v10467_v8  ;;  %2691 = vmatmul.bf16.gmra.mxu2 %v9941_v63  ;;  %v3972_v47 = vmax.f32 %v3970_v36, %v3971_v21 }
 0x5e1   : > { %v3105_v52 = vpop.f32.mrf.mxu0 }
 0x5e2   : > { %v4348_v32 = vmax.f32 %v4347_v40, %v3563_v50  ;;  %v3673_v41 = vmax.f32 %v2934_v35, 0.0  ;;  %v3106_v7 = vadd.f32 %v3105_v52, %v10458_v62 }
 0x5e3   : > { %v2136_v5 = vpop.f32.mrf.mxu2 }
 0x5e4   : > { %v4224_v46 = vmax.f32 %v4223_v38, %v3673_v41  ;;  %v3682_v31 = vmax.f32 %v3106_v7, 0.0  ;;  %v2137_v54 = vadd.f32 %v2136_v5, %v10346_v42  ;;  %2975 = vmatmul.bf16.gmra.mxu3 %v10323_v58  ;;  %3144 = vmatmul.bf16.gmra.mxu0 %v10323_v58 }
 0x5e5   : > { %v3239_v2 = vpop.f32.mrf.mxu1 }
 0x5e6   : > { %v4294_v57 = vmax.f32 %v4293_v30, %v3682_v31  ;;  %v3820_v3 = vmax.f32 %v2137_v54, 0.0  ;;  %v3240_v63 = vadd.f32 %v3239_v2, %v10556_v10 }
 0x5e7   : > { %v2936_v20 = vpop.f32.mrf.mxu3 }
 0x5e8   : > { %v3898_v29 = vmax.f32 %v3897_v16, %v3820_v3  ;;  %v3571_v18 = vmax.f32 %v3240_v63, 0.0  ;;  %v2937_v43 = vadd.f32 %v2936_v20, %v10467_v8  ;;  %3278 = vmatmul.bf16.gmra.mxu1 %v10224_v39 }
 0x5e9   : > { %v3107_v15 = vpop.f32.mrf.mxu0 }
 0x5ea   : > { %v4349_v40 = vmax.f32 %v4348_v32, %v3571_v18  ;;  %v3681_v60 = vmax.f32 %v2937_v43, 0.0  ;;  %v3108_v44 = vadd.f32 %v3107_v15, %v10458_v62 }
 0x5eb   : > { %v2138_v38 = vpop.f32.mrf.mxu2 }
 0x5ec   : > { %v4225_v6 = vmax.f32 %v4224_v46, %v3681_v60  ;;  %v3690_v0 = vmax.f32 %v3108_v44, 0.0  ;;  %v2139_v25 = vadd.f32 %v2138_v38, %v10346_v42  ;;  %v3973_v42 = vrot.slane %v3972_v47, 1 }
 0x5ed   : > { %v3241_v30 = vpop.f32.mrf.mxu1 }
 0x5ee   : > { %v4295_v28 = vmax.f32 %v4294_v57, %v3690_v0  ;;  %v3828_v26 = vmax.f32 %v2139_v25, 0.0  ;;  %v3242_v61 = vadd.f32 %v3241_v30, %v10556_v10  ;;  %v9285_v57 = vld [vmem:[%s11219_s6] sm:$0xff] }
 0x5ef   : > { %v2938_v16 = vpop.f32.mrf.mxu3 }
 0x5f0   : > { %v3899_v50 = vmax.f32 %v3898_v29, %v3828_v26  ;;  %v3579_v35 = vmax.f32 %v3242_v61, 0.0  ;;  %v2939_v52 = vadd.f32 %v2938_v16, %v10467_v8  ;;  %2696 = vmatmul.bf16.gmra.mxu2 %v9960_v23  ;;  %v10756_v23 = vperm.slane %v9285_v57, 4 }
 0x5f1   : > { %v3110_v32 = vpop.f32.mrf.mxu0  ;;  %v3974_v29 = vmax.f32 %v3972_v47, %v3973_v42 }
 0x5f2   : > { %v3900_v41 = vrot.slane %v3899_v50, 4  ;;  %v4350_v7 = vmax.f32 %v4349_v40, %v3579_v35  ;;  %v3689_v27 = vmax.f32 %v2939_v52, 0.0  ;;  %v3111_v5 = vadd.f32 %v3110_v32, %v10458_v62 }
 0x5f3   : > { %v2657_v46 = vpop.f32.mrf.mxu2  ;;  %v4397_v25 = vrot.slane %v3974_v29, 7 }
 0x5f4   : > { %v3901_v31 = vmax.f32 %v3899_v50, %v3900_v41  ;;  %v4226_v54 = vmax.f32 %v4225_v6, %v3689_v27  ;;  %v3698_v2 = vmax.f32 %v3111_v5, 0.0  ;;  %2980 = vmatmul.bf16.gmra.mxu3 %v10335_v1  ;;  %3149 = vmatmul.bf16.gmra.mxu0 %v10335_v1  ;;  %v2658_v60 = vadd.f32 %v2657_v46, %v10756_v23 }
 0x5f5   : > { %v3244_v3 = vpop.f32.mrf.mxu1 }
 0x5f6   : > { %v3902_v63 = vrot.slane %v3901_v31, 2  ;;  %v4296_v36 = vmax.f32 %v4295_v28, %v3698_v2  ;;  %v3245_v20 = vadd.f32 %v3244_v3, %v10556_v10  ;;  %v3328_v16 = vmax.f32 %v2658_v60, 0.0 }
 0x5f7   : > { %v2941_v18 = vpop.f32.mrf.mxu3 }
 0x5f8   : > { %v3903_v43 = vmax.f32 %v3901_v31, %v3902_v63  ;;  %v3587_v15 = vmax.f32 %v3245_v20, 0.0  ;;  %v2942_v40 = vadd.f32 %v2941_v18, %v10467_v8  ;;  %3283 = vmatmul.bf16.gmra.mxu1 %v10238_v51 }
 0x5f9   : > { %v3112_v44 = vpop.f32.mrf.mxu0 }
 0x5fa   : > { %v3904_v21 = vrot.slane %v3903_v43, 1  ;;  %v4351_v38 = vmax.f32 %v4350_v7, %v3587_v15  ;;  %v3697_v6 = vmax.f32 %v2942_v40, 0.0  ;;  %v3113_v0 = vadd.f32 %v3112_v44, %v10458_v62 }
 0x5fb   : > { %v2659_v30 = vpop.f32.mrf.mxu2 }
 0x5fc   : > { %v3905_v28 = vmax.f32 %v3903_v43, %v3904_v21  ;;  %v4227_v26 = vmax.f32 %v4226_v54, %v3697_v6  ;;  %v3706_v61 = vmax.f32 %v3113_v0, 0.0  ;;  %v2660_v47 = vadd.f32 %v2659_v30, %v10756_v23 }
 0x5fd   : > { %v3246_v50 = vpop.f32.mrf.mxu1 }
 0x5fe   : > { %v4405_v35 = vsel %vm4404_vm4, %v3905_v28, %v4397_v25  ;;  %v4297_v52 = vmax.f32 %v4296_v36, %v3706_v61  ;;  %v3336_v32 = vmax.f32 %v2660_v47, 0.0  ;;  %v3247_v41 = vadd.f32 %v3246_v50, %v10556_v10 }
 0x5ff   : > { %v10766_v7 = vsel %vm4408_vm5, %v4405_v35, %v10566_v4  ;;  %v2943_v27 = vpop.f32.mrf.mxu3 }
 0x600   : > { %v4113_v5 = vmax.f32 %v3328_v16, %v3336_v32  ;;  %v3595_v42 = vmax.f32 %v3247_v41, 0.0  ;;  %v2944_v46 = vadd.f32 %v2943_v27, %v10467_v8  ;;  %2701 = vmatmul.bf16.gmra.mxu2 %v9978_v13 }
 0x601   : > { %v3115_v31 = vpop.f32.mrf.mxu0 }
 0x602   : > { %v4352_v54 = vmax.f32 %v4351_v38, %v3595_v42  ;;  %v3705_v2 = vmax.f32 %v2944_v46, 0.0  ;;  %v3116_v57 = vadd.f32 %v3115_v31, %v10458_v62 }
 0x603   : > { %v2662_v3 = vpop.f32.mrf.mxu2 }
 0x604   : > { %v4228_v63 = vmax.f32 %v4227_v26, %v3705_v2  ;;  %v3714_v36 = vmax.f32 %v3116_v57, 0.0  ;;  %v2663_v20 = vadd.f32 %v2662_v3, %v10756_v23 }
 0x605   : > { %v3249_v29 = vpop.f32.mrf.mxu1 }
 0x606   : > { %v4298_v4 = vmax.f32 %v4297_v52, %v3714_v36  ;;  %v3344_v18 = vmax.f32 %v2663_v20, 0.0  ;;  %v3250_v43 = vadd.f32 %v3249_v29, %v10556_v10 }
 0x607   : > { %v2946_v15 = vpop.f32.mrf.mxu3 }
 0x608   : > { %v4114_v40 = vmax.f32 %v4113_v5, %v3344_v18  ;;  %v3603_v60 = vmax.f32 %v3250_v43, 0.0  ;;  %v2947_v13 = vadd.f32 %v2946_v15, %v10467_v8  ;;  %3288 = vmatmul.bf16.gmra.mxu1 %v10252_v49 }
 0x609   : > { %v3117_v44 = vpop.f32.mrf.mxu0 }
 0x60a   : > { %v4353_v21 = vmax.f32 %v4352_v54, %v3603_v60  ;;  %v3713_v38 = vmax.f32 %v2947_v13, 0.0  ;;  %v3118_v6 = vadd.f32 %v3117_v44, %v10458_v62 }
 0x60b   : > { %v2664_v0 = vpop.f32.mrf.mxu2 }
 0x60c   : > { %v4229_v25 = vmax.f32 %v4228_v63, %v3713_v38  ;;  %v3722_v30 = vmax.f32 %v3118_v6, 0.0  ;;  %v2665_v28 = vadd.f32 %v2664_v0, %v10756_v23 }
 0x60d   : > { %v3251_v26 = vpop.f32.mrf.mxu1 }
 0x60e   : > { %v4299_v61 = vmax.f32 %v4298_v4, %v3722_v30  ;;  %v3352_v47 = vmax.f32 %v2665_v28, 0.0  ;;  %v3252_v16 = vadd.f32 %v3251_v26, %v10556_v10 }
 0x60f   : > { %v2948_v50 = vpop.f32.mrf.mxu3 }
 0x610   : > { %v4115_v35 = vmax.f32 %v4114_v40, %v3352_v47  ;;  %v3611_v52 = vmax.f32 %v3252_v16, 0.0  ;;  %v2949_v32 = vadd.f32 %v2948_v50, %v10467_v8  ;;  %2706 = vmatmul.bf16.gmra.mxu2 %v9991_v17 }
 0x611   : > { %v3120_v41 = vpop.f32.mrf.mxu0 }
 0x612   : > { %v4354_v27 = vmax.f32 %v4353_v21, %v3611_v52  ;;  %v3721_v5 = vmax.f32 %v2949_v32, 0.0  ;;  %v3121_v42 = vadd.f32 %v3120_v41, %v10458_v62 }
 0x613   : > { %v2667_v46 = vpop.f32.mrf.mxu2 }
 0x614   : > { %v4230_v31 = vmax.f32 %v4229_v25, %v3721_v5  ;;  %v3730_v54 = vmax.f32 %v3121_v42, 0.0  ;;  %v2668_v2 = vadd.f32 %v2667_v46, %v10756_v23 }
 0x615   : > { %v3254_v57 = vpop.f32.mrf.mxu1 }
 0x616   : > { %v4300_v3 = vmax.f32 %v4299_v61, %v3730_v54  ;;  %v3360_v63 = vmax.f32 %v2668_v2, 0.0  ;;  %v3255_v36 = vadd.f32 %v3254_v57, %v10556_v10 }
 0x617   : > { %v2951_v20 = vpop.f32.mrf.mxu3 }
 0x618   : > { %v4116_v29 = vmax.f32 %v4115_v35, %v3360_v63  ;;  %v3619_v4 = vmax.f32 %v3255_v36, 0.0  ;;  %v2952_v17 = vadd.f32 %v2951_v20, %v10467_v8  ;;  %3293 = vmatmul.bf16.gmra.mxu1 %v10266_v37 }
 0x619   : > { %v3122_v18 = vpop.f32.mrf.mxu0 }
 0x61a   : > { %v4355_v43 = vmax.f32 %v4354_v27, %v3619_v4  ;;  %v3729_v15 = vmax.f32 %v2952_v17, 0.0  ;;  %v3123_v40 = vadd.f32 %v3122_v18, %v10458_v62 }
 0x61b   : > { %v2669_v60 = vpop.f32.mrf.mxu2 }
 0x61c   : > { %v4231_v13 = vmax.f32 %v4230_v31, %v3729_v15  ;;  %v3738_v44 = vmax.f32 %v3123_v40, 0.0  ;;  %v2670_v21 = vadd.f32 %v2669_v60, %v10756_v23 }
 0x61d   : > { %v3256_v38 = vpop.f32.mrf.mxu1 }
 0x61e   : > { %v4301_v6 = vmax.f32 %v4300_v3, %v3738_v44  ;;  %v3368_v0 = vmax.f32 %v2670_v21, 0.0  ;;  %v3257_v25 = vadd.f32 %v3256_v38, %v10556_v10 }
 0x61f   : > { %v2953_v30 = vpop.f32.mrf.mxu3 }
 0x620   : > { %v4117_v28 = vmax.f32 %v4116_v29, %v3368_v0  ;;  %v3627_v26 = vmax.f32 %v3257_v25, 0.0  ;;  %v2954_v61 = vadd.f32 %v2953_v30, %v10467_v8  ;;  %2711 = vmatmul.bf16.gmra.mxu2 %v10007_v22 }
 0x621   : > { %v3125_v47 = vpop.f32.mrf.mxu0 }
 0x622   : > { %v4356_v16 = vmax.f32 %v4355_v43, %v3627_v26  ;;  %v3737_v50 = vmax.f32 %v2954_v61, 0.0  ;;  %v3126_v35 = vadd.f32 %v3125_v47, %v10458_v62 }
 0x623   : > { %v2672_v52 = vpop.f32.mrf.mxu2 }
 0x624   : > { %v4232_v32 = vmax.f32 %v4231_v13, %v3737_v50  ;;  %v3746_v41 = vmax.f32 %v3126_v35, 0.0  ;;  %v2673_v27 = vadd.f32 %v2672_v52, %v10756_v23 }
 0x625   : > { %v3259_v5 = vpop.f32.mrf.mxu1 }
 0x626   : > { %v10792_v42 = vmax.f32 %v4301_v6, %v3746_v41  ;;  %v3376_v46 = vmax.f32 %v2673_v27, 0.0  ;;  %v3260_v31 = vadd.f32 %v3259_v5, %v10556_v10 }
 0x627   : > { %v2956_v54 = vpop.f32.mrf.mxu3 }
 0x628   : > { %v4118_v2 = vmax.f32 %v4117_v28, %v3376_v46  ;;  %v3635_v57 = vmax.f32 %v3260_v31, 0.0  ;;  %v2957_v22 = vadd.f32 %v2956_v54, %v10467_v8  ;;  %3298 = vmatmul.bf16.gmra.mxu1 %v10280_v59 }
 0x62a   : > { %v4357_v3 = vmax.f32 %v4356_v16, %v3635_v57  ;;  %v3745_v63 = vmax.f32 %v2957_v22, 0.0 }
 0x62b   : > { %v2674_v36 = vpop.f32.mrf.mxu2 }
 0x62c   : > { %v10797_v20 = vmax.f32 %v4232_v32, %v3745_v63  ;;  %v2675_v29 = vadd.f32 %v2674_v36, %v10756_v23 }
 0x62d   : > { %v3261_v4 = vpop.f32.mrf.mxu1 }
 0x62e   : > { %v3384_v17 = vmax.f32 %v2675_v29, 0.0  ;;  %v3262_v18 = vadd.f32 %v3261_v4, %v10556_v10 }
 0x630   : > { %v4119_v43 = vmax.f32 %v4118_v2, %v3384_v17  ;;  %v3643_v15 = vmax.f32 %v3262_v18, 0.0  ;;  %2716 = vmatmul.bf16.gmra.mxu2 %v10028_v9 }
 0x632   : > { %v4358_v40 = vmax.f32 %v4357_v3, %v3643_v15 }
 0x633   : > { %v2677_v60 = vpop.f32.mrf.mxu2 }
 0x634   : > { %v2678_v13 = vadd.f32 %v2677_v60, %v10756_v23 }
 0x635   : > { %v3264_v44 = vpop.f32.mrf.mxu1 }
 0x636   : > { %v3392_v21 = vmax.f32 %v2678_v13, 0.0  ;;  %v3265_v38 = vadd.f32 %v3264_v44, %v10556_v10 }
 0x638   : > { %v4120_v6 = vmax.f32 %v4119_v43, %v3392_v21  ;;  %v3651_v0 = vmax.f32 %v3265_v38, 0.0  ;;  %3303 = vmatmul.bf16.gmra.mxu1 %v10294_v55 }
 0x63a   : > { %v4359_v25 = vmax.f32 %v4358_v40, %v3651_v0 }
 0x63b   : > { %v2679_v30 = vpop.f32.mrf.mxu2 }
 0x63c   : > { %v2680_v28 = vadd.f32 %v2679_v30, %v10756_v23 }
 0x63d   : > { %v3266_v26 = vpop.f32.mrf.mxu1 }
 0x63e   : > { %v3400_v61 = vmax.f32 %v2680_v28, 0.0  ;;  %v3267_v9 = vadd.f32 %v3266_v26, %v10556_v10 }
 0x640   : > { %v4121_v47 = vmax.f32 %v4120_v6, %v3400_v61  ;;  %v3659_v16 = vmax.f32 %v3267_v9, 0.0  ;;  %2721 = vmatmul.bf16.gmra.mxu2 %v10044_v33 }
 0x642   : > { %v4360_v50 = vmax.f32 %v4359_v25, %v3659_v16 }
 0x643   : > { %v2682_v35 = vpop.f32.mrf.mxu2 }
 0x644   : > { %v2683_v52 = vadd.f32 %v2682_v35, %v10756_v23 }
 0x645   : > { %v3269_v32 = vpop.f32.mrf.mxu1 }
 0x646   : > { %v3408_v41 = vmax.f32 %v2683_v52, 0.0  ;;  %v3270_v27 = vadd.f32 %v3269_v32, %v10556_v10 }
 0x648   : > { %v4122_v5 = vmax.f32 %v4121_v47, %v3408_v41  ;;  %v3667_v46 = vmax.f32 %v3270_v27, 0.0  ;;  %3308 = vmatmul.bf16.gmra.mxu1 %v10308_v11 }
 0x64a   : > { %v4361_v31 = vmax.f32 %v4360_v50, %v3667_v46 }
 0x64b   : > { %v2684_v54 = vpop.f32.mrf.mxu2 }
 0x64c   : > { %v2685_v2 = vadd.f32 %v2684_v54, %v10756_v23  ;;  %v10826_v54 = vpop.f32.mrf.mxu0 }
 0x64d   : > { %v3271_v57 = vpop.f32.mrf.mxu1 }
 0x64e   : > { %v3416_v22 = vmax.f32 %v2685_v2, 0.0  ;;  %v3272_v33 = vadd.f32 %v3271_v57, %v10556_v10 }
 0x650   : > { %v4123_v3 = vmax.f32 %v4122_v5, %v3416_v22  ;;  %v3675_v63 = vmax.f32 %v3272_v33, 0.0  ;;  %2726 = vmatmul.bf16.gmra.mxu2 %v10060_v12 }
 0x652   : > { %v4362_v36 = vmax.f32 %v4361_v31, %v3675_v63 }
 0x653   : > { %v2687_v29 = vpop.f32.mrf.mxu2 }
 0x654   : > { %v2688_v4 = vadd.f32 %v2687_v29, %v10756_v23 }
 0x655   : > { %v3274_v17 = vpop.f32.mrf.mxu1 }
 0x656   : > { %v3424_v18 = vmax.f32 %v2688_v4, 0.0  ;;  %v3275_v43 = vadd.f32 %v3274_v17, %v10556_v10 }
 0x658   : > { %v4124_v15 = vmax.f32 %v4123_v3, %v3424_v18  ;;  %v3683_v40 = vmax.f32 %v3275_v43, 0.0  ;;  %3313 = vmatmul.bf16.gmra.mxu1 %v10323_v58  ;;  %v10831_v18 = vpop.f32.mrf.mxu0 }
 0x65a   : > { %v4363_v60 = vmax.f32 %v4362_v36, %v3683_v40 }
 0x65b   : > { %v2689_v13 = vpop.f32.mrf.mxu2 }
 0x65c   : > { %v2690_v44 = vadd.f32 %v2689_v13, %v10756_v23 }
 0x65d   : > { %v3276_v21 = vpop.f32.mrf.mxu1 }
 0x65e   : > { %v3432_v38 = vmax.f32 %v2690_v44, 0.0  ;;  %v3277_v12 = vadd.f32 %v3276_v21, %v10556_v10 }
 0x660   : > { %v4125_v6 = vmax.f32 %v4124_v15, %v3432_v38  ;;  %v3691_v0 = vmax.f32 %v3277_v12, 0.0  ;;  %2731 = vmatmul.bf16.gmra.mxu2 %v10076_v19 }
 0x662   : > { %v4364_v25 = vmax.f32 %v4363_v60, %v3691_v0 }
 0x663   : > { %v2692_v30 = vpop.f32.mrf.mxu2 }
 0x664   : > { %v2693_v28 = vadd.f32 %v2692_v30, %v10756_v23 }
 0x665   : > { %v3279_v26 = vpop.f32.mrf.mxu1 }
 0x666   : > { %v3440_v61 = vmax.f32 %v2693_v28, 0.0  ;;  %v3280_v9 = vadd.f32 %v3279_v26, %v10556_v10 }
 0x668   : > { %v4126_v47 = vmax.f32 %v4125_v6, %v3440_v61  ;;  %v3699_v16 = vmax.f32 %v3280_v9, 0.0  ;;  %3318 = vmatmul.bf16.gmra.mxu1 %v10335_v1  ;;  %v10837_v6 = vpop.f32.mrf.mxu0 }
 0x66a   : > { %v4365_v50 = vmax.f32 %v4364_v25, %v3699_v16 }
 0x66b   : > { %v2694_v35 = vpop.f32.mrf.mxu2 }
 0x66c   : > { %v2695_v52 = vadd.f32 %v2694_v35, %v10756_v23 }
 0x66d   : > { %v3281_v32 = vpop.f32.mrf.mxu1 }
 0x66e   : > { %v3448_v41 = vmax.f32 %v2695_v52, 0.0  ;;  %v3282_v19 = vadd.f32 %v3281_v32, %v10556_v10 }
 0x670   : > { %v4127_v27 = vmax.f32 %v4126_v47, %v3448_v41  ;;  %v3707_v5 = vmax.f32 %v3282_v19, 0.0  ;;  %2736 = vmatmul.bf16.gmra.mxu2 %v10097_v56 }
 0x672   : > { %v4366_v46 = vmax.f32 %v4365_v50, %v3707_v5  ;;  %v3135_v50 = vpop.f32.mrf.mxu0 }
 0x673   : > { %v2697_v31 = vpop.f32.mrf.mxu2 }
 0x674   : > { %v2698_v2 = vadd.f32 %v2697_v31, %v10756_v23 }
 0x675   : > { %v3284_v57 = vpop.f32.mrf.mxu1 }
 0x676   : > { %v3456_v22 = vmax.f32 %v2698_v2, 0.0  ;;  %v3285_v33 = vadd.f32 %v3284_v57, %v10556_v10 }
 0x678   : > { %v4128_v3 = vmax.f32 %v4127_v27, %v3456_v22  ;;  %v3715_v63 = vmax.f32 %v3285_v33, 0.0 }
 0x67a   : > { %v4367_v36 = vmax.f32 %v4366_v46, %v3715_v63  ;;  %v3137_v57 = vpop.f32.mrf.mxu0 }
 0x67b   : > { %v2699_v29 = vpop.f32.mrf.mxu2 }
 0x67c   : > { %v2700_v4 = vadd.f32 %v2699_v29, %v10756_v23 }
 0x67d   : > { %v3286_v17 = vpop.f32.mrf.mxu1 }
 0x67e   : > { %v3464_v56 = vmax.f32 %v2700_v4, 0.0  ;;  %v3287_v43 = vadd.f32 %v3286_v17, %v10556_v10 }
 0x680   : > { %v4129_v15 = vmax.f32 %v4128_v3, %v3464_v56  ;;  %v3723_v40 = vmax.f32 %v3287_v43, 0.0  ;;  %2741 = vmatmul.bf16.gmra.mxu2 %v10115_v24 }
 0x682   : > { %v4368_v60 = vmax.f32 %v4367_v36, %v3723_v40  ;;  %v3140_v4 = vpop.f32.mrf.mxu0 }
 0x683   : > { %v2702_v13 = vpop.f32.mrf.mxu2 }
 0x684   : > { %v2703_v44 = vadd.f32 %v2702_v13, %v10756_v23 }
 0x685   : > { %v3289_v21 = vpop.f32.mrf.mxu1 }
 0x686   : > { %v3472_v38 = vmax.f32 %v2703_v44, 0.0  ;;  %v3290_v12 = vadd.f32 %v3289_v21, %v10556_v10 }
 0x688   : > { %v4130_v0 = vmax.f32 %v4129_v15, %v3472_v38  ;;  %v3731_v25 = vmax.f32 %v3290_v12, 0.0 }
 0x68a   : > { %v4369_v30 = vmax.f32 %v4368_v60, %v3731_v25  ;;  %v3142_v13 = vpop.f32.mrf.mxu0 }
 0x68b   : > { %v2704_v28 = vpop.f32.mrf.mxu2 }
 0x68c   : > { %v2705_v26 = vadd.f32 %v2704_v28, %v10756_v23 }
 0x68d   : > { %v3291_v61 = vpop.f32.mrf.mxu1 }
 0x68e   : > { %v3480_v9 = vmax.f32 %v2705_v26, 0.0  ;;  %v3292_v24 = vadd.f32 %v3291_v61, %v10556_v10 }
 0x690   : > { %v4131_v47 = vmax.f32 %v4130_v0, %v3480_v9  ;;  %v3739_v16 = vmax.f32 %v3292_v24, 0.0  ;;  %2746 = vmatmul.bf16.gmra.mxu2 %v10138_v53 }
 0x692   : > { %v4370_v35 = vmax.f32 %v4369_v30, %v3739_v16  ;;  %v3145_v25 = vpop.f32.mrf.mxu0 }
 0x693   : > { %v2707_v52 = vpop.f32.mrf.mxu2 }
 0x694   : > { %v2708_v32 = vadd.f32 %v2707_v52, %v10756_v23  ;;  %v3128_v52 = vadd.f32 %v10826_v54, %v10458_v62 }
 0x695   : > { %v3294_v41 = vpop.f32.mrf.mxu1 }
 0x696   : > { %v3488_v19 = vmax.f32 %v2708_v32, 0.0  ;;  %v3295_v27 = vadd.f32 %v3294_v41, %v10556_v10  ;;  %v3131_v41 = vadd.f32 %v10831_v18, %v10458_v62 }
 0x698   : > { %v4132_v5 = vmax.f32 %v4131_v47, %v3488_v19  ;;  %v3747_v46 = vmax.f32 %v3295_v27, 0.0  ;;  %v3754_v19 = vmax.f32 %v3128_v52, 0.0  ;;  %v3133_v27 = vadd.f32 %v10837_v6, %v10458_v62 }
 0x699   : > { %v3141_v6 = vadd.f32 %v3140_v4, %v10458_v62 }
 0x69a   : > { %v10844_v31 = vmax.f32 %v4370_v35, %v3747_v46  ;;  %v3147_v47 = vpop.f32.mrf.mxu0  ;;  %v3762_v46 = vmax.f32 %v3131_v41, 0.0  ;;  %v3770_v54 = vmax.f32 %v3133_v27, 0.0 }
 0x69b   : > { %v2709_v2 = vpop.f32.mrf.mxu2  ;;  %v3148_v4 = vadd.f32 %v3147_v47, %v10458_v62 }
 0x69c   : > { %v2710_v22 = vadd.f32 %v2709_v2, %v10756_v23  ;;  %v3136_v2 = vadd.f32 %v3135_v50, %v10458_v62 }
 0x69d   : > { %v10847_v33 = vpop.f32.mrf.mxu1 }
 0x69e   : > { %v3496_v53 = vmax.f32 %v2710_v22, 0.0 }
 0x6a0   : > { %v4133_v3 = vmax.f32 %v4132_v5, %v3496_v53  ;;  %2751 = vmatmul.bf16.gmra.mxu2 %v10156_v45 }
 0x6a2   : > { %v3150_v53 = vpop.f32.mrf.mxu0 }
 0x6a3   : > { %v2712_v63 = vpop.f32.mrf.mxu2 }
 0x6a4   : > { %v2713_v36 = vadd.f32 %v2712_v63, %v10756_v23  ;;  %v4303_v63 = vmax.f32 %v10792_v42, %v3754_v19  ;;  %v3146_v42 = vadd.f32 %v3145_v25, %v10458_v62 }
 0x6a5   : > { %v10851_v29 = vpop.f32.mrf.mxu1 }
 0x6a6   : > { %v3504_v17 = vmax.f32 %v2713_v36, 0.0  ;;  %v3138_v36 = vadd.f32 %v3137_v57, %v10458_v62  ;;  %v4304_v18 = vmax.f32 %v4303_v63, %v3762_v46  ;;  %v3297_v57 = vadd.f32 %v10847_v33, %v10556_v10 }
 0x6a7   : > { %v3818_v33 = vmax.f32 %v3148_v4, 0.0 }
 0x6a8   : > { %v4134_v56 = vmax.f32 %v4133_v3, %v3504_v17 }
 0x6ab   : > { %v2714_v43 = vpop.f32.mrf.mxu2 }
 0x6ac   : > { %v2715_v15 = vadd.f32 %v2714_v43, %v10756_v23  ;;  %v4305_v43 = vmax.f32 %v4304_v18, %v3770_v54 }
 0x6ad   : > { %v10854_v40 = vpop.f32.mrf.mxu1 }
 0x6ae   : > { %v3512_v60 = vmax.f32 %v2715_v15, 0.0  ;;  %v3786_v15 = vmax.f32 %v3138_v36, 0.0  ;;  %v3302_v25 = vadd.f32 %v10854_v40, %v10556_v10 }
 0x6b0   : > { %v4135_v44 = vmax.f32 %v4134_v56, %v3512_v60  ;;  %2756 = vmatmul.bf16.gmra.mxu2 %v10174_v14  ;;  %v3778_v56 = vmax.f32 %v3136_v2, 0.0  ;;  %v3143_v60 = vadd.f32 %v3142_v13, %v10458_v62  ;;  %v3300_v13 = vadd.f32 %v10851_v29, %v10556_v10 }
 0x6b1   : > { %v3771_v2 = vmax.f32 %v3302_v25, 0.0 }
 0x6b2   : > { %v3763_v19 = vmax.f32 %v3300_v13, 0.0 }
 0x6b3   : > { %v2717_v21 = vpop.f32.mrf.mxu2 }
 0x6b4   : > { %v2718_v45 = vadd.f32 %v2717_v21, %v10756_v23  ;;  %v4306_v21 = vmax.f32 %v4305_v43, %v3778_v56 }
 0x6b5   : > { %v3304_v38 = vpop.f32.mrf.mxu1 }
 0x6b6   : > { %v3520_v12 = vmax.f32 %v2718_v45, 0.0  ;;  %v3794_v45 = vmax.f32 %v3141_v6, 0.0  ;;  %v3305_v47 = vadd.f32 %v3304_v38, %v10556_v10 }
 0x6b8   : > { %v4136_v0 = vmax.f32 %v4135_v44, %v3520_v12 }
 0x6bb   : > { %v2719_v30 = vpop.f32.mrf.mxu2 }
 0x6bc   : > { %v2720_v28 = vadd.f32 %v2719_v30, %v10756_v23  ;;  %v3802_v30 = vmax.f32 %v3143_v60, 0.0 }
 0x6bd   : > { %v10859_v26 = vpop.f32.mrf.mxu1 }
 0x6be   : > { %v3528_v61 = vmax.f32 %v2720_v28, 0.0  ;;  %v3152_v28 = vpop.f32.mrf.mxu0 }
 0x6c0   : > { %v4137_v9 = vmax.f32 %v4136_v0, %v3528_v61  ;;  %2761 = vmatmul.bf16.gmra.mxu2 %v10192_v48  ;;  %v4307_v0 = vmax.f32 %v4306_v21, %v3786_v15 }
 0x6c3   : > { %v2722_v24 = vpop.f32.mrf.mxu2 }
 0x6c4   : > { %v2723_v14 = vadd.f32 %v2722_v24, %v10756_v23  ;;  %v3810_v24 = vmax.f32 %v3146_v42, 0.0 }
 0x6c5   : > { %v3309_v16 = vpop.f32.mrf.mxu1 }
 0x6c6   : > { %v3536_v35 = vmax.f32 %v2723_v14, 0.0  ;;  %v3151_v14 = vadd.f32 %v3150_v53, %v10458_v62  ;;  %v3307_v53 = vadd.f32 %v10859_v26, %v10556_v10  ;;  %v3310_v36 = vadd.f32 %v3309_v16, %v10556_v10 }
 0x6c8   : > { %v4138_v32 = vmax.f32 %v4137_v9, %v3536_v35  ;;  %v4308_v9 = vmax.f32 %v4307_v0, %v3794_v45  ;;  %v3755_v35 = vmax.f32 %v3297_v57, 0.0  ;;  %v3787_v56 = vmax.f32 %v3307_v53, 0.0 }
 0x6c9   : > { %v3795_v60 = vmax.f32 %v3310_v36, 0.0 }
 0x6ca   : > { %v4309_v52 = vmax.f32 %v4308_v9, %v3802_v30  ;;  %v4372_v46 = vmax.f32 %v10844_v31, %v3755_v35 }
 0x6cb   : > { %v2724_v5 = vpop.f32.mrf.mxu2 }
 0x6cc   : > { %v2725_v48 = vadd.f32 %v2724_v5, %v10756_v23  ;;  %v4310_v29 = vmax.f32 %v4309_v52, %v3810_v24  ;;  %v3826_v5 = vmax.f32 %v3151_v14, 0.0  ;;  %v4373_v54 = vmax.f32 %v4372_v46, %v3763_v19 }
 0x6cd   : > { %v3311_v22 = vpop.f32.mrf.mxu1 }
 0x6ce   : > { %v3544_v3 = vmax.f32 %v2725_v48, 0.0  ;;  %v4374_v18 = vmax.f32 %v4373_v54, %v3771_v2  ;;  %v3312_v6 = vadd.f32 %v3311_v22, %v10556_v10 }
 0x6d0   : > { %v4139_v17 = vmax.f32 %v4138_v32, %v3544_v3  ;;  %2766 = vmatmul.bf16.gmra.mxu2 %v10210_v34  ;;  %v3153_v32 = vadd.f32 %v3152_v28, %v10458_v62  ;;  %v4311_v3 = vmax.f32 %v4310_v29, %v3818_v33  ;;  %v3779_v62 = vmax.f32 %v3305_v47, 0.0 }
 0x6d1   : > { %v3803_v45 = vmax.f32 %v3312_v6, 0.0 }
 0x6d2   : > { %v3834_v63 = vmax.f32 %v3153_v32, 0.0  ;;  %v4312_v38 = vmax.f32 %v4311_v3, %v3826_v5  ;;  %v4375_v15 = vmax.f32 %v4374_v18, %v3779_v62 }
 0x6d3   : > { %v2727_v50 = vpop.f32.mrf.mxu2 }
 0x6d4   : > { %v2728_v44 = vadd.f32 %v2727_v50, %v10756_v23  ;;  %v4313_v31 = vmax.f32 %v4312_v38, %v3834_v63  ;;  %v4376_v21 = vmax.f32 %v4375_v15, %v3787_v56 }
 0x6d5   : > { %v3314_v12 = vpop.f32.mrf.mxu1 }
 0x6d6   : > { %v3552_v34 = vmax.f32 %v2728_v44, 0.0  ;;  %v3315_v26 = vadd.f32 %v3314_v12, %v10556_v10  ;;  %v4377_v57 = vmax.f32 %v4376_v21, %v3795_v60 }
 0x6d8   : > { %v4140_v61 = vmax.f32 %v4139_v17, %v3552_v34  ;;  %v3811_v34 = vmax.f32 %v3315_v26, 0.0  ;;  %v4378_v30 = vmax.f32 %v4377_v57, %v3803_v45 }
 0x6db   : > { %v2729_v41 = vpop.f32.mrf.mxu2 }
 0x6dc   : > { %v2730_v27 = vadd.f32 %v2729_v41, %v10756_v23 }
 0x6dd   : > { %v3316_v48 = vpop.f32.mrf.mxu1 }
 0x6de   : > { %v3560_v40 = vmax.f32 %v2730_v27, 0.0  ;;  %v3317_v16 = vadd.f32 %v3316_v48, %v10556_v10 }
 0x6e0   : > { %v4141_v17 = vmax.f32 %v4140_v61, %v3560_v40  ;;  %2771 = vmatmul.bf16.gmra.mxu2 %v10224_v39  ;;  %v4314_v39 = vrot.slane %v4313_v31, 4  ;;  %v3819_v4 = vmax.f32 %v3317_v16, 0.0  ;;  %v4379_v61 = vmax.f32 %v4378_v30, %v3811_v34 }
 0x6e2   : > { %v4315_v13 = vmax.f32 %v4313_v31, %v4314_v39  ;;  %v4380_v14 = vmax.f32 %v4379_v61, %v3819_v4 }
 0x6e3   : > { %v2732_v43 = vpop.f32.mrf.mxu2 }
 0x6e4   : > { %v2733_v50 = vadd.f32 %v2732_v43, %v10756_v23  ;;  %v4316_v52 = vrot.slane %v4315_v13, 2 }
 0x6e5   : > { %v3319_v44 = vpop.f32.mrf.mxu1 }
 0x6e6   : > { %v3568_v42 = vmax.f32 %v2733_v50, 0.0  ;;  %v3320_v22 = vadd.f32 %v3319_v44, %v10556_v10  ;;  %v4317_v27 = vmax.f32 %v4315_v13, %v4316_v52 }
 0x6e8   : > { %v4142_v0 = vmax.f32 %v4141_v17, %v3568_v42  ;;  %v3827_v12 = vmax.f32 %v3320_v22, 0.0  ;;  %v4318_v2 = vrot.slane %v4317_v27, 1 }
 0x6ea   : > { %v4381_v33 = vmax.f32 %v4380_v14, %v3827_v12 }
 0x6eb   : > { %v2734_v28 = vpop.f32.mrf.mxu2 }
 0x6ec   : > { %v2735_v9 = vadd.f32 %v2734_v28, %v10756_v23 }
 0x6ed   : > { %v3321_v24 = vpop.f32.mrf.mxu1 }
 0x6ee   : > { %v3576_v35 = vmax.f32 %v2735_v9, 0.0  ;;  %v3322_v25 = vadd.f32 %v3321_v24, %v10556_v10  ;;  %v4319_v10 = vmax.f32 %v4317_v27, %v4318_v2 }
 0x6f0   : > { %v4143_v32 = vmax.f32 %v4142_v0, %v3576_v35  ;;  %v3835_v41 = vmax.f32 %v3322_v25, 0.0  ;;  %2776 = vmatmul.bf16.gmra.mxu2 %v10238_v51  ;;  %v4402_v51 = vrot.slane %v4319_v10, 2 }
 0x6f2   : > { %v4382_v19 = vmax.f32 %v4381_v33, %v3835_v41 }
 0x6f3   : > { %v2737_v47 = vpop.f32.mrf.mxu2 }
 0x6f4   : > { %v4383_v29 = vrot.slane %v4382_v19, 4  ;;  %v2738_v5 = vadd.f32 %v2737_v47, %v10756_v23 }
 0x6f6   : > { %v4384_v48 = vmax.f32 %v4382_v19, %v4383_v29  ;;  %v3584_v46 = vmax.f32 %v2738_v5, 0.0 }
 0x6f8   : > { %v4385_v53 = vrot.slane %v4384_v48, 2  ;;  %v4144_v40 = vmax.f32 %v4143_v32, %v3584_v46 }
 0x6fa   : > { %v4386_v3 = vmax.f32 %v4384_v48, %v4385_v53 }
 0x6fb   : > { %v2739_v63 = vpop.f32.mrf.mxu2 }
 0x6fc   : > { %v4387_v54 = vrot.slane %v4386_v3, 1  ;;  %v2740_v62 = vadd.f32 %v2739_v63, %v10756_v23 }
 0x6fe   : > { %v4388_v36 = vmax.f32 %v4386_v3, %v4387_v54  ;;  %v3592_v17 = vmax.f32 %v2740_v62, 0.0 }
 0x700   : > { %v4403_v38 = vrot.slane %v4388_v36, 1  ;;  %v4145_v18 = vmax.f32 %v4144_v40, %v3592_v17  ;;  %2781 = vmatmul.bf16.gmra.mxu2 %v10252_v49 }
 0x702   : > { %v10905_v56 = vsel %vm4412_vm6, %v4402_v51, %v4403_v38  ;;  %v2958_v38 = vpop.f32.mrf.mxu3 }
 0x703   : > { %v2742_v6 = vpop.f32.mrf.mxu2 }
 0x704   : > { %v2743_v31 = vadd.f32 %v2742_v6, %v10756_v23 }
 0x706   : > { %v3600_v43 = vmax.f32 %v2743_v31, 0.0 }
 0x708   : > { %v4146_v15 = vmax.f32 %v4145_v18, %v3600_v43 }
 0x70b   : > { %v2744_v60 = vpop.f32.mrf.mxu2 }
 0x70c   : > { %v2745_v26 = vadd.f32 %v2744_v60, %v10756_v23 }
 0x70e   : > { %v3608_v50 = vmax.f32 %v2745_v26, 0.0 }
 0x710   : > { %v4147_v44 = vmax.f32 %v4146_v15, %v3608_v50  ;;  %2786 = vmatmul.bf16.gmra.mxu2 %v10266_v37 }
 0x713   : > { %v2747_v21 = vpop.f32.mrf.mxu2 }
 0x714   : > { %v2748_v45 = vadd.f32 %v2747_v21, %v10756_v23 }
 0x716   : > { %v3616_v16 = vmax.f32 %v2748_v45, 0.0 }
 0x718   : > { %v4148_v42 = vmax.f32 %v4147_v44, %v3616_v16 }
 0x71b   : > { %v2749_v49 = vpop.f32.mrf.mxu2 }
 0x71c   : > { %v2750_v39 = vadd.f32 %v2749_v49, %v10756_v23 }
 0x71e   : > { %v3624_v57 = vmax.f32 %v2750_v39, 0.0 }
 0x720   : > { %v4149_v34 = vmax.f32 %v4148_v42, %v3624_v57  ;;  %2791 = vmatmul.bf16.gmra.mxu2 %v10280_v59 }
 0x723   : > { %v2752_v0 = vpop.f32.mrf.mxu2 }
 0x724   : > { %v2753_v22 = vadd.f32 %v2752_v0, %v10756_v23 }
 0x726   : > { %v3632_v30 = vmax.f32 %v2753_v22, 0.0 }
 0x728   : > { %v4150_v4 = vmax.f32 %v4149_v34, %v3632_v30 }
 0x72b   : > { %v2754_v28 = vpop.f32.mrf.mxu2 }
 0x72c   : > { %v2755_v37 = vadd.f32 %v2754_v28, %v10756_v23 }
 0x72e   : > { %v3640_v13 = vmax.f32 %v2755_v37, 0.0 }
 0x730   : > { %v4151_v61 = vmax.f32 %v4150_v4, %v3640_v13  ;;  %2796 = vmatmul.bf16.gmra.mxu2 %v10294_v55 }
 0x733   : > { %v2757_v12 = vpop.f32.mrf.mxu2 }
 0x734   : > { %v2758_v9 = vadd.f32 %v2757_v12, %v10756_v23 }
 0x736   : > { %v3648_v24 = vmax.f32 %v2758_v9, 0.0 }
 0x738   : > { %v4152_v14 = vmax.f32 %v4151_v61, %v3648_v24 }
 0x73b   : > { %v2759_v35 = vpop.f32.mrf.mxu2 }
 0x73c   : > { %v2760_v59 = vadd.f32 %v2759_v35, %v10756_v23 }
 0x73e   : > { %v3656_v25 = vmax.f32 %v2760_v59, 0.0 }
 0x740   : > { %v4153_v52 = vmax.f32 %v4152_v14, %v3656_v25  ;;  %2801 = vmatmul.bf16.gmra.mxu2 %v10308_v11 }
 0x743   : > { %v2762_v33 = vpop.f32.mrf.mxu2 }
 0x744   : > { %v2763_v32 = vadd.f32 %v2762_v33, %v10756_v23  ;;  %v2959_v33 = vadd.f32 %v2958_v38, %v10467_v8 }
 0x746   : > { %v3664_v41 = vmax.f32 %v2763_v32, 0.0 }
 0x748   : > { %v4154_v19 = vmax.f32 %v4153_v52, %v3664_v41  ;;  %v3753_v41 = vmax.f32 %v2959_v33, 0.0 }
 0x74b   : > { %v2764_v47 = vpop.f32.mrf.mxu2 }
 0x74c   : > { %v2765_v55 = vadd.f32 %v2764_v47, %v10756_v23 }
 0x74e   : > { %v3672_v27 = vmax.f32 %v2765_v55, 0.0 }
 0x750   : > { %v4155_v29 = vmax.f32 %v4154_v19, %v3672_v27  ;;  %2806 = vmatmul.bf16.gmra.mxu2 %v10323_v58 }
 0x753   : > { %v2767_v5 = vpop.f32.mrf.mxu2 }
 0x754   : > { %v2768_v48 = vadd.f32 %v2767_v5, %v10756_v23 }
 0x756   : > { %v3680_v46 = vmax.f32 %v2768_v48, 0.0 }
 0x758   : > { %v4156_v2 = vmax.f32 %v4155_v29, %v3680_v46  ;;  %v4234_v29 = vmax.f32 %v10797_v20, %v3753_v41 }
 0x75b   : > { %v2769_v53 = vpop.f32.mrf.mxu2 }
 0x75c   : > { %v2770_v11 = vadd.f32 %v2769_v53, %v10756_v23 }
 0x75e   : > { %v3688_v40 = vmax.f32 %v2770_v11, 0.0 }
 0x760   : > { %v4157_v3 = vmax.f32 %v4156_v2, %v3688_v40  ;;  %2811 = vmatmul.bf16.gmra.mxu2 %v10335_v1  ;;  %v2961_v1 = vpop.f32.mrf.mxu3 }
 0x761   : > { %v2962_v32 = vadd.f32 %v2961_v1, %v10467_v8 }
 0x763   : > { %v2772_v63 = vpop.f32.mrf.mxu2  ;;  %v3761_v47 = vmax.f32 %v2962_v32, 0.0 }
 0x764   : > { %v2773_v10 = vadd.f32 %v2772_v63, %v10756_v23 }
 0x765   : > { %v4235_v2 = vmax.f32 %v4234_v29, %v3761_v47 }
 0x766   : > { %v3696_v54 = vmax.f32 %v2773_v10, 0.0 }
 0x768   : > { %v4158_v62 = vmax.f32 %v4157_v3, %v3696_v54  ;;  %v2963_v16 = vpop.f32.mrf.mxu3 }
 0x769   : > { %v2964_v19 = vadd.f32 %v2963_v16, %v10467_v8 }
 0x76b   : > { %v2774_v36 = vpop.f32.mrf.mxu2  ;;  %v3769_v5 = vmax.f32 %v2964_v19, 0.0 }
 0x76c   : > { %v2775_v58 = vadd.f32 %v2774_v36, %v10756_v23 }
 0x76d   : > { %v4236_v40 = vmax.f32 %v4235_v2, %v3769_v5 }
 0x76e   : > { %v3704_v17 = vmax.f32 %v2775_v58, 0.0 }
 0x770   : > { %v4159_v51 = vmax.f32 %v4158_v62, %v3704_v17  ;;  %v2966_v0 = vpop.f32.mrf.mxu3 }
 0x771   : > { %v2967_v55 = vadd.f32 %v2966_v0, %v10467_v8 }
 0x773   : > { %v2777_v18 = vpop.f32.mrf.mxu2  ;;  %v3777_v53 = vmax.f32 %v2967_v55, 0.0 }
 0x774   : > { %v2778_v6 = vadd.f32 %v2777_v18, %v10756_v23 }
 0x775   : > { %v4237_v10 = vmax.f32 %v4236_v40, %v3777_v53 }
 0x776   : > { %v3712_v31 = vmax.f32 %v2778_v6, 0.0 }
 0x778   : > { %v4160_v43 = vmax.f32 %v4159_v51, %v3712_v31  ;;  %v2968_v37 = vpop.f32.mrf.mxu3 }
 0x779   : > { %v2969_v48 = vadd.f32 %v2968_v37, %v10467_v8 }
 0x77b   : > { %v2779_v15 = vpop.f32.mrf.mxu2  ;;  %v3785_v3 = vmax.f32 %v2969_v48, 0.0 }
 0x77c   : > { %v2780_v60 = vadd.f32 %v2779_v15, %v10756_v23 }
 0x77d   : > { %v4238_v20 = vmax.f32 %v4237_v10, %v3785_v3 }
 0x77e   : > { %v3720_v26 = vmax.f32 %v2780_v60, 0.0 }
 0x780   : > { %v4161_v50 = vmax.f32 %v4160_v43, %v3720_v26  ;;  %v2971_v12 = vpop.f32.mrf.mxu3 }
 0x781   : > { %v2972_v11 = vadd.f32 %v2971_v12, %v10467_v8 }
 0x783   : > { %v2782_v44 = vpop.f32.mrf.mxu2  ;;  %v3793_v54 = vmax.f32 %v2972_v11, 0.0 }
 0x784   : > { %v2783_v21 = vadd.f32 %v2782_v44, %v10756_v23 }
 0x785   : > { %v4239_v18 = vmax.f32 %v4238_v20, %v3793_v54 }
 0x786   : > { %v3728_v45 = vmax.f32 %v2783_v21, 0.0 }
 0x788   : > { %v4162_v42 = vmax.f32 %v4161_v50, %v3728_v45  ;;  %v2973_v24 = vpop.f32.mrf.mxu3 }
 0x789   : > { %v2974_v63 = vadd.f32 %v2973_v24, %v10467_v8 }
 0x78b   : > { %v2784_v49 = vpop.f32.mrf.mxu2  ;;  %v3801_v17 = vmax.f32 %v2974_v63, 0.0 }
 0x78c   : > { %v2785_v39 = vadd.f32 %v2784_v49, %v10756_v23 }
 0x78d   : > { %v4240_v1 = vmax.f32 %v4239_v18, %v3801_v17  ;;  %v3836_v18 = vld [vmem:[#allocation2] sm:$0xff] }
 0x78e   : > { %v3736_v57 = vmax.f32 %v2785_v39, 0.0 }
 0x790   : > { %v4163_v34 = vmax.f32 %v4162_v42, %v3736_v57  ;;  %v2976_v35 = vpop.f32.mrf.mxu3 }
 0x791   : > { %v2977_v62 = vadd.f32 %v2976_v35, %v10467_v8 }
 0x793   : > { %v2787_v22 = vpop.f32.mrf.mxu2  ;;  %v3809_v6 = vmax.f32 %v2977_v62, 0.0 }
 0x794   : > { %v2788_v30 = vadd.f32 %v2787_v22, %v10756_v23 }
 0x795   : > { %v4241_v45 = vmax.f32 %v4240_v1, %v3809_v6 }
 0x796   : > { %v3744_v4 = vmax.f32 %v2788_v30, 0.0 }
 0x798   : > { %v4164_v28 = vmax.f32 %v4163_v34, %v3744_v4  ;;  %v2978_v25 = vpop.f32.mrf.mxu3 }
 0x799   : > { %v2979_v51 = vadd.f32 %v2978_v25, %v10467_v8 }
 0x79b   : > { %v2789_v13 = vpop.f32.mrf.mxu2  ;;  %v3817_v26 = vmax.f32 %v2979_v51, 0.0 }
 0x79c   : > { %v2790_v58 = vadd.f32 %v2789_v13, %v10756_v23 }
 0x79d   : > { %v4242_v34 = vmax.f32 %v4241_v45, %v3817_v26 }
 0x79e   : > { %v3752_v15 = vmax.f32 %v2790_v58, 0.0 }
 0x7a0   : > { %v2981_v46 = vpop.f32.mrf.mxu3  ;;  %v4165_v49 = vmax.f32 %v4164_v28, %v3752_v15 }
 0x7a1   : > { %v2982_v43 = vadd.f32 %v2981_v46, %v10467_v8 }
 0x7a3   : > { %v2792_v61 = vpop.f32.mrf.mxu2  ;;  %v3825_v42 = vmax.f32 %v2982_v43, 0.0 }
 0x7a4   : > { %v2793_v38 = vadd.f32 %v2792_v61, %v10756_v23 }
 0x7a5   : > { %v4243_v37 = vmax.f32 %v4242_v34, %v3825_v42 }
 0x7a6   : > { %v3760_v44 = vmax.f32 %v2793_v38, 0.0 }
 0x7a8   : > { %v2983_v31 = vpop.f32.mrf.mxu3  ;;  %v4166_v22 = vmax.f32 %v4165_v49, %v3760_v44 }
 0x7a9   : > { %v2984_v50 = vadd.f32 %v2983_v31, %v10467_v8 }
 0x7ab   : > { %v2794_v9 = vpop.f32.mrf.mxu2  ;;  %v3833_v0 = vmax.f32 %v2984_v50, 0.0 }
 0x7ac   : > { %v2795_v60 = vadd.f32 %v2794_v9, %v10756_v23 }
 0x7ad   : > { %v4244_v12 = vmax.f32 %v4243_v37, %v3833_v0 }
 0x7ae   : > { %v3768_v39 = vmax.f32 %v2795_v60, 0.0 }
 0x7af   : > { %v4245_v33 = vrot.slane %v4244_v12, 4 }
 0x7b0   : > { %v4167_v13 = vmax.f32 %v4166_v22, %v3768_v39 }
 0x7b1   : > { %v4246_v55 = vmax.f32 %v4244_v12, %v4245_v33 }
 0x7b3   : > { %v2797_v14 = vpop.f32.mrf.mxu2  ;;  %v4247_v2 = vrot.slane %v4246_v55, 2 }
 0x7b4   : > { %v2798_v21 = vadd.f32 %v2797_v14, %v10756_v23 }
 0x7b5   : > { %v4248_v3 = vmax.f32 %v4246_v55, %v4247_v2 }
 0x7b6   : > { %v3776_v30 = vmax.f32 %v2798_v21, 0.0 }
 0x7b7   : > { %v4249_v54 = vrot.slane %v4248_v3, 1 }
 0x7b8   : > { %v4168_v9 = vmax.f32 %v4167_v13, %v3776_v30 }
 0x7b9   : > { %v4250_v58 = vmax.f32 %v4248_v3, %v4249_v54 }
 0x7bb   : > { %v2799_v59 = vpop.f32.mrf.mxu2  ;;  %v4401_v51 = vrot.slane %v4250_v58, 3 }
 0x7bc   : > { %v2800_v57 = vadd.f32 %v2799_v59, %v10756_v23 }
 0x7be   : > { %v3784_v61 = vmax.f32 %v2800_v57, 0.0 }
 0x7c0   : > { %v4169_v35 = vmax.f32 %v4168_v9, %v3784_v61 }
 0x7c3   : > { %v2802_v52 = vpop.f32.mrf.mxu2 }
 0x7c4   : > { %v2803_v4 = vadd.f32 %v2802_v52, %v10756_v23 }
 0x7c6   : > { %v3792_v24 = vmax.f32 %v2803_v4, 0.0 }
 0x7c8   : > { %v4170_v32 = vmax.f32 %v4169_v35, %v3792_v24 }
 0x7cb   : > { %v2804_v27 = vpop.f32.mrf.mxu2 }
 0x7cc   : > { %v2805_v8 = vadd.f32 %v2804_v27, %v10756_v23 }
 0x7ce   : > { %v3800_v25 = vmax.f32 %v2805_v8, 0.0 }
 0x7d0   : > { %v4171_v19 = vmax.f32 %v4170_v32, %v3800_v25 }
 0x7d3   : > { %v2807_v36 = vpop.f32.mrf.mxu2 }
 0x7d4   : > { %v2808_v14 = vadd.f32 %v2807_v36, %v10756_v23 }
 0x7d6   : > { %v3808_v41 = vmax.f32 %v2808_v14, 0.0 }
 0x7d8   : > { %v4172_v29 = vmax.f32 %v4171_v19, %v3808_v41 }
 0x7db   : > { %v2809_v16 = vpop.f32.mrf.mxu2 }
 0x7dc   : > { %v2810_v59 = vadd.f32 %v2809_v16, %v10756_v23 }
 0x7de   : > { %v3816_v47 = vmax.f32 %v2810_v59, 0.0 }
 0x7e0   : > { %v4173_v48 = vmax.f32 %v4172_v29, %v3816_v47 }
 0x7e3   : > { %v2812_v28 = vpop.f32.mrf.mxu2 }
 0x7e4   : > { %v2813_v52 = vadd.f32 %v2812_v28, %v10756_v23 }
 0x7e6   : > { %v3824_v27 = vmax.f32 %v2813_v52, 0.0 }
 0x7e8   : > { %v4174_v53 = vmax.f32 %v4173_v48, %v3824_v27 }
 0x7eb   : > { %v2814_v5 = vpop.f32.mrf.mxu2 }
 0x7ec   : > { %v2815_v46 = vadd.f32 %v2814_v5, %v10756_v23 }
 0x7ee   : > { %v3832_v11 = vmax.f32 %v2815_v46, 0.0 }
 0x7f0   : > { %v4175_v40 = vmax.f32 %v4174_v53, %v3832_v11 }
 0x7f2   : > { %v4176_v63 = vrot.slane %v4175_v40, 4 }
 0x7f4   : > { %v4177_v10 = vmax.f32 %v4175_v40, %v4176_v63 }
 0x7f6   : > { %v4178_v62 = vrot.slane %v4177_v10, 2 }
 0x7f8   : > { %v4179_v36 = vmax.f32 %v4177_v10, %v4178_v62 }
 0x7fa   : > { %v4180_v20 = vrot.slane %v4179_v36, 1 }
 0x7fc   : > { %v4181_v17 = vmax.f32 %v4179_v36, %v4180_v20 }
 0x7fe   : > { %v4400_v38 = vrot.slane %v4181_v17, 4 }
 0x800   : > { %v4411_v23 = vsel %vm4410_vm7, %v4400_v38, %v4401_v51 }
 0x801   : > { %v4415_v6 = vsel %vm4414_vm8, %v4411_v23, %v10905_v56  ;;  %4424 = sbr.rel (%p7492_p5) target bundleno = 2735 (0xaaf), region = 92 }
 0x802   : > { %v4417_v31 = vsel %vm4416_vm9, %v10766_v7, %v4415_v6 }
 0x803   : > { %v4419_v43 = vmax.f32 %v3836_v18, %v4417_v31 }
 0x805   : > { %4420 = vst [vmem:[#allocation2] sm:$0xff] %v4419_v43 }
 0x806   : > { %v7607_v15 = vld [vmem:[#allocation6 + $0xe0] sm:$0xf]  ;;  %v8873_v60 = vld [vmem:[#allocation6 + $0xec] sm:$0xf0]  ;;  %vm6990_vm10 = vcmask 24576  }
 0x807   : > { %v7735_v1 = vld [vmem:[#allocation6 + $0x1e0] sm:$0xf]  ;;  %v7608_v26 = vor.u32 %v8873_v60, %v7607_v15  ;;  %v8905_v50 = vld [vmem:[#allocation6 + $0x1ec] sm:$0xf0] }
 0x808   : > { %v7863_v44 = vld [vmem:[#allocation6 + $0x2e0] sm:$0xf]  ;;  %v8937_v21 = vld [vmem:[#allocation6 + $0x2ec] sm:$0xf0]  ;;  %v7736_v45 = vor.u32 %v8905_v50, %v7735_v1 }
 0x809   : > { %v7864_v16 = vor.u32 %v8937_v21, %v7863_v44  ;;  %v7991_v42 = vld [vmem:[#allocation6 + $0x3e0] sm:$0xf]  ;;  %v8969_v49 = vld [vmem:[#allocation6 + $0x3ec] sm:$0xf0]  ;;  %5997 = vmatpush.bf16.msra.mxu0 %v7608_v26 }
 0x80a   : > { %v7591_v39 = vld [vmem:[#allocation6 + $0xc0] sm:$0xf]  ;;  %v7992_v56 = vor.u32 %v8969_v49, %v7991_v42  ;;  %v8869_v7 = vld [vmem:[#allocation6 + $0xcc] sm:$0xf0]  ;;  %6010 = vmatpush.bf16.msra.mxu1 %v7736_v45 }
 0x80b   : > { %v7719_v57 = vld [vmem:[#allocation6 + $0x1c0] sm:$0xf]  ;;  %v8901_v34 = vld [vmem:[#allocation6 + $0x1cc] sm:$0xf0]  ;;  %6023 = vmatpush.bf16.msra.mxu2 %v7864_v16  ;;  %v7592_v0 = vor.u32 %v8869_v7, %v7591_v39 }
 0x80c   : > { %v7720_v22 = vor.u32 %v8901_v34, %v7719_v57  ;;  %v7847_v30 = vld [vmem:[#allocation6 + $0x2c0] sm:$0xf]  ;;  %v8933_v4 = vld [vmem:[#allocation6 + $0x2cc] sm:$0xf0]  ;;  %6036 = vmatpush.bf16.msra.mxu3 %v7992_v56 }
 0x80d   : > { %v7975_v37 = vld [vmem:[#allocation6 + $0x3c0] sm:$0xf]  ;;  %v7848_v13 = vor.u32 %v8933_v4, %v7847_v30  ;;  %v8965_v61 = vld [vmem:[#allocation6 + $0x3cc] sm:$0xf0]  ;;  %5998 = vmatpush.bf16.msra.mxu0 %v7592_v0 }
 0x80e   : > { %v7575_v8 = vld [vmem:[#allocation6 + $0xa0] sm:$0xf]  ;;  %v8865_v12 = vld [vmem:[#allocation6 + $0xac] sm:$0xf0]  ;;  %v7976_v9 = vor.u32 %v8965_v61, %v7975_v37  ;;  %6011 = vmatpush.bf16.msra.mxu1 %v7720_v22 }
 0x80f   : > { %v7703_v24 = vld [vmem:[#allocation6 + $0x1a0] sm:$0xf]  ;;  %v8897_v14 = vld [vmem:[#allocation6 + $0x1ac] sm:$0xf0]  ;;  %v7576_v35 = vor.u32 %v8865_v12, %v7575_v8  ;;  %6024 = vmatpush.bf16.msra.mxu2 %v7848_v13 }
 0x810   : > { %v7831_v28 = vld [vmem:[#allocation6 + $0x2a0] sm:$0xf]  ;;  %v8929_v25 = vld [vmem:[#allocation6 + $0x2ac] sm:$0xf0]  ;;  %v7704_v32 = vor.u32 %v8897_v14, %v7703_v24  ;;  %6037 = vmatpush.bf16.msra.mxu3 %v7976_v9 }
 0x811   : > { %v7959_v59 = vld [vmem:[#allocation6 + $0x3a0] sm:$0xf]  ;;  %v8961_v33 = vld [vmem:[#allocation6 + $0x3ac] sm:$0xf0]  ;;  %v7832_v41 = vor.u32 %v8929_v25, %v7831_v28  ;;  %5999 = vmatpush.bf16.msra.mxu0 %v7576_v35 }
 0x812   : > { %v7559_v52 = vld [vmem:[#allocation6 + $0x80] sm:$0xf]  ;;  %v8861_v19 = vld [vmem:[#allocation6 + $0x8c] sm:$0xf0]  ;;  %v7960_v55 = vor.u32 %v8961_v33, %v7959_v59  ;;  %6012 = vmatpush.bf16.msra.mxu1 %v7704_v32 }
 0x813   : > { %v7687_v47 = vld [vmem:[#allocation6 + $0x180] sm:$0xf]  ;;  %v8893_v29 = vld [vmem:[#allocation6 + $0x18c] sm:$0xf0]  ;;  %v7560_v2 = vor.u32 %v8861_v19, %v7559_v52  ;;  %6025 = vmatpush.bf16.msra.mxu2 %v7832_v41 }
 0x814   : > { %v7815_v27 = vld [vmem:[#allocation6 + $0x280] sm:$0xf]  ;;  %v8925_v5 = vld [vmem:[#allocation6 + $0x28c] sm:$0xf0]  ;;  %v7688_v53 = vor.u32 %v8893_v29, %v7687_v47  ;;  %6038 = vmatpush.bf16.msra.mxu3 %v7960_v55 }
 0x815   : > { %v7943_v48 = vld [vmem:[#allocation6 + $0x380] sm:$0xf]  ;;  %v8957_v46 = vld [vmem:[#allocation6 + $0x38c] sm:$0xf0]  ;;  %v7816_v11 = vor.u32 %v8925_v5, %v7815_v27  ;;  %6000 = vmatpush.bf16.msra.mxu0 %v7560_v2 }
 0x816   : > { %v7543_v40 = vld [vmem:[#allocation6 + $0x60] sm:$0xf]  ;;  %v8857_v3 = vld [vmem:[#allocation6 + $0x6c] sm:$0xf0]  ;;  %v7944_v10 = vor.u32 %v8957_v46, %v7943_v48  ;;  %6013 = vmatpush.bf16.msra.mxu1 %v7688_v53 }
 0x817   : > { %v7671_v63 = vld [vmem:[#allocation6 + $0x160] sm:$0xf]  ;;  %v8889_v54 = vld [vmem:[#allocation6 + $0x16c] sm:$0xf0]  ;;  %v7544_v17 = vor.u32 %v8857_v3, %v7543_v40  ;;  %6026 = vmatpush.bf16.msra.mxu2 %v7816_v11 }
 0x818   : > { %v7799_v62 = vld [vmem:[#allocation6 + $0x260] sm:$0xf]  ;;  %v8921_v36 = vld [vmem:[#allocation6 + $0x26c] sm:$0xf0]  ;;  %v7672_v51 = vor.u32 %v8889_v54, %v7671_v63  ;;  %6039 = vmatpush.bf16.msra.mxu3 %v7944_v10 }
 0x819   : > { %v7927_v58 = vld [vmem:[#allocation6 + $0x360] sm:$0xf]  ;;  %v8953_v20 = vld [vmem:[#allocation6 + $0x36c] sm:$0xf0]  ;;  %v7800_v38 = vor.u32 %v8921_v36, %v7799_v62  ;;  %6001 = vmatpush.bf16.msra.mxu0 %v7544_v17 }
 0x81a   : > { %v7527_v18 = vld [vmem:[#allocation6 + $0x40] sm:$0xf]  ;;  %v8853_v23 = vld [vmem:[#allocation6 + $0x4c] sm:$0xf0]  ;;  %v7928_v31 = vor.u32 %v8953_v20, %v7927_v58  ;;  %6014 = vmatpush.bf16.msra.mxu1 %v7672_v51 }
 0x81b   : > { %v7655_v6 = vld [vmem:[#allocation6 + $0x140] sm:$0xf]  ;;  %v8885_v43 = vld [vmem:[#allocation6 + $0x14c] sm:$0xf0]  ;;  %v7528_v50 = vor.u32 %v8853_v23, %v7527_v18  ;;  %6027 = vmatpush.bf16.msra.mxu2 %v7800_v38 }
 0x81c   : > { %v7783_v15 = vld [vmem:[#allocation6 + $0x240] sm:$0xf]  ;;  %v8917_v60 = vld [vmem:[#allocation6 + $0x24c] sm:$0xf0]  ;;  %v7656_v44 = vor.u32 %v8885_v43, %v7655_v6  ;;  %6040 = vmatpush.bf16.msra.mxu3 %v7928_v31 }
 0x81d   : > { %v7911_v1 = vld [vmem:[#allocation6 + $0x340] sm:$0xf]  ;;  %v8949_v26 = vld [vmem:[#allocation6 + $0x34c] sm:$0xf0]  ;;  %v7784_v21 = vor.u32 %v8917_v60, %v7783_v15  ;;  %6002 = vmatpush.bf16.msra.mxu0 %v7528_v50  ;;  %v10958_v50 = vld [vmem:[#allocation2] sm:$0xff] }
 0x81e   : > { %v7511_v45 = vld [vmem:[#allocation6 + $0x20] sm:$0xf]  ;;  %v8849_v16 = vld [vmem:[#allocation6 + $0x2c] sm:$0xf0]  ;;  %v7912_v49 = vor.u32 %v8949_v26, %v7911_v1  ;;  %6015 = vmatpush.bf16.msra.mxu1 %v7656_v44 }
 0x81f   : > { %v7639_v42 = vld [vmem:[#allocation6 + $0x120] sm:$0xf]  ;;  %v8881_v39 = vld [vmem:[#allocation6 + $0x12c] sm:$0xf0]  ;;  %v7512_v0 = vor.u32 %v8849_v16, %v7511_v45  ;;  %6028 = vmatpush.bf16.msra.mxu2 %v7784_v21  ;;  %v4429_v45 = vperm.slane %v10958_v50, 2  ;;  %v4427_v16 = vperm.slane %v10958_v50, 0 }
 0x820   : > { %v7767_v56 = vld [vmem:[#allocation6 + $0x220] sm:$0xf]  ;;  %v8913_v7 = vld [vmem:[#allocation6 + $0x22c] sm:$0xf0]  ;;  %v7640_v4 = vor.u32 %v8881_v39, %v7639_v42  ;;  %6041 = vmatpush.bf16.msra.mxu3 %v7912_v49  ;;  %v4430_v42 = vperm.slane %v10958_v50, 3 }
 0x821   : > { %v7895_v57 = vld [vmem:[#allocation6 + $0x320] sm:$0xf]  ;;  %v8945_v34 = vld [vmem:[#allocation6 + $0x32c] sm:$0xf0]  ;;  %v7768_v37 = vor.u32 %v8913_v7, %v7767_v56  ;;  %6003 = vmatpush.bf16.msra.mxu0 %v7512_v0  ;;  %v10963_v0 = vpack.c.bf16 %v4429_v45, %v4429_v45  ;;  %v8871_v45 = vld [vmem:[#allocation6 + $0xe4] sm:$0xf] }
 0x822   : > { %v7495_v22 = vld [vmem:[#allocation6] sm:$0xf]  ;;  %v8845_v30 = vld [vmem:[#allocation6 + $0xc] sm:$0xf0]  ;;  %v7896_v12 = vor.u32 %v8945_v34, %v7895_v57  ;;  %6016 = vmatpush.bf16.msra.mxu1 %v7640_v4 }
 0x823   : > { %v7623_v13 = vld [vmem:[#allocation6 + $0x100] sm:$0xf]  ;;  %v8877_v61 = vld [vmem:[#allocation6 + $0x10c] sm:$0xf0]  ;;  %v7496_v59 = vor.u32 %v8845_v30, %v7495_v22  ;;  %6029 = vmatpush.bf16.msra.mxu2 %v7768_v37  ;;  %v10965_v22 = vpack.c.bf16 %v4427_v16, %v4427_v16  ;;  %v10967_v30 = vpack.c.bf16 %v4430_v42, %v4430_v42  ;;  %v4428_v37 = vperm.slane %v10958_v50, 1 }
 0x824   : > { %v7751_v8 = vld [vmem:[#allocation6 + $0x200] sm:$0xf]  ;;  %v8909_v9 = vld [vmem:[#allocation6 + $0x20c] sm:$0xf0]  ;;  %v7624_v52 = vor.u32 %v8877_v61, %v7623_v13  ;;  %6042 = vmatpush.bf16.msra.mxu3 %v7896_v12  ;;  %v7609_v16 = vld [vmem:[#allocation6 + $0xf0] sm:$0xf0] }
 0x825   : > { %v7879_v24 = vld [vmem:[#allocation6 + $0x300] sm:$0xf]  ;;  %v8941_v14 = vld [vmem:[#allocation6 + $0x30c] sm:$0xf0]  ;;  %v7752_v19 = vor.u32 %v8909_v9, %v7751_v8  ;;  %6004 = vmatpush.bf16.msra.mxu0 %v7496_v59  ;;  %v8903_v42 = vld [vmem:[#allocation6 + $0x1e4] sm:$0xf] }
 0x826   : > { %v8119_v28 = vld [vmem:[#allocation6 + $0x4e0] sm:$0xf]  ;;  %v9001_v35 = vld [vmem:[#allocation6 + $0x4ec] sm:$0xf0]  ;;  %v7880_v29 = vor.u32 %v8941_v14, %v7879_v24  ;;  %6017 = vmatpush.bf16.msra.mxu1 %v7624_v52 }
 0x827   : > { %v8247_v25 = vld [vmem:[#allocation6 + $0x5e0] sm:$0xf]  ;;  %v9033_v33 = vld [vmem:[#allocation6 + $0x5ec] sm:$0xf0]  ;;  %v8120_v27 = vor.u32 %v9001_v35, %v8119_v28  ;;  %6030 = vmatpush.bf16.msra.mxu2 %v7752_v19 }
 0x828   : > { %v8375_v32 = vld [vmem:[#allocation6 + $0x6e0] sm:$0xf]  ;;  %v9065_v41 = vld [vmem:[#allocation6 + $0x6ec] sm:$0xf0]  ;;  %v8248_v5 = vor.u32 %v9033_v33, %v8247_v25  ;;  %6043 = vmatpush.bf16.msra.mxu3 %v7880_v29  ;;  %v10971_v25 = vpack.c.bf16 %v4428_v37, %v4428_v37  ;;  %6005 = vmatmul.bf16.vlgmr.msra.gmra.mxu0 %v10965_v22  ;;  %v7993_v37 = vld [vmem:[#allocation6 + $0x3f0] sm:$0xf0] }
 0x829   : > { %v8503_v47 = vld [vmem:[#allocation6 + $0x7e0] sm:$0xf]  ;;  %v9097_v55 = vld [vmem:[#allocation6 + $0x7ec] sm:$0xf0]  ;;  %v8376_v48 = vor.u32 %v9065_v41, %v8375_v32  ;;  %6049 = vmatpush.bf16.msrb.mxu0 %v8120_v27 }
 0x82a   : > { %v8103_v46 = vld [vmem:[#allocation6 + $0x4c0] sm:$0xf]  ;;  %v8997_v2 = vld [vmem:[#allocation6 + $0x4cc] sm:$0xf0]  ;;  %v8504_v11 = vor.u32 %v9097_v55, %v8503_v47  ;;  %6062 = vmatpush.bf16.msrb.mxu1 %v8248_v5  ;;  %6031 = vmatmul.bf16.vlgmr.msra.gmra.mxu2 %v10963_v0 }
 0x82b   : > { %v8231_v53 = vld [vmem:[#allocation6 + $0x5c0] sm:$0xf]  ;;  %v9029_v40 = vld [vmem:[#allocation6 + $0x5cc] sm:$0xf0]  ;;  %v8104_v62 = vor.u32 %v8997_v2, %v8103_v46  ;;  %6075 = vmatpush.bf16.msrb.mxu2 %v8376_v48  ;;  %6044 = vmatmul.bf16.vlgmr.msra.gmra.mxu3 %v10967_v30 }
 0x82c   : > { %v8359_v3 = vld [vmem:[#allocation6 + $0x6c0] sm:$0xf]  ;;  %v9061_v63 = vld [vmem:[#allocation6 + $0x6cc] sm:$0xf0]  ;;  %v8232_v58 = vor.u32 %v9029_v40, %v8231_v53  ;;  %6088 = vmatpush.bf16.msrb.mxu3 %v8504_v11  ;;  %6018 = vmatmul.bf16.vlgmr.msra.gmra.mxu1 %v10971_v25 }
 0x82d   : > { %v8487_v10 = vld [vmem:[#allocation6 + $0x7c0] sm:$0xf]  ;;  %v9093_v54 = vld [vmem:[#allocation6 + $0x7cc] sm:$0xf0]  ;;  %v8360_v20 = vor.u32 %v9061_v63, %v8359_v3  ;;  %6050 = vmatpush.bf16.msrb.mxu0 %v8104_v62 }
 0x82e   : > { %v8087_v36 = vld [vmem:[#allocation6 + $0x4a0] sm:$0xf]  ;;  %v8993_v17 = vld [vmem:[#allocation6 + $0x4ac] sm:$0xf0]  ;;  %v8488_v18 = vor.u32 %v9093_v54, %v8487_v10  ;;  %6063 = vmatpush.bf16.msrb.mxu1 %v8232_v58 }
 0x82f   : > { %v8215_v51 = vld [vmem:[#allocation6 + $0x5a0] sm:$0xf]  ;;  %v9025_v38 = vld [vmem:[#allocation6 + $0x5ac] sm:$0xf0]  ;;  %v8088_v15 = vor.u32 %v8993_v17, %v8087_v36  ;;  %6076 = vmatpush.bf16.msrb.mxu2 %v8360_v20 }
 0x830   : > { %v8343_v23 = vld [vmem:[#allocation6 + $0x6a0] sm:$0xf]  ;;  %v9057_v6 = vld [vmem:[#allocation6 + $0x6ac] sm:$0xf0]  ;;  %v8216_v60 = vor.u32 %v9025_v38, %v8215_v51  ;;  %6089 = vmatpush.bf16.msrb.mxu3 %v8488_v18 }
 0x831   : > { %v8471_v31 = vld [vmem:[#allocation6 + $0x7a0] sm:$0xf]  ;;  %v9089_v43 = vld [vmem:[#allocation6 + $0x7ac] sm:$0xf0]  ;;  %v8344_v44 = vor.u32 %v9057_v6, %v8343_v23  ;;  %6051 = vmatpush.bf16.msrb.mxu0 %v8088_v15  ;;  %v4433_v23 = vperm.slane %v10958_v50, 6 }
 0x832   : > { %v8071_v1 = vld [vmem:[#allocation6 + $0x480] sm:$0xf]  ;;  %v8989_v26 = vld [vmem:[#allocation6 + $0x48c] sm:$0xf0]  ;;  %v8472_v49 = vor.u32 %v9089_v43, %v8471_v31  ;;  %6064 = vmatpush.bf16.msrb.mxu1 %v8216_v60 }
 0x833   : > { %v8199_v21 = vld [vmem:[#allocation6 + $0x580] sm:$0xf]  ;;  %v9021_v39 = vld [vmem:[#allocation6 + $0x58c] sm:$0xf0]  ;;  %v8072_v4 = vor.u32 %v8989_v26, %v8071_v1  ;;  %6077 = vmatpush.bf16.msrb.mxu2 %v8344_v44 }
 0x834   : > { %v8327_v56 = vld [vmem:[#allocation6 + $0x680] sm:$0xf]  ;;  %v9053_v7 = vld [vmem:[#allocation6 + $0x68c] sm:$0xf0]  ;;  %v8200_v13 = vor.u32 %v9021_v39, %v8199_v21  ;;  %6090 = vmatpush.bf16.msrb.mxu3 %v8472_v49  ;;  %v7737_v39 = vld [vmem:[#allocation6 + $0x1f0] sm:$0xf0] }
 0x835   : > { %v8455_v57 = vld [vmem:[#allocation6 + $0x780] sm:$0xf]  ;;  %v9085_v34 = vld [vmem:[#allocation6 + $0x78c] sm:$0xf0]  ;;  %v8328_v61 = vor.u32 %v9053_v7, %v8327_v56  ;;  %6052 = vmatpush.bf16.msrb.mxu0 %v8072_v4  ;;  %v8935_v56 = vld [vmem:[#allocation6 + $0x2e4] sm:$0xf] }
 0x836   : > { %v8055_v8 = vld [vmem:[#allocation6 + $0x460] sm:$0xf]  ;;  %v8985_v12 = vld [vmem:[#allocation6 + $0x46c] sm:$0xf0]  ;;  %v8456_v24 = vor.u32 %v9085_v34, %v8455_v57  ;;  %6065 = vmatpush.bf16.msrb.mxu1 %v8200_v13  ;;  %v7865_v7 = vld [vmem:[#allocation6 + $0x2f0] sm:$0xf0] }
 0x837   : > { %v8183_v9 = vld [vmem:[#allocation6 + $0x560] sm:$0xf]  ;;  %v9017_v14 = vld [vmem:[#allocation6 + $0x56c] sm:$0xf0]  ;;  %v8056_v32 = vor.u32 %v8985_v12, %v8055_v8  ;;  %6078 = vmatpush.bf16.msrb.mxu2 %v8328_v61  ;;  %v8967_v4 = vld [vmem:[#allocation6 + $0x3e4] sm:$0xf]  ;;  %v7612_v12 = vor.u32 %v8871_v45, %v7609_v16 }
 0x838   : > { %v8311_v28 = vld [vmem:[#allocation6 + $0x660] sm:$0xf]  ;;  %v9049_v35 = vld [vmem:[#allocation6 + $0x66c] sm:$0xf0]  ;;  %v8184_v41 = vor.u32 %v9017_v14, %v8183_v9  ;;  %6091 = vmatpush.bf16.msrb.mxu3 %v8456_v24  ;;  %v4431_v13 = vperm.slane %v10958_v50, 4  ;;  %v4434_v61 = vperm.slane %v10958_v50, 7  ;;  %v7740_v24 = vor.u32 %v8903_v42, %v7737_v39 }
 0x839   : > { %v8439_v59 = vld [vmem:[#allocation6 + $0x760] sm:$0xf]  ;;  %v9081_v33 = vld [vmem:[#allocation6 + $0x76c] sm:$0xf0]  ;;  %v8312_v52 = vor.u32 %v9049_v35, %v8311_v28  ;;  %6053 = vmatpush.bf16.msrb.mxu0 %v8056_v32  ;;  %v4432_v9 = vperm.slane %v10958_v50, 5  ;;  %v7868_v14 = vor.u32 %v8935_v56, %v7865_v7 }
 0x83a   : > { %v8039_v19 = vld [vmem:[#allocation6 + $0x440] sm:$0xf]  ;;  %v8981_v47 = vld [vmem:[#allocation6 + $0x44c] sm:$0xf0]  ;;  %v8440_v29 = vor.u32 %v9081_v33, %v8439_v59  ;;  %6066 = vmatpush.bf16.msrb.mxu1 %v8184_v41  ;;  %v8867_v28 = vld [vmem:[#allocation6 + $0xc4] sm:$0xf]  ;;  %v7996_v33 = vor.u32 %v8967_v4, %v7993_v37 }
 0x83b   : > { %v8167_v55 = vld [vmem:[#allocation6 + $0x540] sm:$0xf]  ;;  %v9013_v27 = vld [vmem:[#allocation6 + $0x54c] sm:$0xf0]  ;;  %v8040_v53 = vor.u32 %v8981_v47, %v8039_v19  ;;  %6079 = vmatpush.bf16.msrb.mxu2 %v8312_v52  ;;  %v7593_v35 = vld [vmem:[#allocation6 + $0xd0] sm:$0xf0]  ;;  %v10980_v19 = vpack.c.bf16 %v4433_v23, %v4433_v23 }
 0x83c   : > { %v8295_v5 = vld [vmem:[#allocation6 + $0x640] sm:$0xf]  ;;  %v9045_v48 = vld [vmem:[#allocation6 + $0x64c] sm:$0xf0]  ;;  %v8168_v11 = vor.u32 %v9013_v27, %v8167_v55  ;;  %6092 = vmatpush.bf16.msrb.mxu3 %v8440_v29  ;;  %v8899_v59 = vld [vmem:[#allocation6 + $0x1c4] sm:$0xf]  ;;  %v10982_v29 = vpack.c.bf16 %v4431_v13, %v4431_v13  ;;  %v10984_v27 = vpack.c.bf16 %v4434_v61, %v4434_v61  ;;  %v7596_v50 = vor.u32 %v8867_v28, %v7593_v35 }
 0x83d   : > { %v8423_v46 = vld [vmem:[#allocation6 + $0x740] sm:$0xf]  ;;  %v9077_v2 = vld [vmem:[#allocation6 + $0x74c] sm:$0xf0]  ;;  %v8296_v40 = vor.u32 %v9045_v48, %v8295_v5  ;;  %6054 = vmatpush.bf16.msrb.mxu0 %v8040_v53  ;;  %v7721_v32 = vld [vmem:[#allocation6 + $0x1d0] sm:$0xf0]  ;;  %v10986_v5 = vpack.c.bf16 %v4432_v9, %v4432_v9 }
 0x83e   : > { %v8023_v3 = vld [vmem:[#allocation6 + $0x420] sm:$0xf]  ;;  %v8977_v63 = vld [vmem:[#allocation6 + $0x42c] sm:$0xf0]  ;;  %v8424_v54 = vor.u32 %v9077_v2, %v8423_v46  ;;  %6067 = vmatpush.bf16.msrb.mxu1 %v8168_v11  ;;  %v8931_v41 = vld [vmem:[#allocation6 + $0x2c4] sm:$0xf]  ;;  %v7724_v48 = vor.u32 %v8899_v59, %v7721_v32 }
 0x83f   : > { %v8151_v10 = vld [vmem:[#allocation6 + $0x520] sm:$0xf]  ;;  %v9009_v62 = vld [vmem:[#allocation6 + $0x52c] sm:$0xf0]  ;;  %v8024_v51 = vor.u32 %v8977_v63, %v8023_v3  ;;  %6080 = vmatpush.bf16.msrb.mxu2 %v8296_v40  ;;  %v7849_v52 = vld [vmem:[#allocation6 + $0x2d0] sm:$0xf0] }
 0x840   : > { %v8279_v36 = vld [vmem:[#allocation6 + $0x620] sm:$0xf]  ;;  %v9041_v58 = vld [vmem:[#allocation6 + $0x62c] sm:$0xf0]  ;;  %v8152_v6 = vor.u32 %v9009_v62, %v8151_v10  ;;  %6093 = vmatpush.bf16.msrb.mxu3 %v8424_v54  ;;  %v8963_v47 = vld [vmem:[#allocation6 + $0x3c4] sm:$0xf]  ;;  %v7852_v46 = vor.u32 %v8931_v41, %v7849_v52 }
 0x841   : > { %v8407_v20 = vld [vmem:[#allocation6 + $0x720] sm:$0xf]  ;;  %v9073_v17 = vld [vmem:[#allocation6 + $0x72c] sm:$0xf0]  ;;  %v8280_v31 = vor.u32 %v9041_v58, %v8279_v36  ;;  %6055 = vmatpush.bf16.msrb.mxu0 %v8024_v51  ;;  %v7977_v55 = vld [vmem:[#allocation6 + $0x3d0] sm:$0xf0] }
 0x842   : > { %v8007_v38 = vld [vmem:[#allocation6 + $0x400] sm:$0xf]  ;;  %v8973_v18 = vld [vmem:[#allocation6 + $0x40c] sm:$0xf0]  ;;  %v8408_v1 = vor.u32 %v9073_v17, %v8407_v20  ;;  %6068 = vmatpush.bf16.msrb.mxu1 %v8152_v6  ;;  %v8863_v2 = vld [vmem:[#allocation6 + $0xa4] sm:$0xf]  ;;  %v7980_v40 = vor.u32 %v8963_v47, %v7977_v55 }
 0x843   : > { %v8135_v43 = vld [vmem:[#allocation6 + $0x500] sm:$0xf]  ;;  %v9005_v15 = vld [vmem:[#allocation6 + $0x50c] sm:$0xf0]  ;;  %v8008_v49 = vor.u32 %v8973_v18, %v8007_v38  ;;  %6081 = vmatpush.bf16.msrb.mxu2 %v8280_v31  ;;  %v7577_v53 = vld [vmem:[#allocation6 + $0xb0] sm:$0xf0] }
 0x844   : > { %v8263_v60 = vld [vmem:[#allocation6 + $0x600] sm:$0xf]  ;;  %v9037_v26 = vld [vmem:[#allocation6 + $0x60c] sm:$0xf0]  ;;  %v8136_v57 = vor.u32 %v9005_v15, %v8135_v43  ;;  %6094 = vmatpush.bf16.msrb.mxu3 %v8408_v1  ;;  %v8895_v11 = vld [vmem:[#allocation6 + $0x1a4] sm:$0xf]  ;;  %v7580_v36 = vor.u32 %v8863_v2, %v7577_v53 }
 0x845   : > { %v8391_v44 = vld [vmem:[#allocation6 + $0x700] sm:$0xf]  ;;  %v9069_v21 = vld [vmem:[#allocation6 + $0x70c] sm:$0xf0]  ;;  %v8264_v34 = vor.u32 %v9037_v26, %v8263_v60  ;;  %6056 = vmatpush.bf16.msrb.mxu0 %v8008_v49  ;;  %v7705_v3 = vld [vmem:[#allocation6 + $0x1b0] sm:$0xf0] }
 0x846   : > { %v8392_v8 = vor.u32 %v9069_v21, %v8391_v44  ;;  %6069 = vmatpush.bf16.msrb.mxu1 %v8136_v57  ;;  %v8927_v63 = vld [vmem:[#allocation6 + $0x2a4] sm:$0xf]  ;;  %v7833_v10 = vld [vmem:[#allocation6 + $0x2b0] sm:$0xf0]  ;;  %v7708_v58 = vor.u32 %v8895_v11, %v7705_v3 }
 0x847   : > { %6082 = vmatpush.bf16.msrb.mxu2 %v8264_v34  ;;  %v8959_v54 = vld [vmem:[#allocation6 + $0x3a4] sm:$0xf]  ;;  %v7961_v62 = vld [vmem:[#allocation6 + $0x3b0] sm:$0xf0]  ;;  %v7836_v20 = vor.u32 %v8927_v63, %v7833_v10 }
 0x848   : > { %6095 = vmatpush.bf16.msrb.mxu3 %v8392_v8  ;;  %6057 = vmatmul.bf16.vlgmr.msrb.gmra.mxu0 %v10982_v29  ;;  %v8859_v17 = vld [vmem:[#allocation6 + $0x84] sm:$0xf]  ;;  %v7561_v51 = vld [vmem:[#allocation6 + $0x90] sm:$0xf0]  ;;  %v7964_v18 = vor.u32 %v8959_v54, %v7961_v62 }
 0x849   : > { %6101 = vmatpush.bf16.msra.mxu0 %v7612_v12  ;;  %6070 = vmatmul.bf16.vlgmr.msrb.gmra.mxu1 %v10986_v5  ;;  %v8891_v38 = vld [vmem:[#allocation6 + $0x184] sm:$0xf]  ;;  %v7689_v23 = vld [vmem:[#allocation6 + $0x190] sm:$0xf0]  ;;  %v7564_v60 = vor.u32 %v8859_v17, %v7561_v51 }
 0x84a   : > { %6114 = vmatpush.bf16.msra.mxu1 %v7740_v24  ;;  %6083 = vmatmul.bf16.vlgmr.msrb.gmra.mxu2 %v10980_v19  ;;  %v8923_v6 = vld [vmem:[#allocation6 + $0x284] sm:$0xf]  ;;  %v7817_v31 = vld [vmem:[#allocation6 + $0x290] sm:$0xf0]  ;;  %v7692_v1 = vor.u32 %v8891_v38, %v7689_v23 }
 0x84b   : > { %6127 = vmatpush.bf16.msra.mxu2 %v7868_v14  ;;  %6096 = vmatmul.bf16.vlgmr.msrb.gmra.mxu3 %v10984_v27  ;;  %v8955_v43 = vld [vmem:[#allocation6 + $0x384] sm:$0xf]  ;;  %v7945_v15 = vld [vmem:[#allocation6 + $0x390] sm:$0xf0]  ;;  %v7820_v26 = vor.u32 %v8923_v6, %v7817_v31 }
 0x84c   : > { %6140 = vmatpush.bf16.msra.mxu3 %v7996_v33  ;;  %v8855_v44 = vld [vmem:[#allocation6 + $0x64] sm:$0xf]  ;;  %v7545_v21 = vld [vmem:[#allocation6 + $0x70] sm:$0xf0]  ;;  %v7948_v16 = vor.u32 %v8955_v43, %v7945_v15 }
 0x84d   : > { %6102 = vmatpush.bf16.msra.mxu0 %v7596_v50  ;;  %v8887_v45 = vld [vmem:[#allocation6 + $0x164] sm:$0xf]  ;;  %v7673_v42 = vld [vmem:[#allocation6 + $0x170] sm:$0xf0]  ;;  %v7548_v57 = vor.u32 %v8855_v44, %v7545_v21 }
 0x84e   : > { %6115 = vmatpush.bf16.msra.mxu1 %v7724_v48  ;;  %v8919_v49 = vld [vmem:[#allocation6 + $0x264] sm:$0xf]  ;;  %v7801_v39 = vld [vmem:[#allocation6 + $0x270] sm:$0xf0]  ;;  %v7676_v34 = vor.u32 %v8887_v45, %v7673_v42 }
 0x84f   : > { %6128 = vmatpush.bf16.msra.mxu2 %v7852_v46  ;;  %v8951_v56 = vld [vmem:[#allocation6 + $0x364] sm:$0xf]  ;;  %v7929_v7 = vld [vmem:[#allocation6 + $0x370] sm:$0xf0]  ;;  %v7804_v4 = vor.u32 %v8919_v49, %v7801_v39 }
 0x850   : > { %6141 = vmatpush.bf16.msra.mxu3 %v7980_v40  ;;  %v8851_v37 = vld [vmem:[#allocation6 + $0x44] sm:$0xf]  ;;  %v7529_v13 = vld [vmem:[#allocation6 + $0x50] sm:$0xf0]  ;;  %v7932_v8 = vor.u32 %v8951_v56, %v7929_v7 }
 0x851   : > { %6103 = vmatpush.bf16.msra.mxu0 %v7580_v36  ;;  %v8883_v61 = vld [vmem:[#allocation6 + $0x144] sm:$0xf]  ;;  %v7657_v12 = vld [vmem:[#allocation6 + $0x150] sm:$0xf0]  ;;  %v7532_v35 = vor.u32 %v8851_v37, %v7529_v13 }
 0x852   : > { %6116 = vmatpush.bf16.msra.mxu1 %v7708_v58  ;;  %v8915_v9 = vld [vmem:[#allocation6 + $0x244] sm:$0xf]  ;;  %v7785_v24 = vld [vmem:[#allocation6 + $0x250] sm:$0xf0]  ;;  %v7660_v59 = vor.u32 %v8883_v61, %v7657_v12 }
 0x853   : > { %6129 = vmatpush.bf16.msra.mxu2 %v7836_v20  ;;  %v8947_v14 = vld [vmem:[#allocation6 + $0x344] sm:$0xf]  ;;  %v7913_v28 = vld [vmem:[#allocation6 + $0x350] sm:$0xf0]  ;;  %v7788_v33 = vor.u32 %v8915_v9, %v7785_v24 }
 0x854   : > { %6142 = vmatpush.bf16.msra.mxu3 %v7964_v18  ;;  %v8847_v32 = vld [vmem:[#allocation6 + $0x24] sm:$0xf]  ;;  %v7513_v41 = vld [vmem:[#allocation6 + $0x30] sm:$0xf0]  ;;  %v7916_v47 = vor.u32 %v8947_v14, %v7913_v28 }
 0x855   : > { %6104 = vmatpush.bf16.msra.mxu0 %v7564_v60  ;;  %v8879_v52 = vld [vmem:[#allocation6 + $0x124] sm:$0xf]  ;;  %v7641_v55 = vld [vmem:[#allocation6 + $0x130] sm:$0xf0]  ;;  %v7516_v53 = vor.u32 %v8847_v32, %v7513_v41 }
 0x856   : > { %6117 = vmatpush.bf16.msra.mxu1 %v7692_v1  ;;  %v8911_v50 = vld [vmem:[#allocation6 + $0x224] sm:$0xf]  ;;  %v7769_v48 = vld [vmem:[#allocation6 + $0x230] sm:$0xf0]  ;;  %v7644_v3 = vor.u32 %v8879_v52, %v7641_v55 }
 0x857   : > { %6130 = vmatpush.bf16.msra.mxu2 %v7820_v26  ;;  %v8943_v46 = vld [vmem:[#allocation6 + $0x324] sm:$0xf]  ;;  %v7897_v2 = vld [vmem:[#allocation6 + $0x330] sm:$0xf0]  ;;  %v7772_v63 = vor.u32 %v8911_v50, %v7769_v48 }
 0x858   : > { %6143 = vmatpush.bf16.msra.mxu3 %v7948_v16  ;;  %v8843_v11 = vld [vmem:[#allocation6 + $0x4] sm:$0xf]  ;;  %v7497_v40 = vld [vmem:[#allocation6 + $0x10] sm:$0xf0]  ;;  %v7900_v36 = vor.u32 %v8943_v46, %v7897_v2 }
 0x859   : > { %6105 = vmatpush.bf16.msra.mxu0 %v7548_v57  ;;  %v8875_v10 = vld [vmem:[#allocation6 + $0x104] sm:$0xf]  ;;  %v7625_v54 = vld [vmem:[#allocation6 + $0x110] sm:$0xf0]  ;;  %v7500_v23 = vor.u32 %v8843_v11, %v7497_v40 }
 0x85a   : > { %6118 = vmatpush.bf16.msra.mxu1 %v7676_v34  ;;  %v8907_v62 = vld [vmem:[#allocation6 + $0x204] sm:$0xf]  ;;  %v7753_v58 = vld [vmem:[#allocation6 + $0x210] sm:$0xf0]  ;;  %v7628_v15 = vor.u32 %v8875_v10, %v7625_v54 }
 0x85b   : > { %6131 = vmatpush.bf16.msra.mxu2 %v7804_v4  ;;  %v8939_v20 = vld [vmem:[#allocation6 + $0x304] sm:$0xf]  ;;  %v7881_v17 = vld [vmem:[#allocation6 + $0x310] sm:$0xf0]  ;;  %v7756_v60 = vor.u32 %v8907_v62, %v7753_v58 }
 0x85c   : > { %6144 = vmatpush.bf16.msra.mxu3 %v7932_v8  ;;  %v8999_v51 = vld [vmem:[#allocation6 + $0x4e4] sm:$0xf]  ;;  %v8121_v38 = vld [vmem:[#allocation6 + $0x4f0] sm:$0xf0]  ;;  %v7884_v44 = vor.u32 %v8939_v20, %v7881_v17 }
 0x85d   : > { %6106 = vmatpush.bf16.msra.mxu0 %v7532_v35  ;;  %v9031_v18 = vld [vmem:[#allocation6 + $0x5e4] sm:$0xf]  ;;  %v8249_v6 = vld [vmem:[#allocation6 + $0x5f0] sm:$0xf0]  ;;  %v8124_v21 = vor.u32 %v8999_v51, %v8121_v38 }
 0x85e   : > { %6119 = vmatpush.bf16.msra.mxu1 %v7660_v59  ;;  %v9063_v31 = vld [vmem:[#allocation6 + $0x6e4] sm:$0xf]  ;;  %v8377_v43 = vld [vmem:[#allocation6 + $0x6f0] sm:$0xf0]  ;;  %v8252_v45 = vor.u32 %v9031_v18, %v8249_v6 }
 0x85f   : > { %6132 = vmatpush.bf16.msra.mxu2 %v7788_v33  ;;  %v9095_v1 = vld [vmem:[#allocation6 + $0x7e4] sm:$0xf]  ;;  %v8505_v26 = vld [vmem:[#allocation6 + $0x7f0] sm:$0xf0]  ;;  %v8380_v16 = vor.u32 %v9063_v31, %v8377_v43 }
 0x860   : > { %6145 = vmatpush.bf16.msra.mxu3 %v7916_v47  ;;  %v8995_v42 = vld [vmem:[#allocation6 + $0x4c4] sm:$0xf]  ;;  %v8105_v49 = vld [vmem:[#allocation6 + $0x4d0] sm:$0xf0]  ;;  %v8508_v56 = vor.u32 %v9095_v1, %v8505_v26 }
 0x861   : > { %6107 = vmatpush.bf16.msra.mxu0 %v7516_v53  ;;  %v9027_v39 = vld [vmem:[#allocation6 + $0x5c4] sm:$0xf]  ;;  %v8233_v7 = vld [vmem:[#allocation6 + $0x5d0] sm:$0xf0]  ;;  %v8108_v13 = vor.u32 %v8995_v42, %v8105_v49 }
 0x862   : > { %6120 = vmatpush.bf16.msra.mxu1 %v7644_v3  ;;  %v9059_v57 = vld [vmem:[#allocation6 + $0x6c4] sm:$0xf]  ;;  %v8361_v34 = vld [vmem:[#allocation6 + $0x6d0] sm:$0xf0]  ;;  %v8236_v61 = vor.u32 %v9027_v39, %v8233_v7 }
 0x863   : > { %6133 = vmatpush.bf16.msra.mxu2 %v7772_v63  ;;  %v9091_v4 = vld [vmem:[#allocation6 + $0x7c4] sm:$0xf]  ;;  %v8489_v37 = vld [vmem:[#allocation6 + $0x7d0] sm:$0xf0]  ;;  %v8364_v8 = vor.u32 %v9059_v57, %v8361_v34 }
 0x864   : > { %6146 = vmatpush.bf16.msra.mxu3 %v7900_v36  ;;  %v8991_v12 = vld [vmem:[#allocation6 + $0x4a4] sm:$0xf]  ;;  %v8089_v9 = vld [vmem:[#allocation6 + $0x4b0] sm:$0xf0]  ;;  %v8492_v14 = vor.u32 %v9091_v4, %v8489_v37 }
 0x865   : > { %6108 = vmatpush.bf16.msra.mxu0 %v7500_v23  ;;  %v9023_v24 = vld [vmem:[#allocation6 + $0x5a4] sm:$0xf]  ;;  %v8217_v28 = vld [vmem:[#allocation6 + $0x5b0] sm:$0xf0]  ;;  %v8092_v41 = vor.u32 %v8991_v12, %v8089_v9 }
 0x866   : > { %6121 = vmatpush.bf16.msra.mxu1 %v7628_v15  ;;  %v9055_v35 = vld [vmem:[#allocation6 + $0x6a4] sm:$0xf]  ;;  %v8345_v59 = vld [vmem:[#allocation6 + $0x6b0] sm:$0xf0]  ;;  %v8220_v52 = vor.u32 %v9023_v24, %v8217_v28 }
 0x867   : > { %6134 = vmatpush.bf16.msra.mxu2 %v7756_v60  ;;  %v9087_v33 = vld [vmem:[#allocation6 + $0x7a4] sm:$0xf]  ;;  %v8473_v32 = vld [vmem:[#allocation6 + $0x7b0] sm:$0xf0]  ;;  %v8348_v47 = vor.u32 %v9055_v35, %v8345_v59 }
 0x868   : > { %6147 = vmatpush.bf16.msra.mxu3 %v7884_v44  ;;  %6109 = vmatmul.bf16.vlgmr.msra.gmra.mxu0 %v10965_v22  ;;  %v8987_v55 = vld [vmem:[#allocation6 + $0x484] sm:$0xf]  ;;  %v8073_v50 = vld [vmem:[#allocation6 + $0x490] sm:$0xf0]  ;;  %v8476_v46 = vor.u32 %v9087_v33, %v8473_v32 }
 0x869   : > { %6153 = vmatpush.bf16.msrb.mxu0 %v8124_v21  ;;  %6122 = vmatmul.bf16.vlgmr.msra.gmra.mxu1 %v10971_v25  ;;  %v9019_v48 = vld [vmem:[#allocation6 + $0x584] sm:$0xf]  ;;  %v8201_v2 = vld [vmem:[#allocation6 + $0x590] sm:$0xf0]  ;;  %v8076_v63 = vor.u32 %v8987_v55, %v8073_v50  ;;  %v7615_v50 = vld [vmem:[#allocation6 + $0xe8] sm:$0xf] }
 0x86a   : > { %6166 = vmatpush.bf16.msrb.mxu1 %v8252_v45  ;;  %6135 = vmatmul.bf16.vlgmr.msra.gmra.mxu2 %v10963_v0  ;;  %v9051_v53 = vld [vmem:[#allocation6 + $0x684] sm:$0xf]  ;;  %v8329_v11 = vld [vmem:[#allocation6 + $0x690] sm:$0xf0]  ;;  %v8204_v10 = vor.u32 %v9019_v48, %v8201_v2  ;;  %v8874_v48 = vld [vmem:[#allocation6 + $0xf4] sm:$0xf0] }
 0x86b   : > { %6179 = vmatpush.bf16.msrb.mxu2 %v8380_v16  ;;  %6148 = vmatmul.bf16.vlgmr.msra.gmra.mxu3 %v10967_v30  ;;  %v9083_v40 = vld [vmem:[#allocation6 + $0x784] sm:$0xf]  ;;  %v8457_v3 = vld [vmem:[#allocation6 + $0x790] sm:$0xf0]  ;;  %v8332_v54 = vor.u32 %v9051_v53, %v8329_v11  ;;  %v8906_v53 = vld [vmem:[#allocation6 + $0x1f4] sm:$0xf0] }
 0x86c   : > { %6192 = vmatpush.bf16.msrb.mxu3 %v8508_v56  ;;  %v8983_v62 = vld [vmem:[#allocation6 + $0x464] sm:$0xf]  ;;  %v8057_v36 = vld [vmem:[#allocation6 + $0x470] sm:$0xf0]  ;;  %v8460_v20 = vor.u32 %v9083_v40, %v8457_v3  ;;  %v7871_v11 = vld [vmem:[#allocation6 + $0x2e8] sm:$0xf] }
 0x86d   : > { %6154 = vmatpush.bf16.msrb.mxu0 %v8108_v13  ;;  %v9015_v58 = vld [vmem:[#allocation6 + $0x564] sm:$0xf]  ;;  %v8185_v17 = vld [vmem:[#allocation6 + $0x570] sm:$0xf0]  ;;  %v8060_v6 = vor.u32 %v8983_v62, %v8057_v36  ;;  %v8938_v40 = vld [vmem:[#allocation6 + $0x2f4] sm:$0xf0]  ;;  %v7616_v36 = vor.u32 %v8874_v48, %v7615_v50 }
 0x86e   : > { %6167 = vmatpush.bf16.msrb.mxu1 %v8236_v61  ;;  %v9047_v51 = vld [vmem:[#allocation6 + $0x664] sm:$0xf]  ;;  %v8313_v38 = vld [vmem:[#allocation6 + $0x670] sm:$0xf0]  ;;  %v8188_v31 = vor.u32 %v9015_v58, %v8185_v17  ;;  %v7599_v17 = vld [vmem:[#allocation6 + $0xc8] sm:$0xf] }
 0x86f   : > { %6180 = vmatpush.bf16.msrb.mxu2 %v8364_v8  ;;  %v9079_v18 = vld [vmem:[#allocation6 + $0x764] sm:$0xf]  ;;  %v8441_v23 = vld [vmem:[#allocation6 + $0x770] sm:$0xf0]  ;;  %v8316_v43 = vor.u32 %v9047_v51, %v8313_v38  ;;  %v8870_v51 = vld [vmem:[#allocation6 + $0xd4] sm:$0xf0] }
 0x870   : > { %6193 = vmatpush.bf16.msrb.mxu3 %v8492_v14  ;;  %v8979_v15 = vld [vmem:[#allocation6 + $0x444] sm:$0xf]  ;;  %v8041_v60 = vld [vmem:[#allocation6 + $0x450] sm:$0xf0]  ;;  %v8444_v26 = vor.u32 %v9079_v18, %v8441_v23  ;;  %v7727_v38 = vld [vmem:[#allocation6 + $0x1c8] sm:$0xf] }
 0x871   : > { %6155 = vmatpush.bf16.msrb.mxu0 %v8092_v41  ;;  %v9011_v1 = vld [vmem:[#allocation6 + $0x544] sm:$0xf]  ;;  %v8169_v44 = vld [vmem:[#allocation6 + $0x550] sm:$0xf0]  ;;  %v8044_v49 = vor.u32 %v8979_v15, %v8041_v60  ;;  %v8902_v23 = vld [vmem:[#allocation6 + $0x1d4] sm:$0xf0]  ;;  %v7600_v60 = vor.u32 %v8870_v51, %v7599_v17 }
 0x872   : > { %6168 = vmatpush.bf16.msrb.mxu1 %v8220_v52  ;;  %v9043_v21 = vld [vmem:[#allocation6 + $0x644] sm:$0xf]  ;;  %v8297_v45 = vld [vmem:[#allocation6 + $0x650] sm:$0xf0]  ;;  %v8172_v39 = vor.u32 %v9011_v1, %v8169_v44  ;;  %v8966_v15 = vld [vmem:[#allocation6 + $0x3d4] sm:$0xf0]  ;;  %v7728_v1 = vor.u32 %v8902_v23, %v7727_v38 }
 0x873   : > { %6181 = vmatpush.bf16.msrb.mxu2 %v8348_v47  ;;  %v9075_v16 = vld [vmem:[#allocation6 + $0x744] sm:$0xf]  ;;  %v8425_v42 = vld [vmem:[#allocation6 + $0x750] sm:$0xf0]  ;;  %v8300_v56 = vor.u32 %v9043_v21, %v8297_v45  ;;  %v7583_v44 = vld [vmem:[#allocation6 + $0xa8] sm:$0xf] }
 0x874   : > { %6194 = vmatpush.bf16.msrb.mxu3 %v8476_v46  ;;  %v8975_v7 = vld [vmem:[#allocation6 + $0x424] sm:$0xf]  ;;  %v8025_v57 = vld [vmem:[#allocation6 + $0x430] sm:$0xf0]  ;;  %v8428_v4 = vor.u32 %v9075_v16, %v8425_v42  ;;  %v7743_v46 = vld [vmem:[#allocation6 + $0x1e8] sm:$0xf] }
 0x875   : > { %6156 = vmatpush.bf16.msrb.mxu0 %v8076_v63  ;;  %v9007_v34 = vld [vmem:[#allocation6 + $0x524] sm:$0xf]  ;;  %v8153_v37 = vld [vmem:[#allocation6 + $0x530] sm:$0xf0]  ;;  %v8028_v9 = vor.u32 %v8975_v7, %v8025_v57  ;;  %v7744_v58 = vor.u32 %v8906_v53, %v7743_v46  ;;  %v8866_v21 = vld [vmem:[#allocation6 + $0xb4] sm:$0xf0] }
 0x876   : > { %6169 = vmatpush.bf16.msrb.mxu1 %v8204_v10  ;;  %v9039_v13 = vld [vmem:[#allocation6 + $0x624] sm:$0xf]  ;;  %v8281_v61 = vld [vmem:[#allocation6 + $0x630] sm:$0xf0]  ;;  %v8156_v28 = vor.u32 %v9007_v34, %v8153_v37  ;;  %v7999_v10 = vld [vmem:[#allocation6 + $0x3e8] sm:$0xf]  ;;  %v7584_v57 = vor.u32 %v8866_v21, %v7583_v44 }
 0x877   : > { %6182 = vmatpush.bf16.msrb.mxu2 %v8332_v54  ;;  %v9071_v8 = vld [vmem:[#allocation6 + $0x724] sm:$0xf]  ;;  %v8409_v12 = vld [vmem:[#allocation6 + $0x730] sm:$0xf0]  ;;  %v8284_v35 = vor.u32 %v9039_v13, %v8281_v61  ;;  %v8970_v54 = vld [vmem:[#allocation6 + $0x3f4] sm:$0xf0] }
 0x878   : > { %6195 = vmatpush.bf16.msrb.mxu3 %v8460_v20  ;;  %v8971_v24 = vld [vmem:[#allocation6 + $0x404] sm:$0xf]  ;;  %v8009_v14 = vld [vmem:[#allocation6 + $0x410] sm:$0xf0]  ;;  %v8412_v41 = vor.u32 %v9071_v8, %v8409_v12  ;;  %v7872_v20 = vor.u32 %v8938_v40, %v7871_v11  ;;  %v8000_v18 = vor.u32 %v8970_v54, %v7999_v10  ;;  %v7711_v45 = vld [vmem:[#allocation6 + $0x1a8] sm:$0xf] }
 0x879   : > { %6157 = vmatpush.bf16.msrb.mxu0 %v8060_v6  ;;  %v9003_v59 = vld [vmem:[#allocation6 + $0x504] sm:$0xf]  ;;  %v8137_v33 = vld [vmem:[#allocation6 + $0x510] sm:$0xf0]  ;;  %v8012_v2 = vor.u32 %v8971_v24, %v8009_v14  ;;  %v7855_v6 = vld [vmem:[#allocation6 + $0x2c8] sm:$0xf] }
 0x87a   : > { %6170 = vmatpush.bf16.msrb.mxu1 %v8188_v31  ;;  %v9035_v32 = vld [vmem:[#allocation6 + $0x604] sm:$0xf]  ;;  %v8265_v52 = vld [vmem:[#allocation6 + $0x610] sm:$0xf0]  ;;  %v8140_v3 = vor.u32 %v9003_v59, %v8137_v33  ;;  %v8934_v31 = vld [vmem:[#allocation6 + $0x2d4] sm:$0xf0] }
 0x87b   : > { %6183 = vmatpush.bf16.msrb.mxu2 %v8316_v43  ;;  %v9067_v47 = vld [vmem:[#allocation6 + $0x704] sm:$0xf]  ;;  %v8393_v55 = vld [vmem:[#allocation6 + $0x710] sm:$0xf0]  ;;  %v8268_v63 = vor.u32 %v9035_v32, %v8265_v52  ;;  %v7983_v43 = vld [vmem:[#allocation6 + $0x3c8] sm:$0xf] }
 0x87c   : > { %6196 = vmatpush.bf16.msrb.mxu3 %v8444_v26  ;;  %v8396_v62 = vor.u32 %v9067_v47, %v8393_v55  ;;  %v7856_v26 = vor.u32 %v8934_v31, %v7855_v6  ;;  %v7984_v16 = vor.u32 %v8966_v15, %v7983_v43  ;;  %v8898_v42 = vld [vmem:[#allocation6 + $0x1b4] sm:$0xf0]  ;;  %v7567_v37 = vld [vmem:[#allocation6 + $0x88] sm:$0xf] }
 0x87d   : > { %6158 = vmatpush.bf16.msrb.mxu0 %v8044_v49  ;;  %v7839_v49 = vld [vmem:[#allocation6 + $0x2a8] sm:$0xf]  ;;  %v8962_v7 = vld [vmem:[#allocation6 + $0x3b4] sm:$0xf0]  ;;  %v7712_v34 = vor.u32 %v8898_v42, %v7711_v45 }
 0x87e   : > { %6171 = vmatpush.bf16.msrb.mxu1 %v8172_v39  ;;  %v8930_v39 = vld [vmem:[#allocation6 + $0x2b4] sm:$0xf0]  ;;  %v7695_v61 = vld [vmem:[#allocation6 + $0x188] sm:$0xf] }
 0x87f   : > { %6184 = vmatpush.bf16.msrb.mxu2 %v8300_v56  ;;  %v7967_v56 = vld [vmem:[#allocation6 + $0x3a8] sm:$0xf]  ;;  %v8862_v13 = vld [vmem:[#allocation6 + $0x94] sm:$0xf0] }
 0x880   : > { %6197 = vmatpush.bf16.msrb.mxu3 %v8428_v4  ;;  %v7840_v4 = vor.u32 %v8930_v39, %v7839_v49  ;;  %v7968_v8 = vor.u32 %v8962_v7, %v7967_v56  ;;  %v8894_v12 = vld [vmem:[#allocation6 + $0x194] sm:$0xf0]  ;;  %v7951_v14 = vld [vmem:[#allocation6 + $0x388] sm:$0xf] }
 0x881   : > { %6159 = vmatpush.bf16.msrb.mxu0 %v8028_v9  ;;  %v7823_v9 = vld [vmem:[#allocation6 + $0x288] sm:$0xf]  ;;  %v8926_v24 = vld [vmem:[#allocation6 + $0x294] sm:$0xf0]  ;;  %v7696_v59 = vor.u32 %v8894_v12, %v7695_v61 }
 0x882   : > { %6172 = vmatpush.bf16.msrb.mxu1 %v8156_v28  ;;  %v8958_v28 = vld [vmem:[#allocation6 + $0x394] sm:$0xf0]  ;;  %v7824_v33 = vor.u32 %v8926_v24, %v7823_v9  ;;  %v7551_v32 = vld [vmem:[#allocation6 + $0x68] sm:$0xf] }
 0x883   : > { %6185 = vmatpush.bf16.msrb.mxu2 %v8284_v35  ;;  %v7568_v35 = vor.u32 %v8862_v13, %v7567_v37  ;;  %v7679_v52 = vld [vmem:[#allocation6 + $0x168] sm:$0xf]  ;;  %v7952_v47 = vor.u32 %v8958_v28, %v7951_v14  ;;  %v8890_v55 = vld [vmem:[#allocation6 + $0x174] sm:$0xf0] }
 0x884   : > { %6198 = vmatpush.bf16.msrb.mxu3 %v8412_v41  ;;  %v8858_v41 = vld [vmem:[#allocation6 + $0x74] sm:$0xf0]  ;;  %v7807_v50 = vld [vmem:[#allocation6 + $0x268] sm:$0xf]  ;;  %v7680_v11 = vor.u32 %v8890_v55, %v7679_v52 }
 0x885   : > { %6160 = vmatpush.bf16.msrb.mxu0 %v8012_v2  ;;  %v8922_v48 = vld [vmem:[#allocation6 + $0x274] sm:$0xf0]  ;;  %v7935_v46 = vld [vmem:[#allocation6 + $0x368] sm:$0xf]  ;;  %v7552_v53 = vor.u32 %v8858_v41, %v7551_v32 }
 0x886   : > { %6173 = vmatpush.bf16.msrb.mxu1 %v8140_v3  ;;  %v8954_v2 = vld [vmem:[#allocation6 + $0x374] sm:$0xf0]  ;;  %v7808_v40 = vor.u32 %v8922_v48, %v7807_v50  ;;  %v7535_v3 = vld [vmem:[#allocation6 + $0x48] sm:$0xf] }
 0x887   : > { %6186 = vmatpush.bf16.msrb.mxu2 %v8268_v63  ;;  %v8854_v63 = vld [vmem:[#allocation6 + $0x54] sm:$0xf0]  ;;  %v7663_v10 = vld [vmem:[#allocation6 + $0x148] sm:$0xf]  ;;  %v7936_v54 = vor.u32 %v8954_v2, %v7935_v46 }
 0x888   : > { %6199 = vmatpush.bf16.msrb.mxu3 %v8396_v62  ;;  %6161 = vmatmul.bf16.vlgmr.msrb.gmra.mxu0 %v10982_v29  ;;  %v8886_v62 = vld [vmem:[#allocation6 + $0x154] sm:$0xf0]  ;;  %v7536_v51 = vor.u32 %v8854_v63, %v7535_v3  ;;  %v7519_v23 = vld [vmem:[#allocation6 + $0x28] sm:$0xf] }
 0x889   : > { %6205 = vmatpush.bf16.msra.mxu0 %v7616_v36  ;;  %6174 = vmatmul.bf16.vlgmr.msrb.gmra.mxu1 %v10986_v5  ;;  %v7791_v36 = vld [vmem:[#allocation6 + $0x248] sm:$0xf]  ;;  %v8950_v17 = vld [vmem:[#allocation6 + $0x354] sm:$0xf0]  ;;  %v7664_v38 = vor.u32 %v8886_v62, %v7663_v10 }
 0x88a   : > { %6218 = vmatpush.bf16.msra.mxu1 %v7744_v58  ;;  %6187 = vmatmul.bf16.vlgmr.msrb.gmra.mxu2 %v10980_v19  ;;  %v8918_v58 = vld [vmem:[#allocation6 + $0x254] sm:$0xf0]  ;;  %v7647_v31 = vld [vmem:[#allocation6 + $0x128] sm:$0xf] }
 0x88b   : > { %6231 = vmatpush.bf16.msra.mxu2 %v7872_v20  ;;  %6200 = vmatmul.bf16.vlgmr.msrb.gmra.mxu3 %v10984_v27  ;;  %v7919_v20 = vld [vmem:[#allocation6 + $0x348] sm:$0xf]  ;;  %v8850_v6 = vld [vmem:[#allocation6 + $0x34] sm:$0xf0] }
 0x88c   : > { %6244 = vmatpush.bf16.msra.mxu3 %v8000_v18  ;;  %v7792_v18 = vor.u32 %v8918_v58, %v7791_v36  ;;  %v7920_v43 = vor.u32 %v8950_v17, %v7919_v20  ;;  %v8882_v15 = vld [vmem:[#allocation6 + $0x134] sm:$0xf0]  ;;  %v7520_v21 = vor.u32 %v8850_v6, %v7519_v23  ;;  %v7503_v45 = vld [vmem:[#allocation6 + $0x8] sm:$0xf] }
 0x88d   : > { %6206 = vmatpush.bf16.msra.mxu0 %v7600_v60  ;;  %v7775_v60 = vld [vmem:[#allocation6 + $0x228] sm:$0xf]  ;;  %v8946_v44 = vld [vmem:[#allocation6 + $0x334] sm:$0xf0]  ;;  %v7648_v42 = vor.u32 %v8882_v15, %v7647_v31 }
 0x88e   : > { %6219 = vmatpush.bf16.msra.mxu1 %v7728_v1  ;;  %v8914_v1 = vld [vmem:[#allocation6 + $0x234] sm:$0xf0]  ;;  %v7631_v39 = vld [vmem:[#allocation6 + $0x108] sm:$0xf] }
 0x88f   : > { %6232 = vmatpush.bf16.msra.mxu2 %v7856_v26  ;;  %v7903_v26 = vld [vmem:[#allocation6 + $0x328] sm:$0xf]  ;;  %v7776_v49 = vor.u32 %v8914_v1, %v7775_v60  ;;  %v8878_v56 = vld [vmem:[#allocation6 + $0x114] sm:$0xf0] }
 0x890   : > { %6245 = vmatpush.bf16.msra.mxu3 %v7984_v16  ;;  %v8846_v16 = vld [vmem:[#allocation6 + $0x14] sm:$0xf0]  ;;  %v7759_v7 = vld [vmem:[#allocation6 + $0x208] sm:$0xf]  ;;  %v7632_v28 = vor.u32 %v8878_v56, %v7631_v39 }
 0x891   : > { %6207 = vmatpush.bf16.msra.mxu0 %v7584_v57  ;;  %v7904_v57 = vor.u32 %v8946_v44, %v7903_v26  ;;  %v8942_v37 = vld [vmem:[#allocation6 + $0x314] sm:$0xf0]  ;;  %v8127_v13 = vld [vmem:[#allocation6 + $0x4e8] sm:$0xf]  ;;  %v7504_v12 = vor.u32 %v8846_v16, %v7503_v45 }
 0x892   : > { %6220 = vmatpush.bf16.msra.mxu1 %v7712_v34  ;;  %v8910_v34 = vld [vmem:[#allocation6 + $0x214] sm:$0xf0]  ;;  %v8383_v24 = vld [vmem:[#allocation6 + $0x6e8] sm:$0xf] }
 0x893   : > { %6233 = vmatpush.bf16.msra.mxu2 %v7840_v4  ;;  %v7887_v4 = vld [vmem:[#allocation6 + $0x308] sm:$0xf]  ;;  %v9002_v61 = vld [vmem:[#allocation6 + $0x4f4] sm:$0xf0] }
 0x894   : > { %6246 = vmatpush.bf16.msra.mxu3 %v7968_v8  ;;  %v8255_v8 = vld [vmem:[#allocation6 + $0x5e8] sm:$0xf]  ;;  %v9034_v9 = vld [vmem:[#allocation6 + $0x5f4] sm:$0xf0]  ;;  %v7888_v32 = vor.u32 %v8942_v37, %v7887_v4  ;;  %v8128_v41 = vor.u32 %v9002_v61, %v8127_v13 }
 0x895   : > { %6208 = vmatpush.bf16.msra.mxu0 %v7568_v35  ;;  %v9066_v14 = vld [vmem:[#allocation6 + $0x6f4] sm:$0xf0]  ;;  %v7760_v35 = vor.u32 %v8910_v34, %v7759_v7  ;;  %v8256_v52 = vor.u32 %v9034_v9, %v8255_v8  ;;  %v8111_v55 = vld [vmem:[#allocation6 + $0x4c8] sm:$0xf]  ;;  %v11007_v8 = vld [vmem:[%s11221_s8] sm:$0xf] }
 0x896   : > { %6221 = vmatpush.bf16.msra.mxu1 %v7696_v59  ;;  %v8511_v59 = vld [vmem:[#allocation6 + $0x7e8] sm:$0xf]  ;;  %v8998_v50 = vld [vmem:[#allocation6 + $0x4d4] sm:$0xf0] }
 0x897   : > { %6234 = vmatpush.bf16.msra.mxu2 %v7824_v33  ;;  %v9098_v33 = vld [vmem:[#allocation6 + $0x7f4] sm:$0xf0]  ;;  %v8239_v48 = vld [vmem:[#allocation6 + $0x5c8] sm:$0xf]  ;;  %v8112_v63 = vor.u32 %v8998_v50, %v8111_v55 }
 0x898   : > { %6247 = vmatpush.bf16.msra.mxu3 %v7952_v47  ;;  %v8384_v47 = vor.u32 %v9066_v14, %v8383_v24  ;;  %v8512_v46 = vor.u32 %v9098_v33, %v8511_v59  ;;  %v9030_v2 = vld [vmem:[#allocation6 + $0x5d4] sm:$0xf0]  ;;  %v8095_v62 = vld [vmem:[#allocation6 + $0x4a8] sm:$0xf] }
 0x899   : > { %6209 = vmatpush.bf16.msra.mxu0 %v7552_v53  ;;  %v8367_v53 = vld [vmem:[#allocation6 + $0x6c8] sm:$0xf]  ;;  %v9094_v3 = vld [vmem:[#allocation6 + $0x7d4] sm:$0xf0]  ;;  %v8240_v10 = vor.u32 %v9030_v2, %v8239_v48 }
 0x89a   : > { %6222 = vmatpush.bf16.msra.mxu1 %v7680_v11  ;;  %v9062_v11 = vld [vmem:[#allocation6 + $0x6d4] sm:$0xf0]  ;;  %v8223_v58 = vld [vmem:[#allocation6 + $0x5a8] sm:$0xf] }
 0x89b   : > { %6235 = vmatpush.bf16.msra.mxu2 %v7808_v40  ;;  %v8495_v40 = vld [vmem:[#allocation6 + $0x7c8] sm:$0xf]  ;;  %v8994_v36 = vld [vmem:[#allocation6 + $0x4b4] sm:$0xf0] }
 0x89c   : > { %6248 = vmatpush.bf16.msra.mxu3 %v7936_v54  ;;  %v8368_v54 = vor.u32 %v9062_v11, %v8367_v53  ;;  %v8496_v20 = vor.u32 %v9094_v3, %v8495_v40  ;;  %v9026_v17 = vld [vmem:[#allocation6 + $0x5b4] sm:$0xf0]  ;;  %v8096_v6 = vor.u32 %v8994_v36, %v8095_v62  ;;  %v8079_v15 = vld [vmem:[#allocation6 + $0x488] sm:$0xf] }
 0x89d   : > { %6210 = vmatpush.bf16.msra.mxu0 %v7536_v51  ;;  %v8351_v51 = vld [vmem:[#allocation6 + $0x6a8] sm:$0xf]  ;;  %v9090_v23 = vld [vmem:[#allocation6 + $0x7b4] sm:$0xf0]  ;;  %v8224_v31 = vor.u32 %v9026_v17, %v8223_v58 }
 0x89e   : > { %6223 = vmatpush.bf16.msra.mxu1 %v7664_v38  ;;  %v9058_v38 = vld [vmem:[#allocation6 + $0x6b4] sm:$0xf0]  ;;  %v8207_v1 = vld [vmem:[#allocation6 + $0x588] sm:$0xf] }
 0x89f   : > { %6236 = vmatpush.bf16.msra.mxu2 %v7792_v18  ;;  %v8479_v18 = vld [vmem:[#allocation6 + $0x7a8] sm:$0xf]  ;;  %v8990_v60 = vld [vmem:[#allocation6 + $0x494] sm:$0xf0] }
 0x8a0   : > { %6249 = vmatpush.bf16.msra.mxu3 %v7920_v43  ;;  %v8352_v43 = vor.u32 %v9058_v38, %v8351_v51  ;;  %v8480_v26 = vor.u32 %v9090_v23, %v8479_v18  ;;  %v9022_v44 = vld [vmem:[#allocation6 + $0x594] sm:$0xf0]  ;;  %v8463_v16 = vld [vmem:[#allocation6 + $0x788] sm:$0xf] }
 0x8a1   : > { %6211 = vmatpush.bf16.msra.mxu0 %v7520_v21  ;;  %v8335_v21 = vld [vmem:[#allocation6 + $0x688] sm:$0xf]  ;;  %v9054_v45 = vld [vmem:[#allocation6 + $0x694] sm:$0xf0]  ;;  %v8208_v56 = vor.u32 %v9022_v44, %v8207_v1 }
 0x8a2   : > { %6224 = vmatpush.bf16.msra.mxu1 %v7648_v42  ;;  %v9086_v42 = vld [vmem:[#allocation6 + $0x794] sm:$0xf0]  ;;  %v8063_v39 = vld [vmem:[#allocation6 + $0x468] sm:$0xf]  ;;  %v8336_v7 = vor.u32 %v9054_v45, %v8335_v21 }
 0x8a3   : > { %6237 = vmatpush.bf16.msra.mxu2 %v7776_v49  ;;  %v8080_v49 = vor.u32 %v8990_v60, %v8079_v15  ;;  %v8191_v34 = vld [vmem:[#allocation6 + $0x568] sm:$0xf]  ;;  %v9018_v4 = vld [vmem:[#allocation6 + $0x574] sm:$0xf0]  ;;  %v8464_v37 = vor.u32 %v9086_v42, %v8463_v16 }
 0x8a4   : > { %6250 = vmatpush.bf16.msra.mxu3 %v7904_v57  ;;  %v8986_v57 = vld [vmem:[#allocation6 + $0x474] sm:$0xf0]  ;;  %v8319_v13 = vld [vmem:[#allocation6 + $0x668] sm:$0xf] }
 0x8a5   : > { %6212 = vmatpush.bf16.msra.mxu0 %v7504_v12  ;;  %v9050_v61 = vld [vmem:[#allocation6 + $0x674] sm:$0xf0]  ;;  %v8447_v12 = vld [vmem:[#allocation6 + $0x768] sm:$0xf]  ;;  %v8064_v24 = vor.u32 %v8986_v57, %v8063_v39  ;;  %v6006_v2 = vpop.f32.mrf.mxu0  ;;  %v8872_v39 = vld [vmem:[#allocation6 + $0xec] sm:$0xf] }
 0x8a6   : > { %6225 = vmatpush.bf16.msra.mxu1 %v7632_v28  ;;  %v9082_v9 = vld [vmem:[#allocation6 + $0x774] sm:$0xf0]  ;;  %v8047_v14 = vld [vmem:[#allocation6 + $0x448] sm:$0xf]  ;;  %v8192_v28 = vor.u32 %v9018_v4, %v8191_v34  ;;  %v7745_v34 = vld [vmem:[#allocation6 + $0x1f8] sm:$0xf0] }
 0x8a7   : > { %6238 = vmatpush.bf16.msra.mxu2 %v7760_v35  ;;  %v8320_v35 = vor.u32 %v9050_v61, %v8319_v13  ;;  %v8982_v59 = vld [vmem:[#allocation6 + $0x454] sm:$0xf0]  ;;  %v8175_v33 = vld [vmem:[#allocation6 + $0x548] sm:$0xf]  ;;  %v8936_v4 = vld [vmem:[#allocation6 + $0x2ec] sm:$0xf] }
 0x8a8   : > { %6251 = vmatpush.bf16.msra.mxu3 %v7888_v32  ;;  %6213 = vmatmul.bf16.vlgmr.msra.gmra.mxu0 %v10965_v22  ;;  %v5989_v32 = vperm.slane %v11007_v8, 0  ;;  %v9046_v55 = vld [vmem:[#allocation6 + $0x654] sm:$0xf0]  ;;  %v8431_v50 = vld [vmem:[#allocation6 + $0x748] sm:$0xf] }
 0x8a9   : > { %6257 = vmatpush.bf16.msrb.mxu0 %v8128_v41  ;;  %6226 = vmatmul.bf16.vlgmr.msra.gmra.mxu1 %v10971_v25  ;;  %v8448_v41 = vor.u32 %v9082_v9, %v8447_v12  ;;  %v9078_v48 = vld [vmem:[#allocation6 + $0x754] sm:$0xf0]  ;;  %v8031_v40 = vld [vmem:[#allocation6 + $0x428] sm:$0xf] }
 0x8aa   : > { %6270 = vmatpush.bf16.msrb.mxu1 %v8256_v52  ;;  %6239 = vmatmul.bf16.vlgmr.msra.gmra.mxu2 %v10963_v0  ;;  %v9014_v52 = vld [vmem:[#allocation6 + $0x554] sm:$0xf0]  ;;  %v8432_v62 = vor.u32 %v9078_v48, %v8431_v50  ;;  %v8287_v58 = vld [vmem:[#allocation6 + $0x628] sm:$0xf]  ;;  %v7729_v50 = vld [vmem:[#allocation6 + $0x1d8] sm:$0xf0] }
 0x8ab   : > { %6283 = vmatpush.bf16.msrb.mxu2 %v8384_v47  ;;  %6252 = vmatmul.bf16.vlgmr.msra.gmra.mxu3 %v10967_v30  ;;  %v8303_v47 = vld [vmem:[#allocation6 + $0x648] sm:$0xf]  ;;  %v8176_v53 = vor.u32 %v9014_v52, %v8175_v33  ;;  %v8978_v3 = vld [vmem:[#allocation6 + $0x434] sm:$0xf0]  ;;  %v7601_v52 = vld [vmem:[#allocation6 + $0xd8] sm:$0xf0] }
 0x8ac   : > { %6296 = vmatpush.bf16.msrb.mxu3 %v8512_v46  ;;  %v8048_v46 = vor.u32 %v8982_v59, %v8047_v14  ;;  %v8304_v11 = vor.u32 %v9046_v55, %v8303_v47  ;;  %v9010_v36 = vld [vmem:[#allocation6 + $0x534] sm:$0xf0]  ;;  %v8415_v17 = vld [vmem:[#allocation6 + $0x728] sm:$0xf]  ;;  %v8032_v18 = vor.u32 %v8978_v3, %v8031_v40  ;;  %v8001_v14 = vld [vmem:[#allocation6 + $0x3f8] sm:$0xf0] }
 0x8ad   : > { %6258 = vmatpush.bf16.msrb.mxu0 %v8112_v63  ;;  %v8159_v63 = vld [vmem:[#allocation6 + $0x528] sm:$0xf]  ;;  %v9074_v51 = vld [vmem:[#allocation6 + $0x734] sm:$0xf0]  ;;  %v6008_v61 = vpop.f32.mrf.mxu0  ;;  %v8900_v47 = vld [vmem:[#allocation6 + $0x1cc] sm:$0xf] }
 0x8ae   : > { %6271 = vmatpush.bf16.msrb.mxu1 %v8240_v10  ;;  %v6007_v10 = vadd.f32 %v6006_v2, %v5989_v32  ;;  %v8015_v23 = vld [vmem:[#allocation6 + $0x408] sm:$0xf]  ;;  %v9006_v60 = vld [vmem:[#allocation6 + $0x514] sm:$0xf0]  ;;  %v8416_v44 = vor.u32 %v9074_v51, %v8415_v17  ;;  %v8932_v48 = vld [vmem:[#allocation6 + $0x2cc] sm:$0xf] }
 0x8af   : > { %6284 = vmatpush.bf16.msrb.mxu2 %v8368_v54  ;;  %v6019_v54 = vpop.f32.mrf.mxu1  ;;  %v8143_v15 = vld [vmem:[#allocation6 + $0x508] sm:$0xf]  ;;  %v9038_v21 = vld [vmem:[#allocation6 + $0x614] sm:$0xf0]  ;;  %v8964_v2 = vld [vmem:[#allocation6 + $0x3cc] sm:$0xf] }
 0x8b0   : > { %6297 = vmatpush.bf16.msrb.mxu3 %v8496_v20  ;;  %v9042_v20 = vld [vmem:[#allocation6 + $0x634] sm:$0xf0]  ;;  %v6020_v38 = vadd.f32 %v6019_v54, %v6007_v10  ;;  %v8271_v1 = vld [vmem:[#allocation6 + $0x608] sm:$0xf]  ;;  %v8144_v12 = vor.u32 %v9006_v60, %v8143_v15  ;;  %v8864_v54 = vld [vmem:[#allocation6 + $0xac] sm:$0xf] }
 0x8b1   : > { %6259 = vmatpush.bf16.msrb.mxu0 %v8096_v6  ;;  %v8974_v6 = vld [vmem:[#allocation6 + $0x414] sm:$0xf0]  ;;  %v8399_v45 = vld [vmem:[#allocation6 + $0x708] sm:$0xf]  ;;  %v8272_v9 = vor.u32 %v9038_v21, %v8271_v1  ;;  %v8928_v17 = vld [vmem:[#allocation6 + $0x2ac] sm:$0xf] }
 0x8b2   : > { %6272 = vmatpush.bf16.msrb.mxu1 %v8224_v31  ;;  %v8160_v31 = vor.u32 %v9010_v36, %v8159_v63  ;;  %v9070_v16 = vld [vmem:[#allocation6 + $0x714] sm:$0xf0]  ;;  %v8016_v57 = vor.u32 %v8974_v6, %v8015_v23  ;;  %v7732_v63 = vor.u32 %v8900_v47, %v7729_v50  ;;  %v8896_v36 = vld [vmem:[#allocation6 + $0x1ac] sm:$0xf]  ;;  %v7841_v51 = vld [vmem:[#allocation6 + $0x2b8] sm:$0xf0] }
 0x8b3   : > { %6285 = vmatpush.bf16.msrb.mxu2 %v8352_v43  ;;  %v8288_v43 = vor.u32 %v9042_v20, %v8287_v58  ;;  %v7713_v20 = vld [vmem:[#allocation6 + $0x1b8] sm:$0xf0]  ;;  %v8892_v60 = vld [vmem:[#allocation6 + $0x18c] sm:$0xf] }
 0x8b4   : > { %6298 = vmatpush.bf16.msrb.mxu3 %v8480_v26  ;;  %v6032_v26 = vpop.f32.mrf.mxu2  ;;  %v7716_v6 = vor.u32 %v8896_v36, %v7713_v20  ;;  %v7569_v15 = vld [vmem:[#allocation6 + $0x98] sm:$0xf0]  ;;  %v8884_v47 = vld [vmem:[#allocation6 + $0x14c] sm:$0xf] }
 0x8b5   : > { %6260 = vmatpush.bf16.msrb.mxu0 %v8080_v49  ;;  %v6033_v42 = vadd.f32 %v6032_v26, %v6020_v38  ;;  %v6045_v49 = vpop.f32.mrf.mxu3  ;;  %v8960_v38 = vld [vmem:[#allocation6 + $0x3ac] sm:$0xf]  ;;  %v7697_v26 = vld [vmem:[#allocation6 + $0x198] sm:$0xf0] }
 0x8b6   : > { %6273 = vmatpush.bf16.msrb.mxu1 %v8208_v56  ;;  %v7617_v56 = vld [vmem:[#allocation6 + $0xf8] sm:$0xf0]  ;;  %v8848_v36 = vld [vmem:[#allocation6 + $0x2c] sm:$0xf] }
 0x8b7   : > { %6286 = vmatpush.bf16.msrb.mxu2 %v8336_v7  ;;  %v8904_v7 = vld [vmem:[#allocation6 + $0x1ec] sm:$0xf]  ;;  %v11010_v13 = vadd.f32 %v6045_v49, %v6033_v42  ;;  %v7620_v59 = vor.u32 %v8872_v39, %v7617_v56  ;;  %v7825_v21 = vld [vmem:[#allocation6 + $0x298] sm:$0xf0]  ;;  %v7700_v39 = vor.u32 %v8892_v60, %v7697_v26 }
 0x8b8   : > { %6299 = vmatpush.bf16.msrb.mxu3 %v8464_v37  ;;  %v7873_v37 = vld [vmem:[#allocation6 + $0x2f8] sm:$0xf0]  ;;  %v7748_v33 = vor.u32 %v8904_v7, %v7745_v34  ;;  %v8856_v7 = vld [vmem:[#allocation6 + $0x6c] sm:$0xf] }
 0x8b9   : > { %6261 = vmatpush.bf16.msrb.mxu0 %v8064_v24  ;;  %v8968_v24 = vld [vmem:[#allocation6 + $0x3ec] sm:$0xf]  ;;  %v7876_v32 = vor.u32 %v8936_v4, %v7873_v37  ;;  %v7665_v50 = vld [vmem:[#allocation6 + $0x158] sm:$0xf0] }
 0x8ba   : > { %6274 = vmatpush.bf16.msrb.mxu1 %v8192_v28  ;;  %v6021_v28 = vpop.f32.mrf.mxu1  ;;  %v8004_v55 = vor.u32 %v8968_v24, %v8001_v14  ;;  %v8888_v34 = vld [vmem:[#allocation6 + $0x16c] sm:$0xf]  ;;  %v7809_v24 = vld [vmem:[#allocation6 + $0x278] sm:$0xf0] }
 0x8bb   : > { %6287 = vmatpush.bf16.msrb.mxu2 %v8320_v35  ;;  %v8400_v35 = vor.u32 %v9070_v16, %v8399_v45  ;;  %v8956_v45 = vld [vmem:[#allocation6 + $0x38c] sm:$0xf]  ;;  %v7953_v16 = vld [vmem:[#allocation6 + $0x398] sm:$0xf0] }
 0x8bc   : > { %6300 = vmatpush.bf16.msrb.mxu3 %v8448_v41  ;;  %v8868_v41 = vld [vmem:[#allocation6 + $0xcc] sm:$0xf]  ;;  %v7956_v61 = vor.u32 %v8956_v45, %v7953_v16  ;;  %v7937_v28 = vld [vmem:[#allocation6 + $0x378] sm:$0xf0] }
 0x8bd   : > { %6262 = vmatpush.bf16.msrb.mxu0 %v8048_v46  ;;  %v7857_v46 = vld [vmem:[#allocation6 + $0x2d8] sm:$0xf0]  ;;  %v7604_v40 = vor.u32 %v8868_v41, %v7601_v52  ;;  %v6047_v3 = vpop.f32.mrf.mxu3  ;;  %v8952_v14 = vld [vmem:[#allocation6 + $0x36c] sm:$0xf] }
 0x8be   : > { %6275 = vmatpush.bf16.msrb.mxu1 %v8176_v53  ;;  %v7985_v53 = vld [vmem:[#allocation6 + $0x3d8] sm:$0xf0]  ;;  %v7860_v10 = vor.u32 %v8932_v48, %v7857_v46  ;;  %v8852_v41 = vld [vmem:[#allocation6 + $0x4c] sm:$0xf] }
 0x8bf   : > { %6288 = vmatpush.bf16.msrb.mxu2 %v8304_v11  ;;  %v6034_v11 = vpop.f32.mrf.mxu2  ;;  %v7988_v58 = vor.u32 %v8964_v2, %v7985_v53  ;;  %v7537_v52 = vld [vmem:[#allocation6 + $0x58] sm:$0xf0]  ;;  %v8916_v48 = vld [vmem:[#allocation6 + $0x24c] sm:$0xf] }
 0x8c0   : > { %6301 = vmatpush.bf16.msrb.mxu3 %v8432_v62  ;;  %v7585_v62 = vld [vmem:[#allocation6 + $0xb8] sm:$0xf0]  ;;  %v8948_v11 = vld [vmem:[#allocation6 + $0x34c] sm:$0xf]  ;;  %v7540_v3 = vor.u32 %v8852_v41, %v7537_v52 }
 0x8c1   : > { %6263 = vmatpush.bf16.msrb.mxu0 %v8032_v18  ;;  %v7969_v18 = vld [vmem:[#allocation6 + $0x3b8] sm:$0xf0]  ;;  %v7588_v23 = vor.u32 %v8864_v54, %v7585_v62  ;;  %v7668_v54 = vor.u32 %v8884_v47, %v7665_v50  ;;  %v8880_v20 = vld [vmem:[#allocation6 + $0x12c] sm:$0xf] }
 0x8c2   : > { %6276 = vmatpush.bf16.msrb.mxu1 %v8160_v31  ;;  %v7844_v31 = vor.u32 %v8928_v17, %v7841_v51  ;;  %v7972_v1 = vor.u32 %v8960_v38, %v7969_v18  ;;  %v7793_v46 = vld [vmem:[#allocation6 + $0x258] sm:$0xf0]  ;;  %v8912_v18 = vld [vmem:[#allocation6 + $0x22c] sm:$0xf] }
 0x8c3   : > { %6289 = vmatpush.bf16.msrb.mxu2 %v8288_v43  ;;  %v8860_v43 = vld [vmem:[#allocation6 + $0x8c] sm:$0xf]  ;;  %v7796_v62 = vor.u32 %v8916_v48, %v7793_v46  ;;  %v7649_v38 = vld [vmem:[#allocation6 + $0x138] sm:$0xf0] }
 0x8c4   : > { %6302 = vmatpush.bf16.msrb.mxu3 %v8416_v44  ;;  %v8924_v44 = vld [vmem:[#allocation6 + $0x28c] sm:$0xf]  ;;  %v7572_v42 = vor.u32 %v8860_v43, %v7569_v15  ;;  %v7505_v60 = vld [vmem:[#allocation6 + $0x18] sm:$0xf0] }
 0x8c5   : > { %6264 = vmatpush.bf16.msrb.mxu0 %v8016_v57  ;;  %v6058_v49 = vpop.f32.mrf.mxu0  ;;  %v7828_v56 = vor.u32 %v8924_v44, %v7825_v21  ;;  %v7553_v57 = vld [vmem:[#allocation6 + $0x78] sm:$0xf0]  ;;  %v8844_v15 = vld [vmem:[#allocation6 + $0xc] sm:$0xf] }
 0x8c6   : > { %6277 = vmatpush.bf16.msrb.mxu1 %v8144_v12  ;;  %v6059_v4 = vadd.f32 %v6058_v49, %v11010_v13  ;;  %v6071_v37 = vpop.f32.mrf.mxu1  ;;  %v7681_v12 = vld [vmem:[#allocation6 + $0x178] sm:$0xf0]  ;;  %v7940_v13 = vor.u32 %v8952_v14, %v7937_v28  ;;  %v8876_v44 = vld [vmem:[#allocation6 + $0x10c] sm:$0xf] }
 0x8c7   : > { %6290 = vmatpush.bf16.msrb.mxu2 %v8272_v9  ;;  %v8920_v9 = vld [vmem:[#allocation6 + $0x26c] sm:$0xf]  ;;  %v7633_v21 = vld [vmem:[#allocation6 + $0x118] sm:$0xf0] }
 0x8c8   : > { %6303 = vmatpush.bf16.msrb.mxu3 %v8400_v35  ;;  %6265 = vmatmul.bf16.vlgmr.msrb.gmra.mxu0 %v10982_v29  ;;  %v6072_v35 = vadd.f32 %v6071_v37, %v6059_v4  ;;  %v8908_v45 = vld [vmem:[#allocation6 + $0x20c] sm:$0xf]  ;;  %v7761_v49 = vld [vmem:[#allocation6 + $0x218] sm:$0xf0]  ;;  %v7508_v37 = vor.u32 %v8844_v15, %v7505_v60 }
 0x8c9   : > { %6309 = vmatpush.bf16.msra.mxu0 %v7620_v59  ;;  %6278 = vmatmul.bf16.vlgmr.msrb.gmra.mxu1 %v10986_v5  ;;  %v7556_v59 = vor.u32 %v8856_v7, %v7553_v57  ;;  %v9000_v57 = vld [vmem:[#allocation6 + $0x4ec] sm:$0xf]  ;;  %v7764_v14 = vor.u32 %v8908_v45, %v7761_v49  ;;  %v8113_v47 = vld [vmem:[#allocation6 + $0x4d8] sm:$0xf0] }
 0x8ca   : > { %6322 = vmatpush.bf16.msra.mxu1 %v7748_v33  ;;  %6291 = vmatmul.bf16.vlgmr.msrb.gmra.mxu2 %v10980_v19  ;;  %v7684_v33 = vor.u32 %v8888_v34, %v7681_v12  ;;  %v8129_v34 = vld [vmem:[#allocation6 + $0x4f8] sm:$0xf0]  ;;  %v9032_v4 = vld [vmem:[#allocation6 + $0x5ec] sm:$0xf] }
 0x8cb   : > { %6335 = vmatpush.bf16.msra.mxu2 %v7876_v32  ;;  %6304 = vmatmul.bf16.vlgmr.msrb.gmra.mxu3 %v10984_v27  ;;  %v7812_v32 = vor.u32 %v8920_v9, %v7809_v24  ;;  %v9064_v12 = vld [vmem:[#allocation6 + $0x6ec] sm:$0xf]  ;;  %v8385_v9 = vld [vmem:[#allocation6 + $0x6f8] sm:$0xf0]  ;;  %v7636_v24 = vor.u32 %v8876_v44, %v7633_v21 }
 0x8cc   : > { %6348 = vmatpush.bf16.msra.mxu3 %v8004_v55  ;;  %v9096_v28 = vld [vmem:[#allocation6 + $0x7ec] sm:$0xf]  ;;  %v8388_v41 = vor.u32 %v9064_v12, %v8385_v9  ;;  %v8241_v50 = vld [vmem:[#allocation6 + $0x5d8] sm:$0xf0] }
 0x8cd   : > { %6310 = vmatpush.bf16.msra.mxu0 %v7604_v40  ;;  %v6084_v55 = vpop.f32.mrf.mxu2  ;;  %v7921_v40 = vld [vmem:[#allocation6 + $0x358] sm:$0xf0]  ;;  %v8996_v52 = vld [vmem:[#allocation6 + $0x4cc] sm:$0xf] }
 0x8ce   : > { %6323 = vmatpush.bf16.msra.mxu1 %v7732_v63  ;;  %v6085_v2 = vadd.f32 %v6084_v55, %v6072_v35  ;;  %v6097_v53 = vpop.f32.mrf.mxu3  ;;  %v6073_v17 = vpop.f32.mrf.mxu1  ;;  %v7924_v51 = vor.u32 %v8948_v11, %v7921_v40  ;;  %v8513_v35 = vld [vmem:[#allocation6 + $0x7f8] sm:$0xf0]  ;;  %v9028_v55 = vld [vmem:[#allocation6 + $0x5cc] sm:$0xf]  ;;  %v8116_v11 = vor.u32 %v8996_v52, %v8113_v47 }
 0x8cf   : > { %6336 = vmatpush.bf16.msra.mxu2 %v7860_v10  ;;  %v6060_v10 = vpop.f32.mrf.mxu0  ;;  %v9060_v48 = vld [vmem:[#allocation6 + $0x6cc] sm:$0xf]  ;;  %v8369_v46 = vld [vmem:[#allocation6 + $0x6d8] sm:$0xf0]  ;;  %v8244_v40 = vor.u32 %v9028_v55, %v8241_v50 }
 0x8d0   : > { %6349 = vmatpush.bf16.msra.mxu3 %v7988_v58  ;;  %v11017_v63 = vadd.f32 %v6097_v53, %v6085_v2  ;;  %v7521_v58 = vld [vmem:[#allocation6 + $0x38] sm:$0xf0]  ;;  %v9092_v2 = vld [vmem:[#allocation6 + $0x7cc] sm:$0xf] }
 0x8d1   : > { %6311 = vmatpush.bf16.msra.mxu0 %v7588_v23  ;;  %v7777_v23 = vld [vmem:[#allocation6 + $0x238] sm:$0xf0]  ;;  %v7524_v43 = vor.u32 %v8848_v36, %v7521_v58  ;;  %v8992_v10 = vld [vmem:[#allocation6 + $0x4ac] sm:$0xf] }
 0x8d2   : > { %6324 = vmatpush.bf16.msra.mxu1 %v7716_v6  ;;  %v8944_v6 = vld [vmem:[#allocation6 + $0x32c] sm:$0xf]  ;;  %v7780_v26 = vor.u32 %v8912_v18, %v7777_v23  ;;  %v8497_v53 = vld [vmem:[#allocation6 + $0x7d8] sm:$0xf0] }
 0x8d3   : > { %6337 = vmatpush.bf16.msra.mxu2 %v7844_v31  ;;  %v7905_v31 = vld [vmem:[#allocation6 + $0x338] sm:$0xf0]  ;;  %v8500_v36 = vor.u32 %v9092_v2, %v8497_v53  ;;  %v9084_v44 = vld [vmem:[#allocation6 + $0x78c] sm:$0xf] }
 0x8d4   : > { %6350 = vmatpush.bf16.msra.mxu3 %v7972_v1  ;;  %v7652_v1 = vor.u32 %v8880_v20, %v7649_v38  ;;  %v8225_v58 = vld [vmem:[#allocation6 + $0x5b8] sm:$0xf0]  ;;  %v9056_v20 = vld [vmem:[#allocation6 + $0x6ac] sm:$0xf] }
 0x8d5   : > { %6312 = vmatpush.bf16.msra.mxu0 %v7572_v42  ;;  %v6086_v16 = vpop.f32.mrf.mxu2  ;;  %v7908_v42 = vor.u32 %v8944_v6, %v7905_v31  ;;  %v8353_v17 = vld [vmem:[#allocation6 + $0x6b8] sm:$0xf0]  ;;  %v8988_v31 = vld [vmem:[#allocation6 + $0x48c] sm:$0xf] }
 0x8d6   : > { %6325 = vmatpush.bf16.msra.mxu1 %v7700_v39  ;;  %v8940_v39 = vld [vmem:[#allocation6 + $0x30c] sm:$0xf]  ;;  %v6099_v7 = vpop.f32.mrf.mxu3  ;;  %v8481_v38 = vld [vmem:[#allocation6 + $0x7b8] sm:$0xf0]  ;;  %v8356_v6 = vor.u32 %v9056_v20, %v8353_v17  ;;  %v5990_v20 = vperm.slane %v11007_v8, 1 }
 0x8d7   : > { %6338 = vmatpush.bf16.msra.mxu2 %v7828_v56  ;;  %v7889_v56 = vld [vmem:[#allocation6 + $0x318] sm:$0xf0]  ;;  %v8984_v16 = vld [vmem:[#allocation6 + $0x46c] sm:$0xf]  ;;  %v9114_v8 = vld [vmem:[#allocation8 + $0x74] sm:$0xf0] }
 0x8d8   : > { %6351 = vmatpush.bf16.msra.mxu3 %v7956_v61  ;;  %v8257_v61 = vld [vmem:[#allocation6 + $0x5f8] sm:$0xf0]  ;;  %v9016_v49 = vld [vmem:[#allocation6 + $0x56c] sm:$0xf] }
 0x8d9   : > { %6313 = vmatpush.bf16.msra.mxu0 %v7556_v59  ;;  %v7892_v59 = vor.u32 %v8940_v39, %v7889_v56  ;;  %v8209_v60 = vld [vmem:[#allocation6 + $0x598] sm:$0xf0]  ;;  %v9076_v47 = vld [vmem:[#allocation6 + $0x74c] sm:$0xf] }
 0x8da   : > { %6326 = vmatpush.bf16.msra.mxu1 %v7684_v33  ;;  %v8132_v33 = vor.u32 %v9000_v57, %v8129_v34  ;;  %v8193_v7 = vld [vmem:[#allocation6 + $0x578] sm:$0xf0]  ;;  %v9048_v57 = vld [vmem:[#allocation6 + $0x66c] sm:$0xf] }
 0x8db   : > { %6339 = vmatpush.bf16.msra.mxu2 %v7812_v32  ;;  %v8260_v32 = vor.u32 %v9032_v4, %v8257_v61  ;;  %v8321_v34 = vld [vmem:[#allocation6 + $0x678] sm:$0xf0]  ;;  %v9080_v4 = vld [vmem:[#allocation6 + $0x76c] sm:$0xf]  ;;  %v8196_v12 = vor.u32 %v9016_v49, %v8193_v7 }
 0x8dc   : > { %6352 = vmatpush.bf16.msra.mxu3 %v7940_v13  ;;  %v8516_v13 = vor.u32 %v9096_v28, %v8513_v35  ;;  %v8324_v9 = vor.u32 %v9048_v57, %v8321_v34  ;;  %v9012_v28 = vld [vmem:[#allocation6 + $0x54c] sm:$0xf]  ;;  %v8433_v55 = vld [vmem:[#allocation6 + $0x758] sm:$0xf0] }
 0x8dd   : > { %6314 = vmatpush.bf16.msra.mxu0 %v7540_v3  ;;  %v8372_v3 = vor.u32 %v9060_v48, %v8369_v46  ;;  %v8976_v2 = vld [vmem:[#allocation6 + $0x42c] sm:$0xf]  ;;  %v8033_v53 = vld [vmem:[#allocation6 + $0x438] sm:$0xf0] }
 0x8de   : > { %6327 = vmatpush.bf16.msra.mxu1 %v7668_v54  ;;  %v8097_v54 = vld [vmem:[#allocation6 + $0x4b8] sm:$0xf0]  ;;  %v8036_v17 = vor.u32 %v8976_v2, %v8033_v53  ;;  %v8543_v2 = vld [vmem:[#allocation8 + $0x30] sm:$0xf] }
 0x8df   : > { %6340 = vmatpush.bf16.msra.mxu2 %v7796_v62  ;;  %v9024_v62 = vld [vmem:[#allocation6 + $0x5ac] sm:$0xf]  ;;  %v8100_v18 = vor.u32 %v8992_v10, %v8097_v54  ;;  %v8161_v10 = vld [vmem:[#allocation6 + $0x538] sm:$0xf0]  ;;  %v8607_v53 = vld [vmem:[#allocation8 + $0xb0] sm:$0xf] }
 0x8e0   : > { %6353 = vmatpush.bf16.msra.mxu3 %v7924_v51  ;;  %v9088_v51 = vld [vmem:[#allocation6 + $0x7ac] sm:$0xf]  ;;  %v8228_v23 = vor.u32 %v9024_v62, %v8225_v58  ;;  %v8289_v62 = vld [vmem:[#allocation6 + $0x638] sm:$0xf0] }
 0x8e1   : > { %6315 = vmatpush.bf16.msra.mxu0 %v7524_v43  ;;  %v8081_v43 = vld [vmem:[#allocation6 + $0x498] sm:$0xf0]  ;;  %v8484_v15 = vor.u32 %v9088_v51, %v8481_v38  ;;  %v9040_v54 = vld [vmem:[#allocation6 + $0x62c] sm:$0xf] }
 0x8e2   : > { %6328 = vmatpush.bf16.msra.mxu1 %v7652_v1  ;;  %v9052_v1 = vld [vmem:[#allocation6 + $0x68c] sm:$0xf]  ;;  %v8417_v58 = vld [vmem:[#allocation6 + $0x738] sm:$0xf0] }
 0x8e3   : > { %6341 = vmatpush.bf16.msra.mxu2 %v7780_v26  ;;  %v8337_v26 = vld [vmem:[#allocation6 + $0x698] sm:$0xf0]  ;;  %v8972_v51 = vld [vmem:[#allocation6 + $0x40c] sm:$0xf] }
 0x8e4   : > { %6354 = vmatpush.bf16.msra.mxu3 %v7908_v42  ;;  %v8340_v45 = vor.u32 %v9052_v1, %v8337_v26  ;;  %v8065_v42 = vld [vmem:[#allocation6 + $0x478] sm:$0xf0]  ;;  %v9068_v1 = vld [vmem:[#allocation6 + $0x70c] sm:$0xf] }
 0x8e5   : > { %6316 = vmatpush.bf16.msra.mxu0 %v7508_v37  ;;  %v11023_v21 = vpop.f32.mrf.mxu0  ;;  %v8449_v37 = vld [vmem:[#allocation6 + $0x778] sm:$0xf0]  ;;  %v8068_v61 = vor.u32 %v8984_v16, %v8065_v42  ;;  %v9130_v16 = vld [vmem:[#allocation8 + $0xf4] sm:$0xf0] }
 0x8e6   : > { %6329 = vmatpush.bf16.msra.mxu1 %v7636_v24  ;;  %v11025_v39 = vpop.f32.mrf.mxu1  ;;  %v8980_v24 = vld [vmem:[#allocation6 + $0x44c] sm:$0xf] }
 0x8e7   : > { %6342 = vmatpush.bf16.msra.mxu2 %v7764_v14  ;;  %v8049_v14 = vld [vmem:[#allocation6 + $0x458] sm:$0xf0] }
 0x8e8   : > { %6355 = vmatpush.bf16.msra.mxu3 %v7892_v59  ;;  %6317 = vmatmul.bf16.vlgmr.msra.gmra.mxu0 %v10965_v22  ;;  %v8465_v22 = vld [vmem:[#allocation6 + $0x798] sm:$0xf0]  ;;  %v8452_v59 = vor.u32 %v9080_v4, %v8449_v37  ;;  %v8567_v4 = vld [vmem:[#allocation8 + $0x60] sm:$0xf]  ;;  %v9112_v37 = vld [vmem:[#allocation8 + $0x64] sm:$0xf0] }
 0x8e9   : > { %6361 = vmatpush.bf16.msrb.mxu0 %v8132_v33  ;;  %6330 = vmatmul.bf16.vlgmr.msra.gmra.mxu1 %v10971_v25  ;;  %v8468_v56 = vor.u32 %v9084_v44, %v8465_v22  ;;  %v8177_v33 = vld [vmem:[#allocation6 + $0x558] sm:$0xf0]  ;;  %v8575_v22 = vld [vmem:[#allocation8 + $0x70] sm:$0xf] }
 0x8ea   : > { %6374 = vmatpush.bf16.msrb.mxu1 %v8260_v32  ;;  %6343 = vmatmul.bf16.vlgmr.msra.gmra.mxu2 %v10963_v0  ;;  %v9020_v0 = vld [vmem:[#allocation6 + $0x58c] sm:$0xf]  ;;  %v8180_v48 = vor.u32 %v9012_v28, %v8177_v33  ;;  %v8401_v44 = vld [vmem:[#allocation6 + $0x718] sm:$0xf0]  ;;  %v8576_v7 = vor.u32 %v9114_v8, %v8575_v22  ;;  %v9110_v28 = vld [vmem:[#allocation8 + $0x54] sm:$0xf0] }
 0x8eb   : > { %6387 = vmatpush.bf16.msrb.mxu2 %v8388_v41  ;;  %6356 = vmatmul.bf16.vlgmr.msra.gmra.mxu3 %v10967_v30  ;;  %v8084_v30 = vor.u32 %v8988_v31, %v8081_v43  ;;  %v8212_v25 = vor.u32 %v9020_v0, %v8209_v60  ;;  %v9044_v32 = vld [vmem:[#allocation6 + $0x64c] sm:$0xf]  ;;  %v8305_v41 = vld [vmem:[#allocation6 + $0x658] sm:$0xf0]  ;;  %v8591_v22 = vld [vmem:[#allocation8 + $0x90] sm:$0xf] }
 0x8ec   : > { %6400 = vmatpush.bf16.msrb.mxu3 %v8516_v13  ;;  %v8052_v13 = vor.u32 %v8980_v24, %v8049_v14  ;;  %v8308_v46 = vor.u32 %v9044_v32, %v8305_v41  ;;  %v8145_v31 = vld [vmem:[#allocation6 + $0x518] sm:$0xf0]  ;;  %v8559_v14 = vld [vmem:[#allocation8 + $0x50] sm:$0xf] }
 0x8ed   : > { %6362 = vmatpush.bf16.msrb.mxu0 %v8116_v11  ;;  %v11027_v35 = vpop.f32.mrf.mxu2  ;;  %v6112_v50 = vpop.f32.mrf.mxu0  ;;  %v9008_v11 = vld [vmem:[#allocation6 + $0x52c] sm:$0xf]  ;;  %v8273_v60 = vld [vmem:[#allocation6 + $0x618] sm:$0xf0]  ;;  %v8560_v33 = vor.u32 %v9110_v28, %v8559_v14  ;;  %v9129_v14 = vld [vmem:[#allocation8 + $0xf4] sm:$0xf] }
 0x8ee   : > { %6375 = vmatpush.bf16.msrb.mxu1 %v8244_v40  ;;  %v11029_v52 = vpop.f32.mrf.mxu3  ;;  %v6125_v40 = vpop.f32.mrf.mxu1  ;;  %v8164_v38 = vor.u32 %v9008_v11, %v8161_v10  ;;  %v9146_v50 = vld [vmem:[#allocation8 + $0x174] sm:$0xf0]  ;;  %v9144_v10 = vld [vmem:[#allocation8 + $0x164] sm:$0xf0]  ;;  %v8641_v28 = vld [vmem:[#allocation8 + $0xf8] sm:$0xf0] }
 0x8ef   : > { %6388 = vmatpush.bf16.msrb.mxu2 %v8372_v3  ;;  %v8436_v3 = vor.u32 %v9076_v47, %v8433_v55  ;;  %v9108_v47 = vld [vmem:[#allocation8 + $0x44] sm:$0xf0]  ;;  %v8615_v55 = vld [vmem:[#allocation8 + $0xc0] sm:$0xf] }
 0x8f0   : > { %6401 = vmatpush.bf16.msrb.mxu3 %v8500_v36  ;;  %v9072_v36 = vld [vmem:[#allocation6 + $0x72c] sm:$0xf] }
 0x8f1   : > { %6363 = vmatpush.bf16.msrb.mxu0 %v8100_v18  ;;  %v8292_v18 = vor.u32 %v9040_v54, %v8289_v62  ;;  %v8420_v0 = vor.u32 %v9072_v36, %v8417_v58 }
 0x8f2   : > { %6376 = vmatpush.bf16.msrb.mxu1 %v8228_v23  ;;  %v8017_v23 = vld [vmem:[#allocation6 + $0x418] sm:$0xf0] }
 0x8f3   : > { %6389 = vmatpush.bf16.msrb.mxu2 %v8356_v6  ;;  %v9004_v6 = vld [vmem:[#allocation6 + $0x50c] sm:$0xf] }
 0x8f4   : > { %6402 = vmatpush.bf16.msrb.mxu3 %v8484_v15  ;;  %v9036_v15 = vld [vmem:[#allocation6 + $0x60c] sm:$0xf]  ;;  %v8148_v42 = vor.u32 %v9004_v6, %v8145_v31  ;;  %v8687_v6 = vld [vmem:[#allocation8 + $0x150] sm:$0xf]  ;;  %v9142_v31 = vld [vmem:[#allocation8 + $0x154] sm:$0xf0] }
 0x8f5   : > { %6364 = vmatpush.bf16.msrb.mxu0 %v8084_v30  ;;  %v6138_v43 = vpop.f32.mrf.mxu2  ;;  %v6111_v30 = vadd.f32 %v11023_v21, %v5990_v20  ;;  %v8276_v49 = vor.u32 %v9036_v15, %v8273_v60  ;;  %v8568_v21 = vor.u32 %v9112_v37, %v8567_v4  ;;  %v8535_v20 = vld [vmem:[#allocation8 + $0x20] sm:$0xf]  ;;  %v9116_v4 = vld [vmem:[#allocation8 + $0x84] sm:$0xf0]  ;;  %v9113_v37 = vld [vmem:[#allocation8 + $0x74] sm:$0xf] }
 0x8f6   : > { %6377 = vmatpush.bf16.msrb.mxu1 %v8212_v25  ;;  %v6151_v26 = vpop.f32.mrf.mxu3  ;;  %v8020_v25 = vor.u32 %v8972_v51, %v8017_v23  ;;  %v8599_v51 = vld [vmem:[#allocation8 + $0xa0] sm:$0xf]  ;;  %v8688_v43 = vor.u32 %v9142_v31, %v8687_v6  ;;  %v9123_v6 = vld [vmem:[#allocation8 + $0xc4] sm:$0xf]  ;;  %v8617_v31 = vld [vmem:[#allocation8 + $0xc8] sm:$0xf0] }
 0x8f7   : > { %6390 = vmatpush.bf16.msrb.mxu2 %v8340_v45  ;;  %v8639_v45 = vld [vmem:[#allocation8 + $0xf0] sm:$0xf]  ;;  %v6124_v34 = vadd.f32 %v11025_v39, %v6111_v30  ;;  %v9118_v30 = vld [vmem:[#allocation8 + $0x94] sm:$0xf0] }
 0x8f8   : > { %6403 = vmatpush.bf16.msrb.mxu3 %v8468_v56  ;;  %v8404_v56 = vor.u32 %v9068_v1, %v8401_v44  ;;  %v8640_v57 = vor.u32 %v9130_v16, %v8639_v45  ;;  %v8623_v39 = vld [vmem:[#allocation8 + $0xd0] sm:$0xf]  ;;  %v9102_v44 = vld [vmem:[#allocation8 + $0x14] sm:$0xf0]  ;;  %v9140_v45 = vld [vmem:[#allocation8 + $0x144] sm:$0xf0] }
 0x8f9   : > { %6365 = vmatpush.bf16.msrb.mxu0 %v8068_v61  ;;  %v8631_v61 = vld [vmem:[#allocation8 + $0xe0] sm:$0xf]  ;;  %v6137_v24 = vadd.f32 %v11027_v35, %v6124_v34  ;;  %v9124_v35 = vld [vmem:[#allocation8 + $0xc4] sm:$0xf0]  ;;  %v8527_v26 = vld [vmem:[#allocation8 + $0x10] sm:$0xf] }
 0x8fa   : > { %6378 = vmatpush.bf16.msrb.mxu1 %v8196_v12  ;;  %v9128_v12 = vld [vmem:[#allocation8 + $0xe4] sm:$0xf0]  ;;  %v8583_v34 = vld [vmem:[#allocation8 + $0x80] sm:$0xf] }
 0x8fb   : > { %6391 = vmatpush.bf16.msrb.mxu2 %v8324_v9  ;;  %v8632_v9 = vor.u32 %v9128_v12, %v8631_v61  ;;  %v6150_v32 = vadd.f32 %v11029_v52, %v6137_v24  ;;  %v9122_v52 = vld [vmem:[#allocation8 + $0xb4] sm:$0xf0]  ;;  %v8577_v12 = vld [vmem:[#allocation8 + $0x78] sm:$0xf0] }
 0x8fc   : > { %6404 = vmatpush.bf16.msrb.mxu3 %v8452_v59  ;;  %v9126_v59 = vld [vmem:[#allocation8 + $0xd4] sm:$0xf0]  ;;  %v8608_v58 = vor.u32 %v9122_v52, %v8607_v53  ;;  %v8561_v52 = vld [vmem:[#allocation8 + $0x58] sm:$0xf0] }
 0x8fd   : > { %6366 = vmatpush.bf16.msrb.mxu0 %v8052_v13  ;;  %v8624_v41 = vor.u32 %v9126_v59, %v8623_v39  ;;  %v8703_v13 = vld [vmem:[#allocation8 + $0x170] sm:$0xf]  ;;  %v9138_v24 = vld [vmem:[#allocation8 + $0x134] sm:$0xf0] }
 0x8fe   : > { %6379 = vmatpush.bf16.msrb.mxu1 %v8180_v48  ;;  %v8704_v48 = vor.u32 %v9146_v50, %v8703_v13  ;;  %v8663_v13 = vld [vmem:[#allocation8 + $0x120] sm:$0xf]  ;;  %v9136_v50 = vld [vmem:[#allocation8 + $0x124] sm:$0xf0]  ;;  %v9134_v53 = vld [vmem:[#allocation8 + $0x114] sm:$0xf0] }
 0x8ff   : > { %6392 = vmatpush.bf16.msrb.mxu2 %v8308_v46  ;;  %v8616_v46 = vor.u32 %v9124_v35, %v8615_v55  ;;  %v8644_v55 = vor.u32 %v9129_v14, %v8641_v28  ;;  %v8569_v35 = vld [vmem:[#allocation8 + $0x68] sm:$0xf0]  ;;  %v8529_v14 = vld [vmem:[#allocation8 + $0x18] sm:$0xf0]  ;;  %v9117_v28 = vld [vmem:[#allocation8 + $0x94] sm:$0xf] }
 0x900   : > { %6405 = vmatpush.bf16.msrb.mxu3 %v8436_v3  ;;  %v8695_v3 = vld [vmem:[#allocation8 + $0x160] sm:$0xf] }
 0x901   : > { %6367 = vmatpush.bf16.msrb.mxu0 %v8036_v17  ;;  %v8696_v54 = vor.u32 %v9144_v10, %v8695_v3  ;;  %v9104_v17 = vld [vmem:[#allocation8 + $0x24] sm:$0xf0]  ;;  %v9125_v3 = vld [vmem:[#allocation8 + $0xd4] sm:$0xf] }
 0x902   : > { %6380 = vmatpush.bf16.msrb.mxu1 %v8164_v38 }
 0x903   : > { %6393 = vmatpush.bf16.msrb.mxu2 %v8292_v18  ;;  %v9120_v18 = vld [vmem:[#allocation8 + $0xa4] sm:$0xf0] }
 0x904   : > { %6406 = vmatpush.bf16.msrb.mxu3 %v8420_v0  ;;  %v8536_v0 = vor.u32 %v9104_v17, %v8535_v20  ;;  %v8600_v1 = vor.u32 %v9120_v18, %v8599_v51  ;;  %v8705_v20 = vld [vmem:[#allocation8 + $0x178] sm:$0xf0]  ;;  %v8553_v18 = vld [vmem:[#allocation8 + $0x48] sm:$0xf0] }
 0x905   : > { %6368 = vmatpush.bf16.msrb.mxu0 %v8020_v25  ;;  %v8679_v25 = vld [vmem:[#allocation8 + $0x140] sm:$0xf] }
 0x906   : > { %6381 = vmatpush.bf16.msrb.mxu1 %v8148_v42  ;;  %v6175_v40 = vpop.f32.mrf.mxu1  ;;  %v8680_v16 = vor.u32 %v9140_v45, %v8679_v25  ;;  %v8697_v25 = vld [vmem:[#allocation8 + $0x168] sm:$0xf0] }
 0x907   : > { %6394 = vmatpush.bf16.msrb.mxu2 %v8276_v49  ;;  %v8528_v49 = vor.u32 %v9102_v44, %v8527_v26  ;;  %v9121_v26 = vld [vmem:[#allocation8 + $0xb4] sm:$0xf] }
 0x908   : > { %6407 = vmatpush.bf16.msrb.mxu3 %v8404_v56  ;;  %6369 = vmatmul.bf16.vlgmr.msrb.gmra.mxu0 %v10982_v29  ;;  %v8551_v29 = vld [vmem:[#allocation8 + $0x40] sm:$0xf] }
 0x909   : > { %6811 = vmatpush.bf16.msra.mxu0 %v8576_v7  ;;  %6382 = vmatmul.bf16.vlgmr.msrb.gmra.mxu1 %v10986_v5  ;;  %v8552_v5 = vor.u32 %v9108_v47, %v8551_v29  ;;  %v8519_v56 = vld [vmem:[#allocation8] sm:$0xf]  ;;  %v9100_v7 = vld [vmem:[#allocation8 + $0x4] sm:$0xf0]  ;;  %v8580_v29 = vor.u32 %v9113_v37, %v8577_v12  ;;  %v9111_v47 = vld [vmem:[#allocation8 + $0x64] sm:$0xf] }
 0x90a   : > { %6824 = vmatpush.bf16.msra.mxu1 %v8640_v57  ;;  %6395 = vmatmul.bf16.vlgmr.msrb.gmra.mxu2 %v10980_v19  ;;  %v6162_v19 = vpop.f32.mrf.mxu0  ;;  %v8592_v57 = vor.u32 %v9118_v30, %v8591_v22  ;;  %v8609_v22 = vld [vmem:[#allocation8 + $0xb8] sm:$0xf0]  ;;  %v9143_v30 = vld [vmem:[#allocation8 + $0x164] sm:$0xf] }
 0x90b   : > { %6408 = vmatmul.bf16.vlgmr.msrb.gmra.mxu3 %v10984_v27  ;;  %v9106_v27 = vld [vmem:[#allocation8 + $0x34] sm:$0xf0]  ;;  %v6163_v11 = vadd.f32 %v6162_v19, %v6150_v32  ;;  %6837 = vmatpush.bf16.msra.mxu2 %v8704_v48  ;;  %v6413_v32 = vmax.f32 %v11017_v63, 0.0  ;;  %v9127_v48 = vld [vmem:[#allocation8 + $0xe4] sm:$0xf]  ;;  %v8664_v19 = vor.u32 %v9136_v50, %v8663_v13  ;;  %v8572_v63 = vor.u32 %v9111_v47, %v8569_v35 }
 0x90c   : > { %v8544_v62 = vor.u32 %v9106_v27, %v8543_v2  ;;  %v8655_v27 = vld [vmem:[#allocation8 + $0x110] sm:$0xf]  ;;  %v8700_v45 = vor.u32 %v9143_v30, %v8697_v25  ;;  %v8689_v37 = vld [vmem:[#allocation8 + $0x158] sm:$0xf0]  ;;  %v9099_v13 = vld [vmem:[#allocation8 + $0x4] sm:$0xf] }
 0x90d   : > { %6812 = vmatpush.bf16.msra.mxu0 %v8568_v21  ;;  %v6176_v36 = vadd.f32 %v6175_v40, %v6163_v11  ;;  %v6188_v38 = vpop.f32.mrf.mxu2  ;;  %v11043_v2 = vpack.c.bf16 %v6413_v32, %v6413_v32  ;;  %v9109_v40 = vld [vmem:[#allocation8 + $0x54] sm:$0xf]  ;;  %v8656_v10 = vor.u32 %v9134_v53, %v8655_v27  ;;  %v9139_v32 = vld [vmem:[#allocation8 + $0x144] sm:$0xf]  ;;  %v8585_v27 = vld [vmem:[#allocation8 + $0x88] sm:$0xf0] }
 0x90e   : > { %6825 = vmatpush.bf16.msra.mxu1 %v8632_v9  ;;  %v6201_v23 = vpop.f32.mrf.mxu3  ;;  %v6177_v8 = vpop.f32.mrf.mxu1  ;;  %v8671_v9 = vld [vmem:[#allocation8 + $0x130] sm:$0xf]  ;;  %v8564_v17 = vor.u32 %v9109_v40, %v8561_v52  ;;  %v9135_v52 = vld [vmem:[#allocation8 + $0x124] sm:$0xf] }
 0x90f   : > { %6838 = vmatpush.bf16.msra.mxu2 %v8696_v54  ;;  %v6189_v15 = vadd.f32 %v6188_v38, %v6176_v36  ;;  %v8672_v39 = vor.u32 %v9138_v24, %v8671_v9  ;;  %v8625_v54 = vld [vmem:[#allocation8 + $0xd8] sm:$0xf0]  ;;  %v9132_v36 = vld [vmem:[#allocation8 + $0x104] sm:$0xf0]  ;;  %v9107_v38 = vld [vmem:[#allocation8 + $0x44] sm:$0xf] }
 0x910   : > { %v8628_v51 = vor.u32 %v9125_v3, %v8625_v54  ;;  %v9101_v24 = vld [vmem:[#allocation8 + $0x14] sm:$0xf]  ;;  %v8665_v3 = vld [vmem:[#allocation8 + $0x128] sm:$0xf0] }
 0x911   : > { %6813 = vmatpush.bf16.msra.mxu0 %v8560_v33  ;;  %v6202_v42 = vadd.f32 %v6201_v23, %v6189_v15  ;;  %v8520_v33 = vor.u32 %v9100_v7, %v8519_v56  ;;  %v8620_v15 = vor.u32 %v9123_v6, %v8617_v31  ;;  %v8537_v56 = vld [vmem:[#allocation8 + $0x28] sm:$0xf0]  ;;  %v9119_v7 = vld [vmem:[#allocation8 + $0xa4] sm:$0xf]  ;;  %v8532_v47 = vor.u32 %v9101_v24, %v8529_v14  ;;  %v9152_v24 = vld [vmem:[#allocation8 + $0x1a4] sm:$0xf0] }
 0x912   : > { %6826 = vmatpush.bf16.msra.mxu1 %v8624_v41  ;;  %v6164_v60 = vpop.f32.mrf.mxu0  ;;  %v8584_v41 = vor.u32 %v9116_v4, %v8583_v34  ;;  %v9141_v4 = vld [vmem:[#allocation8 + $0x154] sm:$0xf]  ;;  %v9131_v6 = vld [vmem:[#allocation8 + $0x104] sm:$0xf]  ;;  %v8649_v31 = vld [vmem:[#allocation8 + $0x108] sm:$0xf0] }
 0x913   : > { %6839 = vmatpush.bf16.msra.mxu2 %v8688_v43  ;;  %v6414_v59 = vmax.f32 %v6202_v42, 0.0  ;;  %v9105_v60 = vld [vmem:[#allocation8 + $0x34] sm:$0xf]  ;;  %v8612_v42 = vor.u32 %v9121_v26, %v8609_v22  ;;  %v8692_v12 = vor.u32 %v9141_v4, %v8689_v37  ;;  %v9158_v22 = vld [vmem:[#allocation8 + $0x1d4] sm:$0xf0] }
 0x915   : > { %6814 = vmatpush.bf16.msra.mxu0 %v8552_v5  ;;  %v6190_v61 = vpop.f32.mrf.mxu2  ;;  %v8633_v5 = vld [vmem:[#allocation8 + $0xe8] sm:$0xf0] }
 0x916   : > { %6827 = vmatpush.bf16.msra.mxu1 %v8616_v46  ;;  %v6203_v21 = vpop.f32.mrf.mxu3  ;;  %v11041_v46 = vpack.c.bf16 %v6414_v59, %v6414_v59  ;;  %v8636_v11 = vor.u32 %v9127_v48, %v8633_v5  ;;  %v8593_v59 = vld [vmem:[#allocation8 + $0x98] sm:$0xf0]  ;;  %v8521_v48 = vld [vmem:[#allocation8 + $0x8] sm:$0xf0]  ;;  %v9137_v5 = vld [vmem:[#allocation8 + $0x134] sm:$0xf] }
 0x917   : > { %6840 = vmatpush.bf16.msra.mxu2 %v8680_v16  ;;  %v8596_v50 = vor.u32 %v9117_v28, %v8593_v59 }
 0x919   : > { %6815 = vmatpush.bf16.msra.mxu0 %v8544_v62  ;;  %v8647_v62 = vld [vmem:[#allocation8 + $0x100] sm:$0xf] }
 0x91a   : > { %6828 = vmatpush.bf16.msra.mxu1 %v8608_v58  ;;  %v9145_v58 = vld [vmem:[#allocation8 + $0x174] sm:$0xf]  ;;  %v8648_v23 = vor.u32 %v9132_v36, %v8647_v62  ;;  %v8524_v62 = vor.u32 %v9099_v13, %v8521_v48  ;;  %v9162_v36 = vld [vmem:[#allocation8 + $0x1f4] sm:$0xf0] }
 0x91b   : > { %6841 = vmatpush.bf16.msra.mxu2 %v8672_v39  ;;  %v8708_v43 = vor.u32 %v9145_v58, %v8705_v20  ;;  %v9161_v13 = vld [vmem:[#allocation8 + $0x1f4] sm:$0xf] }
 0x91d   : > { %6816 = vmatpush.bf16.msra.mxu0 %v8536_v0  ;;  %v8556_v0 = vor.u32 %v9107_v38, %v8553_v18  ;;  %v8657_v38 = vld [vmem:[#allocation8 + $0x118] sm:$0xf0] }
 0x91e   : > { %6829 = vmatpush.bf16.msra.mxu1 %v8600_v1  ;;  %v8545_v1 = vld [vmem:[#allocation8 + $0x38] sm:$0xf0] }
 0x91f   : > { %6842 = vmatpush.bf16.msra.mxu2 %v8664_v19  ;;  %v8548_v16 = vor.u32 %v9105_v60, %v8545_v1  ;;  %v8673_v19 = vld [vmem:[#allocation8 + $0x138] sm:$0xf0]  ;;  %v8759_v60 = vld [vmem:[#allocation8 + $0x1e0] sm:$0xf]  ;;  %v9160_v1 = vld [vmem:[#allocation8 + $0x1e4] sm:$0xf0] }
 0x920   : > { %v8760_v26 = vor.u32 %v9160_v1, %v8759_v60  ;;  %v8721_v60 = vld [vmem:[#allocation8 + $0x198] sm:$0xf0] }
 0x921   : > { %6817 = vmatpush.bf16.msra.mxu0 %v8528_v49  ;;  %v9103_v49 = vld [vmem:[#allocation8 + $0x24] sm:$0xf] }
 0x922   : > { %6830 = vmatpush.bf16.msra.mxu1 %v8592_v57  ;;  %v8601_v57 = vld [vmem:[#allocation8 + $0xa8] sm:$0xf0]  ;;  %v8540_v21 = vor.u32 %v9103_v49, %v8537_v56 }
 0x923   : > { %6843 = vmatpush.bf16.msra.mxu2 %v8656_v10  ;;  %v8604_v9 = vor.u32 %v9119_v7, %v8601_v57  ;;  %v8767_v10 = vld [vmem:[#allocation8 + $0x1f0] sm:$0xf] }
 0x924   : > { %v8768_v20 = vor.u32 %v9162_v36, %v8767_v10  ;;  %v8735_v57 = vld [vmem:[#allocation8 + $0x1b0] sm:$0xf] }
 0x925   : > { %6818 = vmatpush.bf16.msra.mxu0 %v8520_v33  ;;  %v6214_v44 = vpop.f32.mrf.mxu0 }
 0x926   : > { %6831 = vmatpush.bf16.msra.mxu1 %v8584_v41  ;;  %v11047_v8 = vpop.f32.mrf.mxu1  ;;  %v8681_v41 = vld [vmem:[#allocation8 + $0x148] sm:$0xf0]  ;;  %6850 = vmatpush.bf16.msra.mxu3 %v8768_v20 }
 0x927   : > { %6844 = vmatpush.bf16.msra.mxu2 %v8648_v23 }
 0x928   : > { %6819 = vmatmul.bf16.vlgmr.msra.gmra.mxu0 %v11043_v2 }
 0x929   : > { %6863 = vmatpush.bf16.msrb.mxu0 %v8580_v29  ;;  %6832 = vmatmul.bf16.vlgmr.msra.gmra.mxu1 %v11041_v46  ;;  %v8684_v29 = vor.u32 %v9139_v32, %v8681_v41  ;;  %v9150_v32 = vld [vmem:[#allocation8 + $0x194] sm:$0xf0] }
 0x92a   : > { %6876 = vmatpush.bf16.msrb.mxu1 %v8644_v55  ;;  %v11052_v55 = vld [vmem:[%s11221_s8] sm:$0xf]  ;;  %6851 = vmatpush.bf16.msra.mxu3 %v8760_v26 }
 0x92b   : > { %6889 = vmatpush.bf16.msrb.mxu2 %v8708_v43  ;;  %v5991_v35 = vperm.slane %v11052_v55, 2 }
 0x92d   : > { %6864 = vmatpush.bf16.msrb.mxu0 %v8572_v63  ;;  %v6240_v34 = vpop.f32.mrf.mxu2  ;;  %v6216_v39 = vpop.f32.mrf.mxu0  ;;  %v9115_v63 = vld [vmem:[#allocation8 + $0x84] sm:$0xf]  ;;  %v6215_v54 = vadd.f32 %v6214_v44, %v5991_v35  ;;  %v8751_v44 = vld [vmem:[#allocation8 + $0x1d0] sm:$0xf] }
 0x92e   : > { %6877 = vmatpush.bf16.msrb.mxu1 %v8636_v11  ;;  %v6253_v61 = vpop.f32.mrf.mxu3  ;;  %v6229_v33 = vpop.f32.mrf.mxu1  ;;  %v8676_v11 = vor.u32 %v9137_v5, %v8673_v19  ;;  %v8588_v58 = vor.u32 %v9115_v63, %v8585_v27  ;;  %v9159_v5 = vld [vmem:[#allocation8 + $0x1e4] sm:$0xf]  ;;  %v8761_v19 = vld [vmem:[#allocation8 + $0x1e8] sm:$0xf0] }
 0x92f   : > { %6890 = vmatpush.bf16.msrb.mxu2 %v8700_v45  ;;  %v6228_v18 = vadd.f32 %v11047_v8, %v6215_v54  ;;  %v8752_v45 = vor.u32 %v9158_v22, %v8751_v44  ;;  %v8719_v33 = vld [vmem:[#allocation8 + $0x190] sm:$0xf]  ;;  %v8764_v27 = vor.u32 %v9159_v5, %v8761_v19  ;;  %v9155_v54 = vld [vmem:[#allocation8 + $0x1c4] sm:$0xf]  ;;  %v8713_v22 = vld [vmem:[#allocation8 + $0x188] sm:$0xf0] }
 0x930   : > { %v8720_v41 = vor.u32 %v9150_v32, %v8719_v33  ;;  %v9147_v44 = vld [vmem:[#allocation8 + $0x184] sm:$0xf]  ;;  %v6930_v19 = vld [vmem:[%s11259_s20 + $0x68] sm:$0xff] }
 0x931   : > { %6865 = vmatpush.bf16.msrb.mxu0 %v8564_v17  ;;  %v8668_v17 = vor.u32 %v9135_v52, %v8665_v3  ;;  %v6241_v43 = vadd.f32 %v6240_v34, %v6228_v18  ;;  %6852 = vmatpush.bf16.msra.mxu3 %v8752_v45  ;;  %v9154_v34 = vld [vmem:[#allocation8 + $0x1b4] sm:$0xf0]  ;;  %v6931_v5 = vld [vmem:[%s11259_s20 + $0x70] sm:$0xff] }
 0x932   : > { %6878 = vmatpush.bf16.msrb.mxu1 %v8628_v51  ;;  %v9133_v51 = vld [vmem:[#allocation8 + $0x114] sm:$0xf] }
 0x933   : > { %6891 = vmatpush.bf16.msrb.mxu2 %v8692_v12  ;;  %v8660_v23 = vor.u32 %v9133_v51, %v8657_v38  ;;  %v8736_v12 = vor.u32 %v9154_v34, %v8735_v57  ;;  %v8737_v51 = vld [vmem:[#allocation8 + $0x1b8] sm:$0xf0]  ;;  %v5992_v38 = vperm.slane %v11052_v55, 3 }
 0x935   : > { %6866 = vmatpush.bf16.msrb.mxu0 %v8556_v0  ;;  %v6242_v53 = vpop.f32.mrf.mxu2  ;;  %v8652_v0 = vor.u32 %v9131_v6, %v8649_v31  ;;  %v8729_v6 = vld [vmem:[#allocation8 + $0x1a8] sm:$0xf0] }
 0x936   : > { %6879 = vmatpush.bf16.msrb.mxu1 %v8620_v15  ;;  %v6255_v40 = vpop.f32.mrf.mxu3  ;;  %v6254_v15 = vadd.f32 %v6253_v61, %v6241_v43 }
 0x937   : > { %6892 = vmatpush.bf16.msrb.mxu2 %v8684_v29  ;;  %v8711_v29 = vld [vmem:[#allocation8 + $0x180] sm:$0xf]  ;;  %v8753_v40 = vld [vmem:[#allocation8 + $0x1d8] sm:$0xf0] }
 0x939   : > { %6867 = vmatpush.bf16.msrb.mxu0 %v8548_v16  ;;  %v8743_v16 = vld [vmem:[#allocation8 + $0x1c0] sm:$0xf] }
 0x93a   : > { %6880 = vmatpush.bf16.msrb.mxu1 %v8612_v42  ;;  %v9156_v42 = vld [vmem:[#allocation8 + $0x1c4] sm:$0xf0] }
 0x93b   : > { %6893 = vmatpush.bf16.msrb.mxu2 %v8676_v11  ;;  %v9157_v11 = vld [vmem:[#allocation8 + $0x1d4] sm:$0xf] }
 0x93c   : > { %v8756_v52 = vor.u32 %v9157_v11, %v8753_v40  ;;  %v6946_v11 = vld [vmem:[%s11259_s20 + $0xe8] sm:$0xff]  ;;  %v6928_v40 = vld [vmem:[%s11259_s20 + $0x58] sm:$0xff] }
 0x93d   : > { %6868 = vmatpush.bf16.msrb.mxu0 %v8540_v21 }
 0x93e   : > { %6881 = vmatpush.bf16.msrb.mxu1 %v8604_v9  ;;  %v8727_v9 = vld [vmem:[#allocation8 + $0x1a0] sm:$0xf] }
 0x93f   : > { %6894 = vmatpush.bf16.msrb.mxu2 %v8668_v17  ;;  %v8728_v39 = vor.u32 %v9152_v24, %v8727_v9  ;;  %v9153_v17 = vld [vmem:[#allocation8 + $0x1b4] sm:$0xf] }
 0x940   : > { %v8740_v18 = vor.u32 %v9153_v17, %v8737_v51  ;;  %v6923_v17 = vld [vmem:[%s11259_s20 + $0x30] sm:$0xff]  ;;  %v6922_v51 = vld [vmem:[%s11259_s20 + $0x28] sm:$0xff] }
 0x941   : > { %6869 = vmatpush.bf16.msrb.mxu0 %v8532_v47  ;;  %v9148_v47 = vld [vmem:[#allocation8 + $0x184] sm:$0xf0] }
 0x942   : > { %6882 = vmatpush.bf16.msrb.mxu1 %v8596_v50  ;;  %v8712_v35 = vor.u32 %v9148_v47, %v8711_v29  ;;  %v8769_v50 = vld [vmem:[#allocation8 + $0x1f8] sm:$0xf0] }
 0x943   : > { %6895 = vmatpush.bf16.msrb.mxu2 %v8660_v23  ;;  %v8772_v48 = vor.u32 %v9161_v13, %v8769_v50  ;;  %v9151_v23 = vld [vmem:[#allocation8 + $0x1a4] sm:$0xf] }
 0x945   : > { %6870 = vmatpush.bf16.msrb.mxu0 %v8524_v62  ;;  %v6266_v8 = vpop.f32.mrf.mxu0  ;;  %v8745_v62 = vld [vmem:[#allocation8 + $0x1c8] sm:$0xf0] }
 0x946   : > { %6883 = vmatpush.bf16.msrb.mxu1 %v8588_v58  ;;  %v6267_v30 = vadd.f32 %v6266_v8, %v6254_v15  ;;  %v6279_v25 = vpop.f32.mrf.mxu1  ;;  %v8748_v58 = vor.u32 %v9155_v54, %v8745_v62  ;;  %v9149_v15 = vld [vmem:[#allocation8 + $0x194] sm:$0xf]  ;;  %v6944_v54 = vld [vmem:[%s11259_s20 + $0xd8] sm:$0xff]  ;;  %v6926_v62 = vld [vmem:[%s11259_s20 + $0x48] sm:$0xff] }
 0x947   : > { %6896 = vmatpush.bf16.msrb.mxu2 %v8652_v0  ;;  %v8732_v0 = vor.u32 %v9151_v23, %v8729_v6  ;;  %v8724_v26 = vor.u32 %v9149_v15, %v8721_v60  ;;  %v6942_v15 = vld [vmem:[%s11259_s20 + $0xc8] sm:$0xff]  ;;  %v6917_v60 = vld [vmem:[%s11259_s20] sm:$0xff] }
 0x948   : > { %6871 = vmatmul.bf16.vlgmr.msrb.gmra.mxu0 %v11043_v2  ;;  %v6280_v2 = vadd.f32 %v6279_v25, %v6267_v30  ;;  %v8716_v30 = vor.u32 %v9147_v44, %v8713_v22  ;;  %v6939_v44 = vld [vmem:[%s11259_s20 + $0xb0] sm:$0xff]  ;;  %v6938_v22 = vld [vmem:[%s11259_s20 + $0xa8] sm:$0xff] }
 0x949   : > { %6884 = vmatmul.bf16.vlgmr.msrb.gmra.mxu1 %v11041_v46  ;;  %v8744_v46 = vor.u32 %v9156_v42, %v8743_v16 }
 0x94b   : > { %6853 = vmatpush.bf16.msra.mxu3 %v8744_v46 }
 0x94d   : > { %v6292_v49 = vpop.f32.mrf.mxu2  ;;  %v6268_v37 = vpop.f32.mrf.mxu0 }
 0x94e   : > { %v6293_v56 = vadd.f32 %v6292_v49, %v6280_v2  ;;  %v6305_v7 = vpop.f32.mrf.mxu3  ;;  %v6281_v61 = vpop.f32.mrf.mxu1 }
 0x94f   : > { %6854 = vmatpush.bf16.msra.mxu3 %v8736_v12 }
 0x950   : > { %v6306_v4 = vadd.f32 %v6305_v7, %v6293_v56 }
 0x952   : > { %v6415_v21 = vmax.f32 %v6306_v4, 0.0 }
 0x953   : > { %6855 = vmatpush.bf16.msra.mxu3 %v8728_v39 }
 0x954   : > { %v6419_v14 = vpack.c.bf16 %v6415_v21, %v6415_v21  ;;  %v6485_v21 = vld [vmem:[%s11223_s10] sm:$0x3] }
 0x955   : > { %v6294_v28 = vpop.f32.mrf.mxu2  ;;  %v6807_v9 = vperm.slane %v6485_v21, 0  ;;  %v6808_v32 = vperm.slane %v6485_v21, 1 }
 0x956   : > { %6845 = vmatmul.bf16.vlgmr.msra.gmra.mxu2 %v6419_v14  ;;  %v6307_v59 = vpop.f32.mrf.mxu3 }
 0x957   : > { %6856 = vmatpush.bf16.msra.mxu3 %v8720_v41 }
 0x95b   : > { %6857 = vmatpush.bf16.msra.mxu3 %v8712_v35 }
 0x95f   : > { %6902 = vmatpush.bf16.msrb.mxu3 %v8772_v48  ;;  %v6932_v48 = vld [vmem:[%s11259_s20 + $0x78] sm:$0xff] }
 0x960   : > { %6950 = vmatpush.msra.mxu0 %v6932_v48 }
 0x962   : > { %6951 = vmatpush.msra.mxu0 %v6931_v5 }
 0x963   : > { %6903 = vmatpush.bf16.msrb.mxu3 %v8764_v27  ;;  %v6947_v27 = vld [vmem:[%s11259_s20 + $0xf0] sm:$0xff] }
 0x964   : > { %6952 = vmatpush.msra.mxu0 %v6930_v19 }
 0x965   : > { %v6318_v63 = vpop.f32.mrf.mxu0 }
 0x966   : > { %6897 = vmatmul.bf16.vlgmr.msrb.gmra.mxu2 %v6419_v14  ;;  %v6331_v53 = vpop.f32.mrf.mxu1  ;;  %v6319_v1 = vadd.f32 %v6318_v63, %v5992_v38  ;;  %v6948_v63 = vld [vmem:[%s11259_s20 + $0xf8] sm:$0xff]  ;;  %v6921_v38 = vld [vmem:[%s11259_s20 + $0x20] sm:$0xff] }
 0x967   : > { %6904 = vmatpush.bf16.msrb.mxu3 %v8756_v52  ;;  %6970 = vmatpush.msra.mxu1 %v6948_v63  ;;  %v6945_v52 = vld [vmem:[%s11259_s20 + $0xe0] sm:$0xff] }
 0x968   : > { %v6332_v8 = vadd.f32 %v6331_v53, %v6319_v1  ;;  %v6929_v53 = vld [vmem:[%s11259_s20 + $0x60] sm:$0xff] }
 0x969   : > { %6971 = vmatpush.msra.mxu1 %v6947_v27  ;;  %6953 = vmatpush.msra.mxu0 %v6929_v53  ;;  %v6941_v1 = vld [vmem:[%s11259_s20 + $0xc0] sm:$0xff] }
 0x96b   : > { %6905 = vmatpush.bf16.msrb.mxu3 %v8748_v58  ;;  %6972 = vmatpush.msra.mxu1 %v6946_v11  ;;  %v6924_v58 = vld [vmem:[%s11259_s20 + $0x38] sm:$0xff] }
 0x96c   : > { %6954 = vmatpush.msra.mxu0 %v6928_v40 }
 0x96d   : > { %v6344_v3 = vpop.f32.mrf.mxu2  ;;  %v6320_v36 = vpop.f32.mrf.mxu0  ;;  %6973 = vmatpush.msra.mxu1 %v6945_v52 }
 0x96e   : > { %v6357_v10 = vpop.f32.mrf.mxu3  ;;  %v6333_v20 = vpop.f32.mrf.mxu1  ;;  %v6345_v25 = vadd.f32 %v6344_v3, %v6332_v8  ;;  %v6925_v36 = vld [vmem:[%s11259_s20 + $0x40] sm:$0xff] }
 0x96f   : > { %6906 = vmatpush.bf16.msrb.mxu3 %v8740_v18  ;;  %6974 = vmatpush.msra.mxu1 %v6944_v54  ;;  %v6920_v18 = vld [vmem:[%s11259_s20 + $0x18] sm:$0xff]  ;;  %v6937_v8 = vld [vmem:[%s11259_s20 + $0xa0] sm:$0xff] }
 0x970   : > { %v6358_v55 = vadd.f32 %v6357_v10, %v6345_v25  ;;  %v6927_v10 = vld [vmem:[%s11259_s20 + $0x50] sm:$0xff] }
 0x971   : > { %6955 = vmatpush.msra.mxu0 %v6927_v10  ;;  %v6935_v25 = vld [vmem:[%s11259_s20 + $0x90] sm:$0xff] }
 0x973   : > { %6907 = vmatpush.bf16.msrb.mxu3 %v8732_v0  ;;  %6956 = vmatpush.msra.mxu0 %v6926_v62  ;;  %v6918_v0 = vld [vmem:[%s11259_s20 + $0x8] sm:$0xff] }
 0x975   : > { %v6346_v31 = vpop.f32.mrf.mxu2  ;;  %6957 = vmatpush.msra.mxu0 %v6925_v36 }
 0x976   : > { %v6359_v43 = vpop.f32.mrf.mxu3  ;;  %v6919_v31 = vld [vmem:[%s11259_s20 + $0x10] sm:$0xff] }
 0x977   : > { %6908 = vmatpush.bf16.msrb.mxu3 %v8724_v26  ;;  %6958 = vmatpush.msra.mxu0 %v6924_v58  ;;  %v6943_v43 = vld [vmem:[%s11259_s20 + $0xd0] sm:$0xff]  ;;  %v6940_v26 = vld [vmem:[%s11259_s20 + $0xb8] sm:$0xff] }
 0x978   : > { %6975 = vmatpush.msra.mxu1 %v6943_v43 }
 0x979   : > { %6959 = vmatpush.msra.mxu0 %v6923_v17 }
 0x97a   : > { %6976 = vmatpush.msra.mxu1 %v6942_v15 }
 0x97b   : > { %6909 = vmatpush.bf16.msrb.mxu3 %v8716_v30  ;;  %6960 = vmatpush.msra.mxu0 %v6922_v51  ;;  %v6936_v30 = vld [vmem:[%s11259_s20 + $0x98] sm:$0xff] }
 0x97c   : > { %6977 = vmatpush.msra.mxu1 %v6941_v1 }
 0x97d   : > { %6961 = vmatpush.msra.mxu0 %v6921_v38 }
 0x97e   : > { %6978 = vmatpush.msra.mxu1 %v6940_v26 }
 0x97f   : > { %6962 = vmatpush.msra.mxu0 %v6920_v18 }
 0x980   : > { %6979 = vmatpush.msra.mxu1 %v6939_v44 }
 0x981   : > { %6963 = vmatpush.msra.mxu0 %v6919_v31 }
 0x982   : > { %6980 = vmatpush.msra.mxu1 %v6938_v22 }
 0x983   : > { %6964 = vmatpush.msra.mxu0 %v6918_v0 }
 0x984   : > { %6981 = vmatpush.msra.mxu1 %v6937_v8 }
 0x985   : > { %v6370_v45 = vpop.f32.mrf.mxu0  ;;  %6965 = vmatpush.msra.mxu0 %v6917_v60 }
 0x986   : > { %v6383_v2 = vpop.f32.mrf.mxu1  ;;  %v6371_v16 = vadd.f32 %v6370_v45, %v6358_v55  ;;  %6982 = vmatpush.msra.mxu1 %v6936_v30  ;;  %v6934_v55 = vld [vmem:[%s11259_s20 + $0x88] sm:$0xff]  ;;  %v6933_v45 = vld [vmem:[%s11259_s20 + $0x80] sm:$0xff] }
 0x988   : > { %v6384_v42 = vadd.f32 %v6383_v2, %v6371_v16  ;;  %6983 = vmatpush.msra.mxu1 %v6935_v25 }
 0x98a   : > { %6984 = vmatpush.msra.mxu1 %v6934_v55 }
 0x98c   : > { %6985 = vmatpush.msra.mxu1 %v6933_v45 }
 0x98d   : > { %v6396_v49 = vpop.f32.mrf.mxu2  ;;  %v6372_v7 = vpop.f32.mrf.mxu0 }
 0x98e   : > { %v6397_v46 = vadd.f32 %v6396_v49, %v6384_v42  ;;  %v6409_v56 = vpop.f32.mrf.mxu3  ;;  %v6385_v57 = vpop.f32.mrf.mxu1 }
 0x990   : > { %v6410_v34 = vadd.f32 %v6409_v56, %v6397_v46 }
 0x992   : > { %v6416_v4 = vmax.f32 %v6410_v34, 0.0 }
 0x994   : > { %v6420_v37 = vpack.c.bf16 %v6416_v4, %v6416_v4 }
 0x995   : > { %v6398_v61 = vpop.f32.mrf.mxu2 }
 0x996   : > { %v6411_v12 = vpop.f32.mrf.mxu3  ;;  %6858 = vmatmul.bf16.vlgmr.msra.gmra.mxu3 %v6420_v37 }
 0x9a5   : > { %v6820_v24 = vpop.f32.mrf.mxu0 }
 0x9a6   : > { %v6821_v14 = vadd.f32 %v6820_v24, %v6807_v9  ;;  %v6833_v28 = vpop.f32.mrf.mxu1  ;;  %6910 = vmatmul.bf16.vlgmr.msrb.gmra.mxu3 %v6420_v37  ;;  %v6949_v37 = vld [vmem:[%s11260_s24] sm:$0x1] }
 0x9a8   : > { %v11062_v39 = vadd.f32 %v6833_v28, %v6821_v14 }
 0x9ad   : > { %v6822_v59 = vpop.f32.mrf.mxu0 }
 0x9ae   : > { %v6835_v33 = vpop.f32.mrf.mxu1 }
 0x9c5   : > { %v6872_v41 = vpop.f32.mrf.mxu0 }
 0x9c6   : > { %v6873_v29 = vadd.f32 %v6872_v41, %v6808_v32  ;;  %v6885_v47 = vpop.f32.mrf.mxu1 }
 0x9c8   : > { %v11064_v35 = vadd.f32 %v6885_v47, %v6873_v29 }
 0x9cd   : > { %v6874_v13 = vpop.f32.mrf.mxu0 }
 0x9ce   : > { %v6887_v50 = vpop.f32.mrf.mxu1 }
 0x9d9   : > { %v6846_v3 = vpop.f32.mrf.mxu2 }
 0x9da   : > { %v6847_v2 = vadd.f32 %v6846_v3, %v11062_v39 }
 0x9e1   : > { %v6848_v20 = vpop.f32.mrf.mxu2 }
 0x9e9   : > { %v6898_v23 = vpop.f32.mrf.mxu2 }
 0x9ea   : > { %v6899_v56 = vadd.f32 %v6898_v23, %v11064_v35 }
 0x9f1   : > { %v6900_v6 = vpop.f32.mrf.mxu2 }
 0xa19   : > { %v6859_v16 = vpop.f32.mrf.mxu3 }
 0xa1a   : > { %v6860_v42 = vadd.f32 %v6859_v16, %v6847_v2 }
 0xa1c   : > { %v6915_v49 = vmax.f32 %v6860_v42, 0.0 }
 0xa1e   : > { %6966 = vmatmul.f32.vlgmr.msra.gmra.mxu0 %v6915_v49 }
 0xa21   : > { %v6861_v46 = vpop.f32.mrf.mxu3 }
 0xa29   : > { %v6911_v7 = vpop.f32.mrf.mxu3 }
 0xa2a   : > { %v6912_v57 = vadd.f32 %v6911_v7, %v6899_v56 }
 0xa2c   : > { %v6916_v34 = vmax.f32 %v6912_v57, 0.0 }
 0xa2e   : > { %6986 = vmatmul.f32.vlgmr.msra.gmra.mxu1 %v6916_v34 }
 0xa31   : > { %v6913_v4 = vpop.f32.mrf.mxu3 }
 0xa9b   : > { %v6967_v61 = vpop.f32.mrf.mxu0 }
 0xa9c   : > { %v6968_v12 = vadd.f32 %v6967_v61, %v6949_v37 }
 0xaab   : > { %v6987_v21 = vpop.f32.mrf.mxu1 }
 0xaac   : > { %v6988_v9 = vadd.f32 %v6987_v21, %v6968_v12 }
 0xaae   : > { %6991 = vst.msk [vmem:[%s9680_s17] sm:$0x1] %vm6990_vm10, %v6988_v9 }
 0xaaf PF: > { %s11261_s19 = sld [smem:[#allocation26_spill]]  ;;  %s7003_s13 = sshll.u32 %s9680_s17, 4  ;;  %s7004_s13 = int_to_ptr.vmem [resolvable:$true] %s7003_s13 }
 0xab0   : > { %s6993_s28 = scalar_lea.sflag [#allocation5], %s504_s7 }
 0xab5   : > { %s7001_s12 = scalar_lea.hbm %s11261_s19, %s9467_s29  ;;  %s9397_s16 = scalar_lea.hbm %s11261_s19, 2 }
 0xab6   : > { %s7005_s27 = sshll.u32 %s7001_s12, 4  ;;  %s7006_s27 = int_to_ptr.hbm [resolvable:$true] %s7005_s27 }
 0xab7   : > { %s9391_s15 = sshra.s32 %s7006_s27, 4  ;;  %s9392_s15 = int_to_ptr.hbm [resolvable:$true] %s9391_s15 }
 0xab8   : > { %s9393_s21 = scalar_lea.hbm %s9392_s15, 1  ;;  %p9398_p10 = scmp.lt.s32.totalorder %s9392_s15, %s11261_s19 }
 0xab9   : > { %p9394_p6 = scmp.ne.s32.totalorder %s9392_s15, %s9393_s21  ;;  %p9399_p11 = scmp.lt.s32.totalorder %s9397_s16, %s9393_s21 }
 0xabb   : > { %p9395_p7 = pnand %p9394_p6, %p9611_p3  ;;  %p9400_p12 = por %p9399_p11, %p9398_p10 }
 0xabd   : > { %p9396_p8 = pneg %p9395_p7 }
 0xabf   : > { %p9401_p13 = pnand %p9400_p12, %p9396_p8 }
 0xac1   : > { %9404 = shalt.err (!%p9401_p13)
}
 0xac2   : > { %9180 = dma.vmem_to_hbm [thread:$0]  (%p9611_p3), %s7004_s13, 16, %s7006_s27, %s6993_s28  }
 0xac3 PF: > { %s11263_s29 = sld [smem:[#allocation17_spill]] }
 0xac4   : > { %s11264_s7 = sld [smem:[#allocation13_spill]] }
 0xac9   : > { %p9202_p0 = scmp.ge.s32.totalorder %s11263_s29, 2 }
 0xaca   : > { %s7017_s24 = sand.u32 1, %s11264_s7  }
 0xacb   : > { %p9193_p1 = pnand %p9202_p0, %p9621_p9  ;;  %s7018_s25 = scalar_lea.sflag [#allocation5], %s7017_s24 }
 0xacd   : > { %p9194_p2 = pneg %p9193_p1 }
 0xacf   : > { %9446 = dma.done.wait (%p9194_p2), %s7018_s25, 16  }
 0xad0   : > { %9448 = vsyncadd (%p9194_p2), %s7018_s25, 4294967280  ;;  %s28_s15 = sadd.s32 1, %s11263_s29   ;;  %s11266_s14 = sld [smem:[#allocation14_spill]] }
 0xad1   : > { %p25_p4 = scmp.ge.s32.totalorder %s28_s15, 6   ;;  %s11267_s27 = sld [smem:[#allocation22_spill]] }
 0xad2   : > { %s11268_s28 = sld [smem:[#allocation15_spill]]  ;;  %s11272_s25 = smov %s9455_s26 }
 0xad3   : > { %s11269_s29 = sld [smem:[#allocation16_spill]] }
 0xad4   : > { %s11270_s30 = sld [smem:[#allocation18_spill]] }
 0xad5   : > { %s11271_s11 = sld [smem:[#allocation20_spill]] }
 0xad6   : > { %s11273_s26 = smov %s11266_s14 }
 0xad7   :  { %27 = sbr.rel (!%p25_p4) target bundleno = 12 (0xc), region = 129 }
 0xadb   : > { %s11274_s14 = smov %s11271_s11 }
 0xadc   :  { %7023 = vsyncpa [#allocation4], 1 }
 0xadd   :  { %7025 = vsyncpa [#allocation4 + $0x1], 1 }
 0xade   :  { %7026 = vsyncpa [#allocation7], 1 }
 0xadf   :  { %7027 = vsyncpa [#allocation5], 1 }
 0xae0   :  { %7029 = vsyncpa [#allocation5 + $0x1], 1 }

</bundles_post_ra>
